<compile_context>
chip_gen: v7x
topology: tpu7x:2x2x1
jax: 0.10.0
libtpu: 0.0.40
codegen_flags: <defaults>
</compile_context>

<pallas_src>
import functools
import math

import numpy as np
import jax
import jax.numpy as jnp
from jax import lax
from jax.experimental import pallas as pl
from jax.experimental.pallas import tpu as pltpu

LANES = 128   # TPU lane width; all feature dims are padded to this
SUB = 8       # f32 sublane granularity; all row offsets are multiples of this


def _round_up(x, m):
    return (x + m - 1) // m * m


# ----------------------------- packed-parameter layout -----------------------------
# f32 "embed" slab rows:
#   [0, 128)               : embedding matrix E (128 x 128), freq and 1/bounds folded in
#   [128, 136)              : row 128 = identity mask, 129 = trig mask, 130 = phase row
#   row 136 + li*8          : bias of Linear layer li (one row, 8-row aligned), li = 0..D
# weight slab (weights_dtype, default bf16):
#   layer li weight (transposed (in, out), zero-padded to 128x128) at rows [li*128, (li+1)*128)


def _embed_layout(D):
    mask_off = LANES                       # 128
    bias_off = mask_off + SUB              # 136
    total_rows = bias_off + (D + 1) * SUB
    return mask_off, bias_off, total_rows


def pack_embed_slab(params, *, D, input_ch, multi_res, bounds):
    """f32 slab: NeRF embedding matrix (with 1/bounds and frequencies folded in),
    identity/trig masks, the phase row (0 on sin lanes, pi/2 on cos lanes) and all biases."""
    ch_time = input_ch * (1 + 2 * multi_res)
    assert ch_time <= LANES, "embedded feature dim must fit in 128 lanes"
    mask_off, bias_off, total_rows = _embed_layout(D)
    buf = np.zeros((total_rows, LANES), np.float32)

    # Standard NeRF embedder ordering: [x, sin(2^0 x), cos(2^0 x), sin(2^1 x), cos(2^1 x), ...]
    for j in range(ch_time):
        blk, i = divmod(j, input_ch)
        freq = 1.0 if blk == 0 else float(2.0 ** ((blk - 1) // 2))
        buf[i, j] = freq / bounds
        if blk == 0:
            buf[mask_off + 0, j] = 1.0                 # identity lanes
        else:
            buf[mask_off + 1, j] = 1.0                 # trig lanes (sin or cos)
            if (blk - 1) % 2 == 1:                     # cos lanes -> phase pi/2
                buf[mask_off + 2, j] = math.pi / 2.0

    for li, (_, b) in enumerate(params):
        b = np.asarray(b, np.float32).reshape(-1)
        buf[bias_off + li * SUB, : b.shape[0]] = b
    return jnp.asarray(buf)


def pack_weight_slab(params, *, D, weights_dtype=jnp.bfloat16):
    """Weight slab: (D+1) zero-padded 128x128 weights stored transposed (in, out)."""
    buf = np.zeros(((D + 1) * LANES, LANES), np.float32)
    for li, (w, _) in enumerate(params):
        w = np.asarray(w, np.float32)
        in_dim, out_dim = w.shape
        assert in_dim <= LANES and out_dim <= LANES
        buf[li * LANES: li * LANES + in_dim, :out_dim] = w
    return jnp.asarray(buf).astype(weights_dtype)


# ----------------------------- Pallas kernel -----------------------------
def _embed_mlp_kernel(t_ref, emb_ref, w_ref, out_ref, *,
                      D, mask_off, bias_off, compute_dtype):
    # t_ref   : (TILE_M, 128) f32  raw time rows, zero-padded to 128 lanes (1/bounds is in E)
    # emb_ref : f32 slab (E, masks, phase, biases)   -- DMA'd once, VMEM-resident across grid
    # w_ref   : weight slab in compute_dtype         -- DMA'd once, VMEM-resident across grid
    t = t_ref[...]                                                 # (TILE_M, 128)

    # Fused NeRF embedding: one MXU matmul + a single EUP sin + VPU mask-select.
    emb_mat = emb_ref[0:LANES, :]                                  # (128, 128) f32
    xt = jnp.dot(t, emb_mat, preferred_element_type=jnp.float32)   # (TILE_M, 128)
    trig = emb_ref[mask_off:mask_off + SUB, :]                     # (8, 128) one-block load
    m_id, m_trig, phase = trig[0:1, :], trig[1:2, :], trig[2:3, :]
    h = m_id * xt + m_trig * jnp.sin(xt + phase)                   # f32 elementwise, 1 transcendental

    # D hidden Linear+ReLU layers, then the output Linear (act_fn='none').
    for li in range(D + 1):
        w = w_ref[li * LANES:(li + 1) * LANES, :]                  # (128, 128) static slice
        b = emb_ref[bias_off + li * SUB: bias_off + li * SUB + 1, :]  # (1, 128) f32
        h = jnp.dot(h.astype(compute_dtype), w,
                    preferred_element_type=jnp.float32) + b
        if li < D:
            h = jnp.maximum(h, 0.0)

    out_ref[...] = h                                               # lane-dense (TILE_M, 128) store


def make_embed_mlp(*, D, input_ch, multi_res, W, output_ch, bounds,
                   tile_m=256, weights_dtype=jnp.bfloat16):
    assert W <= LANES and output_ch <= LANES
    assert tile_m % LANES == 0 and tile_m >= LANES
    mask_off, bias_off, emb_rows = _embed_layout(D)
    w_rows = (D + 1) * LANES
    kernel = functools.partial(_embed_mlp_kernel, D=D, mask_off=mask_off,
                               bias_off=bias_off, compute_dtype=weights_dtype)

    @jax.jit
    def forward_batch(times, emb_slab, w_slab):
        """times: (M, input_ch) -> (M, output_ch); each row is one EmbedMLP.forward(time)."""
        assert w_slab.dtype == jnp.dtype(weights_dtype)
        times = times.astype(jnp.float32).reshape(-1, input_ch)
        m = times.shape[0]
        m_pad = _round_up(max(m, 1), tile_m)
        t = jnp.zeros((m_pad, LANES), jnp.float32)
        t = t.at[:m, :input_ch].set(times)                    # lane-dense 128-wide input block

        resident = lambda i: (0, 0)                           # slabs DMA'd once, kept in VMEM
        cost = pl.CostEstimate(
            flops=2 * m_pad * LANES * LANES * (D + 2),
            transcendentals=m_pad * LANES,
            bytes_accessed=(8 * m_pad * LANES                 # time in + output out (f32)
                            + 4 * emb_rows * LANES
                            + int(w_slab.dtype.itemsize) * w_rows * LANES),
        )
        out = pl.pallas_call(
            kernel,
            out_shape=jax.ShapeDtypeStruct((m_pad, LANES), jnp.float32),
            grid=(m_pad // tile_m,),
            in_specs=[pl.BlockSpec((tile_m, LANES), lambda i: (i, 0)),
                      pl.BlockSpec((emb_rows, LANES), resident),
                      pl.BlockSpec((w_rows, LANES), resident)],
            out_specs=pl.BlockSpec((tile_m, LANES), lambda i: (i, 0)),
            compiler_params=pltpu.CompilerParams(
                dimension_semantics=("parallel",)),           # v7x: shard batch over both TCs
            cost_estimate=cost,
        )(t, emb_slab, w_slab)
        return out[:m, :output_ch]

    def forward(time_vec, emb_slab, w_slab):
        """Module semantics: EmbedMLP.forward(time) -> (1, output_ch)."""
        return forward_batch(jnp.asarray(time_vec).reshape(1, -1), emb_slab, w_slab)

    return forward, forward_batch


# ----------------------------- deterministic parameter init -----------------------------
def init_params(key, ch_time, W, D, output_ch, init_bias=0.0):
    """Mimic PyTorch nn.Linear default init (uniform +-1/sqrt(fan_in)).
    Weights are stored transposed: (in, out)."""
    params = []
    dims = [ch_time] + [W] * D
    for i in range(D):
        fan_in = dims[i]
        key, kw, kb = jax.random.split(key, 3)
        bound = 1.0 / math.sqrt(fan_in)
        w = jax.random.uniform(kw, (fan_in, W), jnp.float32, -bound, bound)
        b = jax.random.uniform(kb, (1, W), jnp.float32, -bound, bound)
        params.append((w, b))
    fan_in = dims[-1] if D > 0 else ch_time
    key, kw = jax.random.split(key)
    bound = 1.0 / math.sqrt(fan_in)
    w_o = jax.random.uniform(kw, (fan_in, output_ch), jnp.float32, -bound, bound)
    b_o = jnp.full((1, output_ch), init_bias, jnp.float32)   # EmbedMLP uses init_bias=0
    params.append((w_o, b_o))
    return params


# ----------------------------- pure-JAX reference -----------------------------
def nerf_embed(x, multi_res):
    feats = [x]
    for k in range(multi_res):
        f = float(2.0 ** k)
        feats.append(jnp.sin(x * f))
        feats.append(jnp.cos(x * f))
    return jnp.concatenate(feats, axis=-1)


def reference_forward(times, params, *, bounds, multi_res, D):
    x = jnp.asarray(times, jnp.float32).reshape(-1, times.shape[-1]) / bounds
    h = nerf_embed(x, multi_res)
    hp = lax.Precision.HIGHEST
    for i in range(D):
        w, b = params[i]
        h = jnp.maximum(jnp.dot(h, w, precision=hp) + b, 0.0)
    w_o, b_o = params[-1]
    return jnp.dot(h, w_o, precision=hp) + b_o


if __name__ == "__main__":
    # Small config consistent with EmbedMLP(input_ch, output_ch, multi_res, W, D, bounds)
    input_ch = 4
    multi_res = 6
    ch_time = input_ch * (1 + 2 * multi_res)   # 52
    W = 32
    D = 2
    output_ch = 16
    bounds = 100.0
    TILE_M = 256                                # 512-1024 for production-size batches
    BATCH = 512                                 # exercises a 2-step grid

    key = jax.random.PRNGKey(0)
    key, k_time, k_batch = jax.random.split(key, 3)
    time = jax.random.uniform(k_time, (input_ch,), jnp.float32, 0.0, bounds)
    times = jax.random.uniform(k_batch, (BATCH, input_ch), jnp.float32, 0.0, bounds)

    params = init_params(key, ch_time, W, D, output_ch, init_bias=0.0)
    emb_slab = pack_embed_slab(params, D=D, input_ch=input_ch,
                               multi_res=multi_res, bounds=bounds)
    w_slab_f32 = pack_weight_slab(params, D=D, weights_dtype=jnp.float32)
    w_slab_bf16 = pack_weight_slab(params, D=D, weights_dtype=jnp.bfloat16)

    fwd_f32, fwd_batch_f32 = make_embed_mlp(
        D=D, input_ch=input_ch, multi_res=multi_res, W=W, output_ch=output_ch,
        bounds=bounds, tile_m=TILE_M, weights_dtype=jnp.float32)
    fwd_bf16, fwd_batch_bf16 = make_embed_mlp(
        D=D, input_ch=input_ch, multi_res=multi_res, W=W, output_ch=output_ch,
        bounds=bounds, tile_m=TILE_M, weights_dtype=jnp.bfloat16)

    # 1) Module semantics (single time vector), exact-parity f32 weights.
    out1 = jax.block_until_ready(fwd_f32(time, emb_slab, w_slab_f32))
    ref1 = reference_forward(time.reshape(1, -1), params,
                             bounds=bounds, multi_res=multi_res, D=D)
    assert out1.shape == (1, output_ch)
    assert jnp.allclose(out1, ref1, atol=1e-4, rtol=1e-4), (out1, ref1)

    # 2) Batched grid (512 rows -> 2 grid steps, "parallel" axis), f32 weights, exact parity.
    out2 = jax.block_until_ready(fwd_batch_f32(times, emb_slab, w_slab_f32))
    ref2 = reference_forward(times, params, bounds=bounds, multi_res=multi_res, D=D)
    assert out2.shape == (BATCH, output_ch)
    assert jnp.allclose(out2, ref2, atol=1e-4, rtol=1e-4)

    # 3) Batched grid with bf16 weights (v6e/v7x MXU-native path); bf16-level tolerance
    #    vs the f32 module reference (weights + dot operands quantized to bf16).
    out3 = jax.block_until_ready(fwd_batch_bf16(times, emb_slab, w_slab_bf16))
    assert out3.shape == (BATCH, output_ch)
    assert jnp.allclose(out3, ref2, atol=5e-2, rtol=5e-2)

    print("KERNEL_OK")
</pallas_src>

<mosaic_0001>
module attributes {stable_mosaic.version = 11 : i64} {
  func.func @_embed_mlp_kernel(%arg0: i32, %arg1: memref<256x128xf32, #tpu.memory_space<vmem>>, %arg2: memref<160x128xf32, #tpu.memory_space<vmem>>, %arg3: memref<384x128xf32, #tpu.memory_space<vmem>>, %arg4: memref<256x128xf32, #tpu.memory_space<vmem>>) attributes {dimension_semantics = [#tpu.dimension_semantics<parallel>], iteration_bounds = array<i64: 1>, scalar_prefetch = 0 : i64, scratch_operands = 0 : i64, tpu.core_type = #tpu.core_type<tc>, window_params = [{transform_indices = @transform_0, window_bounds = array<i64: 256, 128>}, {pipeline_mode = #tpu.pipeline_mode<synchronous>, transform_indices = @transform_1, window_bounds = array<i64: 160, 128>}, {pipeline_mode = #tpu.pipeline_mode<synchronous>, transform_indices = @transform_2, window_bounds = array<i64: 384, 128>}, {transform_indices = @transform_3, window_bounds = array<i64: 256, 128>}]} {
    %c0 = arith.constant 0 : index
    %c0_0 = arith.constant 0 : index
    %0 = vector.load %arg1[%c0, %c0_0] : memref<256x128xf32, #tpu.memory_space<vmem>>, vector<256x128xf32>
    %c0_1 = arith.constant 0 : index
    %c0_2 = arith.constant 0 : index
    %1 = vector.load %arg2[%c0_1, %c0_2] : memref<160x128xf32, #tpu.memory_space<vmem>>, vector<128x128xf32>
    %cst = arith.constant dense<0.000000e+00> : vector<256x128xf32>
    %2 = tpu.matmul %0, %1, %cst {dimension_numbers = #tpu.dot_dimension_numbers<[1], [0], [0], [1], [0, 0, 1, 1], [], []>} : vector<256x128xf32>, vector<128x128xf32>, vector<256x128xf32> -> vector<256x128xf32>
    %c128 = arith.constant 128 : index
    %c0_3 = arith.constant 0 : index
    %3 = vector.load %arg2[%c128, %c0_3] : memref<160x128xf32, #tpu.memory_space<vmem>>, vector<8x128xf32>
    %4 = vector.extract_strided_slice %3 {offsets = [0, 0], sizes = [1, 128], strides = [1, 1]} : vector<8x128xf32> to vector<1x128xf32>
    %5 = vector.extract_strided_slice %3 {offsets = [1, 0], sizes = [1, 128], strides = [1, 1]} : vector<8x128xf32> to vector<1x128xf32>
    %6 = vector.extract_strided_slice %3 {offsets = [2, 0], sizes = [1, 128], strides = [1, 1]} : vector<8x128xf32> to vector<1x128xf32>
    %7 = vector.broadcast %4 : vector<1x128xf32> to vector<256x128xf32>
    %8 = arith.mulf %7, %2 : vector<256x128xf32>
    %9 = vector.broadcast %6 : vector<1x128xf32> to vector<256x128xf32>
    %10 = arith.addf %2, %9 : vector<256x128xf32>
    %11 = math.sin %10 : vector<256x128xf32>
    %12 = vector.broadcast %5 : vector<1x128xf32> to vector<256x128xf32>
    %13 = arith.mulf %12, %11 : vector<256x128xf32>
    %14 = arith.addf %8, %13 : vector<256x128xf32>
    %c0_4 = arith.constant 0 : index
    %c0_5 = arith.constant 0 : index
    %15 = vector.load %arg3[%c0_4, %c0_5] : memref<384x128xf32, #tpu.memory_space<vmem>>, vector<128x128xf32>
    %c136 = arith.constant 136 : index
    %c0_6 = arith.constant 0 : index
    %16 = vector.load %arg2[%c136, %c0_6] : memref<160x128xf32, #tpu.memory_space<vmem>>, vector<1x128xf32>
    %cst_7 = arith.constant dense<0.000000e+00> : vector<256x128xf32>
    %17 = tpu.matmul %14, %15, %cst_7 {dimension_numbers = #tpu.dot_dimension_numbers<[1], [0], [0], [1], [0, 0, 1, 1], [], []>} : vector<256x128xf32>, vector<128x128xf32>, vector<256x128xf32> -> vector<256x128xf32>
    %18 = vector.broadcast %16 : vector<1x128xf32> to vector<256x128xf32>
    %19 = arith.addf %17, %18 : vector<256x128xf32>
    %cst_8 = arith.constant 0.000000e+00 : f32
    %20 = vector.broadcast %cst_8 : f32 to vector<256x128xf32>
    %21 = arith.maximumf %19, %20 : vector<256x128xf32>
    %c128_9 = arith.constant 128 : index
    %c0_10 = arith.constant 0 : index
    %22 = vector.load %arg3[%c128_9, %c0_10] : memref<384x128xf32, #tpu.memory_space<vmem>>, vector<128x128xf32>
    %c144 = arith.constant 144 : index
    %c0_11 = arith.constant 0 : index
    %23 = vector.load %arg2[%c144, %c0_11] : memref<160x128xf32, #tpu.memory_space<vmem>>, vector<1x128xf32>
    %cst_12 = arith.constant dense<0.000000e+00> : vector<256x128xf32>
    %24 = tpu.matmul %21, %22, %cst_12 {dimension_numbers = #tpu.dot_dimension_numbers<[1], [0], [0], [1], [0, 0, 1, 1], [], []>} : vector<256x128xf32>, vector<128x128xf32>, vector<256x128xf32> -> vector<256x128xf32>
    %25 = vector.broadcast %23 : vector<1x128xf32> to vector<256x128xf32>
    %26 = arith.addf %24, %25 : vector<256x128xf32>
    %cst_13 = arith.constant 0.000000e+00 : f32
    %27 = vector.broadcast %cst_13 : f32 to vector<256x128xf32>
    %28 = arith.maximumf %26, %27 : vector<256x128xf32>
    %c256 = arith.constant 256 : index
    %c0_14 = arith.constant 0 : index
    %29 = vector.load %arg3[%c256, %c0_14] : memref<384x128xf32, #tpu.memory_space<vmem>>, vector<128x128xf32>
    %c152 = arith.constant 152 : index
    %c0_15 = arith.constant 0 : index
    %30 = vector.load %arg2[%c152, %c0_15] : memref<160x128xf32, #tpu.memory_space<vmem>>, vector<1x128xf32>
    %cst_16 = arith.constant dense<0.000000e+00> : vector<256x128xf32>
    %31 = tpu.matmul %28, %29, %cst_16 {dimension_numbers = #tpu.dot_dimension_numbers<[1], [0], [0], [1], [0, 0, 1, 1], [], []>} : vector<256x128xf32>, vector<128x128xf32>, vector<256x128xf32> -> vector<256x128xf32>
    %32 = vector.broadcast %30 : vector<1x128xf32> to vector<256x128xf32>
    %33 = arith.addf %31, %32 : vector<256x128xf32>
    %c0_17 = arith.constant 0 : index
    %c0_18 = arith.constant 0 : index
    %34 = vector.load %arg4[%c0_17, %c0_18] : memref<256x128xf32, #tpu.memory_space<vmem>>, vector<256x128xf32>
    tpu.vector_store %arg4[%c0_17, %c0_18], %33 {strides = array<i32>} : memref<256x128xf32, #tpu.memory_space<vmem>>, vector<256x128xf32>,
    return
  }
  func.func @transform_0(%arg0: i32) -> (i32, i32) {
    %c0_i32 = arith.constant 0 : i32
    %c0_i32_0 = arith.constant 0 : i32
    return %arg0, %c0_i32 : i32, i32
  }
  func.func @transform_1(%arg0: i32) -> (i32, i32) {
    %c0_i32 = arith.constant 0 : i32
    %c0_i32_0 = arith.constant 0 : i32
    %c0_i32_1 = arith.constant 0 : i32
    return %c0_i32, %c0_i32_0 : i32, i32
  }
  func.func @transform_2(%arg0: i32) -> (i32, i32) {
    %c0_i32 = arith.constant 0 : i32
    %c0_i32_0 = arith.constant 0 : i32
    %c0_i32_1 = arith.constant 0 : i32
    return %c0_i32, %c0_i32_0 : i32, i32
  }
  func.func @transform_3(%arg0: i32) -> (i32, i32) {
    %c0_i32 = arith.constant 0 : i32
    %c0_i32_0 = arith.constant 0 : i32
    return %arg0, %c0_i32 : i32, i32
  }
}

</mosaic_0001>

<bundles_post_ra>
// kernel: forward_batch.1
= control target key start
LH: loop header
LB: loop body
LE: loop exit
PB: predicated region body
PF: predicated region fallthrough
CT: control target
= control target key end

     0   :  { %8 = vsyncpa [#allocation3], 0  ;;  %s5669_s12 = smov [#allocation2]   ;;  %s10621_s0 = inlined_call_operand.vmem [shape: f32[256,128], index: 0, kind: input, shape index: {}]   ;;  %s10622_s1 = inlined_call_operand.vmem [shape: f32[160,128], index: 1, kind: input, shape index: {}]   ;;  %s10623_s2 = inlined_call_operand.hbm [shape: f32[384,128], index: 2, kind: input, shape index: {}]   ;;  %s10624_s3 = inlined_call_operand.vmem [shape: f32[256,128], index: 3, kind: output, shape index: {}]  }
   0x1   :  { %s18_s13 = sshll.u32 %s5669_s12, 4  ;;  %s5645_s16 = scalar_lea.hbm %s10623_s2, 6144  ;;  %s19_s13 = int_to_ptr.vmem [resolvable:$true] %s18_s13 }
   0x2   :  { %p5646_p0 = scmp.ne.s32.totalorder %s10623_s2, %s5645_s16  ;;  %p5649_p1 = scmp.lt.u32.totalorder %s5645_s16, %s10623_s2 }
   0x4   :  { %p5651_p2 = pnand %p5649_p1, %p5646_p0 }
   0x6   :  { %5654 = shalt.err (!%p5651_p2)
}
   0x7   :  { %s5655_s21 = scalar_lea.vmem %s19_s13, 6144  ;;  %p5660_p4 = scmp.lt.s32.totalorder %s19_s13, %s19_s13 }
   0x8   :  { %p5656_p3 = scmp.ne.s32.totalorder %s19_s13, %s5655_s21  ;;  %p5661_p5 = scmp.lt.s32.totalorder %s5655_s21, %s5655_s21 }
   0xa   :  { %p5662_p6 = por %p5661_p5, %p5660_p4 }
   0xc   :  { %p5663_p7 = pnand %p5662_p6, %p5656_p3 }
   0xe   :  { %5666 = shalt.err (!%p5663_p7)
}
   0xf   :  { %s5670_s22 = smov 128   ;;  %s5671_s23 = smov 8  }
  0x10   :  { %24 = dma.hbm_to_vmem [thread:$0]  %s10623_s2, 6144, %s19_s13, [#allocation3], %s5670_s22, %s5670_s22, %s5671_s23  }
  0x11   :  { %5667 = dma.done.wait [#allocation3], 6144  }
  0x12   :  { %5668 = vsyncadd [#allocation3], 4294961152  ;;  %v60_v0 = vld [vmem:[%s10622_s1] sm:$0xff]  ;;  %v61_v1 = vld [vmem:[%s10622_s1 + $0x8] sm:$0xff]  ;;  %v302_v56 = vlaneseq }
  0x13   :  { %v62_v2 = vld [vmem:[%s10622_s1 + $0x10] sm:$0xff]  ;;  %v5252_v3 = vpack.c.bf16 %v61_v1, %v60_v0  ;;  %v63_v4 = vld [vmem:[%s10622_s1 + $0x18] sm:$0xff]  ;;  %v64_v6 = vld [vmem:[%s10622_s1 + $0x20] sm:$0xff] }
  0x14   :  { %v5256_v5 = vpack.c.bf16 %v63_v4, %v62_v2  ;;  %v65_v7 = vld [vmem:[%s10622_s1 + $0x28] sm:$0xff]  ;;  %v28_v9 = vld [vmem:[%s10621_s0] sm:$0xff]  ;;  %v66_v10 = vld [vmem:[%s10622_s1 + $0x30] sm:$0xff]  ;;  %v5854_v57 = vshrl.u32 %v302_v56, 7 }
  0x15   :  { %5253 = vmatprep.subr.bf16.mxu0 %v5252_v3  ;;  %v5260_v8 = vpack.c.bf16 %v65_v7, %v64_v6  ;;  %v67_v11 = vld [vmem:[%s10622_s1 + $0x38] sm:$0xff]  ;;  %4964 = vmatprep.mubr.f32.mxu0 %v28_v9  ;;  %v68_v13 = vld [vmem:[%s10622_s1 + $0x40] sm:$0xff]  ;;  %v69_v14 = vld [vmem:[%s10622_s1 + $0x48] sm:$0xff] }
  0x16   :  { %5255 = vmatpush3.bf16.msra.mxu0 %v5252_v3  ;;  %v5264_v12 = vpack.c.bf16 %v67_v11, %v66_v10  ;;  %v5268_v15 = vpack.c.bf16 %v69_v14, %v68_v13  ;;  %v70_v16 = vld [vmem:[%s10622_s1 + $0x50] sm:$0xff]  ;;  %v71_v17 = vld [vmem:[%s10622_s1 + $0x58] sm:$0xff]  ;;  %v72_v19 = vld [vmem:[%s10622_s1 + $0x60] sm:$0xff]  ;;  %v340_v58 = vsub.s32 2, %v5854_v57 }
  0x17   :  { %5257 = vmatprep.subr.bf16.mxu0 %v5256_v5  ;;  %v5272_v18 = vpack.c.bf16 %v71_v17, %v70_v16  ;;  %v73_v20 = vld [vmem:[%s10622_s1 + $0x68] sm:$0xff]  ;;  %v74_v22 = vld [vmem:[%s10622_s1 + $0x70] sm:$0xff]  ;;  %v75_v23 = vld [vmem:[%s10622_s1 + $0x78] sm:$0xff]  ;;  %v10633_v16 = vmov 683565275  }
  0x18   :  { %v5276_v21 = vpack.c.bf16 %v73_v20, %v72_v19  ;;  %v5280_v24 = vpack.c.bf16 %v75_v23, %v74_v22  ;;  %v29_v25 = vld [vmem:[%s10621_s0 + $0x8] sm:$0xff]  ;;  %v30_v26 = vld [vmem:[%s10621_s0 + $0x10] sm:$0xff]  ;;  %v31_v27 = vld [vmem:[%s10621_s0 + $0x18] sm:$0xff] }
  0x19   :  { %v32_v28 = vld [vmem:[%s10621_s0 + $0x20] sm:$0xff]  ;;  %v33_v29 = vld [vmem:[%s10621_s0 + $0x28] sm:$0xff]  ;;  %v34_v30 = vld [vmem:[%s10621_s0 + $0x30] sm:$0xff] }
  0x1a   :  { %5259 = vmatpush3.bf16.msra.mxu0 %v5256_v5  ;;  %v35_v31 = vld [vmem:[%s10621_s0 + $0x38] sm:$0xff]  ;;  %v36_v32 = vld [vmem:[%s10621_s0 + $0x40] sm:$0xff]  ;;  %v37_v33 = vld [vmem:[%s10621_s0 + $0x48] sm:$0xff] }
  0x1b   :  { %5261 = vmatprep.subr.bf16.mxu0 %v5260_v8  ;;  %v38_v34 = vld [vmem:[%s10621_s0 + $0x50] sm:$0xff]  ;;  %v39_v35 = vld [vmem:[%s10621_s0 + $0x58] sm:$0xff]  ;;  %v40_v36 = vld [vmem:[%s10621_s0 + $0x60] sm:$0xff] }
  0x1c   :  { %v41_v37 = vld [vmem:[%s10621_s0 + $0x68] sm:$0xff]  ;;  %v42_v38 = vld [vmem:[%s10621_s0 + $0x70] sm:$0xff]  ;;  %v43_v39 = vld [vmem:[%s10621_s0 + $0x78] sm:$0xff] }
  0x1d   :  { %v44_v40 = vld [vmem:[%s10621_s0 + $0x80] sm:$0xff]  ;;  %v45_v41 = vld [vmem:[%s10621_s0 + $0x88] sm:$0xff]  ;;  %v46_v42 = vld [vmem:[%s10621_s0 + $0x90] sm:$0xff] }
  0x1e   :  { %5263 = vmatpush3.bf16.msra.mxu0 %v5260_v8  ;;  %v47_v43 = vld [vmem:[%s10621_s0 + $0x98] sm:$0xff]  ;;  %v48_v44 = vld [vmem:[%s10621_s0 + $0xa0] sm:$0xff]  ;;  %v49_v45 = vld [vmem:[%s10621_s0 + $0xa8] sm:$0xff] }
  0x1f   :  { %5265 = vmatprep.subr.bf16.mxu0 %v5264_v12  ;;  %v50_v46 = vld [vmem:[%s10621_s0 + $0xb0] sm:$0xff]  ;;  %v51_v47 = vld [vmem:[%s10621_s0 + $0xb8] sm:$0xff]  ;;  %v52_v48 = vld [vmem:[%s10621_s0 + $0xc0] sm:$0xff] }
  0x20   :  { %v53_v49 = vld [vmem:[%s10621_s0 + $0xc8] sm:$0xff]  ;;  %v54_v50 = vld [vmem:[%s10621_s0 + $0xd0] sm:$0xff]  ;;  %v55_v51 = vld [vmem:[%s10621_s0 + $0xd8] sm:$0xff] }
  0x21   :  { %v56_v52 = vld [vmem:[%s10621_s0 + $0xe0] sm:$0xff]  ;;  %v57_v53 = vld [vmem:[%s10621_s0 + $0xe8] sm:$0xff]  ;;  %v58_v54 = vld [vmem:[%s10621_s0 + $0xf0] sm:$0xff] }
  0x22   :  { %5267 = vmatpush3.bf16.msra.mxu0 %v5264_v12  ;;  %v59_v55 = vld [vmem:[%s10621_s0 + $0xf8] sm:$0xff]  ;;  %v5860_v59 = vld [vmem:[%s10622_s1 + $0x80] sm:$0xff] }
  0x23   :  { %5269 = vmatprep.subr.bf16.mxu0 %v5268_v15  ;;  %v5863_v60 = vrot.slane %v5860_v59, %v340_v58 }
  0x26   :  { %5271 = vmatpush3.bf16.msra.mxu0 %v5268_v15 }
  0x27   :  { %5273 = vmatprep.subr.bf16.mxu0 %v5272_v18 }
  0x2a   :  { %5275 = vmatpush3.bf16.msra.mxu0 %v5272_v18  ;;  %v10661_v18 = vmov 2475754826  }
  0x2b   :  { %5277 = vmatprep.subr.bf16.mxu0 %v5276_v21 }
  0x2e   :  { %5279 = vmatpush3.bf16.msra.mxu0 %v5276_v21  ;;  %v10659_v21 = vmov 2131351028  }
  0x2f   :  { %5281 = vmatprep.subr.bf16.mxu0 %v5280_v24 }
  0x32   :  { %5283 = vmatpush3.bf16.msra.mxu0 %v5280_v24  ;;  %v10627_v24 = vmov 2102212464  }
  0x35   :  { %4965 = vmatmul.mubr.f32.vlgmr.msra.gmra.mrb[0].mxu0 %v29_v25 }
  0x36   :  { %4967 = vmatprep.mubr.f32.mxu0 %v30_v26 }
  0x39   :  { %4968 = vmatmul.mubr.f32.gmra.mrb[2].mxu0 %v31_v27  ;;  %v10631_v27 = vmov 920167782  }
  0x3a   :  { %4970 = vmatprep.mubr.f32.mxu0 %v32_v28 }
  0x3d   :  { %4971 = vmatmul.mubr.f32.gmra.mrb[4].mxu0 %v33_v29 }
  0x3e   :  { %4973 = vmatprep.mubr.f32.mxu0 %v34_v30  ;;  %v10629_v30 = vmov 1326507024  }
  0x41   :  { %4974 = vmatmul.mubr.f32.gmra.mrb[6].mxu0 %v35_v31 }
  0x42   :  { %4976 = vmatprep.mubr.f32.mxu0 %v36_v32 }
  0x45   :  { %4977 = vmatmul.mubr.f32.gmra.mrb[8].mxu0 %v37_v33 }
  0x46   :  { %4979 = vmatprep.mubr.f32.mxu0 %v38_v34 }
  0x49   :  { %4980 = vmatmul.mubr.f32.gmra.mrb[10].mxu0 %v39_v35 }
  0x4a   :  { %4982 = vmatprep.mubr.f32.mxu0 %v40_v36 }
  0x4d   :  { %4983 = vmatmul.mubr.f32.gmra.mrb[12].mxu0 %v41_v37 }
  0x4e   :  { %4985 = vmatprep.mubr.f32.mxu0 %v42_v38 }
  0x51   :  { %4986 = vmatmul.mubr.f32.gmra.mrb[14].mxu0 %v43_v39 }
  0x52   :  { %4988 = vmatprep.mubr.f32.mxu0 %v44_v40 }
  0x55   :  { %4989 = vmatmul.mubr.f32.gmra.mrb[16].mxu0 %v45_v41 }
  0x56   :  { %4991 = vmatprep.mubr.f32.mxu0 %v46_v42 }
  0x59   :  { %4992 = vmatmul.mubr.f32.gmra.mrb[18].mxu0 %v47_v43 }
  0x5a   :  { %4994 = vmatprep.mubr.f32.mxu0 %v48_v44 }
  0x5d   :  { %4995 = vmatmul.mubr.f32.gmra.mrb[20].mxu0 %v49_v45 }
  0x5e   :  { %4997 = vmatprep.mubr.f32.mxu0 %v50_v46 }
  0x61   :  { %4998 = vmatmul.mubr.f32.gmra.mrb[22].mxu0 %v51_v47 }
  0x62   :  { %5000 = vmatprep.mubr.f32.mxu0 %v52_v48 }
  0x65   :  { %5001 = vmatmul.mubr.f32.gmra.mrb[24].mxu0 %v53_v49 }
  0x66   :  { %5003 = vmatprep.mubr.f32.mxu0 %v54_v50 }
  0x69   :  { %5004 = vmatmul.mubr.f32.gmra.mrb[26].mxu0 %v55_v51 }
  0x6a   :  { %5006 = vmatprep.mubr.f32.mxu0 %v56_v52 }
  0x6d   :  { %5007 = vmatmul.mubr.f32.gmra.mrb[28].mxu0 %v57_v53 }
  0x6e   :  { %5009 = vmatprep.mubr.f32.mxu0 %v58_v54 }
  0x71   :  { %5010 = vmatmul.mubr.f32.gmra.mrb[30].mxu0 %v59_v55 }
 0x108   :  { %v5865_v61 = vpop.f32.mrb[0].mxu0 }
 0x109   :  { %v5869_v62 = vadd.f32 %v5865_v61, %v5863_v60  ;;  %v5871_v63 = vpop.f32.mrb[1].mxu0 }
 0x10b   :  { %v481_v0 = vand.u32 2139095040, %v5869_v62  ;;  %v478_v8 = vand.u32 2147483647, %v5869_v62  ;;  %vm480_vm7 = vcmp.lt.s32.totalorder %v5869_v62, 0  ;;  %vm570_vm13 = vweird.f32 %v5869_v62 }
 0x10c   :  { %v5874_v1 = vpop.f32.mrb[2].mxu0 }
 0x10d   :  { %v482_v2 = vshrl.u32 %v481_v0, 23  ;;  %v5876_v3 = vpop.f32.mrb[3].mxu0  ;;  %v485_v13 = vand.u32 8388607, %v478_v8  ;;  %vm479_vm8 = vcmp.le.f32.partialorder %v478_v8, 0.7853982 }
 0x10e   :  { %v304_v8 = vsub.s32 0, %v5854_v57 }
 0x10f   :  { %v4613_v4 = vadd.s32 4294967169, %v482_v2  ;;  %v486_v32 = vor.u32 8388608, %v485_v13 }
 0x110   :  { %v5878_v5 = vpop.f32.mrb[4].mxu0 }
 0x111   :  { %v488_v6 = vadd.s32 1, %v4613_v4  ;;  %v5880_v7 = vpop.f32.mrb[5].mxu0  ;;  %v526_v46 = vshll.u32 %v486_v32, 8 }
 0x113   :  { %vm489_vm0 = vcmp.gt.s32.totalorder %v488_v6, 0 }
 0x114   :  { %v490_v9 = vsel %vm489_vm0, %v488_v6, 0  ;;  %v5883_v10 = vpop.f32.mrb[6].mxu0 }
 0x115   :  { %10741 = vst [vmem:[#allocation5_spill] sm:$0xff] %v5883_v10  ;;  %v492_v11 = vand.u32 31, %v490_v9  ;;  %v5885_v12 = vpop.f32.mrb[7].mxu0  ;;  %v491_v15 = vshrl.u32 %v490_v9, 5 }
 0x117   :  { %v493_v14 = vsub.s32 32, %v492_v11  ;;  %v495_v17 = vshll.u32 %v10633_v16, %v492_v11  ;;  %v498_v19 = vshll.u32 %v10661_v18, %v492_v11  ;;  %v501_v23 = vshll.u32 %v10659_v21, %v492_v11 }
 0x118   :  { %v504_v26 = vshll.u32 %v10627_v24, %v492_v11  ;;  %v507_v29 = vshll.u32 %v10631_v27, %v492_v11  ;;  %vm510_vm1 = vcmp.lt.s32.totalorder %v491_v15, 1  ;;  %vm513_vm2 = vcmp.lt.s32.totalorder %v491_v15, 4  ;;  %v5909_v6 = vpop.f32.mrb[8].mxu0 }
 0x119   :  { %v496_v20 = vshrl.u32 %v10661_v18, %v493_v14  ;;  %v499_v22 = vshrl.u32 %v10659_v21, %v493_v14  ;;  %v502_v25 = vshrl.u32 %v10627_v24, %v493_v14  ;;  %v505_v28 = vshrl.u32 %v10631_v27, %v493_v14  ;;  %10742 = vst [vmem:[#allocation6_spill] sm:$0xff] %v5909_v6 }
 0x11a   :  { %v508_v31 = vshrl.u32 %v10629_v30, %v493_v14  ;;  %v494_v41 = vshrl.u32 %v10633_v16, %v493_v14  ;;  %vm512_vm3 = vcmp.lt.s32.totalorder %v491_v15, 3  ;;  %vm511_vm4 = vcmp.lt.s32.totalorder %v491_v15, 2 }
 0x11b   :  { %v497_v33 = vor.u32 %v496_v20, %v495_v17  ;;  %v500_v34 = vor.u32 %v499_v22, %v498_v19  ;;  %v503_v35 = vor.u32 %v502_v25, %v501_v23  ;;  %v506_v36 = vor.u32 %v505_v28, %v504_v26 }
 0x11c   :  { %v509_v37 = vor.u32 %v508_v31, %v507_v29  ;;  %v5914_v31 = vadd.f32 %v5863_v60, %v5871_v63 }
 0x11d   :  { %v515_v38 = vsel %vm513_vm2, %v503_v35, 2102212464  ;;  %v518_v39 = vsel %vm510_vm1, %v497_v33, %v500_v34  ;;  %v522_v40 = vsel %vm510_vm1, %v500_v34, %v503_v35  ;;  %v519_v42 = vsel %vm513_vm2, %v506_v36, 920167782 }
 0x11e   :  { %v523_v43 = vsel %vm513_vm2, %v509_v37, 1326507024  ;;  %v520_v44 = vsel %vm512_vm3, %v503_v35, %v519_v42  ;;  %v514_v47 = vsel %vm510_vm1, %v494_v41, %v497_v33  ;;  %v516_v48 = vsel %vm512_vm3, %v500_v34, %v515_v38  ;;  %10743 = vst [vmem:[#allocation7_spill] sm:$0xff] %v5914_v31  ;;  %v5917_v38 = vpop.f32.mrb[9].mxu0 }
 0x11f   :  { %v524_v45 = vsel %vm512_vm3, %v506_v36, %v523_v43  ;;  %v521_v49 = vsel %vm511_vm4, %v518_v39, %v520_v44  ;;  %v517_v55 = vsel %vm511_vm4, %v514_v47, %v516_v48  ;;  %v377_v35 = vand.u32 2139095040, %v5914_v31  ;;  %10744 = vst [vmem:[#allocation8_spill] sm:$0xff] %v5917_v38 }
 0x120   :  { %v525_v50 = vsel %vm511_vm4, %v522_v40, %v524_v45  ;;  %v5903_v53 = vmul.u32.u64.low %v526_v46, %v521_v49  ;;  %v5904_v54 = vmul.u32.u64.high %v526_v46, %v521_v49, %v5903_v53  ;;  %v533_v58 = vmul.u32 %v526_v46, %v517_v55 }
 0x121   :  { %v5900_v51 = vmul.u32.u64.low %v526_v46, %v525_v50  ;;  %v5901_v52 = vmul.u32.u64.high %v526_v46, %v525_v50, %v5900_v51  ;;  %v378_v41 = vshrl.u32 %v377_v35, 23  ;;  %v5922_v43 = vadd.f32 %v5874_v1, %v5863_v60 }
 0x122   :  { %v536_v56 = vadd.s32 1, %v5904_v54  ;;  %v3704_v55 = vsub.s32 1, %v5854_v57 }
 0x123   :  { %vm535_vm5 = vc.u32 %v5901_v52, %v5903_v53  ;;  %v534_v22 = vadd.s32 %v5903_v53, %v5901_v52  ;;  %v4609_v47 = vadd.s32 4294967169, %v378_v41  ;;  %v689_v49 = vand.u32 2139095040, %v5922_v43 }
 0x124   :  { %v537_v0 = vsel %vm535_vm5, %v536_v56, %v5904_v54  ;;  %v5930_v53 = vadd.f32 %v5863_v60, %v5876_v3 }
 0x125   :  { %v538_v2 = vadd.s32 %v537_v0, %v533_v58  ;;  %v384_v50 = vadd.s32 1, %v4609_v47  ;;  %v690_v52 = vshrl.u32 %v689_v49, 23 }
 0x127   :  { %v539_v4 = vadd.s32 536870912, %v538_v2  ;;  %vm385_vm9 = vcmp.gt.s32.totalorder %v384_v50, 0  ;;  %v4621_v56 = vadd.s32 4294967169, %v690_v52 }
 0x128   :  { %v386_v0 = vsel %vm385_vm9, %v384_v50, 0 }
 0x129   :  { %v540_v9 = vshrl.u32 %v539_v4, 30 }
 0x12b   :  { %v541_v11 = vshll.u32 %v540_v9, 30  ;;  %v564_v40 = vsub.s32 4, %v540_v9 }
 0x12d   :  { %v542_v13 = vsub.s32 %v538_v2, %v541_v11  ;;  %v565_v45 = vsel %vm480_vm7, %v564_v40, %v540_v9  ;;  %v585_v2 = vand.u32 2139095040, %v5930_v53  ;;  %v5936_v11 = vrot.slane %v5860_v59, %v304_v8 }
 0x12e   :  { %v567_v48 = vsel %vm479_vm8, 0, %v565_v45  ;;  %v5959_v40 = vshrl.u32 %v386_v0, 5 }
 0x12f   :  { %v544_v14 = vsub.s32 0, %v542_v13  ;;  %v571_v51 = vadd.s32 3, %v567_v48  ;;  %10745 = vst [vmem:[#allocation9_spill] sm:$0xff] %v5936_v11 }
 0x130   :  { %vm409_vm0 = vcmp.lt.s32.totalorder %v5959_v40, 4  ;;  %vm406_vm1 = vcmp.lt.s32.totalorder %v5959_v40, 1  ;;  %vm408_vm2 = vcmp.lt.s32.totalorder %v5959_v40, 3  ;;  %vm407_vm3 = vcmp.lt.s32.totalorder %v5959_v40, 2 }
 0x131   :  { %v4614_v15 = vmin.u32 %v544_v14, %v542_v13  ;;  %v572_v54 = vand.u32 3, %v571_v51  ;;  %v5939_v14 = vrot.slane %v5860_v59, %v3704_v55 }
 0x133   :  { %v546_v17 = vclz %v4614_v15  ;;  %vm577_vm10 = vcmp.eq.s32.totalorder %v572_v54, 2  ;;  %10746 = vst [vmem:[#allocation10_spill] sm:$0xff] %v5939_v14  ;;  %vm574_vm11 = vcmp.eq.s32.totalorder %v572_v54, 0  ;;  %vm573_vm12 = vcmp.lt.s32.totalorder %v572_v54, 2 }
 0x135   :  { %v4615_v19 = vadd.s32 4294967294, %v546_v17  ;;  %v388_v17 = vand.u32 31, %v386_v0 }
 0x137   :  { %vm4616_vm6 = vcmp.lt.s32.totalorder %v4615_v19, 0  ;;  %v397_v47 = vshll.u32 %v10659_v21, %v388_v17  ;;  %v403_v8 = vshll.u32 %v10631_v27, %v388_v17 }
 0x138   :  { %v549_v20 = vsel %vm4616_vm6, 0, %v4615_v19  ;;  %v696_v19 = vadd.s32 1, %v4621_v56 }
 0x139   :  { %v550_v23 = vsub.s32 32, %v549_v20  ;;  %v554_v25 = vsub.s32 4294967266, %v549_v20  ;;  %v551_v26 = vshll.u32 %v542_v13, %v549_v20  ;;  %v586_v20 = vshrl.u32 %v585_v2, 23 }
 0x13a   :  { %vm697_vm14 = vcmp.gt.s32.totalorder %v696_v19, 0 }
 0x13b   :  { %v552_v28 = vshrl.u32 %v534_v22, %v550_v23  ;;  %v555_v29 = vadd.s32 127, %v554_v25  ;;  %v307_v25 = vmul.f32 %v5865_v61, %v5936_v11  ;;  %v4617_v59 = vadd.s32 4294967169, %v586_v20 }
 0x13d   :  { %v553_v32 = vor.u32 %v552_v28, %v551_v26  ;;  %v556_v33 = vshll.u32 %v555_v29, 23  ;;  %v5945_v28 = vsub.s32 32, %v388_v17  ;;  %v592_v35 = vadd.s32 1, %v4617_v59 }
 0x13f   :  { %v557_v34 = vor.u32 4788187, %v556_v33  ;;  %v560_v37 = vcvt.s32.f32 %v553_v32  ;;  %v698_v32 = vsel %vm697_vm14, %v696_v19, 0  ;;  %v5949_v33 = vpop.f32.mrb[10].mxu0  ;;  %v392_v61 = vshrl.u32 %v10661_v18, %v5945_v28 }
 0x140   :  { %10748 = vst [vmem:[#allocation12_spill] sm:$0xff] %v5949_v33  ;;  %v398_v41 = vshrl.u32 %v10627_v24, %v5945_v28  ;;  %vm593_vm15 = vcmp.gt.s32.totalorder %v592_v35, 0  ;;  %v404_v50 = vshrl.u32 %v10629_v30, %v5945_v28 }
 0x141   :  { %v558_v36 = vand.u32 2147483647, %v557_v34  ;;  %v401_v34 = vshrl.u32 %v10631_v27, %v5945_v28  ;;  %v594_v55 = vsel %vm593_vm15, %v592_v35, 0 }
 0x142   :  { %v5976_v52 = vor.u32 %v398_v41, %v397_v47  ;;  %v405_v0 = vor.u32 %v404_v50, %v403_v8  ;;  %v596_v19 = vand.u32 31, %v594_v55 }
 0x143   :  { %v561_v39 = vmul.f32 %v560_v37, %v558_v36  ;;  %v395_v36 = vshrl.u32 %v10659_v21, %v5945_v28  ;;  %v400_v37 = vshll.u32 %v10627_v24, %v388_v17 }
 0x144   :  { %v419_v41 = vsel %vm409_vm0, %v405_v0, 1326507024 }
 0x145   :  { %v562_v42 = vxor.u32 2147483648, %v561_v39  ;;  %v402_v45 = vor.u32 %v401_v34, %v400_v37 }
 0x147   :  { %v563_v44 = vsel %vm480_vm7, %v562_v42, %v561_v39  ;;  %v700_v39 = vand.u32 31, %v698_v32  ;;  %v391_v42 = vshll.u32 %v10633_v16, %v388_v17  ;;  %v415_v54 = vsel %vm409_vm0, %v402_v45, 920167782 }
 0x148   :  { %v566_v46 = vsel %vm479_vm8, %v5869_v62, %v563_v44  ;;  %v10625_v62 = vand.u32 2147483647, %v5914_v31  ;;  %v394_v44 = vshll.u32 %v10661_v18, %v388_v17 }
 0x149   :  { %5517 = vcosq.f32 %v566_v46  ;;  %v5968_v48 = vor.u32 %v392_v61, %v391_v42  ;;  %v5974_v51 = vsub.s32 32, %v700_v39  ;;  %v712_v20 = vshll.u32 %v10627_v24, %v700_v39 }
 0x14a   :  { %5519 = vsinq.f32 %v566_v46  ;;  %v381_v46 = vand.u32 8388607, %v10625_v62  ;;  %v5970_v49 = vor.u32 %v395_v36, %v394_v44  ;;  %v703_v59 = vshll.u32 %v10633_v16, %v700_v39 }
 0x14b   :  { %v707_v17 = vshrl.u32 %v10659_v21, %v5974_v51  ;;  %v706_v34 = vshll.u32 %v10661_v18, %v700_v39  ;;  %v709_v35 = vshll.u32 %v10659_v21, %v700_v39  ;;  %v6022_v44 = vsub.s32 32, %v596_v19 }
 0x14c   :  { %v382_v56 = vor.u32 8388608, %v381_v46  ;;  %v414_v2 = vsel %vm406_vm1, %v5968_v48, %v5970_v49 }
 0x14d   :  { %v6026_v46 = vor.u32 %v707_v17, %v706_v34  ;;  %v600_v34 = vshrl.u32 %v10661_v18, %v6022_v44 }
 0x14e   :  { %v6020_v42 = vshll.u32 %v382_v56, 8 }
 0x153   :  { %v5518_v58 = vpop.eup %5517 }
 0x154   :  { %v5520_v4 = vpop.eup %5519  ;;  %v578_v9 = vxor.u32 2147483648, %v5518_v58 }
 0x155   :  { %v575_v13 = vxor.u32 2147483648, %v5520_v4 }
 0x156   :  { %v579_v15 = vsel %vm577_vm10, %v578_v9, %v5520_v4  ;;  %v713_v4 = vshrl.u32 %v10631_v27, %v5974_v51  ;;  %v716_v9 = vshrl.u32 %v10629_v30, %v5974_v51 }
 0x157   :  { %v576_v57 = vsel %vm574_vm11, %v5518_v58, %v575_v13  ;;  %v10626_v58 = vand.u32 2147483647, %v5922_v43  ;;  %v416_v13 = vsel %vm408_vm2, %v5976_v52, %v415_v54  ;;  %v10636_v54 = vand.u32 2147483647, %v5930_v53 }
 0x158   :  { %v580_v22 = vsel %vm573_vm12, %v576_v57, %v579_v15  ;;  %v704_v15 = vshrl.u32 %v10661_v18, %v5974_v51  ;;  %v710_v57 = vshrl.u32 %v10627_v24, %v5974_v51  ;;  %v714_v61 = vor.u32 %v713_v4, %v712_v20 }
 0x159   :  { %v581_v23 = vsel %vm570_vm13, nan, %v580_v22  ;;  %v715_v22 = vshll.u32 %v10631_v27, %v700_v39  ;;  %v417_v37 = vsel %vm407_vm3, %v414_v2, %v416_v13  ;;  %v418_v39 = vsel %vm406_vm1, %v5970_v49, %v5976_v52 }
 0x15a   :  { %v3707_v26 = vmul.f32 %v5939_v14, %v581_v23  ;;  %v6006_v23 = vadd.f32 %v5878_v5, %v5863_v60  ;;  %v711_v47 = vor.u32 %v710_v57, %v709_v35  ;;  %v609_v13 = vshrl.u32 %v10631_v27, %v6022_v44 }
 0x15b   :  { %v717_v36 = vor.u32 %v716_v9, %v715_v22  ;;  %v6036_v56 = vmul.u32.u64.low %v6020_v42, %v417_v37  ;;  %v6037_v0 = vmul.u32.u64.high %v6020_v42, %v417_v37, %v6036_v56  ;;  %v420_v9 = vsel %vm408_vm2, %v402_v45, %v419_v41  ;;  %v6073_v41 = vpop.f32.mrb[11].mxu0 }
 0x15c   :  { %v5947_v29 = vadd.f32 %v3707_v26, %v307_v25  ;;  %10749 = vst [vmem:[#allocation13_spill] sm:$0xff] %v6006_v23  ;;  %v693_v25 = vand.u32 8388607, %v10626_v58  ;;  %v6011_v26 = vshrl.u32 %v698_v32, 5  ;;  %v6024_v32 = vor.u32 %v704_v15, %v703_v59  ;;  %10750 = vst [vmem:[#allocation14_spill] sm:$0xff] %v6073_v41 }
 0x15d   :  { %v897_v50 = vand.u32 2139095040, %v6006_v23  ;;  %v612_v57 = vshrl.u32 %v10629_v30, %v6022_v44  ;;  %v608_v59 = vshll.u32 %v10627_v24, %v596_v19  ;;  %v603_v35 = vshrl.u32 %v10659_v21, %v6022_v44 }
 0x15e   :  { %10747 = vst [vmem:[#allocation11_spill] sm:$0xff] %v5947_v29  ;;  %v694_v8 = vor.u32 8388608, %v693_v25  ;;  %vm721_vm4 = vcmp.lt.s32.totalorder %v6011_v26, 4  ;;  %vm718_vm5 = vcmp.lt.s32.totalorder %v6011_v26, 1  ;;  %vm720_vm6 = vcmp.lt.s32.totalorder %v6011_v26, 3 }
 0x15f   :  { %v727_v2 = vsel %vm721_vm4, %v714_v61, 920167782  ;;  %v731_v4 = vsel %vm721_vm4, %v717_v36, 1326507024  ;;  %v726_v15 = vsel %vm718_vm5, %v6024_v32, %v6026_v46  ;;  %v730_v17 = vsel %vm718_vm5, %v6026_v46, %v711_v47 }
 0x160   :  { %v898_v45 = vshrl.u32 %v897_v50, 23  ;;  %v728_v20 = vsel %vm720_vm6, %v711_v47, %v727_v2  ;;  %v732_v22 = vsel %vm720_vm6, %v714_v61, %v731_v4  ;;  %v6063_v25 = vshrl.u32 %v594_v55, 5 }
 0x161   :  { %v606_v36 = vshrl.u32 %v10627_v24, %v6022_v44  ;;  %v611_v37 = vshll.u32 %v10631_v27, %v596_v19  ;;  %v421_v61 = vsel %vm407_vm3, %v418_v39, %v420_v9  ;;  %vm719_vm7 = vcmp.lt.s32.totalorder %v6011_v26, 2 }
 0x162   :  { %v599_v55 = vshll.u32 %v10633_v16, %v596_v19  ;;  %v610_v50 = vor.u32 %v609_v13, %v608_v59  ;;  %v602_v2 = vshll.u32 %v10661_v18, %v596_v19  ;;  %v605_v4 = vshll.u32 %v10659_v21, %v596_v19 }
 0x163   :  { %v613_v62 = vor.u32 %v612_v57, %v611_v37  ;;  %v4629_v58 = vadd.s32 4294967169, %v898_v45  ;;  %v729_v24 = vsel %vm719_vm7, %v726_v15, %v728_v20  ;;  %v733_v30 = vsel %vm719_vm7, %v730_v17, %v732_v22 }
 0x164   :  { %v734_v27 = vshll.u32 %v694_v8, 8  ;;  %v589_v39 = vand.u32 8388607, %v10636_v54  ;;  %v601_v9 = vor.u32 %v600_v34, %v599_v55  ;;  %v604_v29 = vor.u32 %v603_v35, %v602_v2 }
 0x165   :  { %v607_v16 = vor.u32 %v606_v36, %v605_v4  ;;  %vm617_vm8 = vcmp.lt.s32.totalorder %v6063_v25, 4  ;;  %v6089_v13 = vmul.u32.u64.low %v6020_v42, %v421_v61  ;;  %v6090_v19 = vmul.u32.u64.high %v6020_v42, %v421_v61, %v6089_v13 }
 0x166   :  { %v623_v57 = vsel %vm617_vm8, %v610_v50, 920167782  ;;  %v6094_v15 = vmul.u32.u64.low %v734_v27, %v729_v24  ;;  %v6095_v45 = vmul.u32.u64.high %v734_v27, %v729_v24, %v6094_v15  ;;  %v627_v8 = vsel %vm617_vm8, %v613_v62, 1326507024 }
 0x167   :  { %v904_v17 = vadd.s32 1, %v4629_v58  ;;  %v6100_v20 = vmul.u32.u64.low %v734_v27, %v733_v30  ;;  %v6101_v22 = vmul.u32.u64.high %v734_v27, %v733_v30, %v6100_v20  ;;  %vm614_vm9 = vcmp.lt.s32.totalorder %v6063_v25, 1 }
 0x168   :  { %vm616_vm10 = vcmp.lt.s32.totalorder %v6063_v25, 3  ;;  %v590_v59 = vor.u32 8388608, %v589_v39  ;;  %v622_v34 = vsel %vm614_vm9, %v601_v9, %v604_v29  ;;  %v10751_v35 = vmov 683565275  }
 0x169   :  { %v624_v24 = vsel %vm616_vm10, %v607_v16, %v623_v57  ;;  %v390_v36 = vshrl.u32 %v10751_v35, %v5945_v28  ;;  %v411_v62 = vsel %vm409_vm0, %v5976_v52, 2102212464  ;;  %v626_v30 = vsel %vm614_vm9, %v604_v29, %v607_v16 }
 0x16a   :  { %v628_v58 = vsel %vm616_vm10, %v610_v50, %v627_v8  ;;  %v723_v37 = vsel %vm721_vm4, %v711_v47, 2102212464  ;;  %vm615_vm11 = vcmp.lt.s32.totalorder %v6063_v25, 2  ;;  %vm905_vm12 = vcmp.gt.s32.totalorder %v904_v17, 0 }
 0x16b   :  { %v410_v28 = vsel %vm406_vm1, %v390_v36, %v5968_v48  ;;  %v702_v61 = vshrl.u32 %v10751_v35, %v5974_v51  ;;  %v625_v52 = vsel %vm615_vm11, %v622_v34, %v624_v24  ;;  %v412_v55 = vsel %vm408_vm2, %v5970_v49, %v411_v62 }
 0x16c   :  { %v629_v47 = vsel %vm615_vm11, %v626_v30, %v628_v58  ;;  %v630_v50 = vshll.u32 %v590_v59, 8  ;;  %v6135_v2 = vadd.f32 %v5863_v60, %v5880_v7  ;;  %v432_v48 = vadd.s32 1, %v6037_v0 }
 0x16d   :  { %v722_v51 = vsel %vm718_vm5, %v702_v61, %v6024_v32  ;;  %v724_v4 = vsel %vm720_vm6, %v6026_v46, %v723_v37  ;;  %v906_v39 = vsel %vm905_vm12, %v904_v17, 0  ;;  %vm431_vm13 = vc.u32 %v6090_v19, %v6036_v56 }
 0x16e   :  { %v744_v49 = vadd.s32 1, %v6095_v45  ;;  %v6147_v13 = vmul.u32.u64.low %v630_v50, %v625_v52  ;;  %v6148_v57 = vmul.u32.u64.high %v630_v50, %v625_v52, %v6147_v13  ;;  %v413_v8 = vsel %vm407_vm3, %v410_v28, %v412_v55 }
 0x16f   :  { %vm743_vm14 = vc.u32 %v6101_v22, %v6094_v15  ;;  %v6155_v32 = vmul.u32.u64.low %v630_v50, %v629_v47  ;;  %v6156_v20 = vmul.u32.u64.high %v630_v50, %v629_v47, %v6155_v32  ;;  %v725_v46 = vsel %vm719_vm7, %v722_v51, %v724_v4 }
 0x170   :  { %v908_v17 = vand.u32 31, %v906_v39  ;;  %v793_v59 = vand.u32 2139095040, %v6135_v2  ;;  %v433_v34 = vsel %vm431_vm13, %v432_v48, %v6037_v0  ;;  %v429_v24 = vmul.u32 %v6020_v42, %v413_v8 }
 0x171   :  { %v745_v36 = vsel %vm743_vm14, %v744_v49, %v6095_v45  ;;  %v741_v40 = vmul.u32 %v734_v27, %v725_v46  ;;  %v619_v62 = vsel %vm617_vm8, %v607_v16, 2102212464  ;;  %v598_v58 = vshrl.u32 %v10751_v35, %v6022_v44 }
 0x172   :  { %v434_v30 = vadd.s32 %v433_v34, %v429_v24  ;;  %v6168_v37 = vsub.s32 32, %v908_v17  ;;  %v794_v26 = vshrl.u32 %v793_v59, 23  ;;  %v620_v42 = vsel %vm616_vm10, %v604_v29, %v619_v62 }
 0x173   :  { %v746_v28 = vadd.s32 %v745_v36, %v741_v40  ;;  %v618_v61 = vsel %vm614_vm9, %v598_v58, %v601_v9  ;;  %v640_v0 = vadd.s32 1, %v6148_v57  ;;  %vm639_vm15 = vc.u32 %v6156_v20, %v6147_v13 }
 0x174   :  { %v435_v16 = vadd.s32 536870912, %v434_v30  ;;  %v10752_v27 = vmov 920167782   ;;  %v4625_v44 = vadd.s32 4294967169, %v794_v26  ;;  %v621_v55 = vsel %vm615_vm11, %v618_v61, %v620_v42 }
 0x175   :  { %v921_v45 = vshrl.u32 %v10752_v27, %v6168_v37  ;;  %v747_v52 = vadd.s32 536870912, %v746_v28  ;;  %v10753_v47 = vmov 1326507024   ;;  %v641_v48 = vsel %vm639_vm15, %v640_v0, %v6148_v57 }
 0x176   :  { %v924_v9 = vshrl.u32 %v10753_v47, %v6168_v37  ;;  %v10635_v29 = vand.u32 2147483647, %v6006_v23  ;;  %v6185_v51 = vshrl.u32 %v906_v39, 5  ;;  %v10754_v4 = vmov 2102212464   ;;  %v6197_v39 = vpop.f32.mrb[12].mxu0 }
 0x177   :  { %v920_v49 = vshll.u32 %v10754_v4, %v908_v17  ;;  %v912_v8 = vshrl.u32 %v10661_v18, %v6168_v37  ;;  %v915_v32 = vshrl.u32 %v10659_v21, %v6168_v37  ;;  %v918_v25 = vshrl.u32 %v10754_v4, %v6168_v37  ;;  %10756 = vst [vmem:[#allocation16_spill] sm:$0xff] %v6197_v39  ;;  %v6284_v39 = vpop.f32.mrb[13].mxu0 }
 0x178   :  { %v923_v46 = vshll.u32 %v10752_v27, %v908_v17  ;;  %v6195_v59 = vshrl.u32 %v435_v16, 30  ;;  %v637_v57 = vmul.u32 %v630_v50, %v621_v55  ;;  %v800_v24 = vadd.s32 1, %v4625_v44  ;;  %10758 = vst [vmem:[#allocation18_spill] sm:$0xff] %v6284_v39 }
 0x179   :  { %v922_v34 = vor.u32 %v921_v45, %v920_v49  ;;  %v911_v36 = vshll.u32 %v10751_v35, %v908_v17  ;;  %v914_v40 = vshll.u32 %v10661_v18, %v908_v17  ;;  %v917_v62 = vshll.u32 %v10659_v21, %v908_v17 }
 0x17a   :  { %10755 = vst [vmem:[#allocation15_spill] sm:$0xff] %v6195_v59  ;;  %v925_v58 = vor.u32 %v924_v9, %v923_v46  ;;  %v6202_v26 = vshrl.u32 %v747_v52, 30  ;;  %v642_v61 = vadd.s32 %v641_v48, %v637_v57  ;;  %v901_v42 = vand.u32 8388607, %v10635_v29 }
 0x17b   :  { %v913_v0 = vor.u32 %v912_v8, %v911_v36  ;;  %v916_v16 = vor.u32 %v915_v32, %v914_v40  ;;  %v919_v50 = vor.u32 %v918_v25, %v917_v62  ;;  %vm929_vm0 = vcmp.lt.s32.totalorder %v6185_v51, 4 }
 0x17c   :  { %v935_v45 = vsel %vm929_vm0, %v922_v34, 920167782  ;;  %vm801_vm1 = vcmp.gt.s32.totalorder %v800_v24, 0  ;;  %v437_v44 = vshll.u32 %v6195_v59, 30  ;;  %v939_v17 = vsel %vm929_vm0, %v925_v58, 1326507024 }
 0x17d   :  { %v749_v52 = vshll.u32 %v6202_v26, 30  ;;  %v902_v55 = vor.u32 8388608, %v901_v42  ;;  %vm926_vm2 = vcmp.lt.s32.totalorder %v6185_v51, 1  ;;  %vm928_vm3 = vcmp.lt.s32.totalorder %v6185_v51, 3 }
 0x17e   :  { %v643_v9 = vadd.s32 536870912, %v642_v61  ;;  %v934_v48 = vsel %vm926_vm2, %v913_v0, %v916_v16  ;;  %v936_v49 = vsel %vm928_vm3, %v919_v50, %v935_v45  ;;  %v802_v8 = vsel %vm801_vm1, %v800_v24, 0 }
 0x17f   :  { %v938_v32 = vsel %vm926_vm2, %v916_v16, %v919_v50  ;;  %v940_v25 = vsel %vm928_vm3, %v922_v34, %v939_v17  ;;  %vm927_vm4 = vcmp.lt.s32.totalorder %v6185_v51, 2  ;;  %v6224_v46 = vsub.s32 %v434_v30, %v437_v44 }
 0x180   :  { %v937_v57 = vsel %vm927_vm4, %v934_v48, %v936_v49  ;;  %v804_v36 = vand.u32 31, %v802_v8  ;;  %v6228_v40 = vsub.s32 %v746_v28, %v749_v52  ;;  %v6230_v62 = vshrl.u32 %v643_v9, 30 }
 0x181   :  { %v941_v24 = vsel %vm927_vm4, %v938_v32, %v940_v25  ;;  %v942_v58 = vshll.u32 %v902_v55, 8  ;;  %v440_v34 = vsub.s32 0, %v6224_v46  ;;  %v931_v9 = vsel %vm929_vm0, %v919_v50, 2102212464 }
 0x182   :  { %v6242_v17 = vsub.s32 32, %v804_v36  ;;  %v752_v28 = vsub.s32 0, %v6228_v40  ;;  %v645_v52 = vshll.u32 %v6230_v62, 30  ;;  %v910_v48 = vshrl.u32 %v10751_v35, %v6168_v37 }
 0x183   :  { %v6234_v42 = vmul.u32.u64.low %v942_v58, %v937_v57  ;;  %v6235_v45 = vmul.u32.u64.high %v942_v58, %v937_v57, %v6234_v42  ;;  %v6239_v30 = vmul.u32.u64.low %v942_v58, %v941_v24  ;;  %v6240_v44 = vmul.u32.u64.high %v942_v58, %v941_v24, %v6239_v30 }
 0x184   :  { %v4610_v55 = vmin.u32 %v440_v34, %v6224_v46  ;;  %v817_v49 = vshrl.u32 %v10752_v27, %v6242_v17  ;;  %v6255_v32 = vadd.f32 %v5883_v10, %v5863_v60  ;;  %v4622_v25 = vmin.u32 %v752_v28, %v6228_v40 }
 0x185   :  { %v6258_v57 = vsub.s32 %v642_v61, %v645_v52  ;;  %v820_v50 = vshrl.u32 %v10753_v47, %v6242_v17  ;;  %v930_v34 = vsel %vm926_vm2, %v910_v48, %v913_v0  ;;  %v932_v37 = vsel %vm928_vm3, %v916_v16, %v931_v9 }
 0x186   :  { %10757 = vst [vmem:[#allocation17_spill] sm:$0xff] %v6255_v32  ;;  %v6267_v30 = vshrl.u32 %v802_v8, 5  ;;  %v816_v29 = vshll.u32 %v10754_v4, %v804_v36  ;;  %v808_v28 = vshrl.u32 %v10661_v18, %v6242_v17  ;;  %v811_v61 = vshrl.u32 %v10659_v21, %v6242_v17 }
 0x187   :  { %v814_v52 = vshrl.u32 %v10754_v4, %v6242_v17  ;;  %v819_v54 = vshll.u32 %v10752_v27, %v804_v36  ;;  %vm951_vm5 = vc.u32 %v6240_v44, %v6234_v42  ;;  %v952_v0 = vadd.s32 1, %v6235_v45 }
 0x188   :  { %v818_v16 = vor.u32 %v817_v49, %v816_v29  ;;  %v1105_v8 = vand.u32 2139095040, %v6255_v32  ;;  %v807_v9 = vshll.u32 %v10751_v35, %v804_v36  ;;  %v810_v48 = vshll.u32 %v10661_v18, %v804_v36 }
 0x189   :  { %v813_v24 = vshll.u32 %v10659_v21, %v804_v36  ;;  %v821_v59 = vor.u32 %v820_v50, %v819_v54  ;;  %v442_v14 = vclz %v4610_v55  ;;  %v933_v41 = vsel %vm927_vm4, %v930_v34, %v932_v37 }
 0x18a   :  { %v10759_v10 = vand.u32 2147483647, %v6135_v2  ;;  %v809_v31 = vor.u32 %v808_v28, %v807_v9  ;;  %v812_v29 = vor.u32 %v811_v61, %v810_v48  ;;  %vm825_vm6 = vcmp.lt.s32.totalorder %v6267_v30, 4 }
 0x18b   :  { %v815_v49 = vor.u32 %v814_v52, %v813_v24  ;;  %v648_v23 = vsub.s32 0, %v6258_v57  ;;  %v953_v54 = vsel %vm951_vm5, %v952_v0, %v6235_v45  ;;  %v831_v36 = vsel %vm825_vm6, %v818_v16, 920167782 }
 0x18c   :  { %v797_v33 = vand.u32 8388607, %v10759_v10  ;;  %v1106_v51 = vshrl.u32 %v1105_v8, 23  ;;  %v754_v55 = vclz %v4622_v25  ;;  %v949_v50 = vmul.u32 %v942_v58, %v933_v41 }
 0x18d   :  { %v835_v10 = vsel %vm825_vm6, %v821_v59, 1326507024  ;;  %v4611_v34 = vadd.s32 4294967294, %v442_v14  ;;  %vm822_vm7 = vcmp.lt.s32.totalorder %v6267_v30, 1  ;;  %vm824_vm8 = vcmp.lt.s32.totalorder %v6267_v30, 3 }
 0x18e   :  { %v954_v24 = vadd.s32 %v953_v54, %v949_v50  ;;  %v798_v37 = vor.u32 8388608, %v797_v33  ;;  %v830_v28 = vsel %vm822_vm7, %v809_v31, %v812_v29  ;;  %v832_v45 = vsel %vm824_vm8, %v815_v49, %v831_v36 }
 0x18f   :  { %v4618_v61 = vmin.u32 %v648_v23, %v6258_v57  ;;  %v834_v41 = vsel %vm822_vm7, %v812_v29, %v815_v49  ;;  %v836_v14 = vsel %vm824_vm8, %v818_v16, %v835_v10  ;;  %v4637_v59 = vadd.s32 4294967169, %v1106_v51 }
 0x190   :  { %v4623_v58 = vadd.s32 4294967294, %v754_v55  ;;  %vm823_vm9 = vcmp.lt.s32.totalorder %v6267_v30, 2  ;;  %vm4612_vm10 = vcmp.lt.s32.totalorder %v4611_v34, 0  ;;  %v955_v25 = vadd.s32 536870912, %v954_v24 }
 0x191   :  { %v833_v33 = vsel %vm823_vm9, %v830_v28, %v832_v45  ;;  %v837_v52 = vsel %vm823_vm9, %v834_v41, %v836_v14  ;;  %v838_v0 = vshll.u32 %v798_v37, 8  ;;  %v650_v23 = vclz %v4618_v61 }
 0x192   :  { %v1112_v8 = vadd.s32 1, %v4637_v59  ;;  %vm4624_vm11 = vcmp.lt.s32.totalorder %v4623_v58, 0  ;;  %v6320_v16 = vsel %vm4612_vm10, 0, %v4611_v34  ;;  %v6325_v51 = vshrl.u32 %v955_v25, 30 }
 0x193   :  { %v6316_v9 = vmul.u32.u64.low %v838_v0, %v833_v33  ;;  %v6317_v48 = vmul.u32.u64.high %v838_v0, %v833_v33, %v6316_v9  ;;  %v6322_v54 = vmul.u32.u64.low %v838_v0, %v837_v52  ;;  %v6323_v36 = vmul.u32.u64.high %v838_v0, %v837_v52, %v6322_v54 }
 0x194   :  { %v757_v55 = vsel %vm4624_vm11, 0, %v4623_v58  ;;  %v4619_v50 = vadd.s32 4294967294, %v650_v23  ;;  %vm1113_vm12 = vcmp.gt.s32.totalorder %v1112_v8, 0  ;;  %v450_v10 = vsub.s32 4294967266, %v6320_v16 }
 0x195   :  { %v827_v37 = vsel %vm825_vm6, %v815_v49, 2102212464  ;;  %v806_v28 = vshrl.u32 %v10751_v35, %v6242_v17  ;;  %v762_v45 = vsub.s32 4294967266, %v757_v55  ;;  %v957_v34 = vshll.u32 %v6325_v51, 30 }
 0x196   :  { %v1114_v61 = vsel %vm1113_vm12, %v1112_v8, 0  ;;  %vm4620_vm13 = vcmp.lt.s32.totalorder %v4619_v50, 0  ;;  %v828_v14 = vsel %vm824_vm8, %v812_v29, %v827_v37  ;;  %v451_v59 = vadd.s32 127, %v450_v10 }
 0x197   :  { %v826_v41 = vsel %vm822_vm7, %v806_v28, %v809_v31  ;;  %v848_v58 = vadd.s32 1, %v6317_v48  ;;  %v758_v33 = vsub.s32 32, %v757_v55  ;;  %vm847_vm14 = vc.u32 %v6323_v36, %v6316_v9 }
 0x198   :  { %v1116_v49 = vand.u32 31, %v1114_v61  ;;  %v763_v17 = vadd.s32 127, %v762_v45  ;;  %v6340_v25 = vsel %vm4620_vm13, 0, %v4619_v50  ;;  %v6342_v52 = vsub.s32 %v954_v24, %v957_v34 }
 0x199   :  { %v829_v23 = vsel %vm823_vm9, %v826_v41, %v828_v14  ;;  %v742_v31 = vadd.s32 %v6094_v15, %v6101_v22  ;;  %v6350_v29 = vadd.f32 %v5863_v60, %v5885_v12  ;;  %v6354_v8 = vmul.f32 %v5936_v11, %v5871_v63 }
 0x19a   :  { %v446_v54 = vsub.s32 32, %v6320_v16  ;;  %v452_v50 = vshll.u32 %v451_v59, 23  ;;  %v849_v24 = vsel %vm847_vm14, %v848_v58, %v6317_v48  ;;  %v658_v30 = vsub.s32 4294967266, %v6340_v25  ;;  %v6381_v59 = vpop.f32.mrb[14].mxu0 }
 0x19b   :  { %10760 = vst [vmem:[#allocation19_spill] sm:$0xff] %v6350_v29  ;;  %10761 = vst [vmem:[#allocation20_spill] sm:$0xff] %v6354_v8  ;;  %v760_v10 = vshrl.u32 %v742_v31, %v758_v33  ;;  %v845_v37 = vmul.u32 %v838_v0, %v829_v23  ;;  %v6359_v28 = vsub.s32 32, %v1116_v49  ;;  %v430_v15 = vadd.s32 %v6036_v56, %v6090_v19 }
 0x19c   :  { %v6365_v22 = vmul.f32 %v5874_v1, %v5936_v11  ;;  %v764_v63 = vshll.u32 %v763_v17, 23  ;;  %v960_v45 = vsub.s32 0, %v6342_v52  ;;  %v759_v34 = vshll.u32 %v6228_v40, %v757_v55  ;;  %10764 = vst [vmem:[#allocation23_spill] sm:$0xff] %v6381_v59 }
 0x19d   :  { %v6371_v48 = vmul.f32 %v5936_v11, %v5876_v3  ;;  %v6373_v41 = vadd.s32 %v849_v24, %v845_v37  ;;  %v1001_v0 = vand.u32 2139095040, %v6350_v29  ;;  %v447_v56 = vshll.u32 %v6224_v46, %v6320_v16 }
 0x19e   :  { %10762 = vst [vmem:[#allocation21_spill] sm:$0xff] %v6365_v22  ;;  %v448_v19 = vshrl.u32 %v430_v15, %v446_v54  ;;  %v6378_v14 = vor.u32 4788187, %v452_v50  ;;  %v761_v58 = vor.u32 %v760_v10, %v759_v34  ;;  %v638_v40 = vadd.s32 %v6147_v13, %v6156_v20 }
 0x19f   :  { %10763 = vst [vmem:[#allocation22_spill] sm:$0xff] %v6371_v48  ;;  %v659_v3 = vadd.s32 127, %v658_v30  ;;  %v1129_v55 = vshrl.u32 %v10752_v27, %v6359_v28  ;;  %v765_v33 = vor.u32 4788187, %v764_v63  ;;  %v4630_v17 = vmin.u32 %v960_v45, %v6342_v52 }
 0x1a0   :  { %v1132_v16 = vshrl.u32 %v10753_v47, %v6359_v28  ;;  %v851_v23 = vadd.s32 536870912, %v6373_v41  ;;  %v6392_v31 = vshrl.u32 %v1114_v61, 5  ;;  %v1128_v54 = vshll.u32 %v10754_v4, %v1116_v49 }
 0x1a1   :  { %v1002_v50 = vshrl.u32 %v1001_v0, 23  ;;  %v1120_v13 = vshrl.u32 %v10661_v18, %v6359_v28  ;;  %v1123_v20 = vshrl.u32 %v10659_v21, %v6359_v28  ;;  %v1126_v24 = vshrl.u32 %v10754_v4, %v6359_v28 }
 0x1a2   :  { %v1131_v10 = vshll.u32 %v10752_v27, %v1116_v49  ;;  %v654_v30 = vsub.s32 32, %v6340_v25  ;;  %v660_v37 = vshll.u32 %v659_v3, 23  ;;  %v1130_v15 = vor.u32 %v1129_v55, %v1128_v54 }
 0x1a3   :  { %v6405_v61 = vadd.f32 %v5909_v6, %v5863_v60  ;;  %v1119_v63 = vshll.u32 %v10751_v35, %v1116_v49  ;;  %v1122_v45 = vshll.u32 %v10661_v18, %v1116_v49  ;;  %v1125_v34 = vshll.u32 %v10659_v21, %v1116_v49 }
 0x1a4   :  { %v1133_v0 = vor.u32 %v1132_v16, %v1131_v10  ;;  %v962_v1 = vclz %v4630_v17  ;;  %v6410_v46 = vshrl.u32 %v851_v23, 30  ;;  %v10766_v8 = vand.u32 2147483647, %v6255_v32 }
 0x1a5   :  { %10765 = vst [vmem:[#allocation24_spill] sm:$0xff] %v6405_v61  ;;  %v4633_v39 = vadd.s32 4294967169, %v1002_v50  ;;  %v6414_v3 = vor.u32 %v1120_v13, %v1119_v63  ;;  %v6416_v55 = vor.u32 %v1123_v20, %v1122_v45  ;;  %v1127_v54 = vor.u32 %v1126_v24, %v1125_v34 }
 0x1a6   :  { %v1109_v59 = vand.u32 8388607, %v10766_v8  ;;  %vm1137_vm15 = vcmp.lt.s32.totalorder %v6392_v31, 4  ;;  %v766_v48 = vand.u32 2147483647, %v765_v33  ;;  %v768_v6 = vcvt.s32.f32 %v761_v58 }
 0x1a7   :  { %v1143_v49 = vsel %vm1137_vm15, %v1130_v15, 920167782  ;;  %v1313_v17 = vand.u32 2139095040, %v6405_v61  ;;  %v655_v16 = vshll.u32 %v6258_v57, %v6340_v25  ;;  %v656_v23 = vshrl.u32 %v638_v40, %v654_v30 }
 0x1a8   :  { %v661_v8 = vor.u32 4788187, %v660_v37  ;;  %v1147_v50 = vsel %vm1137_vm15, %v1133_v0, 1326507024  ;;  %v4631_v13 = vadd.s32 4294967294, %v962_v1  ;;  %vm1134_vm0 = vcmp.lt.s32.totalorder %v6392_v31, 1 }
 0x1a9   :  { %vm1136_vm1 = vcmp.lt.s32.totalorder %v6392_v31, 3  ;;  %v1008_v33 = vadd.s32 1, %v4633_v39  ;;  %v853_v58 = vshll.u32 %v6410_v46, 30  ;;  %v1110_v20 = vor.u32 8388608, %v1109_v59 }
 0x1aa   :  { %v1142_v24 = vsel %vm1134_vm0, %v6414_v3, %v6416_v55  ;;  %v1144_v57 = vsel %vm1136_vm1, %v1127_v54, %v1143_v49  ;;  %v769_v25 = vmul.f32 %v768_v6, %v766_v48  ;;  %v1146_v1 = vsel %vm1134_vm0, %v6416_v55, %v1127_v54 }
 0x1ab   :  { %v1148_v40 = vsel %vm1136_vm1, %v1130_v15, %v1147_v50  ;;  %v1314_v39 = vshrl.u32 %v1313_v17, 23  ;;  %v10767_v10 = vand.u32 2147483647, %v5922_v43  ;;  %vm688_vm3 = vcmp.lt.s32.totalorder %v5922_v43, 0 }
 0x1ac   :  { %v657_v30 = vor.u32 %v656_v23, %v655_v16  ;;  %vm1135_vm4 = vcmp.lt.s32.totalorder %v6392_v31, 2  ;;  %v449_v6 = vor.u32 %v448_v19, %v447_v56  ;;  %v662_v48 = vand.u32 2147483647, %v661_v8 }
 0x1ad   :  { %vm6442_vm2 = vcmp.le.f32.partialorder %v10767_v10, 0.7853982  ;;  %v1145_v37 = vsel %vm1135_vm4, %v1142_v24, %v1144_v57  ;;  %vm1009_vm5 = vcmp.gt.s32.totalorder %v1008_v33, 0  ;;  %vm4632_vm6 = vcmp.lt.s32.totalorder %v4631_v13, 0 }
 0x1ae   :  { %v6451_v15 = vsub.s32 %v6373_v41, %v853_v58  ;;  %v1149_v63 = vsel %vm1135_vm4, %v1146_v1, %v1148_v40  ;;  %v6455_v45 = vshll.u32 %v1110_v20, 8  ;;  %v454_v34 = vand.u32 2147483647, %v6378_v14 }
 0x1af   :  { %v770_v0 = vxor.u32 2147483648, %v769_v25  ;;  %v10770_v56 = vsub.s32 4, %v6202_v26  ;;  %v4645_v49 = vadd.s32 4294967169, %v1314_v39  ;;  %v664_v17 = vcvt.s32.f32 %v657_v30 }
 0x1b0   :  { %v6464_v16 = vmul.u32.u64.low %v6455_v45, %v1145_v37  ;;  %v6465_v41 = vmul.u32.u64.high %v6455_v45, %v1145_v37, %v6464_v16  ;;  %v1010_v23 = vsel %vm1009_vm5, %v1008_v33, 0  ;;  %v456_v8 = vcvt.s32.f32 %v449_v6 }
 0x1b1   :  { %v773_v19 = vsel %vm688_vm3, %v10770_v56, %v6202_v26  ;;  %v6468_v50 = vsel %vm4632_vm6, 0, %v4631_v13  ;;  %v6471_v14 = vmul.u32.u64.low %v6455_v45, %v1149_v63  ;;  %v6472_v58 = vmul.u32.u64.high %v6455_v45, %v1149_v63, %v6471_v14 }
 0x1b2   :  { %v775_v20 = vsel %vm6442_vm2, 0, %v773_v19  ;;  %v665_v24 = vmul.f32 %v664_v17, %v662_v48  ;;  %v668_v26 = vsub.s32 4, %v6230_v62  ;;  %v856_v57 = vsub.s32 0, %v6451_v15 }
 0x1b3   :  { %v771_v1 = vsel %vm688_vm3, %v770_v0, %v769_v25  ;;  %vm584_vm7 = vcmp.lt.s32.totalorder %v5930_v53, 0  ;;  %v1012_v33 = vand.u32 31, %v1010_v23  ;;  %v1320_v13 = vadd.s32 1, %v4645_v49 }
 0x1b4   :  { %v6481_v40 = vmul.f32 %v456_v8, %v454_v34  ;;  %v10771_v39 = vand.u32 2147483647, %v5930_v53  ;;  %v970_v30 = vsub.s32 4294967266, %v6468_v50  ;;  %v1139_v6 = vsel %vm1137_vm15, %v1127_v54, 2102212464  ;;  %v6502_v34 = vpop.f32.mrb[15].mxu0 }
 0x1b5   :  { %v779_v48 = vadd.s32 3, %v775_v20  ;;  %v6494_v25 = vmul.f32 %v5878_v5, %v5936_v11  ;;  %v6498_v37 = vmul.f32 %v5936_v11, %v5880_v7  ;;  %v1118_v63 = vshrl.u32 %v10751_v35, %v6359_v28  ;;  %10776 = vst [vmem:[#allocation27_spill] sm:$0xff] %v6502_v34 }
 0x1b6   :  { %vm6485_vm8 = vcmp.le.f32.partialorder %v10771_v39, 0.7853982  ;;  %v774_v0 = vsel %vm6442_vm2, %v5922_v43, %v771_v1  ;;  %v666_v56 = vxor.u32 2147483648, %v665_v24  ;;  %v6510_v54 = vsel %vm584_vm7, %v668_v26, %v6230_v62 }
 0x1b7   :  { %10774 = vst [vmem:[#allocation25_spill] sm:$0xff] %v6494_v25  ;;  %10775 = vst [vmem:[#allocation26_spill] sm:$0xff] %v6498_v37  ;;  %v4626_v5 = vmin.u32 %v856_v57, %v6451_v15  ;;  %v1138_v7 = vsel %vm1134_vm0, %v1118_v63, %v6414_v3  ;;  %v1140_v28 = vsel %vm1136_vm1, %v6416_v55, %v1139_v6  ;;  %v6519_v19 = vsub.s32 32, %v1012_v33 }
 0x1b8   :  { %vm1321_vm9 = vcmp.gt.s32.totalorder %v1320_v13, 0  ;;  %v966_v49 = vsub.s32 32, %v6468_v50  ;;  %v971_v17 = vadd.s32 127, %v970_v30  ;;  %v1160_v62 = vadd.s32 1, %v6465_v41 }
 0x1b9   :  { %5521 = vcosq.f32 %v774_v0  ;;  %v6524_v8 = vand.u32 3, %v779_v48  ;;  %vm1159_vm10 = vc.u32 %v6472_v58, %v6464_v16  ;;  %v667_v55 = vsel %vm584_vm7, %v666_v56, %v665_v24 }
 0x1ba   :  { %v950_v14 = vadd.s32 %v6234_v42, %v6240_v44  ;;  %v1141_v20 = vsel %vm1135_vm4, %v1138_v7, %v1140_v28  ;;  %v1322_v26 = vsel %vm1321_vm9, %v1320_v13, 0  ;;  %v967_v57 = vshll.u32 %v6342_v52, %v6468_v50 }
 0x1bb   :  { %v858_v1 = vclz %v4626_v5  ;;  %v10652_v39 = vand.u32 2147483647, %v6350_v29  ;;  %v1025_v30 = vshrl.u32 %v10752_v27, %v6519_v19  ;;  %v972_v48 = vshll.u32 %v971_v17, 23 }
 0x1bc   :  { %v968_v6 = vshrl.u32 %v950_v14, %v966_v49  ;;  %v1161_v24 = vsel %vm1159_vm10, %v1160_v62, %v6465_v41  ;;  %v1028_v42 = vshrl.u32 %v10753_v47, %v6519_v19  ;;  %v1157_v44 = vmul.u32 %v6455_v45, %v1141_v20 }
 0x1bd   :  { %v6546_v31 = vshrl.u32 %v1010_v23, 5  ;;  %v1024_v13 = vshll.u32 %v10754_v4, %v1012_v33  ;;  %v1324_v52 = vand.u32 31, %v1322_v26  ;;  %v1016_v50 = vshrl.u32 %v10661_v18, %v6519_v19 }
 0x1be   :  { %v1019_v63 = vshrl.u32 %v10659_v21, %v6519_v19  ;;  %v1022_v56 = vshrl.u32 %v10754_v4, %v6519_v19  ;;  %v1027_v41 = vshll.u32 %v10752_v27, %v1012_v33  ;;  %v4627_v5 = vadd.s32 4294967294, %v858_v1 }
 0x1bf   :  { %v6556_v7 = vadd.s32 %v1161_v24, %v1157_v44  ;;  %v1005_v45 = vand.u32 8388607, %v10652_v39  ;;  %v1026_v23 = vor.u32 %v1025_v30, %v1024_v13  ;;  %v1015_v28 = vshll.u32 %v10751_v35, %v1012_v33 }
 0x1c0   :  { %v1018_v49 = vshll.u32 %v10661_v18, %v1012_v33  ;;  %v1021_v17 = vshll.u32 %v10659_v21, %v1012_v33  ;;  %v1029_v62 = vor.u32 %v1028_v42, %v1027_v41  ;;  %5523 = vsinq.f32 %v774_v0 }
 0x1c1   :  { %v6566_v14 = vsel %vm6485_vm8, %v5930_v53, %v667_v55  ;;  %v6568_v20 = vor.u32 %v968_v6, %v967_v57  ;;  %v6570_v1 = vsub.s32 32, %v1324_v52  ;;  %v6572_v24 = vor.u32 %v1016_v50, %v1015_v28 }
 0x1c2   :  { %v6574_v30 = vor.u32 %v1019_v63, %v1018_v49  ;;  %v6576_v44 = vor.u32 %v1022_v56, %v1021_v17  ;;  %vm1033_vm11 = vcmp.lt.s32.totalorder %v6546_v31, 4  ;;  %v973_v0 = vor.u32 4788187, %v972_v48 }
 0x1c3   :  { %v6579_v33 = vpop.eup %5521  ;;  %vm4628_vm12 = vcmp.lt.s32.totalorder %v4627_v5, 0  ;;  %v1039_v55 = vsel %vm1033_vm11, %v1026_v23, 920167782  ;;  %v6585_v57 = vadd.f32 %v5863_v60, %v5917_v38  ;;  %v1163_v6 = vadd.s32 536870912, %v6556_v7 }
 0x1c4   :  { %v1006_v42 = vor.u32 8388608, %v1005_v45  ;;  %v1043_v13 = vsel %vm1033_vm11, %v1029_v62, 1326507024  ;;  %vm1030_vm13 = vcmp.lt.s32.totalorder %v6546_v31, 1  ;;  %vm1031_vm14 = vcmp.lt.s32.totalorder %v6546_v31, 2 }
 0x1c5   :  { %vm1032_vm15 = vcmp.lt.s32.totalorder %v6546_v31, 3  ;;  %v1337_v48 = vshrl.u32 %v10752_v27, %v6570_v1  ;;  %v1038_v63 = vsel %vm1030_vm13, %v6572_v24, %v6574_v30  ;;  %v1042_v41 = vsel %vm1030_vm13, %v6574_v30, %v6576_v44 }
 0x1c6   :  { %v1040_v56 = vsel %vm1032_vm15, %v6576_v44, %v1039_v55  ;;  %v1340_v45 = vshrl.u32 %v10753_v47, %v6570_v1  ;;  %v1044_v28 = vsel %vm1032_vm15, %v1026_v23, %v1043_v13  ;;  %v6611_v49 = vshrl.u32 %v1322_v26, 5 }
 0x1c7   :  { %v1336_v17 = vshll.u32 %v10754_v4, %v1324_v52  ;;  %v1209_v62 = vand.u32 2139095040, %v6585_v57  ;;  %v1328_v55 = vshrl.u32 %v10661_v18, %v6570_v1  ;;  %v1331_v39 = vshrl.u32 %v10659_v21, %v6570_v1 }
 0x1c8   :  { %v1334_v59 = vshrl.u32 %v10754_v4, %v6570_v1  ;;  %v1339_v3 = vshll.u32 %v10752_v27, %v1324_v52  ;;  %v6623_v50 = vsel %vm4628_vm12, 0, %v4627_v5  ;;  %v1041_v26 = vsel %vm1031_vm14, %v1038_v63, %v1040_v56 }
 0x1c9   :  { %v6627_v23 = vshll.u32 %v1006_v42, 8  ;;  %v1338_v13 = vor.u32 %v1337_v48, %v1336_v17  ;;  %v1327_v34 = vshll.u32 %v10751_v35, %v1324_v52  ;;  %v1330_v37 = vshll.u32 %v10661_v18, %v1324_v52 }
 0x1ca   :  { %v1333_v29 = vshll.u32 %v10659_v21, %v1324_v52  ;;  %v1341_v38 = vor.u32 %v1340_v45, %v1339_v3  ;;  %v6632_v25 = vpop.eup %5523  ;;  %v6634_v22 = vshrl.u32 %v1163_v6, 30  ;;  %v1045_v5 = vsel %vm1031_vm14, %v1042_v41, %v1044_v28 }
 0x1cb   :  { %v10777_v32 = vand.u32 2147483647, %v6405_v61  ;;  %v1210_v42 = vshrl.u32 %v1209_v62, 23  ;;  %v6640_v56 = vor.u32 %v1328_v55, %v1327_v34  ;;  %v6642_v48 = vor.u32 %v1331_v39, %v1330_v37  ;;  %v10778_v39 = vld [vmem:[#allocation13_spill] sm:$0xff] }
 0x1cc   :  { %v1335_v17 = vor.u32 %v1334_v59, %v1333_v29  ;;  %vm1345_vm0 = vcmp.lt.s32.totalorder %v6611_v49, 4  ;;  %v974_v52 = vand.u32 2147483647, %v973_v0  ;;  %v866_v41 = vsub.s32 4294967266, %v6623_v50 }
 0x1cd   :  { %v1317_v63 = vand.u32 8388607, %v10777_v32  ;;  %v6646_v3 = vmul.u32.u64.low %v6627_v23, %v1041_v26  ;;  %v6647_v45 = vmul.u32.u64.high %v6627_v23, %v1041_v26, %v6646_v3  ;;  %v1351_v6 = vsel %vm1345_vm0, %v1338_v13, 920167782 }
 0x1ce   :  { %v6654_v32 = vmul.u32.u64.low %v6627_v23, %v1045_v5  ;;  %v6655_v34 = vmul.u32.u64.high %v6627_v23, %v1045_v5, %v6654_v32  ;;  %v1355_v29 = vsel %vm1345_vm0, %v1341_v38, 1326507024  ;;  %v976_v37 = vcvt.s32.f32 %v6568_v20 }
 0x1cf   :  { %vm1342_vm1 = vcmp.lt.s32.totalorder %v6611_v49, 1  ;;  %vm1344_vm2 = vcmp.lt.s32.totalorder %v6611_v49, 3  ;;  %v4641_v59 = vadd.s32 4294967169, %v1210_v42  ;;  %vm896_vm3 = vcmp.lt.s32.totalorder %v10778_v39, 0  ;;  %v6676_v42 = vpop.f32.mrb[16].mxu0 }
 0x1d0   :  { %v1165_v0 = vshll.u32 %v6634_v22, 30  ;;  %v1318_v28 = vor.u32 8388608, %v1317_v63  ;;  %v1350_v62 = vsel %vm1342_vm1, %v6640_v56, %v6642_v48  ;;  %v1352_v38 = vsel %vm1344_vm2, %v1335_v17, %v1351_v6  ;;  %10779 = vst [vmem:[#allocation13_spill] sm:$0xff] %v6676_v42 }
 0x1d1   :  { %v786_v20 = vxor.u32 2147483648, %v6579_v33  ;;  %v977_v55 = vmul.f32 %v976_v37, %v974_v52  ;;  %v1354_v26 = vsel %vm1342_vm1, %v6642_v48, %v1335_v17  ;;  %v1356_v5 = vsel %vm1344_vm2, %v1338_v13, %v1355_v29 }
 0x1d2   :  { %vm785_vm4 = vcmp.eq.s32.totalorder %v6524_v8, 2  ;;  %v980_v63 = vsub.s32 4, %v6325_v51  ;;  %v867_v32 = vadd.s32 127, %v866_v41  ;;  %v1035_v6 = vsel %vm1033_vm11, %v6576_v44, 2102212464 }
 0x1d3   :  { %vm1343_vm5 = vcmp.lt.s32.totalorder %v6611_v49, 2  ;;  %vm782_vm6 = vcmp.eq.s32.totalorder %v6524_v8, 0  ;;  %5525 = vcosq.f32 %v6566_v14  ;;  %v10780_v52 = vand.u32 2147483647, %v10778_v39 }
 0x1d4   :  { %v1014_v29 = vshrl.u32 %v10751_v35, %v6519_v19  ;;  %v1353_v41 = vsel %vm1343_vm5, %v1350_v62, %v1352_v38  ;;  %v1216_v37 = vadd.s32 1, %v4641_v59  ;;  %v862_v44 = vsub.s32 32, %v6623_v50 }
 0x1d5   :  { %vm6688_vm7 = vcmp.le.f32.partialorder %v10780_v52, 0.7853982  ;;  %v6698_v21 = vsub.s32 %v6556_v7, %v1165_v0  ;;  %v1357_v18 = vsel %vm1343_vm5, %v1354_v26, %v1356_v5  ;;  %v6702_v42 = vshll.u32 %v1318_v28, 8  ;;  %v10783_v52 = vld [vmem:[#allocation7_spill] sm:$0xff] }
 0x1d6   :  { %vm376_vm9 = vcmp.lt.s32.totalorder %v10783_v52, 0  ;;  %v978_v61 = vxor.u32 2147483648, %v977_v55  ;;  %v846_v19 = vadd.s32 %v6316_v9, %v6323_v36  ;;  %v1034_v59 = vsel %vm1030_vm13, %v1014_v29, %v6572_v24 }
 0x1d7   :  { %v1036_v7 = vsel %vm1032_vm15, %v6574_v30, %v1035_v6  ;;  %v868_v0 = vshll.u32 %v867_v32, 23  ;;  %v1056_v62 = vadd.s32 1, %v6647_v45  ;;  %vm1055_vm10 = vc.u32 %v6655_v34, %v6646_v3 }
 0x1d8   :  { %v6715_v28 = vmul.u32.u64.low %v6702_v42, %v1353_v41  ;;  %v6716_v38 = vmul.u32.u64.high %v6702_v42, %v1353_v41, %v6715_v28  ;;  %v6722_v9 = vmul.u32.u64.low %v6702_v42, %v1357_v18  ;;  %v6723_v36 = vmul.u32.u64.high %v6702_v42, %v1357_v18, %v6722_v9 }
 0x1d9   :  { %vm1217_vm11 = vcmp.gt.s32.totalorder %v1216_v37, 0  ;;  %v783_v24 = vxor.u32 2147483648, %v6632_v25  ;;  %v864_v26 = vshrl.u32 %v846_v19, %v862_v44  ;;  %v1168_v30 = vsub.s32 0, %v6698_v21 }
 0x1da   :  { %v1037_v5 = vsel %vm1031_vm14, %v1034_v59, %v1036_v7  ;;  %5527 = vsinq.f32 %v6566_v14  ;;  %v10784_v32 = vsel %vm6485_vm8, 0, %v6510_v54  ;;  %v981_v18 = vsel %vm896_vm3, %v980_v63, %v6325_v51 }
 0x1db   :  { %v675_v6 = vadd.s32 3, %v10784_v32  ;;  %v863_v29 = vshll.u32 %v6451_v15, %v6623_v50  ;;  %v869_v41 = vor.u32 4788187, %v868_v0  ;;  %v1057_v44 = vsel %vm1055_vm10, %v1056_v62, %v6647_v45 }
 0x1dc   :  { %v1347_v31 = vsel %vm1345_vm0, %v1335_v17, 2102212464  ;;  %v1218_v19 = vsel %vm1217_vm11, %v1216_v37, 0  ;;  %vm778_vm12 = vweird.f32 %v5922_v43  ;;  %v787_v10 = vsel %vm785_vm4, %v786_v20, %v6632_v25 }
 0x1dd   :  { %v979_v54 = vsel %vm896_vm3, %v978_v61, %v977_v55  ;;  %v1053_v51 = vmul.u32 %v6627_v23, %v1037_v5  ;;  %v1326_v15 = vshrl.u32 %v10751_v35, %v6570_v1  ;;  %v784_v14 = vsel %vm782_vm6, %v6579_v33, %v783_v24  ;;  %v6757_v63 = vpop.eup %5525 }
 0x1de   :  { %v983_v50 = vsel %vm6688_vm7, 0, %v981_v18  ;;  %v865_v17 = vor.u32 %v864_v26, %v863_v29  ;;  %v4638_v45 = vmin.u32 %v1168_v30, %v6698_v21  ;;  %v1348_v1 = vsel %vm1344_vm2, %v6642_v48, %v1347_v31  ;;  %v10787_v48 = vld [vmem:[#allocation12_spill] sm:$0xff]  ;;  %v10788_v30 = vld [vmem:[#allocation5_spill] sm:$0xff] }
 0x1df   :  { %v6759_v25 = vadd.s32 %v1057_v44, %v1053_v51  ;;  %v1346_v61 = vsel %vm1342_vm1, %v1326_v15, %v6640_v56  ;;  %v1220_v23 = vand.u32 31, %v1218_v19  ;;  %v10785_v33 = vxor.u32 2147483648, %v6481_v40 }
 0x1e0   :  { %v982_v55 = vsel %vm6688_vm7, %v10778_v39, %v979_v54  ;;  %v870_v37 = vand.u32 2147483647, %v869_v41  ;;  %v1368_v59 = vadd.s32 1, %v6716_v38  ;;  %vm781_vm8 = vcmp.lt.s32.totalorder %v6524_v8, 2 }
 0x1e1   :  { %v6772_v20 = vsel %vm376_vm9, %v10785_v33, %v6481_v40  ;;  %v6779_v56 = vand.u32 3, %v675_v6  ;;  %vm1367_vm13 = vc.u32 %v6723_v36, %v6715_v28  ;;  %v6785_v7 = vadd.f32 %v10787_v48, %v5863_v60 }
 0x1e2   :  { %10786 = vst [vmem:[#allocation28_spill] sm:$0xff] %v6772_v20  ;;  %v788_v40 = vsel %vm781_vm8, %v784_v14, %v787_v10  ;;  %v987_v0 = vadd.s32 3, %v983_v50  ;;  %v872_v62 = vcvt.s32.f32 %v865_v17  ;;  %v1349_v13 = vsel %vm1343_vm5, %v1346_v61, %v1348_v1 }
 0x1e3   :  { %5529 = vcosq.f32 %v982_v55  ;;  %v1170_v9 = vclz %v4638_v45  ;;  %v1059_v24 = vadd.s32 536870912, %v6759_v25  ;;  %v6790_v8 = vsub.s32 32, %v1220_v23 }
 0x1e4   :  { %v873_v26 = vmul.f32 %v872_v62, %v870_v37  ;;  %v6794_v5 = vmul.f32 %v10788_v30, %v5936_v11  ;;  %v6798_v32 = vmul.f32 %v5936_v11, %v5885_v12  ;;  %v1369_v6 = vsel %vm1367_vm13, %v1368_v59, %v6716_v38  ;;  %v5528_v18 = vpop.eup %5527  ;;  %v6839_v62 = vpop.f32.mrb[17].mxu0 }
 0x1e5   :  { %vm681_vm14 = vcmp.eq.s32.totalorder %v6779_v56, 2  ;;  %vm792_vm15 = vcmp.lt.s32.totalorder %v6135_v2, 0  ;;  %v1365_v49 = vmul.u32 %v6702_v42, %v1349_v13  ;;  %v1521_v29 = vand.u32 2139095040, %v6785_v7  ;;  %10796 = vst [vmem:[#allocation29_spill] sm:$0xff] %v6839_v62 }
 0x1e6   :  { %10789 = vst [vmem:[#allocation12_spill] sm:$0xff] %v6794_v5  ;;  %10790 = vst [vmem:[#allocation5_spill] sm:$0xff] %v6798_v32  ;;  %v6807_v41 = vsel %vm778_vm12, nan, %v788_v40  ;;  %vm678_vm0 = vcmp.eq.s32.totalorder %v6779_v56, 0  ;;  %v682_v12 = vxor.u32 2147483648, %v6757_v63  ;;  %5531 = vsinq.f32 %v982_v55 }
 0x1e7   :  { %v6811_v44 = vand.u32 3, %v987_v0  ;;  %v4639_v38 = vadd.s32 4294967294, %v1170_v9  ;;  %v6813_v31 = vshrl.u32 %v1059_v24, 30  ;;  %v6815_v10 = vadd.s32 %v1369_v6, %v1365_v49 }
 0x1e8   :  { %v1233_v42 = vshrl.u32 %v10752_v27, %v6790_v8  ;;  %v679_v54 = vxor.u32 2147483648, %v5528_v18  ;;  %v10791_v43 = vand.u32 2147483647, %v6135_v2  ;;  %v874_v15 = vxor.u32 2147483648, %v873_v26 }
 0x1e9   :  { %v876_v14 = vsub.s32 4, %v6410_v46  ;;  %v1236_v50 = vshrl.u32 %v10753_v47, %v6790_v8  ;;  %v6829_v45 = vshrl.u32 %v1218_v19, 5  ;;  %v1232_v61 = vshll.u32 %v10754_v4, %v1220_v23 }
 0x1ea   :  { %vm6821_vm1 = vcmp.le.f32.partialorder %v10791_v43, 0.7853982  ;;  %v1522_v1 = vshrl.u32 %v1521_v29, 23  ;;  %v10794_v33 = vmov 2475754826   ;;  %v1230_v40 = vshrl.u32 %v10754_v4, %v6790_v8 }
 0x1eb   :  { %v1224_v55 = vshrl.u32 %v10794_v33, %v6790_v8  ;;  %v10795_v37 = vmov 2131351028   ;;  %v1235_v0 = vshll.u32 %v10752_v27, %v1220_v23  ;;  %vm677_vm2 = vcmp.lt.s32.totalorder %v6779_v56, 2 }
 0x1ec   :  { %v1227_v59 = vshrl.u32 %v10795_v37, %v6790_v8  ;;  %vm4640_vm3 = vcmp.lt.s32.totalorder %v4639_v38, 0  ;;  %v1061_v19 = vshll.u32 %v6813_v31, 30  ;;  %v1371_v13 = vadd.s32 536870912, %v6815_v10 }
 0x1ed   :  { %v1234_v9 = vor.u32 %v1233_v42, %v1232_v61  ;;  %v1223_v24 = vshll.u32 %v10751_v35, %v1220_v23  ;;  %v1226_v30 = vshll.u32 %v10794_v33, %v1220_v23  ;;  %v1229_v6 = vshll.u32 %v10795_v37, %v1220_v23  ;;  %v5530_v29 = vpop.eup %5529 }
 0x1ee   :  { %v1237_v49 = vor.u32 %v1236_v50, %v1235_v0  ;;  %v683_v43 = vsel %vm681_vm14, %v682_v12, %v5528_v18  ;;  %v875_v17 = vsel %vm792_vm15, %v874_v15, %v873_v26  ;;  %v10797_v20 = vand.u32 2147483647, %v6585_v57 }
 0x1ef   :  { %v4653_v62 = vadd.s32 4294967169, %v1522_v1  ;;  %vm990_vm4 = vcmp.eq.s32.totalorder %v6811_v44, 0  ;;  %vm993_vm5 = vcmp.eq.s32.totalorder %v6811_v44, 2  ;;  %v6855_v42 = vor.u32 %v1224_v55, %v1223_v24 }
 0x1f0   :  { %v1213_v52 = vand.u32 8388607, %v10797_v20  ;;  %v6857_v61 = vor.u32 %v1227_v59, %v1226_v30  ;;  %v1231_v23 = vor.u32 %v1230_v40, %v1229_v6  ;;  %vm1241_vm6 = vcmp.lt.s32.totalorder %v6829_v45, 4  ;;  %v5532_v15 = vpop.eup %5531 }
 0x1f1   :  { %v680_v18 = vsel %vm678_vm0, %v6757_v63, %v679_v54  ;;  %v6864_v26 = vsel %vm4640_vm3, 0, %v4639_v38  ;;  %v6866_v20 = vshrl.u32 %v1371_v13, 30  ;;  %v1247_v12 = vsel %vm1241_vm6, %v1234_v9, 920167782 }
 0x1f2   :  { %v994_v50 = vxor.u32 2147483648, %v5530_v29  ;;  %v877_v1 = vsel %vm792_vm15, %v876_v14, %v6410_v46  ;;  %v6874_v55 = vsub.s32 %v6759_v25, %v1061_v19  ;;  %v1251_v63 = vsel %vm1241_vm6, %v1237_v49, 1326507024 }
 0x1f3   :  { %vm674_vm7 = vweird.f32 %v5930_v53  ;;  %v878_v38 = vsel %vm6821_vm1, %v6135_v2, %v875_v17  ;;  %vm1238_vm10 = vcmp.lt.s32.totalorder %v6829_v45, 1  ;;  %vm1240_vm11 = vcmp.lt.s32.totalorder %v6829_v45, 3 }
 0x1f4   :  { %v1528_v54 = vadd.s32 1, %v4653_v62  ;;  %vm989_vm12 = vcmp.lt.s32.totalorder %v6811_v44, 2  ;;  %v1178_v46 = vsub.s32 4294967266, %v6864_v26  ;;  %v1214_v25 = vor.u32 8388608, %v1213_v52 }
 0x1f5   :  { %v1246_v14 = vsel %vm1238_vm10, %v6855_v42, %v6857_v61  ;;  %v1248_v59 = vsel %vm1240_vm11, %v1231_v23, %v1247_v12  ;;  %v991_v40 = vxor.u32 2147483648, %v5532_v15  ;;  %v1373_v17 = vshll.u32 %v6866_v20, 30 }
 0x1f6   :  { %v1250_v0 = vsel %vm1238_vm10, %v6857_v61, %v1231_v23  ;;  %v1252_v62 = vsel %vm1240_vm11, %v1234_v9, %v1251_v63  ;;  %v684_v52 = vsel %vm677_vm2, %v680_v18, %v683_v43  ;;  %5533 = vcosq.f32 %v878_v38 }
 0x1f7   :  { %v1064_v19 = vsub.s32 0, %v6874_v55  ;;  %vm1239_vm8 = vcmp.lt.s32.totalorder %v6829_v45, 2  ;;  %vm986_vm13 = vweird.f32 %v10778_v39  ;;  %v879_v13 = vsel %vm6821_vm1, 0, %v877_v1  ;;  %v10805_v39 = vld [vmem:[#allocation21_spill] sm:$0xff] }
 0x1f8   :  { %5535 = vsinq.f32 %v878_v38  ;;  %v1249_v24 = vsel %vm1239_vm8, %v1246_v14, %v1248_v59  ;;  %vm1529_vm14 = vcmp.gt.s32.totalorder %v1528_v54, 0  ;;  %v1174_v9 = vsub.s32 32, %v6864_v26 }
 0x1f9   :  { %v1179_v30 = vadd.s32 127, %v1178_v46  ;;  %v1253_v56 = vsel %vm1239_vm8, %v1250_v0, %v1252_v62  ;;  %v6910_v6 = vshll.u32 %v1214_v25, 8  ;;  %v992_v49 = vsel %vm990_vm4, %v5530_v29, %v991_v40  ;;  %v10798_v25 = vld [vmem:[#allocation17_spill] sm:$0xff] }
 0x1fa   :  { %v995_v51 = vsel %vm993_vm5, %v994_v50, %v5532_v15  ;;  %v1158_v43 = vadd.s32 %v6464_v16, %v6472_v58  ;;  %v6919_v18 = vsub.s32 %v6815_v10, %v1373_v17  ;;  %v4634_v12 = vmin.u32 %v1064_v19, %v6874_v55  ;;  %v10802_v10 = vld [vmem:[#allocation14_spill] sm:$0xff] }
 0x1fb   :  { %v6923_v1 = vmul.u32.u64.low %v6910_v6, %v1249_v24  ;;  %v6924_v63 = vmul.u32.u64.high %v6910_v6, %v1249_v24, %v6923_v1  ;;  %v1530_v38 = vsel %vm1529_vm14, %v1528_v54, 0  ;;  %v883_v46 = vadd.s32 3, %v879_v13  ;;  %v10804_v19 = vld [vmem:[#allocation10_spill] sm:$0xff] }
 0x1fc   :  { %v10799_v29 = vand.u32 2147483647, %v10798_v25  ;;  %v6934_v16 = vmul.u32.u64.low %v6910_v6, %v1253_v56  ;;  %v6935_v58 = vmul.u32.u64.high %v6910_v6, %v1253_v56, %v6934_v16  ;;  %v6939_v15 = vadd.f32 %v5863_v60, %v10802_v10 }
 0x1fd   :  { %v685_v50 = vsel %vm674_vm7, nan, %v684_v52  ;;  %v1176_v59 = vshrl.u32 %v1158_v43, %v1174_v9  ;;  %v1180_v54 = vshll.u32 %v1179_v30, 23  ;;  %v1188_v40 = vsub.s32 4, %v6634_v22 }
 0x1fe   :  { %vm6929_vm15 = vcmp.le.f32.partialorder %v10799_v29, 0.7853982  ;;  %10803 = vst [vmem:[#allocation17_spill] sm:$0xff] %v6939_v15  ;;  %v996_v17 = vsel %vm989_vm12, %v992_v49, %v995_v51  ;;  %vm1104_vm0 = vcmp.lt.s32.totalorder %v10798_v25, 0  ;;  %v1376_v0 = vsub.s32 0, %v6919_v18 }
 0x1ff   :  { %v1532_v62 = vand.u32 31, %v1530_v38  ;;  %v3709_v13 = vmul.f32 %v10804_v19, %v6807_v41  ;;  %v1175_v24 = vshll.u32 %v6698_v21, %v6864_v26  ;;  %v1066_v53 = vclz %v4634_v12 }
 0x200   :  { %v1243_v52 = vsel %vm1241_vm6, %v1231_v23, 2102212464  ;;  %v3708_v9 = vmul.f32 %v10804_v19, %v685_v50  ;;  %v6955_v30 = vand.u32 3, %v883_v46  ;;  %v1222_v44 = vshrl.u32 %v10751_v35, %v6790_v8  ;;  %v5534_v49 = vpop.eup %5533  ;;  %v10807_v50 = vld [vmem:[#allocation6_spill] sm:$0xff] }
 0x201   :  { %v1417_v56 = vand.u32 2139095040, %v6939_v15  ;;  %v997_v41 = vsel %vm986_vm13, nan, %v996_v17  ;;  %v1177_v51 = vor.u32 %v1176_v59, %v1175_v24  ;;  %v1181_v43 = vor.u32 4788187, %v1180_v54  ;;  %v10809_v54 = vld [vmem:[#allocation22_spill] sm:$0xff] }
 0x202   :  { %v1189_v21 = vsel %vm1104_vm0, %v1188_v40, %v6634_v22  ;;  %v5536_v23 = vpop.eup %5535  ;;  %v4646_v26 = vmin.u32 %v1376_v0, %v6919_v18  ;;  %v1242_v12 = vsel %vm1238_vm10, %v1222_v44, %v6855_v42  ;;  %v1244_v8 = vsel %vm1240_vm11, %v6857_v61, %v1243_v52 }
 0x203   :  { %v6972_v46 = vsub.s32 32, %v1532_v62  ;;  %v6975_v29 = vadd.f32 %v3709_v13, %v10805_v39  ;;  %v4635_v16 = vadd.s32 4294967294, %v1066_v53  ;;  %v6979_v22 = vmul.f32 %v10807_v50, %v5936_v11 }
 0x204   :  { %v1264_v59 = vadd.s32 1, %v6924_v63  ;;  %v6983_v40 = vadd.f32 %v3708_v9, %v10809_v54  ;;  %v6986_v42 = vmul.f32 %v10804_v19, %v997_v41  ;;  %vm1263_vm1 = vc.u32 %v6935_v58, %v6923_v1 }
 0x205   :  { %10806 = vst [vmem:[#allocation14_spill] sm:$0xff] %v6975_v29  ;;  %10808 = vst [vmem:[#allocation21_spill] sm:$0xff] %v6979_v22  ;;  %v1418_v61 = vshrl.u32 %v1417_v56, 23  ;;  %vm886_vm2 = vcmp.eq.s32.totalorder %v6955_v30, 0  ;;  %v887_v17 = vxor.u32 2147483648, %v5536_v23  ;;  %vm889_vm3 = vcmp.eq.s32.totalorder %v6955_v30, 2 }
 0x206   :  { %10810 = vst [vmem:[#allocation6_spill] sm:$0xff] %v6983_v40  ;;  %v890_v0 = vxor.u32 2147483648, %v5534_v49  ;;  %v1191_v13 = vsel %vm6929_vm15, 0, %v1189_v21  ;;  %v1245_v24 = vsel %vm1239_vm8, %v1242_v12, %v1244_v8  ;;  %v1182_v53 = vand.u32 2147483647, %v1181_v43  ;;  %v7013_v8 = vpop.f32.mrb[18].mxu0 }
 0x207   :  { %v1184_v52 = vcvt.s32.f32 %v1177_v51  ;;  %v1378_v9 = vclz %v4646_v26  ;;  %v1545_v44 = vshrl.u32 %v10752_v27, %v6972_v46  ;;  %vm4636_vm4 = vcmp.lt.s32.totalorder %v4635_v16, 0  ;;  %10811 = vst [vmem:[#allocation22_spill] sm:$0xff] %v7013_v8  ;;  %v10812_v29 = vld [vmem:[#allocation16_spill] sm:$0xff] }
 0x208   :  { %v1265_v56 = vsel %vm1263_vm1, %v1264_v59, %v6924_v63  ;;  %v1548_v39 = vshrl.u32 %v10753_v47, %v6972_v46  ;;  %v1261_v50 = vmul.u32 %v6910_v6, %v1245_v24  ;;  %v7003_v21 = vshrl.u32 %v1530_v38, 5 }
 0x209   :  { %v1544_v45 = vshll.u32 %v10754_v4, %v1532_v62  ;;  %v4649_v43 = vadd.s32 4294967169, %v1418_v61  ;;  %v1536_v51 = vshrl.u32 %v10794_v33, %v6972_v46  ;;  %v1539_v26 = vshrl.u32 %v10795_v37, %v6972_v46 }
 0x20a   :  { %v1542_v63 = vshrl.u32 %v10754_v4, %v6972_v46  ;;  %v1547_v12 = vshll.u32 %v10752_v27, %v1532_v62  ;;  %v4647_v59 = vadd.s32 4294967294, %v1378_v9  ;;  %v7015_v6 = vadd.s32 %v1265_v56, %v1261_v50 }
 0x20b   :  { %v1535_v38 = vshll.u32 %v10751_v35, %v1532_v62  ;;  %v1546_v54 = vor.u32 %v1545_v44, %v1544_v45  ;;  %v1538_v61 = vshll.u32 %v10794_v33, %v1532_v62  ;;  %v1541_v24 = vshll.u32 %v10795_v37, %v1532_v62 }
 0x20c   :  { %v1549_v41 = vor.u32 %v1548_v39, %v1547_v12  ;;  %v7022_v40 = vadd.f32 %v10812_v29, %v5863_v60  ;;  %v1185_v22 = vmul.f32 %v1184_v52, %v1182_v53  ;;  %v1195_v32 = vadd.s32 3, %v1191_v13 }
 0x20d   :  { %v10814_v5 = vand.u32 2147483647, %v6785_v7  ;;  %v1424_v9 = vadd.s32 1, %v4649_v43  ;;  %v7026_v56 = vor.u32 %v1536_v51, %v1535_v38  ;;  %v7028_v50 = vor.u32 %v1539_v26, %v1538_v61 }
 0x20e   :  { %10813 = vst [vmem:[#allocation30_spill] sm:$0xff] %v7022_v40  ;;  %v1543_v44 = vor.u32 %v1542_v63, %v1541_v24  ;;  %vm1553_vm5 = vcmp.lt.s32.totalorder %v7003_v21, 4  ;;  %v888_v62 = vsel %vm886_vm2, %v5534_v49, %v887_v17  ;;  %v891_v39 = vsel %vm889_vm3, %v890_v0, %v5536_v23 }
 0x20f   :  { %v1525_v8 = vand.u32 8388607, %v10814_v5  ;;  %v7036_v53 = vsel %vm4636_vm4, 0, %v4635_v16  ;;  %v1559_v5 = vsel %vm1553_vm5, %v1546_v54, 920167782  ;;  %vm882_vm6 = vweird.f32 %v6135_v2 }
 0x210   :  { %vm4648_vm7 = vcmp.lt.s32.totalorder %v4647_v59, 0  ;;  %v1267_v13 = vadd.s32 536870912, %v7015_v6  ;;  %v1563_v52 = vsel %vm1553_vm5, %v1549_v41, 1326507024  ;;  %v1729_v45 = vand.u32 2139095040, %v7022_v40 }
 0x211   :  { %v1186_v49 = vxor.u32 2147483648, %v1185_v22  ;;  %vm1550_vm10 = vcmp.lt.s32.totalorder %v7003_v21, 1  ;;  %vm1552_vm11 = vcmp.lt.s32.totalorder %v7003_v21, 3  ;;  %vm1425_vm12 = vcmp.gt.s32.totalorder %v1424_v9, 0 }
 0x212   :  { %v1074_v23 = vsub.s32 4294967266, %v7036_v53  ;;  %v1526_v16 = vor.u32 8388608, %v1525_v8  ;;  %v1558_v17 = vsel %vm1550_vm10, %v7026_v56, %v7028_v50  ;;  %v1560_v0 = vsel %vm1552_vm11, %v1543_v44, %v1559_v5  ;;  %v10815_v8 = vld [vmem:[#allocation25_spill] sm:$0xff] }
 0x213   :  { %vm885_vm8 = vcmp.lt.s32.totalorder %v6955_v30, 2  ;;  %v7055_v41 = vsel %vm4648_vm7, 0, %v4647_v59  ;;  %v1562_v43 = vsel %vm1550_vm10, %v7028_v50, %v1543_v44  ;;  %v1564_v51 = vsel %vm1552_vm11, %v1546_v54, %v1563_v52  ;;  %v10817_v52 = vld [vmem:[#allocation8_spill] sm:$0xff] }
 0x214   :  { %v7062_v26 = vshrl.u32 %v1267_v13, 30  ;;  %vm1551_vm13 = vcmp.lt.s32.totalorder %v7003_v21, 2  ;;  %v1426_v63 = vsel %vm1425_vm12, %v1424_v9, 0  ;;  %v1730_v12 = vshrl.u32 %v1729_v45, 23 }
 0x215   :  { %v7067_v38 = vadd.f32 %v6986_v42, %v10815_v8  ;;  %v892_v30 = vsel %vm885_vm8, %v888_v62, %v891_v39  ;;  %v7069_v59 = vand.u32 3, %v1195_v32  ;;  %v1561_v61 = vsel %vm1551_vm13, %v1558_v17, %v1560_v0 }
 0x216   :  { %v1187_v24 = vsel %vm1104_vm0, %v1186_v49, %v1185_v22  ;;  %v1075_v54 = vadd.s32 127, %v1074_v23  ;;  %v1565_v5 = vsel %vm1551_vm13, %v1562_v43, %v1564_v51  ;;  %v7077_v13 = vshll.u32 %v1526_v16, 8 }
 0x217   :  { %10816 = vst [vmem:[#allocation25_spill] sm:$0xff] %v7067_v38  ;;  %v1386_v9 = vsub.s32 4294967266, %v7055_v41  ;;  %v7082_v42 = vmul.f32 %v5936_v11, %v10817_v52  ;;  %v7086_v32 = vmul.f32 %v10787_v48, %v5936_v11  ;;  %v1428_v62 = vand.u32 31, %v1426_v63 }
 0x218   :  { %v1269_v39 = vshll.u32 %v7062_v26, 30  ;;  %v7090_v22 = vmul.u32.u64.low %v7077_v13, %v1561_v61  ;;  %v7091_v45 = vmul.u32.u64.high %v7077_v13, %v1561_v61, %v7090_v22  ;;  %v4661_v49 = vadd.s32 4294967169, %v1730_v12 }
 0x219   :  { %10818 = vst [vmem:[#allocation8_spill] sm:$0xff] %v7082_v42  ;;  %10819 = vst [vmem:[#allocation31_spill] sm:$0xff] %v7086_v32  ;;  %v893_v23 = vsel %vm882_vm6, nan, %v892_v30  ;;  %v1190_v16 = vsel %vm6929_vm15, %v10798_v25, %v1187_v24  ;;  %v7100_v17 = vmul.u32.u64.low %v7077_v13, %v1565_v5  ;;  %v7101_v48 = vmul.u32.u64.high %v7077_v13, %v1565_v5, %v7100_v17 }
 0x21a   :  { %v1054_v0 = vadd.s32 %v6646_v3, %v6655_v34  ;;  %v1070_v43 = vsub.s32 32, %v7036_v53  ;;  %v1076_v51 = vshll.u32 %v1075_v54, 23  ;;  %v1555_v12 = vsel %vm1553_vm5, %v1543_v44, 2102212464 }
 0x21b   :  { %v1382_v2 = vsub.s32 32, %v7055_v41  ;;  %v1387_v8 = vadd.s32 127, %v1386_v9  ;;  %v1534_v14 = vshrl.u32 %v10751_v35, %v6972_v46  ;;  %v7111_v30 = vsub.s32 32, %v1428_v62 }
 0x21c   :  { %v7114_v61 = vmul.f32 %v10804_v19, %v893_v23  ;;  %5537 = vcosq.f32 %v1190_v16  ;;  %v7117_v3 = vsub.s32 %v7015_v6, %v1269_v39  ;;  %v1736_v34 = vadd.s32 1, %v4661_v49 }
 0x21d   :  { %5539 = vsinq.f32 %v1190_v16  ;;  %v1366_v44 = vadd.s32 %v6715_v28, %v6723_v36  ;;  %v1554_v24 = vsel %vm1550_vm10, %v1534_v14, %v7026_v56  ;;  %v1556_v46 = vsel %vm1552_vm11, %v7028_v50, %v1555_v12  ;;  %v10821_v12 = vld [vmem:[#allocation18_spill] sm:$0xff] }
 0x21e   :  { %v1071_v54 = vshll.u32 %v6874_v55, %v7036_v53  ;;  %v1072_v5 = vshrl.u32 %v1054_v0, %v1070_v43  ;;  %v1077_v9 = vor.u32 4788187, %v1076_v51  ;;  %v1383_v6 = vshll.u32 %v6919_v18, %v7055_v41  ;;  %v7145_v41 = vpop.f32.mrb[19].mxu0 }
 0x21f   :  { %v1384_v52 = vshrl.u32 %v1366_v44, %v1382_v2  ;;  %v1388_v39 = vshll.u32 %v1387_v8, 23  ;;  %v10670_v28 = vand.u32 2147483647, %v6939_v15  ;;  %v1441_v36 = vshrl.u32 %v10752_v27, %v7111_v30  ;;  %10820 = vst [vmem:[#allocation32_spill] sm:$0xff] %v7145_v41 }
 0x220   :  { %v1272_v56 = vsub.s32 0, %v7117_v3  ;;  %v1557_v50 = vsel %vm1551_vm13, %v1554_v24, %v1556_v46  ;;  %v1576_v49 = vadd.s32 1, %v7091_v45  ;;  %vm1737_vm14 = vcmp.gt.s32.totalorder %v1736_v34, 0 }
 0x221   :  { %vm1575_vm15 = vc.u32 %v7101_v48, %v7090_v22  ;;  %v1432_v55 = vshrl.u32 %v10794_v33, %v7111_v30  ;;  %v1440_v18 = vshll.u32 %v10754_v4, %v1428_v62  ;;  %v1444_v53 = vshrl.u32 %v10753_v47, %v7111_v30 }
 0x222   :  { %v7147_v23 = vshrl.u32 %v1426_v63, 5  ;;  %v1431_v21 = vshll.u32 %v10751_v35, %v1428_v62  ;;  %v1435_v16 = vshrl.u32 %v10795_v37, %v7111_v30  ;;  %v1438_v17 = vshrl.u32 %v10754_v4, %v7111_v30 }
 0x223   :  { %v1442_v0 = vor.u32 %v1441_v36, %v1440_v18  ;;  %v1443_v43 = vshll.u32 %v10752_v27, %v1428_v62  ;;  %v1738_v51 = vsel %vm1737_vm14, %v1736_v34, 0  ;;  %v7157_v2 = vadd.f32 %v5863_v60, %v10821_v12 }
 0x224   :  { %v4642_v8 = vmin.u32 %v1272_v56, %v7117_v3  ;;  %v1577_v63 = vsel %vm1575_vm15, %v1576_v49, %v7091_v45  ;;  %v1434_v14 = vshll.u32 %v10794_v33, %v1428_v62  ;;  %v1437_v44 = vshll.u32 %v10795_v37, %v1428_v62 }
 0x225   :  { %v1573_v24 = vmul.u32 %v7077_v13, %v1557_v50  ;;  %v1421_v46 = vand.u32 8388607, %v10670_v28  ;;  %v7166_v36 = vor.u32 %v1432_v55, %v1431_v21  ;;  %v1445_v34 = vor.u32 %v1444_v53, %v1443_v43 }
 0x226   :  { %v7168_v18 = vpop.eup %5537  ;;  %v7170_v38 = vor.u32 %v1435_v16, %v1434_v14  ;;  %v1439_v41 = vor.u32 %v1438_v17, %v1437_v44  ;;  %vm1449_vm0 = vcmp.lt.s32.totalorder %v7147_v23, 4  ;;  %v1740_v45 = vand.u32 31, %v1738_v51 }
 0x227   :  { %v7173_v56 = vpop.eup %5539  ;;  %v1073_v49 = vor.u32 %v1072_v5, %v1071_v54  ;;  %v7175_v62 = vadd.s32 %v1577_v63, %v1573_v24  ;;  %v1455_v13 = vsel %vm1449_vm0, %v1442_v0, 920167782  ;;  %v1625_v50 = vand.u32 2139095040, %v7157_v2 }
 0x228   :  { %v1078_v55 = vand.u32 2147483647, %v1077_v9  ;;  %v1385_v21 = vor.u32 %v1384_v52, %v1383_v6  ;;  %v1389_v16 = vor.u32 4788187, %v1388_v39  ;;  %v1274_v43 = vclz %v4642_v8 }
 0x229   :  { %vm1446_vm1 = vcmp.lt.s32.totalorder %v7147_v23, 1  ;;  %vm1448_vm2 = vcmp.lt.s32.totalorder %v7147_v23, 3  ;;  %v1459_v54 = vsel %vm1449_vm0, %v1445_v34, 1326507024  ;;  %v1422_v5 = vor.u32 8388608, %v1421_v46 }
 0x22a   :  { %v1454_v17 = vsel %vm1446_vm1, %v7166_v36, %v7170_v38  ;;  %v1456_v9 = vsel %vm1448_vm2, %v1439_v41, %v1455_v13  ;;  %v7191_v63 = vsub.s32 32, %v1740_v45  ;;  %v1080_v52 = vcvt.s32.f32 %v1073_v49 }
 0x22b   :  { %v1579_v39 = vadd.s32 536870912, %v7175_v62  ;;  %v1626_v8 = vshrl.u32 %v1625_v50, 23  ;;  %vm1447_vm3 = vcmp.lt.s32.totalorder %v7147_v23, 2  ;;  %v1458_v44 = vsel %vm1446_vm1, %v7170_v38, %v1439_v41 }
 0x22c   :  { %v1460_v24 = vsel %vm1448_vm2, %v1442_v0, %v1459_v54  ;;  %v7202_v46 = vmul.f32 %v1080_v52, %v1078_v55  ;;  %v1390_v34 = vand.u32 2147483647, %v1389_v16  ;;  %v1392_v13 = vcvt.s32.f32 %v1385_v21 }
 0x22d   :  { %v1457_v49 = vsel %vm1447_vm3, %v1454_v17, %v1456_v9  ;;  %v4643_v28 = vadd.s32 4294967294, %v1274_v43  ;;  %v7206_v50 = vshll.u32 %v1422_v5, 8  ;;  %v1753_v14 = vshrl.u32 %v10752_v27, %v7191_v63  ;;  %v10822_v17 = vld [vmem:[#allocation19_spill] sm:$0xff] }
 0x22e   :  { %v1756_v53 = vshrl.u32 %v10753_v47, %v7191_v63  ;;  %v7212_v6 = vshrl.u32 %v1579_v39, 30  ;;  %v1461_v0 = vsel %vm1447_vm3, %v1458_v44, %v1460_v24  ;;  %v4657_v21 = vadd.s32 4294967169, %v1626_v8 }
 0x22f   :  { %v7218_v16 = vmul.u32.u64.low %v7206_v50, %v1457_v49  ;;  %v7219_v54 = vmul.u32.u64.high %v7206_v50, %v1457_v49, %v7218_v16  ;;  %v1752_v43 = vshll.u32 %v10754_v4, %v1740_v45  ;;  %v1755_v5 = vshll.u32 %v10752_v27, %v1740_v45 }
 0x230   :  { %vm1201_vm4 = vcmp.eq.s32.totalorder %v7069_v59, 2  ;;  %vm1000_vm5 = vcmp.lt.s32.totalorder %v10822_v17, 0  ;;  %v7226_v9 = vshrl.u32 %v1738_v51, 5  ;;  %v1744_v52 = vshrl.u32 %v10794_v33, %v7191_v63 }
 0x231   :  { %v1747_v39 = vshrl.u32 %v10795_v37, %v7191_v63  ;;  %v1750_v8 = vshrl.u32 %v10754_v4, %v7191_v63  ;;  %v7235_v44 = vmul.u32.u64.low %v7206_v50, %v1461_v0  ;;  %v7236_v24 = vmul.u32.u64.high %v7206_v50, %v1461_v0, %v7235_v44 }
 0x232   :  { %v1754_v49 = vor.u32 %v1753_v14, %v1752_v43  ;;  %v1757_v55 = vor.u32 %v1756_v53, %v1755_v5  ;;  %v1743_v32 = vshll.u32 %v10751_v35, %v1740_v45  ;;  %v1746_v51 = vshll.u32 %v10794_v33, %v1740_v45 }
 0x233   :  { %v1749_v42 = vshll.u32 %v10795_v37, %v1740_v45  ;;  %v1632_v15 = vadd.s32 1, %v4657_v21  ;;  %vm1198_vm6 = vcmp.eq.s32.totalorder %v7069_v59, 0  ;;  %vm4644_vm7 = vcmp.lt.s32.totalorder %v4643_v28, 0 }
 0x234   :  { %v1430_v12 = vshrl.u32 %v10751_v35, %v7111_v30  ;;  %v1451_v29 = vsel %vm1449_vm0, %v1439_v41, 2102212464  ;;  %v10823_v0 = vand.u32 2147483647, %v7022_v40  ;;  %v10824_v53 = vand.u32 2147483647, %v10822_v17 }
 0x235   :  { %v7254_v45 = vor.u32 %v1744_v52, %v1743_v32  ;;  %v7256_v21 = vor.u32 %v1747_v39, %v1746_v51  ;;  %v7258_v5 = vor.u32 %v1750_v8, %v1749_v42  ;;  %vm1761_vm11 = vcmp.lt.s32.totalorder %v7226_v9, 4 }
 0x236   :  { %v1733_v14 = vand.u32 8388607, %v10823_v0  ;;  %vm7250_vm10 = vcmp.le.f32.partialorder %v10824_v53, 0.7853982  ;;  %v1082_v30 = vxor.u32 2147483648, %v7202_v46  ;;  %v1393_v41 = vmul.f32 %v1392_v13, %v1390_v34  ;;  %v10827_v53 = vld [vmem:[#allocation24_spill] sm:$0xff] }
 0x237   :  { %v1767_v44 = vsel %vm1761_vm11, %v1754_v49, 920167782  ;;  %v1771_v0 = vsel %vm1761_vm11, %v1757_v55, 1326507024  ;;  %vm1197_vm12 = vcmp.lt.s32.totalorder %v7069_v59, 2  ;;  %vm1312_vm8 = vcmp.lt.s32.totalorder %v10827_v53, 0 }
 0x238   :  { %v7269_v32 = vsel %vm4644_vm7, 0, %v4643_v28  ;;  %v1581_v42 = vshll.u32 %v7212_v6, 30  ;;  %v1450_v52 = vsel %vm1446_vm1, %v1430_v12, %v7166_v36  ;;  %vm1633_vm13 = vcmp.gt.s32.totalorder %v1632_v15, 0 }
 0x239   :  { %v1452_v34 = vsel %vm1448_vm2, %v7170_v38, %v1451_v29  ;;  %v1734_v13 = vor.u32 8388608, %v1733_v14  ;;  %vm1758_vm14 = vcmp.lt.s32.totalorder %v7226_v9, 1  ;;  %vm1760_vm15 = vcmp.lt.s32.totalorder %v7226_v9, 3 }
 0x23a   :  { %v1766_v28 = vsel %vm1758_vm14, %v7254_v45, %v7256_v21  ;;  %v1768_v55 = vsel %vm1760_vm15, %v7258_v5, %v1767_v44  ;;  %v1770_v12 = vsel %vm1758_vm14, %v7256_v21, %v7258_v5  ;;  %v1772_v29 = vsel %vm1760_vm15, %v1754_v49, %v1771_v0 }
 0x23b   :  { %vm1194_vm0 = vweird.f32 %v10798_v25  ;;  %v10828_v38 = vxor.u32 2147483648, %v7168_v18  ;;  %v10829_v39 = vsub.s32 4, %v6813_v31  ;;  %v10830_v51 = vand.u32 2147483647, %v10827_v53 }
 0x23c   :  { %v1472_v49 = vadd.s32 1, %v7219_v54  ;;  %v1634_v44 = vsel %vm1633_vm13, %v1632_v15, 0  ;;  %v1083_v0 = vsel %vm1000_vm5, %v1082_v30, %v7202_v46  ;;  %vm1471_vm2 = vc.u32 %v7236_v24, %v7218_v16 }
 0x23d   :  { %v1203_v36 = vsel %vm1201_vm4, %v10828_v38, %v7173_v56  ;;  %v1085_v8 = vsel %vm1000_vm5, %v10829_v39, %v6813_v31  ;;  %vm7306_vm1 = vcmp.le.f32.partialorder %v10830_v51, 0.7853982  ;;  %v1453_v38 = vsel %vm1447_vm3, %v1450_v52, %v1452_v34  ;;  %v7334_v34 = vpop.f32.mrb[20].mxu0 }
 0x23e   :  { %vm1759_vm4 = vcmp.lt.s32.totalorder %v7226_v9, 2  ;;  %v1394_v31 = vxor.u32 2147483648, %v1393_v41  ;;  %v1282_v39 = vsub.s32 4294967266, %v7269_v32  ;;  %v10833_v40 = vxor.u32 2147483648, %v7173_v56  ;;  %10834 = vst [vmem:[#allocation19_spill] sm:$0xff] %v7334_v34 }
 0x23f   :  { %v1769_v51 = vsel %vm1759_vm4, %v1766_v28, %v1768_v55  ;;  %v1773_v15 = vsel %vm1759_vm4, %v1770_v12, %v1772_v29  ;;  %v7330_v46 = vsub.s32 %v7175_v62, %v1581_v42  ;;  %v7332_v30 = vshll.u32 %v1734_v13, 8 }
 0x240   :  { %v1200_v23 = vsel %vm1198_vm6, %v7168_v18, %v10833_v40  ;;  %v1636_v52 = vand.u32 31, %v1634_v44  ;;  %v1086_v28 = vsel %vm7250_vm10, %v10822_v17, %v1083_v0  ;;  %v1087_v55 = vsel %vm7250_vm10, 0, %v1085_v8  ;;  %v10835_v0 = vld [vmem:[#allocation23_spill] sm:$0xff] }
 0x241   :  { %v1469_v56 = vmul.u32 %v7206_v50, %v1453_v38  ;;  %v1473_v12 = vsel %vm1471_vm2, %v1472_v49, %v7219_v54  ;;  %v7344_v40 = vmul.u32.u64.low %v7332_v30, %v1773_v15  ;;  %v7345_v18 = vmul.u32.u64.high %v7332_v30, %v1773_v15, %v7344_v40 }
 0x242   :  { %v7348_v62 = vmul.u32.u64.low %v7332_v30, %v1769_v51  ;;  %v7349_v42 = vmul.u32.u64.high %v7332_v30, %v1769_v51, %v7348_v62  ;;  %v1204_v13 = vsel %vm1197_vm12, %v1200_v23, %v1203_v36  ;;  %v1395_v43 = vsel %vm1312_vm8, %v1394_v31, %v1393_v41  ;;  %v10836_v51 = vld [vmem:[#allocation26_spill] sm:$0xff] }
 0x243   :  { %v1278_v29 = vsub.s32 32, %v7269_v32  ;;  %v1283_v50 = vadd.s32 127, %v1282_v39  ;;  %v1584_v54 = vsub.s32 0, %v7330_v46  ;;  %v7358_v8 = vadd.s32 %v1473_v12, %v1469_v56 }
 0x244   :  { %v7360_v49 = vsub.s32 32, %v1636_v52  ;;  %v7364_v38 = vadd.f32 %v10835_v0, %v5863_v60  ;;  %v7368_v59 = vadd.f32 %v7114_v61, %v10836_v51  ;;  %5541 = vcosq.f32 %v1086_v28 }
 0x245   :  { %v7370_v36 = vadd.s32 3, %v1087_v55  ;;  %v1262_v41 = vadd.s32 %v6923_v1, %v6935_v58  ;;  %v7376_v31 = vsel %vm1194_vm0, nan, %v1204_v13  ;;  %5543 = vsinq.f32 %v1086_v28 }
 0x246   :  { %10837 = vst [vmem:[#allocation24_spill] sm:$0xff] %v7368_v59  ;;  %v7381_v39 = vsel %vm7306_vm1, %v10827_v53, %v1395_v43  ;;  %v1763_v61 = vsel %vm1761_vm11, %v7258_v5, 2102212464  ;;  %v1279_v15 = vshll.u32 %v7117_v3, %v7269_v32  ;;  %v1284_v55 = vshll.u32 %v1283_v50, 23 }
 0x247   :  { %v1280_v23 = vshrl.u32 %v1262_v41, %v1278_v29  ;;  %v1742_v1 = vshrl.u32 %v10751_v35, %v7191_v63  ;;  %v4654_v25 = vmin.u32 %v1584_v54, %v7330_v46  ;;  %v1475_v58 = vadd.s32 536870912, %v7358_v8 }
 0x248   :  { %v1649_v28 = vshrl.u32 %v10752_v27, %v7360_v49  ;;  %v1937_v56 = vand.u32 2139095040, %v7364_v38  ;;  %v1764_v3 = vsel %vm1760_vm15, %v7256_v21, %v1763_v61  ;;  %v1652_v63 = vshrl.u32 %v10753_v47, %v7360_v49 }
 0x249   :  { %v1762_v5 = vsel %vm1758_vm14, %v1742_v1, %v7254_v45  ;;  %vm1783_vm3 = vc.u32 %v7345_v18, %v7348_v62  ;;  %v1784_v12 = vadd.s32 1, %v7349_v42  ;;  %v7407_v40 = vshrl.u32 %v1634_v44, 5 }
 0x24a   :  { %v1648_v13 = vshll.u32 %v10754_v4, %v1636_v52  ;;  %v1640_v45 = vshrl.u32 %v10794_v33, %v7360_v49  ;;  %v1643_v21 = vshrl.u32 %v10795_v37, %v7360_v49  ;;  %v1646_v43 = vshrl.u32 %v10754_v4, %v7360_v49 }
 0x24b   :  { %v1651_v29 = vshll.u32 %v10752_v27, %v1636_v52  ;;  %v1586_v50 = vclz %v4654_v25  ;;  %v1765_v54 = vsel %vm1759_vm4, %v1762_v5, %v1764_v3  ;;  %v1938_v44 = vshrl.u32 %v1937_v56, 23 }
 0x24c   :  { %v1650_v51 = vor.u32 %v1649_v28, %v1648_v13  ;;  %v1639_v41 = vshll.u32 %v10751_v35, %v1636_v52  ;;  %v1642_v61 = vshll.u32 %v10794_v33, %v1636_v52  ;;  %v1645_v1 = vshll.u32 %v10795_v37, %v1636_v52 }
 0x24d   :  { %v1653_v32 = vor.u32 %v1652_v63, %v1651_v29  ;;  %v1285_v59 = vor.u32 4788187, %v1284_v55  ;;  %v7422_v34 = vshrl.u32 %v1475_v58, 30  ;;  %v1785_v25 = vsel %vm1783_vm3, %v1784_v12, %v7349_v42 }
 0x24e   :  { %v10838_v9 = vand.u32 2147483647, %v7157_v2  ;;  %v7430_v28 = vpop.eup %5541  ;;  %v7432_v56 = vor.u32 %v1640_v45, %v1639_v41  ;;  %v7434_v3 = vor.u32 %v1643_v21, %v1642_v61  ;;  %v1647_v13 = vor.u32 %v1646_v43, %v1645_v1 }
 0x24f   :  { %vm1657_vm5 = vcmp.lt.s32.totalorder %v7407_v40, 4  ;;  %v5544_v52 = vpop.eup %5543  ;;  %v1281_v55 = vor.u32 %v1280_v23, %v1279_v15  ;;  %v1781_v58 = vmul.u32 %v7332_v30, %v1765_v54  ;;  %v4669_v42 = vadd.s32 4294967169, %v1938_v44 }
 0x250   :  { %v1629_v5 = vand.u32 8388607, %v10838_v9  ;;  %v1663_v63 = vsel %vm1657_vm5, %v1650_v51, 920167782  ;;  %v1396_v12 = vsub.s32 4, %v6866_v20  ;;  %5545 = vcosq.f32 %v7381_v39 }
 0x251   :  { %v4655_v29 = vadd.s32 4294967294, %v1586_v50  ;;  %v1667_v45 = vsel %vm1657_vm5, %v1653_v32, 1326507024  ;;  %v1286_v21 = vand.u32 2147483647, %v1285_v59  ;;  %v7444_v43 = vadd.s32 %v1785_v25, %v1781_v58  ;;  %v7485_v58 = vpop.f32.mrb[21].mxu0 }
 0x252   :  { %vm1654_vm6 = vcmp.lt.s32.totalorder %v7407_v40, 1  ;;  %vm1656_vm7 = vcmp.lt.s32.totalorder %v7407_v40, 3  ;;  %v1477_v30 = vshll.u32 %v7422_v34, 30  ;;  %v1630_v15 = vor.u32 8388608, %v1629_v5  ;;  %10842 = vst [vmem:[#allocation23_spill] sm:$0xff] %v7485_v58  ;;  %v10844_v58 = vld [vmem:[#allocation12_spill] sm:$0xff] }
 0x253   :  { %v1662_v23 = vsel %vm1654_vm6, %v7432_v56, %v7434_v3  ;;  %v1664_v50 = vsel %vm1656_vm7, %v1647_v13, %v1663_v63  ;;  %vm1208_vm10 = vcmp.lt.s32.totalorder %v6585_v57, 0  ;;  %v1288_v59 = vcvt.s32.f32 %v1281_v55 }
 0x254   :  { %v1666_v32 = vsel %vm1654_vm6, %v7434_v3, %v1647_v13  ;;  %v1668_v54 = vsel %vm1656_vm7, %v1650_v51, %v1667_v45  ;;  %v1944_v44 = vadd.s32 1, %v4669_v42  ;;  %v1092_v41 = vand.u32 3, %v7370_v36 }
 0x255   :  { %v1397_v61 = vsel %vm1312_vm8, %v1396_v12, %v6866_v20  ;;  %vm4656_vm11 = vcmp.lt.s32.totalorder %v4655_v29, 0  ;;  %vm1655_vm12 = vcmp.lt.s32.totalorder %v7407_v40, 2  ;;  %v3713_v1 = vmul.f32 %v10804_v19, %v7376_v31 }
 0x256   :  { %v1289_v25 = vmul.f32 %v1288_v59, %v1286_v21  ;;  %v1787_v9 = vadd.s32 536870912, %v7444_v43  ;;  %v1665_v5 = vsel %vm1655_vm12, %v1662_v23, %v1664_v50  ;;  %5547 = vsinq.f32 %v7381_v39 }
 0x257   :  { %v10839_v36 = vand.u32 2147483647, %v6585_v57  ;;  %v7479_v20 = vsub.s32 %v7358_v8, %v1477_v30  ;;  %v1669_v31 = vsel %vm1655_vm12, %v1666_v32, %v1668_v54  ;;  %v7483_v55 = vshll.u32 %v1630_v15, 8 }
 0x258   :  { %v1098_v63 = vxor.u32 2147483648, %v7430_v28  ;;  %v1399_v39 = vsel %vm7306_vm1, 0, %v1397_v61  ;;  %v7490_v42 = vsel %vm4656_vm11, 0, %v4655_v29  ;;  %vm1945_vm8 = vcmp.gt.s32.totalorder %v1944_v44, 0 }
 0x259   :  { %vm7474_vm13 = vcmp.le.f32.partialorder %v10839_v36, 0.7853982  ;;  %v1095_v12 = vxor.u32 2147483648, %v5544_v52  ;;  %v1292_v45 = vsub.s32 4, %v7062_v26  ;;  %v1290_v30 = vxor.u32 2147483648, %v1289_v25 }
 0x25a   :  { %v7494_v8 = vmul.u32.u64.low %v7483_v55, %v1665_v5  ;;  %v7495_v21 = vmul.u32.u64.high %v7483_v55, %v1665_v5, %v7494_v8  ;;  %v7498_v15 = vshrl.u32 %v1787_v9, 30  ;;  %v7504_v14 = vpop.eup %5545  ;;  %vm1090_vm14 = vweird.f32 %v10822_v17 }
 0x25b   :  { %v7501_v23 = vmul.u32.u64.low %v7483_v55, %v1669_v31  ;;  %v7502_v50 = vmul.u32.u64.high %v7483_v55, %v1669_v31, %v7501_v23  ;;  %v1403_v29 = vadd.s32 3, %v1399_v39  ;;  %v1594_v59 = vsub.s32 4294967266, %v7490_v42 }
 0x25c   :  { %v1480_v32 = vsub.s32 0, %v7479_v20  ;;  %v1946_v54 = vsel %vm1945_vm8, %v1944_v44, 0  ;;  %vm1093_vm15 = vcmp.lt.s32.totalorder %v1092_v41, 2  ;;  %vm1094_vm0 = vcmp.eq.s32.totalorder %v1092_v41, 0 }
 0x25d   :  { %vm1097_vm1 = vcmp.eq.s32.totalorder %v1092_v41, 2  ;;  %v7511_v61 = vmul.f32 %v5936_v11, %v10802_v10  ;;  %v1096_v9 = vsel %vm1094_vm0, %v7430_v28, %v1095_v12  ;;  %v1293_v36 = vsel %vm1208_vm10, %v1292_v45, %v7062_v26 }
 0x25e   :  { %v1099_v5 = vsel %vm1097_vm1, %v1098_v63, %v5544_v52  ;;  %v1659_v31 = vsel %vm1657_vm5, %v1647_v13, 2102212464  ;;  %v1291_v44 = vsel %vm1208_vm10, %v1290_v30, %v1289_v25  ;;  %v1789_v39 = vshll.u32 %v7498_v15, 30 }
 0x25f   :  { %10843 = vst [vmem:[#allocation26_spill] sm:$0xff] %v7511_v61  ;;  %v1638_v23 = vshrl.u32 %v10751_v35, %v7360_v49  ;;  %v1948_v10 = vand.u32 31, %v1946_v54  ;;  %v7525_v61 = vadd.f32 %v3713_v1, %v10844_v58  ;;  %v7527_v28 = vand.u32 3, %v1403_v29 }
 0x260   :  { %v1595_v52 = vadd.s32 127, %v1594_v59  ;;  %v4650_v26 = vmin.u32 %v1480_v32, %v7479_v20  ;;  %v1100_v63 = vsel %vm1093_vm15, %v1096_v9, %v1099_v5  ;;  %v1295_v13 = vsel %vm7474_vm13, 0, %v1293_v36  ;;  %v7539_v1 = vpop.eup %5547 }
 0x261   :  { %10845 = vst [vmem:[#allocation12_spill] sm:$0xff] %v7525_v61  ;;  %v1658_v25 = vsel %vm1654_vm6, %v1638_v23, %v7432_v56  ;;  %v1660_v49 = vsel %vm1656_vm7, %v7434_v3, %v1659_v31  ;;  %v1410_v58 = vxor.u32 2147483648, %v7504_v14  ;;  %v1294_v41 = vsel %vm7474_vm13, %v6585_v57, %v1291_v44  ;;  %v10846_v3 = vld [vmem:[#allocation27_spill] sm:$0xff] }
 0x262   :  { %v1590_v12 = vsub.s32 32, %v7490_v42  ;;  %v1680_v45 = vadd.s32 1, %v7495_v21  ;;  %v7548_v30 = vsub.s32 %v7444_v43, %v1789_v39  ;;  %vm1679_vm2 = vc.u32 %v7502_v50, %v7494_v8 }
 0x263   :  { %v7552_v56 = vsub.s32 32, %v1948_v10  ;;  %v7556_v29 = vadd.f32 %v5863_v60, %v10846_v3  ;;  %v1574_v51 = vadd.s32 %v7090_v22, %v7101_v48  ;;  %v1596_v59 = vshll.u32 %v1595_v52, 23 }
 0x264   :  { %v1482_v32 = vclz %v4650_v26  ;;  %v1661_v9 = vsel %vm1655_vm12, %v1658_v25, %v1660_v49  ;;  %v7564_v43 = vsel %vm1090_vm14, nan, %v1100_v63  ;;  %v1407_v5 = vxor.u32 2147483648, %v7539_v1 }
 0x265   :  { %10847 = vst [vmem:[#allocation27_spill] sm:$0xff] %v7556_v29  ;;  %vm1409_vm4 = vcmp.eq.s32.totalorder %v7527_v28, 2  ;;  %v7568_v36 = vadd.s32 3, %v1295_v13  ;;  %5549 = vcosq.f32 %v1294_v41  ;;  %v1592_v22 = vshrl.u32 %v1574_v51, %v1590_v12 }
 0x266   :  { %v7571_v31 = vsel %vm1409_vm4, %v1410_v58, %v7539_v1  ;;  %v1681_v48 = vsel %vm1679_vm2, %v1680_v45, %v7495_v21  ;;  %vm1406_vm3 = vcmp.eq.s32.totalorder %v7527_v28, 0  ;;  %v1792_v40 = vsub.s32 0, %v7548_v30 }
 0x267   :  { %v1677_v17 = vmul.u32 %v7483_v55, %v1661_v9  ;;  %v1961_v44 = vshrl.u32 %v10752_v27, %v7552_v56  ;;  %v1833_v39 = vand.u32 2139095040, %v7556_v29  ;;  %v1591_v23 = vshll.u32 %v7330_v46, %v7490_v42 }
 0x268   :  { %v1597_v52 = vor.u32 4788187, %v1596_v59  ;;  %v4651_v26 = vadd.s32 4294967294, %v1482_v32  ;;  %v1964_v63 = vshrl.u32 %v10753_v47, %v7552_v56  ;;  %v10677_v13 = vand.u32 2147483647, %v7364_v38 }
 0x269   :  { %v7584_v21 = vadd.s32 %v1681_v48, %v1677_v17  ;;  %v7587_v25 = vshrl.u32 %v1946_v54, 5  ;;  %v1960_v55 = vshll.u32 %v10754_v4, %v1948_v10  ;;  %v1952_v49 = vshrl.u32 %v10794_v33, %v7552_v56 }
 0x26a   :  { %v1955_v1 = vshrl.u32 %v10795_v37, %v7552_v56  ;;  %v1958_v46 = vshrl.u32 %v10754_v4, %v7552_v56  ;;  %v1963_v42 = vshll.u32 %v10752_v27, %v1948_v10  ;;  %vm1520_vm5 = vcmp.lt.s32.totalorder %v6785_v7, 0 }
 0x26b   :  { %v1593_v58 = vor.u32 %v1592_v22, %v1591_v23  ;;  %v4662_v12 = vmin.u32 %v1792_v40, %v7548_v30  ;;  %v1962_v54 = vor.u32 %v1961_v44, %v1960_v55  ;;  %v1834_v45 = vshrl.u32 %v1833_v39, 23 }
 0x26c   :  { %v1951_v51 = vshll.u32 %v10751_v35, %v1948_v10  ;;  %v1954_v59 = vshll.u32 %v10794_v33, %v1948_v10  ;;  %v1957_v32 = vshll.u32 %v10795_v37, %v1948_v10  ;;  %v1965_v9 = vor.u32 %v1964_v63, %v1963_v42 }
 0x26d   :  { %v1598_v48 = vand.u32 2147483647, %v1597_v52  ;;  %vm4652_vm6 = vcmp.lt.s32.totalorder %v4651_v26, 0  ;;  %v1683_v17 = vadd.s32 536870912, %v7584_v21  ;;  %v1941_v61 = vand.u32 8388607, %v10677_v13 }
 0x26e   :  { %v10848_v22 = vand.u32 2147483647, %v6785_v7  ;;  %v7611_v44 = vor.u32 %v1952_v49, %v1951_v51  ;;  %v7613_v39 = vor.u32 %v1955_v1, %v1954_v59  ;;  %v1959_v23 = vor.u32 %v1958_v46, %v1957_v32 }
 0x26f   :  { %vm1969_vm10 = vcmp.lt.s32.totalorder %v7587_v25, 4  ;;  %v1600_v10 = vcvt.s32.f32 %v1593_v58  ;;  %v1794_v52 = vclz %v4662_v12  ;;  %v4665_v55 = vadd.s32 4294967169, %v1834_v45  ;;  %v7618_v42 = vpop.eup %5549 }
 0x270   :  { %vm7607_vm7 = vcmp.le.f32.partialorder %v10848_v22, 0.7853982  ;;  %v1975_v63 = vsel %vm1969_vm10, %v1962_v54, 920167782  ;;  %vm1402_vm11 = vweird.f32 %v10827_v53  ;;  %v1408_v49 = vsel %vm1406_vm3, %v7504_v14, %v1407_v5 }
 0x271   :  { %5551 = vsinq.f32 %v1294_v41  ;;  %v1604_v1 = vsub.s32 4, %v7212_v6  ;;  %v1979_v46 = vsel %vm1969_vm10, %v1965_v9, 1326507024  ;;  %v1601_v58 = vmul.f32 %v1600_v10, %v1598_v48  ;;  %v7651_v48 = vpop.f32.mrb[22].mxu0 }
 0x272   :  { %v7628_v12 = vsel %vm4652_vm6, 0, %v4651_v26  ;;  %vm1966_vm12 = vcmp.lt.s32.totalorder %v7587_v25, 1  ;;  %vm1968_vm13 = vcmp.lt.s32.totalorder %v7587_v25, 3  ;;  %v7632_v45 = vshrl.u32 %v1683_v17, 30  ;;  %10851 = vst [vmem:[#allocation33_spill] sm:$0xff] %v7651_v48 }
 0x273   :  { %v1942_v51 = vor.u32 8388608, %v1941_v61  ;;  %v1974_v14 = vsel %vm1966_vm12, %v7611_v44, %v7613_v39  ;;  %v1976_v41 = vsel %vm1968_vm13, %v1959_v23, %v1975_v63  ;;  %v4663_v5 = vadd.s32 4294967294, %v1794_v52 }
 0x274   :  { %v1978_v26 = vsel %vm1966_vm12, %v7613_v39, %v1959_v23  ;;  %v1980_v59 = vsel %vm1968_vm13, %v1962_v54, %v1979_v46  ;;  %v1840_v32 = vadd.s32 1, %v4665_v55  ;;  %vm1405_vm8 = vcmp.lt.s32.totalorder %v7527_v28, 2  ;;  %v10852_v54 = vld [vmem:[#allocation16_spill] sm:$0xff] }
 0x275   :  { %v1605_v61 = vsel %vm1520_vm5, %v1604_v1, %v7212_v6  ;;  %v1490_v9 = vsub.s32 4294967266, %v7628_v12  ;;  %vm1967_vm14 = vcmp.lt.s32.totalorder %v7587_v25, 2  ;;  %v3712_v17 = vmul.f32 %v10804_v19, %v7564_v43 }
 0x276   :  { %v7656_v22 = vand.u32 3, %v7568_v36  ;;  %v7660_v10 = vmul.f32 %v10852_v54, %v5936_v11  ;;  %v1977_v28 = vsel %vm1967_vm14, %v1974_v14, %v1976_v41  ;;  %v1412_v6 = vsel %vm1405_vm8, %v1408_v49, %v7571_v31  ;;  %v10854_v31 = vld [vmem:[#allocation5_spill] sm:$0xff] }
 0x277   :  { %v1685_v52 = vshll.u32 %v7632_v45, 30  ;;  %v1981_v63 = vsel %vm1967_vm14, %v1978_v26, %v1980_v59  ;;  %v7668_v55 = vshll.u32 %v1942_v51, 8  ;;  %v1602_v43 = vxor.u32 2147483648, %v1601_v58 }
 0x278   :  { %10853 = vst [vmem:[#allocation16_spill] sm:$0xff] %v7660_v10  ;;  %v1607_v36 = vsel %vm7607_vm7, 0, %v1605_v61  ;;  %vm4664_vm15 = vcmp.lt.s32.totalorder %v4663_v5, 0  ;;  %vm1841_vm0 = vcmp.gt.s32.totalorder %v1840_v32, 0  ;;  %v1486_v1 = vsub.s32 32, %v7628_v12 }
 0x279   :  { %v1491_v46 = vadd.s32 127, %v1490_v9  ;;  %v7674_v14 = vmul.u32.u64.low %v7668_v55, %v1977_v28  ;;  %v7675_v41 = vmul.u32.u64.high %v7668_v55, %v1977_v28, %v7674_v14  ;;  %v7679_v49 = vadd.f32 %v3712_v17, %v10854_v31 }
 0x27a   :  { %v1413_v51 = vsel %vm1402_vm11, nan, %v1412_v6  ;;  %v7684_v26 = vmul.u32.u64.low %v7668_v55, %v1981_v63  ;;  %v7685_v59 = vmul.u32.u64.high %v7668_v55, %v1981_v63, %v7684_v26  ;;  %vm1302_vm1 = vcmp.eq.s32.totalorder %v7656_v22, 0  ;;  %v10856_v63 = vld [vmem:[#allocation18_spill] sm:$0xff] }
 0x27b   :  { %10855 = vst [vmem:[#allocation5_spill] sm:$0xff] %v7679_v49  ;;  %v5552_v61 = vpop.eup %5551  ;;  %v1470_v9 = vadd.s32 %v7218_v16, %v7236_v24  ;;  %v7690_v54 = vsel %vm4664_vm15, 0, %v4663_v5  ;;  %v7693_v28 = vsub.s32 %v7584_v21, %v1685_v52  ;;  %v1842_v17 = vsel %vm1841_vm0, %v1840_v32, 0  ;;  %v10858_v24 = vld [vmem:[#allocation13_spill] sm:$0xff] }
 0x27c   :  { %vm1305_vm2 = vcmp.eq.s32.totalorder %v7656_v22, 2  ;;  %v1603_v53 = vsel %vm1520_vm5, %v1602_v43, %v1601_v58  ;;  %v1611_v6 = vadd.s32 3, %v1607_v36  ;;  %v7700_v31 = vmul.f32 %v5936_v11, %v10856_v63 }
 0x27d   :  { %v1488_v26 = vshrl.u32 %v1470_v9, %v1486_v1  ;;  %v1492_v13 = vshll.u32 %v1491_v46, 23  ;;  %v1971_v16 = vsel %vm1969_vm10, %v1959_v23, 2102212464  ;;  %v7706_v21 = vadd.f32 %v10858_v24, %v5863_v60 }
 0x27e   :  { %10857 = vst [vmem:[#allocation18_spill] sm:$0xff] %v7700_v31  ;;  %v7709_v5 = vmul.f32 %v10804_v19, %v1413_v51  ;;  %v1802_v32 = vsub.s32 4294967266, %v7690_v54  ;;  %v1950_v58 = vshrl.u32 %v10751_v35, %v7552_v56  ;;  %v1844_v52 = vand.u32 31, %v1842_v17 }
 0x27f   :  { %v1306_v43 = vxor.u32 2147483648, %v7618_v42  ;;  %v1606_v36 = vsel %vm7607_vm7, %v6785_v7, %v1603_v53  ;;  %v1487_v23 = vshll.u32 %v7479_v20, %v7628_v12  ;;  %v1688_v1 = vsub.s32 0, %v7693_v28 }
 0x280   :  { %v1303_v46 = vxor.u32 2147483648, %v5552_v61  ;;  %v7721_v51 = vand.u32 3, %v1611_v6  ;;  %v1970_v9 = vsel %vm1966_vm12, %v1950_v58, %v7611_v44  ;;  %v1972_v56 = vsel %vm1968_vm13, %v7613_v39, %v1971_v16 }
 0x281   :  { %v1489_v63 = vor.u32 %v1488_v26, %v1487_v23  ;;  %v1493_v49 = vor.u32 4788187, %v1492_v13  ;;  %v1992_v40 = vadd.s32 1, %v7675_v41  ;;  %v2145_v53 = vand.u32 2139095040, %v7706_v21 }
 0x282   :  { %5553 = vcosq.f32 %v1606_v36  ;;  %v1803_v20 = vadd.s32 127, %v1802_v32  ;;  %vm1991_vm4 = vc.u32 %v7685_v59, %v7674_v14  ;;  %v7733_v12 = vsub.s32 32, %v1844_v52 }
 0x283   :  { %v1307_v44 = vsel %vm1305_vm2, %v1306_v43, %v5552_v61  ;;  %v1798_v6 = vsub.s32 32, %v7690_v54  ;;  %v4658_v39 = vmin.u32 %v1688_v1, %v7693_v28  ;;  %v1973_v13 = vsel %vm1967_vm14, %v1970_v9, %v1972_v56  ;;  %v10859_v61 = vld [vmem:[#allocation17_spill] sm:$0xff] }
 0x284   :  { %v1304_v26 = vsel %vm1302_vm1, %v7618_v42, %v1303_v46  ;;  %5555 = vsinq.f32 %v1606_v36  ;;  %v1500_v16 = vsub.s32 4, %v7422_v34  ;;  %v1782_v32 = vadd.s32 %v7348_v62, %v7345_v18 }
 0x285   :  { %vm1301_vm3 = vcmp.lt.s32.totalorder %v7656_v22, 2  ;;  %vm1416_vm5 = vcmp.lt.s32.totalorder %v10859_v61, 0  ;;  %v1494_v58 = vand.u32 2147483647, %v1493_v49  ;;  %v1496_v43 = vcvt.s32.f32 %v1489_v63 }
 0x286   :  { %v1993_v23 = vsel %vm1991_vm4, %v1992_v40, %v7675_v41  ;;  %v2146_v25 = vshrl.u32 %v2145_v53, 23  ;;  %v1799_v1 = vshll.u32 %v7548_v30, %v7690_v54  ;;  %v1804_v9 = vshll.u32 %v1803_v20, 23 }
 0x287   :  { %v1989_v42 = vmul.u32 %v7668_v55, %v1973_v13  ;;  %v1857_v36 = vshrl.u32 %v10752_v27, %v7733_v12  ;;  %v1800_v46 = vshrl.u32 %v1782_v32, %v1798_v6  ;;  %v1690_v18 = vclz %v4658_v39 }
 0x288   :  { %v1860_v49 = vshrl.u32 %v10753_v47, %v7733_v12  ;;  %v7760_v41 = vshrl.u32 %v1842_v17, 5  ;;  %v1848_v30 = vshrl.u32 %v10794_v33, %v7733_v12  ;;  %v1856_v54 = vshll.u32 %v10754_v4, %v1844_v52 }
 0x289   :  { %v7758_v56 = vadd.s32 %v1993_v23, %v1989_v42  ;;  %v1851_v55 = vshrl.u32 %v10795_v37, %v7733_v12  ;;  %v1854_v63 = vshrl.u32 %v10754_v4, %v7733_v12  ;;  %v1859_v40 = vshll.u32 %v10752_v27, %v1844_v52 }
 0x28a   :  { %v4677_v53 = vadd.s32 4294967169, %v2146_v25  ;;  %v1497_v20 = vmul.f32 %v1496_v43, %v1494_v58  ;;  %v1805_v6 = vor.u32 4788187, %v1804_v9  ;;  %v1847_v39 = vshll.u32 %v10751_v35, %v1844_v52 }
 0x28b   :  { %v1858_v17 = vor.u32 %v1857_v36, %v1856_v54  ;;  %v1801_v13 = vor.u32 %v1800_v46, %v1799_v1  ;;  %v1850_v32 = vshll.u32 %v10794_v33, %v1844_v52  ;;  %v1853_v23 = vshll.u32 %v10795_v37, %v1844_v52  ;;  %v7785_v36 = vpop.f32.mrb[23].mxu0 }
 0x28c   :  { %v1861_v42 = vor.u32 %v1860_v49, %v1859_v40  ;;  %v5554_v62 = vpop.eup %5553  ;;  %vm1298_vm6 = vweird.f32 %v6585_v57  ;;  %v10860_v31 = vand.u32 2147483647, %v10859_v61  ;;  %v4659_v58 = vadd.s32 4294967294, %v1690_v18  ;;  %10864 = vst [vmem:[#allocation13_spill] sm:$0xff] %v7785_v36 }
 0x28d   :  { %v1995_v43 = vadd.s32 536870912, %v7758_v56  ;;  %v10863_v25 = vand.u32 2147483647, %v7556_v29  ;;  %v7783_v9 = vor.u32 %v1848_v30, %v1847_v39  ;;  %v7787_v52 = vor.u32 %v1851_v55, %v1850_v32 }
 0x28e   :  { %vm7776_vm7 = vcmp.le.f32.partialorder %v10860_v31, 0.7853982  ;;  %v1855_v46 = vor.u32 %v1854_v63, %v1853_v23  ;;  %vm1865_vm10 = vcmp.lt.s32.totalorder %v7760_v41, 4  ;;  %v2152_v49 = vadd.s32 1, %v4677_v53  ;;  %v5556_v31 = vpop.eup %5555 }
 0x28f   :  { %v1837_v1 = vand.u32 8388607, %v10863_v25  ;;  %v1308_v54 = vsel %vm1301_vm3, %v1304_v26, %v1307_v44  ;;  %v1501_v18 = vsel %vm1416_vm5, %v1500_v16, %v7422_v34  ;;  %v1806_v40 = vand.u32 2147483647, %v1805_v6 }
 0x290   :  { %v1871_v30 = vsel %vm1865_vm10, %v1858_v17, 920167782  ;;  %v1618_v39 = vxor.u32 2147483648, %v5554_v62  ;;  %v1498_v25 = vxor.u32 2147483648, %v1497_v20  ;;  %v1808_v55 = vcvt.s32.f32 %v1801_v13 }
 0x291   :  { %v1875_v63 = vsel %vm1865_vm10, %v1861_v42, 1326507024  ;;  %vm1613_vm11 = vcmp.lt.s32.totalorder %v7721_v51, 2  ;;  %vm4660_vm12 = vcmp.lt.s32.totalorder %v4659_v58, 0  ;;  %v7800_v53 = vshrl.u32 %v1995_v43, 30 }
 0x292   :  { %vm1862_vm13 = vcmp.lt.s32.totalorder %v7760_v41, 1  ;;  %vm1864_vm8 = vcmp.lt.s32.totalorder %v7760_v41, 3  ;;  %v1838_v34 = vor.u32 8388608, %v1837_v1  ;;  %vm2153_vm14 = vcmp.gt.s32.totalorder %v2152_v49, 0 }
 0x293   :  { %v1870_v22 = vsel %vm1862_vm13, %v7783_v9, %v7787_v52  ;;  %v1872_v44 = vsel %vm1864_vm8, %v1855_v46, %v1871_v30  ;;  %v1615_v26 = vxor.u32 2147483648, %v5556_v31  ;;  %v1809_v16 = vmul.f32 %v1808_v55, %v1806_v40  ;;  %v10865_v30 = vld [vmem:[#allocation30_spill] sm:$0xff] }
 0x294   :  { %v1874_v6 = vsel %vm1862_vm13, %v7787_v52, %v1855_v46  ;;  %v1876_v13 = vsel %vm1864_vm8, %v1858_v17, %v1875_v63  ;;  %vm1610_vm15 = vweird.f32 %v6785_v7  ;;  %vm1614_vm0 = vcmp.eq.s32.totalorder %v7721_v51, 0 }
 0x295   :  { %vm1617_vm1 = vcmp.eq.s32.totalorder %v7721_v51, 2  ;;  %v1499_v32 = vsel %vm1416_vm5, %v1498_v25, %v1497_v20  ;;  %vm1863_vm2 = vcmp.lt.s32.totalorder %v7760_v41, 2  ;;  %v1693_v23 = vsel %vm4660_vm12, 0, %v4659_v58 }
 0x296   :  { %v1997_v42 = vshll.u32 %v7800_v53, 30  ;;  %v1873_v43 = vsel %vm1863_vm2, %v1870_v22, %v1872_v44  ;;  %v2154_v1 = vsel %vm2153_vm14, %v2152_v49, 0  ;;  %v1309_v17 = vsel %vm1298_vm6, nan, %v1308_v54 }
 0x297   :  { %v1503_v40 = vsel %vm7776_vm7, 0, %v1501_v18  ;;  %v10866_v55 = vand.u32 2147483647, %v10865_v30  ;;  %v1877_v58 = vsel %vm1863_vm2, %v1874_v6, %v1876_v13  ;;  %v7837_v25 = vshll.u32 %v1838_v34, 8 }
 0x298   :  { %v1616_v63 = vsel %vm1614_vm0, %v5554_v62, %v1615_v26  ;;  %v1619_v22 = vsel %vm1617_vm1, %v1618_v39, %v5556_v31  ;;  %v1502_v57 = vsel %vm7776_vm7, %v10859_v61, %v1499_v32  ;;  %v1810_v49 = vxor.u32 2147483648, %v1809_v16  ;;  %v10869_v31 = vld [vmem:[#allocation21_spill] sm:$0xff] }
 0x299   :  { %vm7831_vm4 = vcmp.le.f32.partialorder %v10866_v55, 0.7853982  ;;  %v1698_v54 = vsub.s32 4294967266, %v1693_v23  ;;  %v7843_v18 = vmul.u32.u64.low %v7837_v25, %v1873_v43  ;;  %v7844_v44 = vmul.u32.u64.high %v7837_v25, %v1873_v43, %v7843_v18 }
 0x29a   :  { %v2156_v55 = vand.u32 31, %v2154_v1  ;;  %v1507_v36 = vadd.s32 3, %v1503_v40  ;;  %v7848_v48 = vsub.s32 %v7758_v56, %v1997_v42  ;;  %v7856_v10 = vadd.f32 %v7709_v5, %v10869_v31 }
 0x29b   :  { %v7851_v34 = vmul.u32.u64.low %v7837_v25, %v1877_v58  ;;  %v7852_v62 = vmul.u32.u64.high %v7837_v25, %v1877_v58, %v7851_v34  ;;  %v1620_v39 = vsel %vm1613_vm11, %v1616_v63, %v1619_v22  ;;  %vm1728_vm3 = vcmp.lt.s32.totalorder %v10865_v30, 0  ;;  %v10872_v58 = vld [vmem:[#allocation29_spill] sm:$0xff] }
 0x29c   :  { %10870 = vst [vmem:[#allocation17_spill] sm:$0xff] %v7856_v10  ;;  %v1812_v26 = vsub.s32 4, %v7498_v15  ;;  %v7863_v6 = vmul.f32 %v10804_v19, %v1309_v17  ;;  %5557 = vcosq.f32 %v1502_v57  ;;  %v1811_v56 = vsel %vm1728_vm3, %v1810_v49, %v1809_v16 }
 0x29d   :  { %v7869_v13 = vmul.f32 %v10835_v0, %v5936_v11  ;;  %v1694_v5 = vsub.s32 32, %v1693_v23  ;;  %v1699_v32 = vadd.s32 127, %v1698_v54  ;;  %v1867_v51 = vsel %vm1865_vm10, %v1855_v46, 2102212464 }
 0x29e   :  { %v7873_v42 = vsub.s32 32, %v2156_v55  ;;  %v7877_v43 = vsel %vm1610_vm15, nan, %v1620_v39  ;;  %v7879_v17 = vand.u32 3, %v1507_v36  ;;  %v2000_v40 = vsub.s32 0, %v7848_v48 }
 0x29f   :  { %10871 = vst [vmem:[#allocation30_spill] sm:$0xff] %v7869_v13  ;;  %v1846_v16 = vshrl.u32 %v10751_v35, %v7733_v12  ;;  %5559 = vsinq.f32 %v1502_v57  ;;  %v7887_v0 = vsel %vm1728_vm3, %v1812_v26, %v7498_v15  ;;  %v1678_v46 = vadd.s32 %v7494_v8, %v7502_v50 }
 0x2a0   :  { %v7893_v7 = vadd.f32 %v5863_v60, %v10872_v58  ;;  %v1814_v36 = vsel %vm7831_vm4, %v10865_v30, %v1811_v56  ;;  %v1695_v63 = vshll.u32 %v7693_v28, %v1693_v23  ;;  %v1868_v15 = vsel %vm1864_vm8, %v7787_v52, %v1867_v51 }
 0x2a1   :  { %v1866_v12 = vsel %vm1862_vm13, %v1846_v16, %v7783_v9  ;;  %v1696_v22 = vshrl.u32 %v1678_v46, %v1694_v5  ;;  %v1700_v8 = vshll.u32 %v1699_v32, 23  ;;  %v1888_v50 = vadd.s32 1, %v7844_v44 }
 0x2a2   :  { %10873 = vst [vmem:[#allocation21_spill] sm:$0xff] %v7893_v7  ;;  %v2169_v57 = vshrl.u32 %v10752_v27, %v7873_v42  ;;  %v4670_v49 = vmin.u32 %v2000_v40, %v7848_v48  ;;  %vm1887_vm5 = vc.u32 %v7852_v62, %v7843_v18  ;;  %v2172_v9 = vshrl.u32 %v10753_v47, %v7873_v42 }
 0x2a3   :  { %v1869_v52 = vsel %vm1863_vm2, %v1866_v12, %v1868_v15  ;;  %v7916_v23 = vshrl.u32 %v2154_v1, 5  ;;  %v2168_v54 = vshll.u32 %v10754_v4, %v2156_v55  ;;  %v2041_v34 = vand.u32 2139095040, %v7893_v7 }
 0x2a4   :  { %v2160_v31 = vshrl.u32 %v10794_v33, %v7873_v42  ;;  %v2163_v39 = vshrl.u32 %v10795_v37, %v7873_v42  ;;  %v2166_v26 = vshrl.u32 %v10754_v4, %v7873_v42  ;;  %v2171_v56 = vshll.u32 %v10752_v27, %v2156_v55 }
 0x2a5   :  { %v1697_v5 = vor.u32 %v1696_v22, %v1695_v63  ;;  %v1701_v41 = vor.u32 4788187, %v1700_v8  ;;  %v1889_v1 = vsel %vm1887_vm5, %v1888_v50, %v7844_v44  ;;  %v2170_v32 = vor.u32 %v2169_v57, %v2168_v54 }
 0x2a6   :  { %v5558_v51 = vpop.eup %5557  ;;  %v2159_v40 = vshll.u32 %v10751_v35, %v2156_v55  ;;  %v2162_v16 = vshll.u32 %v10794_v33, %v2156_v55  ;;  %v2165_v46 = vshll.u32 %v10795_v37, %v2156_v55  ;;  %v2173_v12 = vor.u32 %v2172_v9, %v2171_v56  ;;  %v7948_v9 = vpop.f32.mrb[24].mxu0 }
 0x2a7   :  { %v2002_v15 = vclz %v4670_v49  ;;  %v1885_v28 = vmul.u32 %v7837_v25, %v1869_v52  ;;  %v10874_v10 = vand.u32 2147483647, %v7706_v21  ;;  %v2042_v29 = vshrl.u32 %v2041_v34, 23  ;;  %10875 = vst [vmem:[#allocation29_spill] sm:$0xff] %v7948_v9 }
 0x2a8   :  { %v7934_v63 = vor.u32 %v2160_v31, %v2159_v40  ;;  %v7936_v22 = vor.u32 %v2163_v39, %v2162_v16  ;;  %v2167_v44 = vor.u32 %v2166_v26, %v2165_v46  ;;  %vm2177_vm6 = vcmp.lt.s32.totalorder %v7916_v23, 4  ;;  %v10876_v40 = vld [vmem:[#allocation22_spill] sm:$0xff] }
 0x2a9   :  { %v2149_v13 = vand.u32 8388607, %v10874_v10  ;;  %v5560_v8 = vpop.eup %5559  ;;  %v1815_v55 = vsel %vm7831_vm4, 0, %v7887_v0  ;;  %5561 = vcosq.f32 %v1814_v36  ;;  %v7942_v50 = vadd.s32 %v1889_v1, %v1885_v28 }
 0x2aa   :  { %v2183_v25 = vsel %vm2177_vm6, %v2170_v32, 920167782  ;;  %v1514_v10 = vxor.u32 2147483648, %v5558_v51  ;;  %5563 = vsinq.f32 %v1814_v36  ;;  %v1702_v57 = vand.u32 2147483647, %v1701_v41 }
 0x2ab   :  { %v2187_v49 = vsel %vm2177_vm6, %v2173_v12, 1326507024  ;;  %vm1509_vm7 = vcmp.lt.s32.totalorder %v7879_v17, 2  ;;  %v1704_v52 = vcvt.s32.f32 %v1697_v5  ;;  %vm2174_vm10 = vcmp.lt.s32.totalorder %v7916_v23, 1 }
 0x2ac   :  { %vm2176_vm11 = vcmp.lt.s32.totalorder %v7916_v23, 3  ;;  %v4673_v20 = vadd.s32 4294967169, %v2042_v29  ;;  %vm1624_vm12 = vcmp.lt.s32.totalorder %v7157_v2, 0  ;;  %v4671_v0 = vadd.s32 4294967294, %v2002_v15 }
 0x2ad   :  { %v2150_v28 = vor.u32 8388608, %v2149_v13  ;;  %v2182_v36 = vsel %vm2174_vm10, %v7934_v63, %v7936_v22  ;;  %v2184_v54 = vsel %vm2176_vm11, %v2167_v44, %v2183_v25  ;;  %v1511_v34 = vxor.u32 2147483648, %v5560_v8 }
 0x2ae   :  { %v1891_v31 = vadd.s32 536870912, %v7942_v50  ;;  %v2186_v39 = vsel %vm2174_vm10, %v7936_v22, %v2167_v44  ;;  %v2188_v29 = vsel %vm2176_vm11, %v2170_v32, %v2187_v49  ;;  %vm1506_vm13 = vweird.f32 %v10859_v61 }
 0x2af   :  { %vm1510_vm8 = vcmp.eq.s32.totalorder %v7879_v17, 0  ;;  %v1819_v13 = vadd.s32 3, %v1815_v55  ;;  %v1705_v26 = vmul.f32 %v1704_v52, %v1702_v57  ;;  %vm2175_vm14 = vcmp.lt.s32.totalorder %v7916_v23, 2 }
 0x2b0   :  { %v3717_v56 = vmul.f32 %v10804_v19, %v7877_v43  ;;  %vm1513_vm15 = vcmp.eq.s32.totalorder %v7879_v17, 2  ;;  %v2185_v5 = vsel %vm2175_vm14, %v2182_v36, %v2184_v54  ;;  %v2048_v41 = vadd.s32 1, %v4673_v20 }
 0x2b1   :  { %vm4672_vm0 = vcmp.lt.s32.totalorder %v4671_v0, 0  ;;  %v2189_v1 = vsel %vm2175_vm14, %v2186_v39, %v2188_v29  ;;  %v7976_v32 = vshll.u32 %v2150_v28, 8  ;;  %v7980_v16 = vadd.f32 %v10876_v40, %v5863_v60  ;;  %v10883_v39 = vld [vmem:[#allocation31_spill] sm:$0xff] }
 0x2b2   :  { %v1512_v46 = vsel %vm1510_vm8, %v5558_v51, %v1511_v34  ;;  %v1515_v12 = vsel %vm1513_vm15, %v1514_v10, %v5560_v8  ;;  %v1708_v43 = vsub.s32 4, %v7632_v45  ;;  %v7983_v15 = vshrl.u32 %v1891_v31, 30  ;;  %v10878_v8 = vld [vmem:[#allocation8_spill] sm:$0xff] }
 0x2b3   :  { %10877 = vst [vmem:[#allocation34_spill] sm:$0xff] %v7980_v16  ;;  %v7985_v55 = vand.u32 3, %v1819_v13  ;;  %v1706_v25 = vxor.u32 2147483648, %v1705_v26  ;;  %v7988_v57 = vmul.u32.u64.low %v7976_v32, %v2185_v5  ;;  %v7989_v49 = vmul.u32.u64.high %v7976_v32, %v2185_v5, %v7988_v57  ;;  %v5562_v52 = vpop.eup %5561 }
 0x2b4   :  { %v7992_v20 = vsel %vm4672_vm0, 0, %v4671_v0  ;;  %v7995_v28 = vmul.u32.u64.low %v7976_v32, %v2189_v1  ;;  %v7996_v36 = vmul.u32.u64.high %v7976_v32, %v2189_v1, %v7995_v28  ;;  %vm2049_vm1 = vcmp.gt.s32.totalorder %v2048_v41, 0  ;;  %v5564_v51 = vpop.eup %5563 }
 0x2b5   :  { %v8000_v10 = vadd.f32 %v7863_v6, %v10878_v8  ;;  %v1516_v54 = vsel %vm1509_vm7, %v1512_v46, %v1515_v12  ;;  %v10880_v34 = vand.u32 2147483647, %v7157_v2  ;;  %v2353_v0 = vand.u32 2139095040, %v7980_v16 }
 0x2b6   :  { %v8012_v29 = vadd.f32 %v3717_v56, %v10883_v39  ;;  %v1709_v13 = vsel %vm1624_vm12, %v1708_v43, %v7632_v45  ;;  %v8019_v6 = vmul.f32 %v5936_v11, %v10846_v3  ;;  %v1893_v17 = vshll.u32 %v7983_v15, 30 }
 0x2b7   :  { %10879 = vst [vmem:[#allocation8_spill] sm:$0xff] %v8000_v10  ;;  %vm8006_vm2 = vcmp.le.f32.partialorder %v10880_v34, 0.7853982  ;;  %vm1822_vm4 = vcmp.eq.s32.totalorder %v7985_v55, 0  ;;  %vm1936_vm3 = vcmp.lt.s32.totalorder %v7364_v38, 0  ;;  %v2010_v5 = vsub.s32 4294967266, %v7992_v20 }
 0x2b8   :  { %10884 = vst [vmem:[#allocation31_spill] sm:$0xff] %v8012_v29  ;;  %10885 = vst [vmem:[#allocation35_spill] sm:$0xff] %v8019_v6  ;;  %v2179_v56 = vsel %vm2177_vm6, %v2167_v44, 2102212464  ;;  %v2050_v1 = vsel %vm2049_vm1, %v2048_v41, 0  ;;  %v1517_v46 = vsel %vm1506_vm13, nan, %v1516_v54  ;;  %v1707_v3 = vsel %vm1624_vm12, %v1706_v25, %v1705_v26 }
 0x2b9   :  { %vm1821_vm5 = vcmp.lt.s32.totalorder %v7985_v55, 2  ;;  %vm1825_vm7 = vcmp.eq.s32.totalorder %v7985_v55, 2  ;;  %v2158_v45 = vshrl.u32 %v10751_v35, %v7873_v42  ;;  %v1823_v12 = vxor.u32 2147483648, %v5564_v51 }
 0x2ba   :  { %v1826_v43 = vxor.u32 2147483648, %v5562_v52  ;;  %v1711_v28 = vsel %vm8006_vm2, 0, %v1709_v13  ;;  %v2354_v44 = vshrl.u32 %v2353_v0, 23  ;;  %v10886_v41 = vand.u32 2147483647, %v7364_v38 }
 0x2bb   :  { %v8044_v8 = vsub.s32 %v7942_v50, %v1893_v17  ;;  %v2178_v26 = vsel %vm2174_vm10, %v2158_v45, %v7934_v63  ;;  %v2180_v42 = vsel %vm2176_vm11, %v7936_v22, %v2179_v56  ;;  %v2052_v25 = vand.u32 31, %v2050_v1 }
 0x2bc   :  { %vm8039_vm6 = vcmp.le.f32.partialorder %v10886_v41, 0.7853982  ;;  %v1710_v54 = vsel %vm8006_vm2, %v7157_v2, %v1707_v3  ;;  %v2006_v34 = vsub.s32 32, %v7992_v20  ;;  %v2011_v0 = vadd.s32 127, %v2010_v5 }
 0x2bd   :  { %v2200_v39 = vadd.s32 1, %v7989_v49  ;;  %v3716_v50 = vmul.f32 %v10804_v19, %v1517_v46  ;;  %v1715_v13 = vadd.s32 3, %v1711_v28  ;;  %v2020_v17 = vsub.s32 4, %v7800_v53 }
 0x2be   :  { %vm2199_vm10 = vc.u32 %v7996_v36, %v7988_v57  ;;  %v1827_v63 = vsel %vm1825_vm7, %v1826_v43, %v5564_v51  ;;  %v1990_v22 = vadd.s32 %v7674_v14, %v7685_v59  ;;  %v2181_v31 = vsel %vm2175_vm14, %v2178_v26, %v2180_v42  ;;  %v10889_v14 = vld [vmem:[#allocation26_spill] sm:$0xff] }
 0x2bf   :  { %v4685_v5 = vadd.s32 4294967169, %v2354_v44  ;;  %v1824_v56 = vsel %vm1822_vm4, %v5562_v52, %v1823_v12  ;;  %5565 = vcosq.f32 %v1710_v54  ;;  %v1896_v46 = vsub.s32 0, %v8044_v8 }
 0x2c0   :  { %v8070_v3 = vsub.s32 32, %v2052_v25  ;;  %vm1818_vm11 = vweird.f32 %v10865_v30  ;;  %5567 = vsinq.f32 %v1710_v54  ;;  %v2008_v45 = vshrl.u32 %v1990_v22, %v2006_v34 }
 0x2c1   :  { %v2012_v51 = vshll.u32 %v2011_v0, 23  ;;  %v2201_v43 = vsel %vm2199_vm10, %v2200_v39, %v7989_v49  ;;  %v8075_v59 = vadd.f32 %v3716_v50, %v10889_v14  ;;  %v2021_v23 = vsel %vm1936_vm3, %v2020_v17, %v7800_v53 }
 0x2c2   :  { %v8082_v52 = vmul.f32 %v10858_v24, %v5936_v11  ;;  %v2197_v12 = vmul.u32 %v7976_v32, %v2181_v31  ;;  %v1828_v28 = vsel %vm1821_vm5, %v1824_v56, %v1827_v63  ;;  %v8087_v44 = vand.u32 3, %v1715_v13  ;;  %v10892_v24 = vld [vmem:[#allocation32_spill] sm:$0xff]  ;;  %v8100_v32 = vpop.f32.mrb[25].mxu0 }
 0x2c3   :  { %10890 = vst [vmem:[#allocation26_spill] sm:$0xff] %v8075_v59  ;;  %v2007_v49 = vshll.u32 %v7848_v48, %v7992_v20  ;;  %v2360_v41 = vadd.s32 1, %v4685_v5  ;;  %v4666_v26 = vmin.u32 %v1896_v46, %v8044_v8  ;;  %v2065_v53 = vshrl.u32 %v10752_v27, %v8070_v3  ;;  %10894 = vst [vmem:[#allocation38_spill] sm:$0xff] %v8100_v32 }
 0x2c4   :  { %10891 = vst [vmem:[#allocation36_spill] sm:$0xff] %v8082_v52  ;;  %v8092_v42 = vadd.s32 %v2201_v43, %v2197_v12  ;;  %v8098_v54 = vadd.f32 %v5863_v60, %v10892_v24  ;;  %v2013_v34 = vor.u32 4788187, %v2012_v51  ;;  %v2023_v0 = vsel %vm8039_vm6, 0, %v2021_v23 }
 0x2c5   :  { %v2009_v55 = vor.u32 %v2008_v45, %v2007_v49  ;;  %v2068_v48 = vshrl.u32 %v10753_v47, %v8070_v3  ;;  %v10682_v20 = vand.u32 2147483647, %v7893_v7  ;;  %v8107_v39 = vshrl.u32 %v2050_v1, 5 }
 0x2c6   :  { %10893 = vst [vmem:[#allocation37_spill] sm:$0xff] %v8098_v54  ;;  %v2056_v50 = vshrl.u32 %v10794_v33, %v8070_v3  ;;  %v2064_v13 = vshll.u32 %v10754_v4, %v2052_v25  ;;  %v2059_v17 = vshrl.u32 %v10795_v37, %v8070_v3  ;;  %v2062_v63 = vshrl.u32 %v10754_v4, %v8070_v3 }
 0x2c7   :  { %v2067_v22 = vshll.u32 %v10752_v27, %v2052_v25  ;;  %vm2361_vm12 = vcmp.gt.s32.totalorder %v2360_v41, 0  ;;  %v1898_v31 = vclz %v4666_v26  ;;  %v2203_v5 = vadd.s32 536870912, %v8092_v42 }
 0x2c8   :  { %v2066_v56 = vor.u32 %v2065_v53, %v2064_v13  ;;  %v2249_v1 = vand.u32 2139095040, %v8098_v54  ;;  %vm1721_vm13 = vcmp.eq.s32.totalorder %v8087_v44, 2  ;;  %v2055_v46 = vshll.u32 %v10751_v35, %v2052_v25 }
 0x2c9   :  { %v2058_v45 = vshll.u32 %v10794_v33, %v2052_v25  ;;  %v2061_v51 = vshll.u32 %v10795_v37, %v2052_v25  ;;  %v2069_v43 = vor.u32 %v2068_v48, %v2067_v22  ;;  %v5566_v14 = vpop.eup %5565  ;;  %v1829_v23 = vsel %vm1818_vm11, nan, %v1828_v28 }
 0x2ca   :  { %v2014_v12 = vand.u32 2147483647, %v2013_v34  ;;  %v2045_v49 = vand.u32 8388607, %v10682_v20  ;;  %v2362_v26 = vsel %vm2361_vm12, %v2360_v41, 0  ;;  %v5568_v53 = vpop.eup %5567  ;;  %vm1718_vm8 = vcmp.eq.s32.totalorder %v8087_v44, 0 }
 0x2cb   :  { %v8128_v13 = vor.u32 %v2056_v50, %v2055_v46  ;;  %v8130_v29 = vor.u32 %v2059_v17, %v2058_v45  ;;  %v2063_v59 = vor.u32 %v2062_v63, %v2061_v51  ;;  %vm2073_vm14 = vcmp.lt.s32.totalorder %v8107_v39, 4 }
 0x2cc   :  { %v2027_v25 = vadd.s32 3, %v2023_v0  ;;  %v4667_v48 = vadd.s32 4294967294, %v1898_v31  ;;  %v2079_v30 = vsel %vm2073_vm14, %v2066_v56, 920167782  ;;  %v2250_v28 = vshrl.u32 %v2249_v1, 23 }
 0x2cd   :  { %v2016_v34 = vcvt.s32.f32 %v2009_v55  ;;  %v8135_v22 = vshrl.u32 %v2203_v5, 30  ;;  %v2083_v41 = vsel %vm2073_vm14, %v2069_v43, 1326507024  ;;  %v2364_v20 = vand.u32 31, %v2362_v26 }
 0x2ce   :  { %v1719_v50 = vxor.u32 2147483648, %v5568_v53  ;;  %v1722_v46 = vxor.u32 2147483648, %v5566_v14  ;;  %vm2070_vm15 = vcmp.lt.s32.totalorder %v8107_v39, 1  ;;  %vm2072_vm0 = vcmp.lt.s32.totalorder %v8107_v39, 3 }
 0x2cf   :  { %v8141_v17 = vmul.f32 %v2016_v34, %v2014_v12  ;;  %v2046_v0 = vor.u32 8388608, %v2045_v49  ;;  %v2078_v55 = vsel %vm2070_vm15, %v8128_v13, %v8130_v29  ;;  %v2080_v63 = vsel %vm2072_vm0, %v2063_v59, %v2079_v30 }
 0x2d0   :  { %vm4668_vm1 = vcmp.lt.s32.totalorder %v4667_v48, 0  ;;  %v2082_v31 = vsel %vm2070_vm15, %v8130_v29, %v2063_v59  ;;  %v2084_v5 = vsel %vm2072_vm0, %v2066_v56, %v2083_v41  ;;  %v4681_v1 = vadd.s32 4294967169, %v2250_v28 }
 0x2d1   :  { %v2205_v45 = vshll.u32 %v8135_v22, 30  ;;  %v8157_v51 = vmul.f32 %v5936_v11, %v10872_v58  ;;  %vm2071_vm2 = vcmp.lt.s32.totalorder %v8107_v39, 2  ;;  %v8160_v43 = vsub.s32 32, %v2364_v20 }
 0x2d2   :  { %v8163_v12 = vmul.f32 %v10804_v19, %v1829_v23  ;;  %v8167_v49 = vsel %vm1721_vm13, %v1722_v46, %v5568_v53  ;;  %v8169_v30 = vand.u32 3, %v2027_v25  ;;  %v2081_v56 = vsel %vm2071_vm2, %v2078_v55, %v2080_v63 }
 0x2d3   :  { %10895 = vst [vmem:[#allocation39_spill] sm:$0xff] %v8157_v51  ;;  %v1886_v58 = vadd.s32 %v7843_v18, %v7852_v62  ;;  %v8175_v28 = vsel %vm4668_vm1, 0, %v4667_v48  ;;  %v2085_v34 = vsel %vm2071_vm2, %v2082_v31, %v2084_v5  ;;  %v8179_v41 = vshll.u32 %v2046_v0, 8 }
 0x2d4   :  { %v8183_v23 = vsel %vm1718_vm8, %v5566_v14, %v1719_v50  ;;  %v2018_v53 = vxor.u32 2147483648, %v8141_v17  ;;  %v2256_v46 = vadd.s32 1, %v4681_v1  ;;  %v8188_v55 = vsub.s32 %v8092_v42, %v2205_v45  ;;  %v10896_v1 = vld [vmem:[#allocation19_spill] sm:$0xff] }
 0x2d5   :  { %v8191_v18 = vmul.u32.u64.low %v8179_v41, %v2081_v56  ;;  %v8192_v62 = vmul.u32.u64.high %v8179_v41, %v2081_v56, %v8191_v18  ;;  %v2377_v48 = vshrl.u32 %v10752_v27, %v8160_v43  ;;  %v1902_v0 = vsub.s32 32, %v8175_v28 }
 0x2d6   :  { %v8199_v14 = vmul.u32.u64.low %v8179_v41, %v2085_v34  ;;  %v8200_v50 = vmul.u32.u64.high %v8179_v41, %v2085_v34, %v8199_v14  ;;  %v2380_v63 = vshrl.u32 %v10753_v47, %v8160_v43  ;;  %v8204_v31 = vshrl.u32 %v2362_v26, 5 }
 0x2d7   :  { %v2368_v42 = vshrl.u32 %v10794_v33, %v8160_v43  ;;  %v2376_v5 = vshll.u32 %v10754_v4, %v2364_v20  ;;  %v8211_v45 = vadd.f32 %v10896_v1, %v5863_v60  ;;  %v2371_v56 = vshrl.u32 %v10795_v37, %v8160_v43 }
 0x2d8   :  { %v2374_v34 = vshrl.u32 %v10754_v4, %v8160_v43  ;;  %v2379_v14 = vshll.u32 %v10752_v27, %v2364_v20  ;;  %vm2257_vm4 = vcmp.gt.s32.totalorder %v2256_v46, 0  ;;  %v1906_v26 = vsub.s32 4294967266, %v8175_v28 }
 0x2d9   :  { %10897 = vst [vmem:[#allocation40_spill] sm:$0xff] %v8211_v45  ;;  %v2208_v25 = vsub.s32 0, %v8188_v55  ;;  %v10898_v10 = vand.u32 2147483647, %v7980_v16  ;;  %v2378_v52 = vor.u32 %v2377_v48, %v2376_v5  ;;  %v2367_v32 = vshll.u32 %v10751_v35, %v2364_v20 }
 0x2da   :  { %v2370_v9 = vshll.u32 %v10794_v33, %v2364_v20  ;;  %v2373_v1 = vshll.u32 %v10795_v37, %v2364_v20  ;;  %v2381_v6 = vor.u32 %v2380_v63, %v2379_v14  ;;  %vm1717_vm5 = vcmp.lt.s32.totalorder %v8087_v44, 2 }
 0x2db   :  { %v2357_v51 = vand.u32 8388607, %v10898_v10  ;;  %v2054_v7 = vshrl.u32 %v10751_v35, %v8070_v3  ;;  %v2075_v24 = vsel %vm2073_vm14, %v2063_v59, 2102212464  ;;  %v2258_v40 = vsel %vm2257_vm4, %v2256_v46, 0 }
 0x2dc   :  { %v2561_v16 = vand.u32 2139095040, %v8211_v45  ;;  %v8231_v10 = vor.u32 %v2368_v42, %v2367_v32  ;;  %v8233_v48 = vor.u32 %v2371_v56, %v2370_v9  ;;  %v2375_v5 = vor.u32 %v2374_v34, %v2373_v1 }
 0x2dd   :  { %vm2385_vm7 = vcmp.lt.s32.totalorder %v8204_v31, 4  ;;  %v1904_v20 = vshrl.u32 %v1886_v58, %v1902_v0  ;;  %v1907_v63 = vadd.s32 127, %v1906_v26  ;;  %v4678_v14 = vmin.u32 %v2208_v25, %v8188_v55 }
 0x2de   :  { %v2391_v3 = vsel %vm2385_vm7, %v2378_v52, 920167782  ;;  %v2074_v59 = vsel %vm2070_vm15, %v2054_v7, %v8128_v13  ;;  %v2076_v32 = vsel %vm2072_vm0, %v8130_v29, %v2075_v24  ;;  %v2395_v9 = vsel %vm2385_vm7, %v2381_v6, 1326507024  ;;  %v8258_v6 = vpop.f32.mrb[26].mxu0 }
 0x2df   :  { %v2260_v46 = vand.u32 31, %v2258_v40  ;;  %v2096_v58 = vadd.s32 1, %v8192_v62  ;;  %vm2382_vm10 = vcmp.lt.s32.totalorder %v8204_v31, 1  ;;  %vm2384_vm11 = vcmp.lt.s32.totalorder %v8204_v31, 3  ;;  %10899 = vst [vmem:[#allocation41_spill] sm:$0xff] %v8258_v6 }
 0x2e0   :  { %v2562_v25 = vshrl.u32 %v2561_v16, 23  ;;  %vm2095_vm12 = vc.u32 %v8200_v50, %v8191_v18  ;;  %v2358_v0 = vor.u32 8388608, %v2357_v51  ;;  %v2390_v7 = vsel %vm2382_vm10, %v8231_v10, %v8233_v48 }
 0x2e1   :  { %v2392_v29 = vsel %vm2384_vm11, %v2375_v5, %v2391_v3  ;;  %v1908_v24 = vshll.u32 %v1907_v63, 23  ;;  %v2077_v13 = vsel %vm2071_vm2, %v2074_v59, %v2076_v32  ;;  %v2394_v16 = vsel %vm2382_vm10, %v8233_v48, %v2375_v5 }
 0x2e2   :  { %v2396_v51 = vsel %vm2384_vm11, %v2378_v52, %v2395_v9  ;;  %v2019_v42 = vsel %vm1936_vm3, %v2018_v53, %v8141_v17  ;;  %v1903_v1 = vshll.u32 %v8044_v8, %v8175_v28  ;;  %vm2383_vm13 = vcmp.lt.s32.totalorder %v8204_v31, 2 }
 0x2e3   :  { %v8273_v56 = vsub.s32 32, %v2260_v46  ;;  %v2210_v39 = vclz %v4678_v14  ;;  %v2097_v34 = vsel %vm2095_vm12, %v2096_v58, %v8192_v62  ;;  %v2393_v26 = vsel %vm2383_vm13, %v2390_v7, %v2392_v29 }
 0x2e4   :  { %v4693_v63 = vadd.s32 4294967169, %v2562_v25  ;;  %v8282_v52 = vsel %vm1717_vm5, %v8183_v23, %v8167_v49  ;;  %v2093_v17 = vmul.u32 %v8179_v41, %v2077_v13  ;;  %v2397_v8 = vsel %vm2383_vm13, %v2394_v16, %v2396_v51 }
 0x2e5   :  { %v8287_v28 = vshll.u32 %v2358_v0, 8  ;;  %v8292_v53 = vsel %vm8039_vm6, %v7364_v38, %v2019_v42  ;;  %v8294_v62 = vor.u32 %v1904_v20, %v1903_v1  ;;  %v1909_v14 = vor.u32 4788187, %v1908_v24  ;;  %v10901_v1 = vld [vmem:[#allocation27_spill] sm:$0xff] }
 0x2e6   :  { %v1916_v3 = vsub.s32 4, %v7983_v15  ;;  %v8297_v44 = vadd.s32 %v2097_v34, %v2093_v17  ;;  %v2273_v23 = vshrl.u32 %v10752_v27, %v8273_v56  ;;  %v4679_v59 = vadd.s32 4294967294, %v2210_v39 }
 0x2e7   :  { %v8300_v49 = vmul.u32.u64.low %v8287_v28, %v2393_v26  ;;  %v8301_v41 = vmul.u32.u64.high %v8287_v28, %v2393_v26, %v8300_v49  ;;  %v8307_v61 = vmul.u32.u64.low %v8287_v28, %v2397_v8  ;;  %v8308_v32 = vmul.u32.u64.high %v8287_v28, %v2397_v8, %v8307_v61 }
 0x2e8   :  { %v2568_v20 = vadd.s32 1, %v4693_v63  ;;  %v2387_v9 = vsel %vm2385_vm7, %v2375_v5, 2102212464  ;;  %v10689_v58 = vand.u32 2147483647, %v8098_v54  ;;  %v2272_v25 = vshll.u32 %v10754_v4, %v2260_v46 }
 0x2e9   :  { %10900 = vst [vmem:[#allocation42_spill] sm:$0xff] %v8300_v49  ;;  %v2276_v0 = vshrl.u32 %v10753_v47, %v8273_v56  ;;  %v8316_v7 = vshrl.u32 %v2258_v40, 5  ;;  %v2264_v29 = vshrl.u32 %v10794_v33, %v8273_v56  ;;  %v2267_v24 = vshrl.u32 %v10795_v37, %v8273_v56 }
 0x2ea   :  { %v2270_v13 = vshrl.u32 %v10754_v4, %v8273_v56  ;;  %v2099_v5 = vadd.s32 536870912, %v8297_v44  ;;  %v2366_v16 = vshrl.u32 %v10751_v35, %v8160_v43  ;;  %v2274_v51 = vor.u32 %v2273_v23, %v2272_v25 }
 0x2eb   :  { %v2275_v42 = vshll.u32 %v10752_v27, %v2260_v46  ;;  %vm1832_vm3 = vcmp.lt.s32.totalorder %v10901_v1, 0  ;;  %v2263_v40 = vshll.u32 %v10751_v35, %v2260_v46  ;;  %v2266_v39 = vshll.u32 %v10794_v33, %v2260_v46 }
 0x2ec   :  { %v2269_v34 = vshll.u32 %v10795_v37, %v2260_v46  ;;  %vm2569_vm6 = vcmp.gt.s32.totalorder %v2568_v20, 0  ;;  %vm1714_vm8 = vweird.f32 %v7157_v2  ;;  %v2386_v26 = vsel %vm2382_vm10, %v2366_v16, %v8231_v10 }
 0x2ed   :  { %v2388_v43 = vsel %vm2384_vm11, %v8233_v48, %v2387_v9  ;;  %v2253_v63 = vand.u32 8388607, %v10689_v58  ;;  %v2277_v17 = vor.u32 %v2276_v0, %v2275_v42  ;;  %v8341_v8 = vor.u32 %v2264_v29, %v2263_v40 }
 0x2ee   :  { %v8343_v23 = vor.u32 %v2267_v24, %v2266_v39  ;;  %v2271_v46 = vor.u32 %v2270_v13, %v2269_v34  ;;  %vm2281_vm14 = vcmp.lt.s32.totalorder %v8316_v7, 4  ;;  %v10902_v61 = vand.u32 2147483647, %v10901_v1 }
 0x2ef   :  { %v8352_v10 = vshrl.u32 %v2099_v5, 30  ;;  %v2408_v48 = vadd.s32 1, %v8301_v41  ;;  %v2287_v9 = vsel %vm2281_vm14, %v2274_v51, 920167782  ;;  %v2570_v0 = vsel %vm2569_vm6, %v2568_v20, 0  ;;  %v10906_v5 = vld [vmem:[#allocation23_spill] sm:$0xff] }
 0x2f0   :  { %vm8348_vm15 = vcmp.le.f32.partialorder %v10902_v61, 0.7853982  ;;  %v1910_v29 = vand.u32 2147483647, %v1909_v14  ;;  %vm4680_vm0 = vcmp.lt.s32.totalorder %v4679_v59, 0  ;;  %v2389_v24 = vsel %vm2383_vm13, %v2386_v26, %v2388_v43 }
 0x2f1   :  { %10905 = vst [vmem:[#allocation27_spill] sm:$0xff] %v8352_v10  ;;  %vm2407_vm1 = vc.u32 %v8308_v32, %v8300_v49  ;;  %vm2278_vm2 = vcmp.lt.s32.totalorder %v8316_v7, 1  ;;  %vm2280_vm4 = vcmp.lt.s32.totalorder %v8316_v7, 3  ;;  %v2291_v13 = vsel %vm2281_vm14, %v2277_v17, 1326507024 }
 0x2f2   :  { %v8367_v16 = vadd.f32 %v5863_v60, %v10906_v5  ;;  %v2254_v20 = vor.u32 8388608, %v2253_v63  ;;  %v2286_v31 = vsel %vm2278_vm2, %v8341_v8, %v8343_v23  ;;  %v2288_v14 = vsel %vm2280_vm4, %v2271_v46, %v2287_v9 }
 0x2f3   :  { %v2572_v42 = vand.u32 31, %v2570_v0  ;;  %v1912_v40 = vcvt.s32.f32 %v8294_v62  ;;  %v8376_v39 = vsel %vm4680_vm0, 0, %v4679_v59  ;;  %v2101_v34 = vshll.u32 %v8352_v10, 30 }
 0x2f4   :  { %10907 = vst [vmem:[#allocation43_spill] sm:$0xff] %v8367_v16  ;;  %v2409_v26 = vsel %vm2407_vm1, %v2408_v48, %v8301_v41  ;;  %v2405_v43 = vmul.u32 %v8287_v28, %v2389_v24  ;;  %vm2279_vm5 = vcmp.lt.s32.totalorder %v8316_v7, 2  ;;  %v2290_v63 = vsel %vm2278_vm2, %v8343_v23, %v2271_v46 }
 0x2f5   :  { %v2292_v17 = vsel %vm2280_vm4, %v2274_v51, %v2291_v13  ;;  %v8387_v61 = vmul.f32 %v1912_v40, %v1910_v29  ;;  %v8392_v62 = vsel %vm1832_vm3, %v1916_v3, %v7983_v15  ;;  %v2289_v41 = vsel %vm2279_vm5, %v2286_v31, %v2288_v14  ;;  %v8424_v13 = vpop.f32.mrb[27].mxu0 }
 0x2f6   :  { %v2457_v28 = vand.u32 2139095040, %v8367_v16  ;;  %v8400_v59 = vsel %vm1714_vm8, nan, %v8282_v52  ;;  %v8402_v48 = vadd.s32 %v2409_v26, %v2405_v43  ;;  %v8404_v51 = vshll.u32 %v2254_v20, 8  ;;  %10908 = vst [vmem:[#allocation44_spill] sm:$0xff] %v8424_v13 }
 0x2f7   :  { %v8406_v9 = vsub.s32 32, %v2572_v42  ;;  %5569 = vcosq.f32 %v8292_v53  ;;  %v2218_v15 = vsub.s32 4294967266, %v8376_v39  ;;  %v8411_v3 = vsub.s32 %v8297_v44, %v2101_v34 }
 0x2f8   :  { %v2293_v29 = vsel %vm2279_vm5, %v2290_v63, %v2292_v17  ;;  %5571 = vsinq.f32 %v8292_v53  ;;  %v8420_v52 = vmul.u32.u64.low %v8404_v51, %v2289_v41  ;;  %v8421_v24 = vmul.u32.u64.high %v8404_v51, %v2289_v41, %v8420_v52 }
 0x2f9   :  { %v2198_v44 = vadd.s32 %v7988_v57, %v7996_v36  ;;  %v2214_v31 = vsub.s32 32, %v8376_v39  ;;  %v2458_v14 = vshrl.u32 %v2457_v28, 23  ;;  %v2411_v53 = vadd.s32 536870912, %v8402_v48 }
 0x2fa   :  { %v8432_v40 = vmul.u32.u64.low %v8404_v51, %v2293_v29  ;;  %v8433_v34 = vmul.u32.u64.high %v8404_v51, %v2293_v29, %v8432_v40  ;;  %v2585_v26 = vshrl.u32 %v10752_v27, %v8406_v9  ;;  %v8437_v43 = vadd.s32 127, %v2218_v15 }
 0x2fb   :  { %v2104_v63 = vsub.s32 0, %v8411_v3  ;;  %v2588_v57 = vshrl.u32 %v10753_v47, %v8406_v9  ;;  %v2283_v36 = vsel %vm2281_vm14, %v2271_v46, 2102212464  ;;  %v8445_v41 = vshrl.u32 %v2570_v0, 5 }
 0x2fc   :  { %v2576_v28 = vshrl.u32 %v10794_v33, %v8406_v9  ;;  %v2584_v29 = vshll.u32 %v10754_v4, %v2572_v42  ;;  %v2579_v15 = vshrl.u32 %v10795_v37, %v8406_v9  ;;  %v2582_v40 = vshrl.u32 %v10754_v4, %v8406_v9 }
 0x2fd   :  { %v2587_v58 = vshll.u32 %v10752_v27, %v2572_v42  ;;  %v4689_v20 = vadd.s32 4294967169, %v2458_v14  ;;  %v8455_v2 = vshrl.u32 %v2411_v53, 30  ;;  %v2262_v46 = vshrl.u32 %v10751_v35, %v8273_v56 }
 0x2fe   :  { %v2575_v0 = vshll.u32 %v10751_v35, %v2572_v42  ;;  %v2586_v17 = vor.u32 %v2585_v26, %v2584_v29  ;;  %v10909_v13 = vand.u32 2147483647, %v8211_v45  ;;  %v2578_v5 = vshll.u32 %v10794_v33, %v2572_v42 }
 0x2ff   :  { %v2581_v54 = vshll.u32 %v10795_v37, %v2572_v42  ;;  %v2589_v10 = vor.u32 %v2588_v57, %v2587_v58  ;;  %v2282_v14 = vsel %vm2278_vm2, %v2262_v46, %v8341_v8  ;;  %v2284_v53 = vsel %vm2280_vm4, %v8343_v23, %v2283_v36 }
 0x300   :  { %v2565_v6 = vand.u32 8388607, %v10909_v13  ;;  %v2304_v56 = vadd.s32 1, %v8421_v24  ;;  %v8471_v49 = vor.u32 %v2576_v28, %v2575_v0  ;;  %v8475_v13 = vor.u32 %v2579_v15, %v2578_v5 }
 0x301   :  { %v8473_v26 = vpop.eup %5569  ;;  %v2583_v29 = vor.u32 %v2582_v40, %v2581_v54  ;;  %vm2593_vm7 = vcmp.lt.s32.totalorder %v8445_v41, 4  ;;  %v2464_v58 = vadd.s32 1, %v4689_v20  ;;  %v2216_v57 = vshrl.u32 %v2198_v44, %v2214_v31  ;;  %v10910_v20 = vld [vmem:[#allocation33_spill] sm:$0xff]  ;;  %v10911_v40 = vld [vmem:[#allocation16_spill] sm:$0xff] }
 0x302   :  { %v8478_v42 = vpop.eup %5571  ;;  %v2413_v8 = vshll.u32 %v8455_v2, 30  ;;  %vm2303_vm10 = vc.u32 %v8433_v34, %v8420_v52  ;;  %v2599_v23 = vsel %vm2593_vm7, %v2586_v17, 920167782  ;;  %v2220_v36 = vshll.u32 %v8437_v43, 23 }
 0x303   :  { %v2285_v5 = vsel %vm2279_vm5, %v2282_v14, %v2284_v53  ;;  %v2603_v54 = vsel %vm2593_vm7, %v2589_v10, 1326507024  ;;  %v8492_v28 = vadd.f32 %v10910_v20, %v5863_v60  ;;  %v4674_v44 = vmin.u32 %v2104_v63, %v8411_v3 }
 0x304   :  { %v2566_v31 = vor.u32 8388608, %v2565_v6  ;;  %vm2590_vm11 = vcmp.lt.s32.totalorder %v8445_v41, 1  ;;  %vm2592_vm12 = vcmp.lt.s32.totalorder %v8445_v41, 3  ;;  %v2305_v15 = vsel %vm2303_vm10, %v2304_v56, %v8421_v24 }
 0x305   :  { %v2598_v7 = vsel %vm2590_vm11, %v8471_v49, %v8475_v13  ;;  %v2600_v10 = vsel %vm2592_vm12, %v2583_v29, %v2599_v23  ;;  %vm2465_vm13 = vcmp.gt.s32.totalorder %v2464_v58, 0  ;;  %v8505_v43 = vsub.s32 %v8402_v48, %v2413_v8 }
 0x306   :  { %v2301_v6 = vmul.u32 %v8404_v51, %v2285_v5  ;;  %v2602_v63 = vsel %vm2590_vm11, %v8475_v13, %v2583_v29  ;;  %v2604_v24 = vsel %vm2592_vm12, %v2586_v17, %v2603_v54  ;;  %v8515_v46 = vadd.f32 %v8163_v12, %v10911_v40 }
 0x307   :  { %v2215_v0 = vshll.u32 %v8188_v55, %v8376_v39  ;;  %vm2591_vm6 = vcmp.lt.s32.totalorder %v8445_v41, 2  ;;  %v2769_v48 = vand.u32 2139095040, %v8492_v28  ;;  %vm2030_vm8 = vcmp.eq.s32.totalorder %v8169_v30, 0 }
 0x308   :  { %10912 = vst [vmem:[#allocation16_spill] sm:$0xff] %v8515_v46  ;;  %vm2033_vm14 = vcmp.eq.s32.totalorder %v8169_v30, 2  ;;  %vm2144_vm0 = vcmp.lt.s32.totalorder %v7706_v21, 0  ;;  %v2106_v51 = vclz %v4674_v44  ;;  %v8524_v14 = vadd.s32 %v2305_v15, %v2301_v6 }
 0x309   :  { %v2601_v12 = vsel %vm2591_vm6, %v2598_v7, %v2600_v10  ;;  %v2466_v17 = vsel %vm2465_vm13, %v2464_v58, 0  ;;  %v3718_v55 = vmul.f32 %v10804_v19, %v8400_v59  ;;  %v10913_v39 = vsel %vm8348_vm15, 0, %v8392_v62 }
 0x30a   :  { %v1923_v53 = vadd.s32 3, %v10913_v39  ;;  %v2605_v56 = vsel %vm2591_vm6, %v2602_v63, %v2604_v24  ;;  %v8536_v8 = vshll.u32 %v2566_v31, 8  ;;  %v10914_v23 = vxor.u32 2147483648, %v8387_v61  ;;  %v10917_v24 = vld [vmem:[#allocation22_spill] sm:$0xff] }
 0x30b   :  { %v2217_v58 = vor.u32 %v2216_v57, %v2215_v0  ;;  %v2221_v54 = vor.u32 4788187, %v2220_v36  ;;  %v2416_v59 = vsub.s32 0, %v8505_v43  ;;  %v2468_v62 = vand.u32 31, %v2466_v17  ;;  %v10919_v0 = vld [vmem:[#allocation18_spill] sm:$0xff] }
 0x30c   :  { %v1915_v5 = vsel %vm1832_vm3, %v10914_v23, %v8387_v61  ;;  %v8545_v44 = vmul.u32.u64.low %v8536_v8, %v2601_v12  ;;  %v8546_v15 = vmul.u32.u64.high %v8536_v8, %v2601_v12, %v8545_v44  ;;  %v2770_v7 = vshrl.u32 %v2769_v48, 23 }
 0x30d   :  { %v4675_v10 = vadd.s32 4294967294, %v2106_v51  ;;  %v2307_v31 = vadd.s32 536870912, %v8524_v14  ;;  %v8551_v6 = vmul.u32.u64.low %v8536_v8, %v2605_v56  ;;  %v8552_v63 = vmul.u32.u64.high %v8536_v8, %v2605_v56, %v8551_v6 }
 0x30e   :  { %10915 = vst [vmem:[#allocation45_spill] sm:$0xff] %v8545_v44  ;;  %v2031_v61 = vxor.u32 2147483648, %v8478_v42  ;;  %v2034_v57 = vxor.u32 2147483648, %v8473_v26  ;;  %v2228_v36 = vsub.s32 4, %v8135_v22  ;;  %v8559_v40 = vmul.f32 %v10917_v24, %v5936_v11 }
 0x30f   :  { %10916 = vst [vmem:[#allocation46_spill] sm:$0xff] %v8552_v63  ;;  %v8562_v12 = vadd.f32 %v3718_v55, %v10919_v0  ;;  %v8564_v48 = vand.u32 3, %v1923_v53  ;;  %v2222_v51 = vand.u32 2147483647, %v2221_v54  ;;  %v4701_v39 = vadd.s32 4294967169, %v2770_v7 }
 0x310   :  { %10918 = vst [vmem:[#allocation22_spill] sm:$0xff] %v8559_v40  ;;  %v8569_v56 = vsel %vm8348_vm15, %v10901_v1, %v1915_v5  ;;  %v4686_v23 = vmin.u32 %v2416_v59, %v8505_v43  ;;  %v2595_v6 = vsel %vm2593_vm7, %v2583_v29, 2102212464  ;;  %v8574_v46 = vsub.s32 32, %v2468_v62 }
 0x311   :  { %10920 = vst [vmem:[#allocation18_spill] sm:$0xff] %v8562_v12  ;;  %v2224_v24 = vcvt.s32.f32 %v2217_v58  ;;  %vm4676_vm3 = vcmp.lt.s32.totalorder %v4675_v10, 0  ;;  %v8576_v55 = vshrl.u32 %v2307_v31, 30  ;;  %v2574_v53 = vshrl.u32 %v10751_v35, %v8406_v9 }
 0x312   :  { %v2032_v25 = vsel %vm2030_vm8, %v8473_v26, %v2031_v61  ;;  %v2035_v5 = vsel %vm2033_vm14, %v2034_v57, %v8478_v42  ;;  %v8589_v29 = vsel %vm2144_vm0, %v2228_v36, %v8135_v22  ;;  %v2776_v58 = vadd.s32 1, %v4701_v39  ;;  %v8618_v36 = vpop.f32.mrb[28].mxu0 }
 0x313   :  { %10921 = vst [vmem:[#allocation47_spill] sm:$0xff] %v8576_v55  ;;  %5573 = vcosq.f32 %v8569_v56  ;;  %v8592_v54 = vmul.f32 %v2224_v24, %v2222_v51  ;;  %v2594_v9 = vsel %vm2590_vm11, %v2574_v53, %v8471_v49  ;;  %v2596_v26 = vsel %vm2592_vm12, %v8475_v13, %v2595_v6  ;;  %10925 = vst [vmem:[#allocation48_spill] sm:$0xff] %v8618_v36 }
 0x314   :  { %vm2029_vm15 = vcmp.lt.s32.totalorder %v8169_v30, 2  ;;  %v10922_v42 = vand.u32 2147483647, %v7706_v21  ;;  %v8607_v59 = vsel %vm4676_vm3, 0, %v4675_v10  ;;  %v2418_v7 = vclz %v4686_v23 }
 0x315   :  { %v2616_v31 = vadd.s32 1, %v8546_v15  ;;  %v2481_v49 = vshrl.u32 %v10752_v27, %v8574_v46  ;;  %v2309_v61 = vshll.u32 %v8576_v55, 30  ;;  %vm2615_vm2 = vc.u32 %v8552_v63, %v8545_v44 }
 0x316   :  { %vm8603_vm1 = vcmp.le.f32.partialorder %v10922_v42, 0.7853982  ;;  %v2484_v57 = vshrl.u32 %v10753_v47, %v8574_v46  ;;  %v2597_v10 = vsel %vm2591_vm6, %v2594_v9, %v2596_v26  ;;  %v8622_v0 = vshrl.u32 %v2466_v17, 5 }
 0x317   :  { %v2480_v51 = vshll.u32 %v10754_v4, %v2468_v62  ;;  %vm2777_vm4 = vcmp.gt.s32.totalorder %v2776_v58, 0  ;;  %v2472_v39 = vshrl.u32 %v10794_v33, %v8574_v46  ;;  %v2475_v23 = vshrl.u32 %v10795_v37, %v8574_v46 }
 0x318   :  { %v2478_v6 = vshrl.u32 %v10754_v4, %v8574_v46  ;;  %v2483_v24 = vshll.u32 %v10752_v27, %v2468_v62  ;;  %v2114_v53 = vsub.s32 4294967266, %v8607_v59  ;;  %v2617_v41 = vsel %vm2615_vm2, %v2616_v31, %v8546_v15 }
 0x319   :  { %v2471_v17 = vshll.u32 %v10751_v35, %v2468_v62  ;;  %v2482_v9 = vor.u32 %v2481_v49, %v2480_v51  ;;  %v2474_v26 = vshll.u32 %v10794_v33, %v2468_v62  ;;  %v2477_v42 = vshll.u32 %v10795_v37, %v2468_v62  ;;  %v10927_v49 = vld [vmem:[#allocation32_spill] sm:$0xff] }
 0x31a   :  { %v2485_v13 = vor.u32 %v2484_v57, %v2483_v24  ;;  %v2778_v12 = vsel %vm2777_vm4, %v2776_v58, 0  ;;  %v4687_v36 = vadd.s32 4294967294, %v2418_v7  ;;  %v8638_v40 = vsub.s32 %v8524_v14, %v2309_v61 }
 0x31b   :  { %v2613_v20 = vmul.u32 %v8536_v8, %v2597_v10  ;;  %v10926_v45 = vand.u32 2147483647, %v8367_v16  ;;  %v8643_v44 = vor.u32 %v2472_v39, %v2471_v17  ;;  %v8645_v15 = vor.u32 %v2475_v23, %v2474_v26 }
 0x31c   :  { %v2479_v31 = vor.u32 %v2478_v6, %v2477_v42  ;;  %vm2489_vm5 = vcmp.lt.s32.totalorder %v8622_v0, 4  ;;  %v8650_v62 = vmul.f32 %v5936_v11, %v10927_v49  ;;  %v2780_v8 = vand.u32 31, %v2778_v12 }
 0x31d   :  { %v2461_v55 = vand.u32 8388607, %v10926_v45  ;;  %v8652_v58 = vadd.s32 %v2617_v41, %v2613_v20  ;;  %v2495_v14 = vsel %vm2489_vm5, %v2482_v9, 920167782  ;;  %v8656_v7 = vpop.eup %5573  ;;  %v8660_v45 = vsel %vm2029_vm15, %v2032_v25, %v2035_v5 }
 0x31e   :  { %10928 = vst [vmem:[#allocation32_spill] sm:$0xff] %v8650_v62  ;;  %v2226_v61 = vxor.u32 2147483648, %v8592_v54  ;;  %v2499_v20 = vsel %vm2489_vm5, %v2485_v13, 1326507024  ;;  %v8668_v10 = vadd.s32 127, %v2114_v53  ;;  %vm4688_vm7 = vcmp.lt.s32.totalorder %v4687_v36, 0 }
 0x31f   :  { %vm2486_vm10 = vcmp.lt.s32.totalorder %v8622_v0, 1  ;;  %vm2488_vm11 = vcmp.lt.s32.totalorder %v8622_v0, 3  ;;  %v2312_v30 = vsub.s32 0, %v8638_v40  ;;  %v2462_v25 = vor.u32 8388608, %v2461_v55 }
 0x320   :  { %v2494_v5 = vsel %vm2486_vm10, %v8643_v44, %v8645_v15  ;;  %v2496_v51 = vsel %vm2488_vm11, %v2479_v31, %v2495_v14  ;;  %v2619_v13 = vadd.s32 536870912, %v8652_v58  ;;  %v2498_v39 = vsel %vm2486_vm10, %v8645_v15, %v2479_v31 }
 0x321   :  { %v2500_v23 = vsel %vm2488_vm11, %v2482_v9, %v2499_v20  ;;  %v8685_v6 = vsub.s32 32, %v2780_v8  ;;  %5575 = vsinq.f32 %v8569_v56  ;;  %v8689_v24 = vsel %vm4688_vm7, 0, %v4687_v36 }
 0x322   :  { %vm2487_vm12 = vcmp.lt.s32.totalorder %v8622_v0, 2  ;;  %v8695_v53 = vsel %vm2144_vm0, %v2226_v61, %v8592_v54  ;;  %v2094_v41 = vadd.s32 %v8191_v18, %v8200_v50  ;;  %v2110_v17 = vsub.s32 32, %v8607_v59  ;;  %v10934_v0 = vld [vmem:[#allocation42_spill] sm:$0xff] }
 0x323   :  { %v2497_v9 = vsel %vm2487_vm12, %v2494_v5, %v2496_v51  ;;  %v2501_v26 = vsel %vm2487_vm12, %v2498_v39, %v2500_v23  ;;  %v8707_v42 = vshll.u32 %v2462_v25, 8  ;;  %v2426_v54 = vsub.s32 4294967266, %v8689_v24 }
 0x324   :  { %v4682_v49 = vmin.u32 %v2312_v30, %v8638_v40  ;;  %v8711_v18 = vshrl.u32 %v2619_v13, 30  ;;  %v2793_v50 = vshrl.u32 %v10752_v27, %v8685_v6  ;;  %v2796_v25 = vshrl.u32 %v10753_v47, %v8685_v6 }
 0x325   :  { %v8716_v14 = vmul.u32.u64.low %v8707_v42, %v2497_v9  ;;  %v8717_v61 = vmul.u32.u64.high %v8707_v42, %v2497_v9, %v8716_v14  ;;  %v8724_v5 = vmul.u32.u64.low %v8707_v42, %v2501_v26  ;;  %v8725_v51 = vmul.u32.u64.high %v8707_v42, %v2501_v26, %v8724_v5 }
 0x326   :  { %10929 = vst [vmem:[#allocation49_spill] sm:$0xff] %v8711_v18  ;;  %v8727_v30 = vshrl.u32 %v2778_v12, 5  ;;  %v2792_v13 = vshll.u32 %v10754_v4, %v2780_v8  ;;  %v2784_v39 = vshrl.u32 %v10794_v33, %v8685_v6  ;;  %v2787_v23 = vshrl.u32 %v10795_v37, %v8685_v6 }
 0x327   :  { %v2790_v9 = vshrl.u32 %v10754_v4, %v8685_v6  ;;  %v2795_v55 = vshll.u32 %v10752_v27, %v2780_v8  ;;  %v2314_v57 = vclz %v4682_v49  ;;  %v2621_v56 = vshll.u32 %v8711_v18, 30  ;;  %v10931_v18 = vld [vmem:[#allocation13_spill] sm:$0xff] }
 0x328   :  { %v2491_v12 = vsel %vm2489_vm5, %v2479_v31, 2102212464  ;;  %v2794_v26 = vor.u32 %v2793_v50, %v2792_v13  ;;  %v2783_v5 = vshll.u32 %v10751_v35, %v2780_v8  ;;  %v2786_v36 = vshll.u32 %v10794_v33, %v2780_v8 }
 0x329   :  { %v2789_v20 = vshll.u32 %v10795_v37, %v2780_v8  ;;  %v2797_v62 = vor.u32 %v2796_v25, %v2795_v55  ;;  %v2422_v16 = vsub.s32 32, %v8689_v24  ;;  %v2470_v4 = vshrl.u32 %v10751_v35, %v8574_v46 }
 0x32a   :  { %v10930_v49 = vand.u32 2147483647, %v8492_v28  ;;  %v8750_v63 = vadd.f32 %v5863_v60, %v10931_v18  ;;  %v8754_v50 = vor.u32 %v2784_v39, %v2783_v5  ;;  %v8756_v13 = vor.u32 %v2787_v23, %v2786_v36  ;;  %v8772_v36 = vpop.f32.mrb[29].mxu0 }
 0x32b   :  { %v8752_v31 = vpop.eup %5575  ;;  %v8758_v8 = vor.u32 %v2790_v9, %v2789_v20  ;;  %vm2801_vm13 = vcmp.lt.s32.totalorder %v8727_v30, 4  ;;  %v8762_v55 = vsub.s32 %v8652_v58, %v2621_v56  ;;  %v2490_v46 = vsel %vm2486_vm10, %v2470_v4, %v8643_v44  ;;  %10933 = vst [vmem:[#allocation50_spill] sm:$0xff] %v8772_v36 }
 0x32c   :  { %v2773_v47 = vand.u32 8388607, %v10930_v49  ;;  %10932 = vst [vmem:[#allocation13_spill] sm:$0xff] %v8750_v63  ;;  %v2492_v25 = vsel %vm2488_vm11, %v8645_v15, %v2491_v12  ;;  %v2807_v39 = vsel %vm2801_vm13, %v2794_v26, 920167782  ;;  %v2427_v20 = vadd.s32 127, %v2426_v54 }
 0x32d   :  { %v4683_v23 = vadd.s32 4294967294, %v2314_v57  ;;  %v2512_v9 = vadd.s32 1, %v8717_v61  ;;  %v2811_v58 = vsel %vm2801_vm13, %v2797_v62, 1326507024  ;;  %vm2026_vm6 = vweird.f32 %v7364_v38 }
 0x32e   :  { %vm2511_vm8 = vc.u32 %v8725_v51, %v8716_v14  ;;  %vm2798_vm14 = vcmp.lt.s32.totalorder %v8727_v30, 1  ;;  %vm2800_vm0 = vcmp.lt.s32.totalorder %v8727_v30, 3  ;;  %v2665_v4 = vand.u32 2139095040, %v8750_v63 }
 0x32f   :  { %v2493_v44 = vsel %vm2487_vm12, %v2490_v46, %v2492_v25  ;;  %v2774_v15 = vor.u32 8388608, %v2773_v47  ;;  %v2806_v62 = vsel %vm2798_vm14, %v8754_v50, %v8756_v13  ;;  %v2808_v57 = vsel %vm2800_vm0, %v8758_v8, %v2807_v39 }
 0x330   :  { %v2112_v56 = vshrl.u32 %v2094_v41, %v2110_v17  ;;  %v2624_v54 = vsub.s32 0, %v8762_v55  ;;  %v2810_v12 = vsel %vm2798_vm14, %v8756_v13, %v8758_v8  ;;  %v2812_v47 = vsel %vm2800_vm0, %v2794_v26, %v2811_v58 }
 0x331   :  { %vm1929_vm3 = vcmp.eq.s32.totalorder %v8564_v48, 2  ;;  %v2406_v5 = vadd.s32 %v10934_v0, %v8308_v32  ;;  %v2428_v49 = vshll.u32 %v2427_v20, 23  ;;  %v2513_v46 = vsel %vm2511_vm8, %v2512_v9, %v8717_v61 }
 0x332   :  { %vm2799_vm15 = vcmp.lt.s32.totalorder %v8727_v30, 2  ;;  %vm1926_vm2 = vcmp.eq.s32.totalorder %v8564_v48, 0  ;;  %v10935_v41 = vshll.u32 %v8668_v10, 23  ;;  %v2509_v25 = vmul.u32 %v8707_v42, %v2493_v44 }
 0x333   :  { %v2809_v26 = vsel %vm2799_vm15, %v2806_v62, %v2808_v57  ;;  %v2666_v39 = vshrl.u32 %v2665_v4, 23  ;;  %v2424_v58 = vshrl.u32 %v2406_v5, %v2422_v16  ;;  %vm4684_vm4 = vcmp.lt.s32.totalorder %v4683_v23, 0 }
 0x334   :  { %v2117_v17 = vor.u32 4788187, %v10935_v41  ;;  %v2813_v32 = vsel %vm2799_vm15, %v2810_v12, %v2812_v47  ;;  %v8812_v20 = vshll.u32 %v2774_v15, 8  ;;  %v2230_v61 = vsel %vm8603_vm1, %v7706_v21, %v8695_v53  ;;  %v10937_v53 = vld [vmem:[#allocation21_spill] sm:$0xff] }
 0x335   :  { %v10936_v10 = vshll.u32 %v8411_v3, %v8607_v59  ;;  %v4694_v9 = vmin.u32 %v2624_v54, %v8762_v55  ;;  %v8822_v44 = vadd.s32 %v2513_v46, %v2509_v25  ;;  %vm1925_vm5 = vcmp.lt.s32.totalorder %v8564_v48, 2 }
 0x336   :  { %v2423_v16 = vshll.u32 %v8505_v43, %v8689_v24  ;;  %v2429_v4 = vor.u32 4788187, %v2428_v49  ;;  %v8828_v15 = vmul.u32.u64.low %v8812_v20, %v2809_v26  ;;  %v8829_v62 = vmul.u32.u64.high %v8812_v20, %v2809_v26, %v8828_v15 }
 0x337   :  { %v2113_v42 = vor.u32 %v2112_v56, %v10936_v10  ;;  %vm2040_vm7 = vcmp.lt.s32.totalorder %v10937_v53, 0  ;;  %v8833_v57 = vsel %vm4684_vm4, 0, %v4683_v23  ;;  %v4697_v56 = vadd.s32 4294967169, %v2666_v39 }
 0x338   :  { %v8836_v3 = vmul.u32.u64.low %v8812_v20, %v2813_v32  ;;  %v8837_v59 = vmul.u32.u64.high %v8812_v20, %v2813_v32, %v8836_v3  ;;  %v2037_v54 = vsel %vm2026_vm6, nan, %v8660_v45  ;;  %v1927_v43 = vxor.u32 2147483648, %v8752_v31  ;;  %v10943_v32 = vld [vmem:[#allocation27_spill] sm:$0xff] }
 0x339   :  { %v2118_v24 = vand.u32 2147483647, %v2117_v17  ;;  %v2425_v12 = vor.u32 %v2424_v58, %v2423_v16  ;;  %5577 = vcosq.f32 %v2230_v61  ;;  %v10938_v47 = vsel %vm8603_vm1, 0, %v8589_v29 }
 0x33a   :  { %v2235_v23 = vadd.s32 3, %v10938_v47  ;;  %v2626_v0 = vclz %v4694_v9  ;;  %v2515_v5 = vadd.s32 536870912, %v8822_v44  ;;  %vm1922_vm10 = vweird.f32 %v10901_v1 }
 0x33b   :  { %v10939_v49 = vand.u32 2147483647, %v10937_v53  ;;  %v2120_v45 = vcvt.s32.f32 %v2113_v42  ;;  %v2430_v46 = vand.u32 2147483647, %v2429_v4  ;;  %v2322_v41 = vsub.s32 4294967266, %v8833_v57 }
 0x33c   :  { %v2803_v29 = vsel %vm2801_vm13, %v8758_v8, 2102212464  ;;  %v10942_v22 = vxor.u32 2147483648, %v8656_v7  ;;  %5579 = vsinq.f32 %v2230_v61  ;;  %v2782_v25 = vshrl.u32 %v10751_v35, %v8685_v6  ;;  %v10944_v61 = vld [vmem:[#allocation34_spill] sm:$0xff] }
 0x33d   :  { %vm8851_vm11 = vcmp.le.f32.partialorder %v10939_v49, 0.7853982  ;;  %v2672_v26 = vadd.s32 1, %v4697_v56  ;;  %v1928_v39 = vsel %vm1926_vm2, %v8656_v7, %v1927_v43  ;;  %v2121_v58 = vmul.f32 %v2120_v45, %v2118_v24 }
 0x33e   :  { %v1931_v17 = vsel %vm1929_vm3, %v10942_v22, %v8752_v31  ;;  %v2124_v10 = vsub.s32 4, %v10943_v32  ;;  %v2432_v42 = vcvt.s32.f32 %v2425_v12  ;;  %v4695_v8 = vadd.s32 4294967294, %v2626_v0 }
 0x33f   :  { %v8870_v9 = vshrl.u32 %v2515_v5, 30  ;;  %v2802_v31 = vsel %vm2798_vm14, %v2782_v25, %v8754_v50  ;;  %v2804_v6 = vsel %vm2800_vm0, %v8756_v13, %v2803_v29  ;;  %vm2352_vm1 = vcmp.lt.s32.totalorder %v10944_v61, 0  ;;  %v10948_v29 = vld [vmem:[#allocation30_spill] sm:$0xff] }
 0x340   :  { %v2433_v16 = vmul.f32 %v2432_v42, %v2430_v46  ;;  %v2323_v4 = vadd.s32 127, %v2322_v41  ;;  %v2824_v7 = vadd.s32 1, %v8829_v62  ;;  %v3721_v3 = vmul.f32 %v10804_v19, %v2037_v54 }
 0x341   :  { %v1932_v56 = vsel %vm1925_vm5, %v1928_v39, %v1931_v17  ;;  %vm2823_vm12 = vc.u32 %v8837_v59, %v8828_v15  ;;  %vm2673_vm13 = vcmp.gt.s32.totalorder %v2672_v26, 0  ;;  %v2122_v50 = vxor.u32 2147483648, %v2121_v58 }
 0x342   :  { %v2125_v13 = vsel %vm2040_vm7, %v2124_v10, %v10943_v32  ;;  %v10945_v43 = vand.u32 2147483647, %v10944_v61  ;;  %v2318_v54 = vsub.s32 32, %v8833_v57  ;;  %v2805_v48 = vsel %vm2799_vm15, %v2802_v31, %v2804_v6 }
 0x343   :  { %v8897_v12 = vand.u32 3, %v2235_v23  ;;  %v2302_v47 = vadd.s32 %v8420_v52, %v8433_v34  ;;  %vm4696_vm8 = vcmp.lt.s32.totalorder %v4695_v8, 0  ;;  %v2517_v0 = vshll.u32 %v8870_v9, 30  ;;  %v5578_v41 = vpop.eup %5577 }
 0x344   :  { %vm8890_vm6 = vcmp.le.f32.partialorder %v10945_v43, 0.7853982  ;;  %v2434_v5 = vxor.u32 2147483648, %v2433_v16  ;;  %v2324_v49 = vshll.u32 %v2323_v4, 23  ;;  %v2825_v45 = vsel %vm2823_vm12, %v2824_v7, %v8829_v62 }
 0x345   :  { %v2674_v46 = vsel %vm2673_vm13, %v2672_v26, 0  ;;  %v8904_v22 = vadd.f32 %v3721_v3, %v10948_v29  ;;  %v1933_v30 = vsel %vm1922_vm10, nan, %v1932_v56  ;;  %v2127_v23 = vsel %vm8851_vm11, 0, %v2125_v13  ;;  %v8942_v56 = vpop.f32.mrb[30].mxu0 }
 0x346   :  { %v2821_v52 = vmul.u32 %v8812_v20, %v2805_v48  ;;  %v2123_v34 = vsel %vm2040_vm7, %v2122_v50, %v2121_v58  ;;  %v2436_v17 = vsub.s32 4, %v8455_v2  ;;  %v2320_v25 = vshrl.u32 %v2302_v47, %v2318_v54  ;;  %v5580_v26 = vpop.eup %5579  ;;  %10950 = vst [vmem:[#allocation21_spill] sm:$0xff] %v8942_v56  ;;  %v10951_v50 = vld [vmem:[#allocation35_spill] sm:$0xff] }
 0x347   :  { %10949 = vst [vmem:[#allocation42_spill] sm:$0xff] %v8904_v22  ;;  %v8914_v62 = vsel %vm4696_vm8, 0, %v4695_v8  ;;  %vm2238_vm14 = vcmp.eq.s32.totalorder %v8897_v12, 0  ;;  %v8918_v39 = vsub.s32 %v8822_v44, %v2517_v0  ;;  %v2676_v32 = vand.u32 31, %v2674_v46 }
 0x348   :  { %v8920_v1 = vadd.s32 %v2825_v45, %v2821_v52  ;;  %v3720_v10 = vmul.f32 %v10804_v19, %v1933_v30  ;;  %v2435_v20 = vsel %vm2352_vm1, %v2434_v5, %v2433_v16  ;;  %v2319_v58 = vshll.u32 %v8638_v40, %v8833_v57 }
 0x349   :  { %v2325_v42 = vor.u32 4788187, %v2324_v49  ;;  %v2242_v8 = vxor.u32 2147483648, %v5578_v41  ;;  %v2126_v31 = vsel %vm8851_vm11, %v10937_v53, %v2123_v34  ;;  %v2131_v6 = vadd.s32 3, %v2127_v23  ;;  %v10954_v34 = vld [vmem:[#allocation37_spill] sm:$0xff] }
 0x34a   :  { %v2634_v44 = vsub.s32 4294967266, %v8914_v62  ;;  %v2239_v4 = vxor.u32 2147483648, %v5580_v26  ;;  %vm2241_vm0 = vcmp.eq.s32.totalorder %v8897_v12, 2  ;;  %v2437_v7 = vsel %vm2352_vm1, %v2436_v17, %v8455_v2  ;;  %v10953_v2 = vld [vmem:[#allocation19_spill] sm:$0xff] }
 0x34b   :  { %v2321_v16 = vor.u32 %v2320_v25, %v2319_v58  ;;  %v2438_v40 = vsel %vm8890_vm6, %v10944_v61, %v2435_v20  ;;  %v2520_v57 = vsub.s32 0, %v8918_v39  ;;  %v2827_v38 = vadd.s32 536870912, %v8920_v1  ;;  %v10955_v25 = vld [vmem:[#allocation46_spill] sm:$0xff] }
 0x34c   :  { %v8940_v3 = vsub.s32 32, %v2676_v32  ;;  %v8945_v13 = vadd.f32 %v3720_v10, %v10951_v50  ;;  %5581 = vcosq.f32 %v2126_v31  ;;  %v2326_v43 = vand.u32 2147483647, %v2325_v42 }
 0x34d   :  { %v8949_v54 = vmul.f32 %v10953_v2, %v5936_v11  ;;  %v2243_v48 = vsel %vm2241_vm0, %v2242_v8, %v5580_v26  ;;  %5583 = vsinq.f32 %v2126_v31  ;;  %v8951_v47 = vand.u32 3, %v2131_v6 }
 0x34e   :  { %10952 = vst [vmem:[#allocation27_spill] sm:$0xff] %v8945_v13  ;;  %v2635_v0 = vadd.s32 127, %v2634_v44  ;;  %vm2237_vm3 = vcmp.lt.s32.totalorder %v8897_v12, 2  ;;  %v2240_v5 = vsel %vm2238_vm14, %v5578_v41, %v2239_v4  ;;  %v2439_v49 = vsel %vm8890_vm6, 0, %v2437_v7  ;;  %v10956_v41 = vld [vmem:[#allocation45_spill] sm:$0xff] }
 0x34f   :  { %5585 = vcosq.f32 %v2438_v40  ;;  %v2328_v45 = vcvt.s32.f32 %v2321_v16  ;;  %v2630_v29 = vsub.s32 32, %v8914_v62  ;;  %v4690_v30 = vmin.u32 %v2520_v57, %v8918_v39 }
 0x350   :  { %v8960_v23 = vshrl.u32 %v2827_v38, 30  ;;  %v2689_v52 = vshrl.u32 %v10752_v27, %v8940_v3  ;;  %5587 = vsinq.f32 %v2438_v40  ;;  %vm2248_vm15 = vcmp.lt.s32.totalorder %v10954_v34, 0 }
 0x351   :  { %v2329_v17 = vmul.f32 %v2328_v45, %v2326_v43  ;;  %v2614_v26 = vadd.s32 %v10956_v41, %v10955_v25  ;;  %v10957_v24 = vmov 1326507024   ;;  %v2636_v20 = vshll.u32 %v2635_v0, 23 }
 0x352   :  { %v2692_v10 = vshrl.u32 %v10957_v24, %v8940_v3  ;;  %v10710_v58 = vand.u32 2147483647, %v8750_v63  ;;  %v8970_v42 = vshrl.u32 %v2674_v46, 5  ;;  %v10958_v8 = vmov 2102212464  }
 0x353   :  { %v2688_v31 = vshll.u32 %v10958_v8, %v2676_v32  ;;  %v2680_v6 = vshrl.u32 %v10794_v33, %v8940_v3  ;;  %v2683_v44 = vshrl.u32 %v10795_v37, %v8940_v3  ;;  %v2686_v4 = vshrl.u32 %v10958_v8, %v8940_v3 }
 0x354   :  { %v2691_v7 = vshll.u32 %v10752_v27, %v2676_v32  ;;  %v10959_v16 = vand.u32 2147483647, %v10954_v34  ;;  %v2632_v46 = vshrl.u32 %v2614_v26, %v2630_v29  ;;  %v2522_v57 = vclz %v4690_v30 }
 0x355   :  { %v2829_v38 = vshll.u32 %v8960_v23, 30  ;;  %v2690_v50 = vor.u32 %v2689_v52, %v2688_v31  ;;  %vm2234_vm4 = vweird.f32 %v7706_v21  ;;  %v2679_v43 = vshll.u32 %v10751_v35, %v2676_v32 }
 0x356   :  { %vm8982_vm2 = vcmp.le.f32.partialorder %v10959_v16, 0.7853982  ;;  %v2682_v2 = vshll.u32 %v10794_v33, %v2676_v32  ;;  %v2685_v0 = vshll.u32 %v10795_v37, %v2676_v32  ;;  %v2693_v45 = vor.u32 %v2692_v10, %v2691_v7  ;;  %v8995_v30 = vpop.eup %5581  ;;  %v10962_v10 = vld [vmem:[#allocation29_spill] sm:$0xff] }
 0x357   :  { %v2330_v25 = vxor.u32 2147483648, %v2329_v17  ;;  %v2631_v41 = vshll.u32 %v8762_v55, %v8914_v62  ;;  %v2637_v16 = vor.u32 4788187, %v2636_v20  ;;  %v2669_v29 = vand.u32 8388607, %v10710_v58  ;;  %v9002_v22 = vpop.eup %5583 }
 0x358   :  { %v8997_v52 = vor.u32 %v2680_v6, %v2679_v43  ;;  %v8999_v26 = vor.u32 %v2683_v44, %v2682_v2  ;;  %v2687_v31 = vor.u32 %v2686_v4, %v2685_v0  ;;  %vm2697_vm5 = vcmp.lt.s32.totalorder %v8970_v42, 4 }
 0x359   :  { %v2244_v32 = vsel %vm2237_vm3, %v2240_v5, %v2243_v48  ;;  %v9007_v55 = vsub.s32 %v8920_v1, %v2829_v38  ;;  %v2703_v62 = vsel %vm2697_vm5, %v2690_v50, 920167782  ;;  %v9013_v20 = vadd.f32 %v10962_v10, %v5863_v60  ;;  %v9015_v6 = vpop.eup %5585  ;;  %v10963_v1 = vld [vmem:[#allocation47_spill] sm:$0xff] }
 0x35a   :  { %v2443_v44 = vadd.s32 3, %v2439_v49  ;;  %v2633_v4 = vor.u32 %v2632_v46, %v2631_v41  ;;  %v4691_v7 = vadd.s32 4294967294, %v2522_v57  ;;  %v2707_v43 = vsel %vm2697_vm5, %v2693_v45, 1326507024  ;;  %v5588_v5 = vpop.eup %5587 }
 0x35b   :  { %v2331_v12 = vsel %vm2248_vm15, %v2330_v25, %v2329_v17  ;;  %v2332_v48 = vsub.s32 4, %v10963_v1  ;;  %vm2694_vm7 = vcmp.lt.s32.totalorder %v8970_v42, 1  ;;  %vm2696_vm10 = vcmp.lt.s32.totalorder %v8970_v42, 3 }
 0x35c   :  { %v2638_v38 = vand.u32 2147483647, %v2637_v16  ;;  %v2670_v2 = vor.u32 8388608, %v2669_v29  ;;  %v2702_v49 = vsel %vm2694_vm7, %v8997_v52, %v8999_v26  ;;  %v2704_v46 = vsel %vm2696_vm10, %v2687_v31, %v2703_v62 }
 0x35d   :  { %v2832_v57 = vsub.s32 0, %v9007_v55  ;;  %v2706_v17 = vsel %vm2694_vm7, %v8999_v26, %v2687_v31  ;;  %v2708_v0 = vsel %vm2696_vm10, %v2690_v50, %v2707_v43  ;;  %v2977_v45 = vand.u32 2139095040, %v9013_v20  ;;  %v10964_v50 = vld [vmem:[#allocation23_spill] sm:$0xff] }
 0x35e   :  { %vm2134_vm11 = vcmp.eq.s32.totalorder %v8951_v47, 0  ;;  %vm2137_vm1 = vcmp.eq.s32.totalorder %v8951_v47, 2  ;;  %v2334_v25 = vsel %vm8982_vm2, %v10954_v34, %v2331_v12  ;;  %v2640_v41 = vcvt.s32.f32 %v2633_v4 }
 0x35f   :  { %vm4692_vm12 = vcmp.lt.s32.totalorder %v4691_v7, 0  ;;  %vm2695_vm13 = vcmp.lt.s32.totalorder %v8970_v42, 2  ;;  %v9045_v16 = vsel %vm2234_vm4, nan, %v2244_v32  ;;  %v9047_v29 = vand.u32 3, %v2443_v44 }
 0x360   :  { %v9051_v62 = vmul.f32 %v5936_v11, %v10964_v50  ;;  %v2705_v43 = vsel %vm2695_vm13, %v2702_v49, %v2704_v46  ;;  %v2333_v4 = vsel %vm2248_vm15, %v2332_v48, %v10963_v1  ;;  %v2641_v12 = vmul.f32 %v2640_v41, %v2638_v38  ;;  %v10967_v41 = vld [vmem:[#allocation40_spill] sm:$0xff] }
 0x361   :  { %v2709_v58 = vsel %vm2695_vm13, %v2706_v17, %v2708_v0  ;;  %v9060_v21 = vshll.u32 %v2670_v2, 8  ;;  %5589 = vcosq.f32 %v2334_v25  ;;  %v9062_v32 = vsel %vm4692_vm12, 0, %v4691_v7 }
 0x362   :  { %10965 = vst [vmem:[#allocation34_spill] sm:$0xff] %v9051_v62  ;;  %v4702_v44 = vmin.u32 %v2832_v57, %v9007_v55  ;;  %v2978_v50 = vshrl.u32 %v2977_v45, 23  ;;  %vm2133_vm6 = vcmp.lt.s32.totalorder %v8951_v47, 2  ;;  %v2138_v49 = vxor.u32 2147483648, %v8995_v30 }
 0x363   :  { %5591 = vsinq.f32 %v2334_v25  ;;  %v9068_v46 = vmul.u32.u64.low %v9060_v21, %v2705_v43  ;;  %v9069_v1 = vmul.u32.u64.high %v9060_v21, %v2705_v43, %v9068_v46  ;;  %v2135_v48 = vxor.u32 2147483648, %v9002_v22  ;;  %v9081_v25 = vpop.f32.mrb[31].mxu0 }
 0x364   :  { %v2335_v38 = vsel %vm8982_vm2, 0, %v2333_v4  ;;  %v9076_v7 = vmul.u32.u64.low %v9060_v21, %v2709_v58  ;;  %v9077_v2 = vmul.u32.u64.high %v9060_v21, %v2709_v58, %v9076_v7  ;;  %v2447_v57 = vxor.u32 2147483648, %v5588_v5  ;;  %10966 = vst [vmem:[#allocation30_spill] sm:$0xff] %v9081_v25  ;;  %v10971_v58 = vld [vmem:[#allocation49_spill] sm:$0xff] }
 0x365   :  { %v2450_v17 = vxor.u32 2147483648, %v9015_v6  ;;  %v2642_v0 = vxor.u32 2147483648, %v2641_v12  ;;  %v2530_v45 = vsub.s32 4294967266, %v9062_v32  ;;  %v10968_v43 = vand.u32 2147483647, %v10967_v41 }
 0x366   :  { %vm2560_vm14 = vcmp.lt.s32.totalorder %v10967_v41, 0  ;;  %v2834_v40 = vclz %v4702_v44  ;;  %v4709_v4 = vadd.s32 4294967169, %v2978_v50  ;;  %vm2446_vm0 = vcmp.eq.s32.totalorder %v9047_v29, 0 }
 0x367   :  { %vm9085_vm8 = vcmp.le.f32.partialorder %v10968_v43, 0.7853982  ;;  %vm2449_vm3 = vcmp.eq.s32.totalorder %v9047_v29, 2  ;;  %v2644_v7 = vsub.s32 4, %v10971_v58  ;;  %v2699_v13 = vsel %vm2697_vm5, %v2687_v31, 2102212464 }
 0x368   :  { %v2136_v43 = vsel %vm2134_vm11, %v8995_v30, %v2135_v48  ;;  %v2139_v25 = vsel %vm2137_vm1, %v2138_v49, %v9002_v22  ;;  %v2339_v62 = vadd.s32 3, %v2335_v38  ;;  %v2678_v44 = vshrl.u32 %v10751_v35, %v8940_v3  ;;  %v10972_v48 = vld [vmem:[#allocation38_spill] sm:$0xff] }
 0x369   :  { %vm2130_vm15 = vweird.f32 %v10937_v53  ;;  %v2448_v50 = vsel %vm2446_vm0, %v9015_v6, %v2447_v57  ;;  %v2451_v56 = vsel %vm2449_vm3, %v2450_v17, %v5588_v5  ;;  %v2643_v31 = vsel %vm2560_vm14, %v2642_v0, %v2641_v12 }
 0x36a   :  { %v2531_v36 = vadd.s32 127, %v2530_v45  ;;  %vm2442_vm2 = vweird.f32 %v10944_v61  ;;  %v4703_v30 = vadd.s32 4294967294, %v2834_v40  ;;  %v2698_v22 = vsel %vm2694_vm7, %v2678_v44, %v8997_v52 }
 0x36b   :  { %v2700_v3 = vsel %vm2696_vm10, %v8999_v26, %v2699_v13  ;;  %v2984_v49 = vadd.s32 1, %v4709_v4  ;;  %v2645_v6 = vsel %vm2560_vm14, %v2644_v7, %v10971_v58  ;;  %v2526_v5 = vsub.s32 32, %v9062_v32  ;;  %v5590_v57 = vpop.eup %5589 }
 0x36c   :  { %v2720_v12 = vadd.s32 1, %v9069_v1  ;;  %v9121_v38 = vadd.f32 %v5863_v60, %v10972_v48  ;;  %v2140_v52 = vsel %vm2133_vm6, %v2136_v43, %v2139_v25  ;;  %vm2445_vm4 = vcmp.lt.s32.totalorder %v9047_v29, 2 }
 0x36d   :  { %v2646_v13 = vsel %vm9085_vm8, %v10967_v41, %v2643_v31  ;;  %vm2719_vm5 = vc.u32 %v9077_v2, %v9068_v46  ;;  %v5592_v26 = vpop.eup %5591  ;;  %v2340_v17 = vand.u32 3, %v2339_v62  ;;  %v2510_v0 = vadd.s32 %v8716_v14, %v8725_v51 }
 0x36e   :  { %v2532_v45 = vshll.u32 %v2531_v36, 23  ;;  %v2701_v40 = vsel %vm2695_vm13, %v2698_v22, %v2700_v3  ;;  %v2452_v47 = vsel %vm2445_vm4, %v2448_v50, %v2451_v56  ;;  %v2647_v29 = vsel %vm9085_vm8, 0, %v2645_v6 }
 0x36f   :  { %vm4704_vm7 = vcmp.lt.s32.totalorder %v4703_v30, 0  ;;  %vm2985_vm10 = vcmp.gt.s32.totalorder %v2984_v49, 0  ;;  %5593 = vcosq.f32 %v2646_v13  ;;  %v2528_v25 = vshrl.u32 %v2510_v0, %v2526_v5  ;;  %v10975_v5 = vld [vmem:[#allocation43_spill] sm:$0xff] }
 0x370   :  { %v2721_v4 = vsel %vm2719_vm5, %v2720_v12, %v9069_v1  ;;  %v2873_v58 = vand.u32 2139095040, %v9121_v38  ;;  %v2343_v62 = vxor.u32 2147483648, %v5592_v26  ;;  %v2346_v7 = vxor.u32 2147483648, %v5590_v57 }
 0x371   :  { %5595 = vsinq.f32 %v2646_v13  ;;  %v2717_v14 = vmul.u32 %v9060_v21, %v2701_v40  ;;  %v2527_v51 = vshll.u32 %v8918_v39, %v9062_v32  ;;  %v2533_v36 = vor.u32 4788187, %v2532_v45 }
 0x372   :  { %v9142_v56 = vsel %vm4704_vm7, 0, %v4703_v30  ;;  %v2986_v42 = vsel %vm2985_vm10, %v2984_v49, 0  ;;  %v3723_v10 = vmul.f32 %v10804_v19, %v9045_v16  ;;  %v2141_v1 = vsel %vm2130_vm15, nan, %v2140_v52  ;;  %v10973_v49 = vld [vmem:[#allocation36_spill] sm:$0xff] }
 0x373   :  { %vm2338_vm11 = vweird.f32 %v10954_v34  ;;  %vm2342_vm1 = vcmp.eq.s32.totalorder %v2340_v17, 0  ;;  %v9149_v43 = vadd.s32 %v2721_v4, %v2717_v14  ;;  %v2453_v21 = vsel %vm2442_vm2, nan, %v2452_v47  ;;  %v10980_v14 = vld [vmem:[#allocation22_spill] sm:$0xff] }
 0x374   :  { %v2651_v44 = vadd.s32 3, %v2647_v29  ;;  %v2529_v39 = vor.u32 %v2528_v25, %v2527_v51  ;;  %v2874_v32 = vshrl.u32 %v2873_v58, 23  ;;  %vm2345_vm12 = vcmp.eq.s32.totalorder %v2340_v17, 2  ;;  %v10976_v29 = vld [vmem:[#allocation39_spill] sm:$0xff]  ;;  %v10978_v58 = vld [vmem:[#allocation33_spill] sm:$0xff] }
 0x375   :  { %v2540_v50 = vsub.s32 4, %v8870_v9  ;;  %v2842_v31 = vsub.s32 4294967266, %v9142_v56  ;;  %v2988_v16 = vand.u32 31, %v2986_v42  ;;  %v3722_v53 = vmul.f32 %v10804_v19, %v2141_v1 }
 0x376   :  { %v2344_v30 = vsel %vm2342_vm1, %v5590_v57, %v2343_v62  ;;  %v2347_v22 = vsel %vm2345_vm12, %v2346_v7, %v5592_v26  ;;  %v2534_v3 = vand.u32 2147483647, %v2533_v36  ;;  %v9157_v6 = vadd.f32 %v3723_v10, %v10973_v49 }
 0x377   :  { %v3725_v61 = vmul.f32 %v10804_v19, %v2453_v21  ;;  %vm2456_vm13 = vcmp.lt.s32.totalorder %v10975_v5, 0  ;;  %v2723_v12 = vadd.s32 536870912, %v9149_v43  ;;  %vm2341_vm6 = vcmp.lt.s32.totalorder %v2340_v17, 2 }
 0x378   :  { %10974 = vst [vmem:[#allocation35_spill] sm:$0xff] %v9157_v6  ;;  %v9162_v52 = vand.u32 3, %v2651_v44  ;;  %v2536_v13 = vcvt.s32.f32 %v2529_v39  ;;  %v4705_v0 = vadd.s32 4294967169, %v2874_v32  ;;  %v2348_v45 = vsel %vm2341_vm6, %v2344_v30, %v2347_v22 }
 0x379   :  { %v2541_v57 = vsel %vm2456_vm13, %v2540_v50, %v8870_v9  ;;  %v2843_v26 = vadd.s32 127, %v2842_v31  ;;  %v9167_v40 = vsub.s32 32, %v2988_v16  ;;  %v5594_v47 = vpop.eup %5593  ;;  %v9170_v25 = vadd.f32 %v3722_v53, %v10976_v29 }
 0x37a   :  { %v2537_v4 = vmul.f32 %v2536_v13, %v2534_v3  ;;  %v9174_v17 = vmul.f32 %v10978_v58, %v5936_v11  ;;  %v2838_v62 = vsub.s32 32, %v9142_v56  ;;  %v9178_v51 = vadd.f32 %v3725_v61, %v10980_v14 }
 0x37b   :  { %10977 = vst [vmem:[#allocation19_spill] sm:$0xff] %v9170_v25  ;;  %v5596_v7 = vpop.eup %5595  ;;  %v10982_v9 = vand.u32 2147483647, %v10975_v5  ;;  %v9188_v10 = vmul.f32 %v5936_v11, %v10931_v18  ;;  %v9190_v1 = vshrl.u32 %v2723_v12, 30  ;;  %v9194_v21 = vsel %vm2338_vm11, nan, %v2348_v45 }
 0x37c   :  { %10979 = vst [vmem:[#allocation37_spill] sm:$0xff] %v9174_v17  ;;  %10981 = vst [vmem:[#allocation46_spill] sm:$0xff] %v9178_v51  ;;  %vm2654_vm14 = vcmp.eq.s32.totalorder %v9162_v52, 0  ;;  %vm2657_vm0 = vcmp.eq.s32.totalorder %v9162_v52, 2  ;;  %v2822_v39 = vadd.s32 %v8828_v15, %v8837_v59  ;;  %v2880_v32 = vadd.s32 1, %v4705_v0 }
 0x37d   :  { %vm9182_vm8 = vcmp.le.f32.partialorder %v10982_v9, 0.7853982  ;;  %10985 = vst [vmem:[#allocation45_spill] sm:$0xff] %v9188_v10  ;;  %v2658_v50 = vxor.u32 2147483648, %v5594_v47  ;;  %v2844_v18 = vshll.u32 %v2843_v26, 23  ;;  %v3001_v34 = vshrl.u32 %v10752_v27, %v9167_v40 }
 0x37e   :  { %v2543_v44 = vsel %vm9182_vm8, 0, %v2541_v57  ;;  %v10714_v31 = vand.u32 2147483647, %v9013_v20  ;;  %v2655_v53 = vxor.u32 2147483648, %v5596_v7  ;;  %v2538_v30 = vxor.u32 2147483648, %v2537_v4 }
 0x37f   :  { %v2840_v22 = vshrl.u32 %v2822_v39, %v2838_v62  ;;  %v3004_v3 = vshrl.u32 %v10957_v24, %v9167_v40  ;;  %v2725_v49 = vshll.u32 %v9190_v1, 30  ;;  %v9208_v61 = vshrl.u32 %v2986_v42, 5 }
 0x380   :  { %v2992_v15 = vshrl.u32 %v10794_v33, %v9167_v40  ;;  %v3000_v59 = vshll.u32 %v10958_v8, %v2988_v16  ;;  %v2995_v12 = vshrl.u32 %v10795_v37, %v9167_v40  ;;  %v2998_v13 = vshrl.u32 %v10958_v8, %v9167_v40 }
 0x381   :  { %v3003_v0 = vshll.u32 %v10752_v27, %v2988_v16  ;;  %vm2881_vm3 = vcmp.gt.s32.totalorder %v2880_v32, 0  ;;  %v2839_v45 = vshll.u32 %v9007_v55, %v9142_v56  ;;  %v2845_v57 = vor.u32 4788187, %v2844_v18 }
 0x382   :  { %v2981_v42 = vand.u32 8388607, %v10714_v31  ;;  %v3002_v26 = vor.u32 %v3001_v34, %v3000_v59  ;;  %v2991_v29 = vshll.u32 %v10751_v35, %v2988_v16  ;;  %v2994_v58 = vshll.u32 %v10794_v33, %v2988_v16 }
 0x383   :  { %v2997_v62 = vshll.u32 %v10795_v37, %v2988_v16  ;;  %v3005_v14 = vor.u32 %v3004_v3, %v3003_v0  ;;  %v2539_v9 = vsel %vm2456_vm13, %v2538_v30, %v2537_v4  ;;  %v2841_v39 = vor.u32 %v2840_v22, %v2839_v45 }
 0x384   :  { %v9228_v51 = vsub.s32 %v9149_v43, %v2725_v49  ;;  %v2882_v55 = vsel %vm2881_vm3, %v2880_v32, 0  ;;  %vm2768_vm15 = vcmp.lt.s32.totalorder %v8492_v28, 0  ;;  %v2993_v56 = vor.u32 %v2992_v15, %v2991_v29 }
 0x385   :  { %v9231_v18 = vor.u32 %v2995_v12, %v2994_v58  ;;  %v2999_v34 = vor.u32 %v2998_v13, %v2997_v62  ;;  %vm3009_vm2 = vcmp.lt.s32.totalorder %v9208_v61, 4  ;;  %v2656_v16 = vsel %vm2654_vm14, %v5594_v47, %v2655_v53 }
 0x386   :  { %v2659_v3 = vsel %vm2657_vm0, %v2658_v50, %v5596_v7  ;;  %v2547_v4 = vadd.s32 3, %v2543_v44  ;;  %v3015_v43 = vsel %vm3009_vm2, %v3002_v26, 920167782  ;;  %v2542_v32 = vsel %vm9182_vm8, %v10975_v5, %v2539_v9  ;;  %v10986_v44 = vld [vmem:[#allocation41_spill] sm:$0xff] }
 0x387   :  { %v2846_v30 = vand.u32 2147483647, %v2845_v57  ;;  %v3019_v22 = vsel %vm3009_vm2, %v3005_v14, 1326507024  ;;  %v2884_v49 = vand.u32 31, %v2882_v55  ;;  %v2728_v15 = vsub.s32 0, %v9228_v51 }
 0x388   :  { %v2982_v59 = vor.u32 8388608, %v2981_v42  ;;  %vm3006_vm4 = vcmp.lt.s32.totalorder %v9208_v61, 1  ;;  %vm3008_vm5 = vcmp.lt.s32.totalorder %v9208_v61, 3  ;;  %v2848_v47 = vcvt.s32.f32 %v2841_v39 }
 0x389   :  { %v3014_v7 = vsel %vm3006_vm4, %v2993_v56, %v9231_v18  ;;  %v3016_v36 = vsel %vm3008_vm5, %v2999_v34, %v3015_v43  ;;  %v9255_v50 = vadd.f32 %v10986_v44, %v5863_v60  ;;  %5597 = vcosq.f32 %v2542_v32  ;;  %v10994_v43 = vld [vmem:[#allocation32_spill] sm:$0xff] }
 0x38a   :  { %v2852_v53 = vsub.s32 4, %v8960_v23  ;;  %v3018_v12 = vsel %vm3006_vm4, %v9231_v18, %v2999_v34  ;;  %v3020_v13 = vsel %vm3008_vm5, %v3002_v26, %v3019_v22  ;;  %5599 = vsinq.f32 %v2542_v32 }
 0x38b   :  { %10987 = vst [vmem:[#allocation47_spill] sm:$0xff] %v9255_v50  ;;  %v2849_v0 = vmul.f32 %v2848_v47, %v2846_v30  ;;  %vm3007_vm7 = vcmp.lt.s32.totalorder %v9208_v61, 2  ;;  %v9264_v45 = vsub.s32 32, %v2884_v49  ;;  %v9268_v57 = vmul.f32 %v10804_v19, %v9194_v21 }
 0x38c   :  { %vm2653_vm10 = vcmp.lt.s32.totalorder %v9162_v52, 2  ;;  %v4698_v42 = vmin.u32 %v2728_v15, %v9228_v51  ;;  %v3017_v29 = vsel %vm3007_vm7, %v3014_v7, %v3016_v36  ;;  %v9274_v58 = vand.u32 3, %v2547_v4 }
 0x38d   :  { %v3021_v26 = vsel %vm3007_vm7, %v3018_v12, %v3020_v13  ;;  %v9278_v62 = vshll.u32 %v2982_v59, 8  ;;  %v3185_v14 = vand.u32 2139095040, %v9255_v50  ;;  %v2660_v9 = vsel %vm2653_vm10, %v2656_v16, %v2659_v3 }
 0x38e   :  { %v9284_v21 = vsel %vm2768_vm15, %v2852_v53, %v8960_v23  ;;  %v2990_v52 = vshrl.u32 %v10751_v35, %v9167_v40  ;;  %v10988_v4 = vand.u32 2147483647, %v8492_v28  ;;  %v2850_v32 = vxor.u32 2147483648, %v2849_v0 }
 0x38f   :  { %v9296_v30 = vmul.u32.u64.low %v9278_v62, %v3017_v29  ;;  %v9297_v16 = vmul.u32.u64.high %v9278_v62, %v3017_v29, %v9296_v30  ;;  %v2897_v23 = vshrl.u32 %v10752_v27, %v9264_v45  ;;  %v2730_v3 = vclz %v4698_v42 }
 0x390   :  { %vm9291_vm11 = vcmp.le.f32.partialorder %v10988_v4, 0.7853982  ;;  %v9303_v40 = vmul.u32.u64.low %v9278_v62, %v3021_v26  ;;  %v9304_v22 = vmul.u32.u64.high %v9278_v62, %v3021_v26, %v9303_v40  ;;  %v2900_v15 = vshrl.u32 %v10957_v24, %v9264_v45  ;;  %v10991_v26 = vld [vmem:[#allocation44_spill] sm:$0xff] }
 0x391   :  { %v3011_v59 = vsel %vm3009_vm2, %v2999_v34, 2102212464  ;;  %v9310_v47 = vshrl.u32 %v2882_v55, 5  ;;  %v2896_v7 = vshll.u32 %v10958_v8, %v2884_v49  ;;  %v3186_v36 = vshrl.u32 %v3185_v14, 23 }
 0x392   :  { %v2888_v53 = vshrl.u32 %v10794_v33, %v9264_v45  ;;  %v2891_v12 = vshrl.u32 %v10795_v37, %v9264_v45  ;;  %v2894_v13 = vshrl.u32 %v10958_v8, %v9264_v45  ;;  %v2899_v42 = vshll.u32 %v10752_v27, %v2884_v49 }
 0x393   :  { %vm2650_vm1 = vweird.f32 %v10967_v41  ;;  %v2851_v55 = vsel %vm2768_vm15, %v2850_v32, %v2849_v0  ;;  %v3010_v34 = vsel %vm3006_vm4, %v2990_v52, %v2993_v56  ;;  %v2898_v29 = vor.u32 %v2897_v23, %v2896_v7  ;;  %v5598_v4 = vpop.eup %5597 }
 0x394   :  { %v9327_v14 = vadd.f32 %v5863_v60, %v10991_v26  ;;  %v2887_v40 = vshll.u32 %v10751_v35, %v2884_v49  ;;  %v2890_v31 = vshll.u32 %v10794_v33, %v2884_v49  ;;  %v2893_v39 = vshll.u32 %v10795_v37, %v2884_v49  ;;  %v5600_v6 = vpop.eup %5599 }
 0x395   :  { %v2901_v44 = vor.u32 %v2900_v15, %v2899_v42  ;;  %v4699_v25 = vadd.s32 4294967294, %v2730_v3  ;;  %v3012_v0 = vsel %vm3008_vm5, %v9231_v18, %v3011_v59  ;;  %v10993_v56 = vand.u32 2147483647, %v9121_v38 }
 0x396   :  { %10992 = vst [vmem:[#allocation23_spill] sm:$0xff] %v9327_v14  ;;  %v4717_v32 = vadd.s32 4294967169, %v3186_v36  ;;  %vm2550_vm12 = vcmp.eq.s32.totalorder %v9274_v58, 0  ;;  %v9338_v23 = vor.u32 %v2888_v53, %v2887_v40  ;;  %v9340_v7 = vor.u32 %v2891_v12, %v2890_v31 }
 0x397   :  { %v2877_v52 = vand.u32 8388607, %v10993_v56  ;;  %v2895_v10 = vor.u32 %v2894_v13, %v2893_v39  ;;  %vm2905_vm13 = vcmp.lt.s32.totalorder %v9310_v47, 4  ;;  %v2554_v49 = vxor.u32 2147483648, %v5598_v4 }
 0x398   :  { %v3032_v3 = vadd.s32 1, %v9297_v16  ;;  %v2911_v15 = vsel %vm2905_vm13, %v2898_v29, 920167782  ;;  %v3081_v18 = vand.u32 2139095040, %v9327_v14  ;;  %v2551_v59 = vxor.u32 2147483648, %v5600_v6 }
 0x399   :  { %v2854_v36 = vsel %vm9291_vm11, %v8492_v28, %v2851_v55  ;;  %vm3031_vm6 = vc.u32 %v9304_v22, %v9296_v30  ;;  %v2915_v31 = vsel %vm2905_vm13, %v2901_v44, 1326507024  ;;  %v3013_v39 = vsel %vm3007_vm7, %v3010_v34, %v3012_v0 }
 0x39a   :  { %vm2902_vm8 = vcmp.lt.s32.totalorder %v9310_v47, 1  ;;  %vm2904_vm14 = vcmp.lt.s32.totalorder %v9310_v47, 3  ;;  %v3192_v53 = vadd.s32 1, %v4717_v32  ;;  %vm2664_vm0 = vcmp.lt.s32.totalorder %v8750_v63, 0 }
 0x39b   :  { %vm4700_vm3 = vcmp.lt.s32.totalorder %v4699_v25, 0  ;;  %v2878_v12 = vor.u32 8388608, %v2877_v52  ;;  %v2910_v13 = vsel %vm2902_vm8, %v9338_v23, %v9340_v7  ;;  %v2912_v44 = vsel %vm2904_vm14, %v2895_v10, %v2911_v15 }
 0x39c   :  { %v3033_v61 = vsel %vm3031_vm6, %v3032_v3, %v9297_v16  ;;  %v2914_v42 = vsel %vm2902_vm8, %v9340_v7, %v2895_v10  ;;  %v2916_v55 = vsel %vm2904_vm14, %v2898_v29, %v2915_v31  ;;  %v3082_v34 = vshrl.u32 %v3081_v18, 23 }
 0x39d   :  { %v2661_v40 = vsel %vm2650_vm1, nan, %v2660_v9  ;;  %vm2553_vm15 = vcmp.eq.s32.totalorder %v9274_v58, 2  ;;  %v3029_v0 = vmul.u32 %v9278_v62, %v3013_v39  ;;  %vm2903_vm2 = vcmp.lt.s32.totalorder %v9310_v47, 2 }
 0x39e   :  { %vm2546_vm4 = vweird.f32 %v10975_v5  ;;  %5601 = vcosq.f32 %v2854_v36  ;;  %v2733_v16 = vsel %vm4700_vm3, 0, %v4699_v25  ;;  %v2913_v56 = vsel %vm2903_vm2, %v2910_v13, %v2912_v44 }
 0x39f   :  { %vm3193_vm5 = vcmp.gt.s32.totalorder %v3192_v53, 0  ;;  %v2855_v29 = vsel %vm9291_vm11, 0, %v9284_v21  ;;  %v9382_v41 = vadd.s32 %v3033_v61, %v3029_v0  ;;  %v2917_v9 = vsel %vm2903_vm2, %v2914_v42, %v2916_v55 }
 0x3a0   :  { %v9386_v62 = vshll.u32 %v2878_v12, 8  ;;  %v2552_v52 = vsel %vm2550_vm12, %v5598_v4, %v2551_v59  ;;  %v2555_v32 = vsel %vm2553_vm15, %v2554_v49, %v5600_v6  ;;  %v2748_v25 = vsub.s32 4, %v9190_v1 }
 0x3a1   :  { %v4713_v3 = vadd.s32 4294967169, %v3082_v34  ;;  %v2738_v15 = vsub.s32 4294967266, %v2733_v16  ;;  %v3194_v21 = vsel %vm3193_vm5, %v3192_v53, 0  ;;  %v9398_v39 = vadd.f32 %v9268_v57, %v10994_v43 }
 0x3a2   :  { %v9392_v18 = vmul.u32.u64.low %v9386_v62, %v2913_v56  ;;  %v9393_v31 = vmul.u32.u64.high %v9386_v62, %v2913_v56, %v9392_v18  ;;  %v3727_v12 = vmul.f32 %v10804_v19, %v2661_v40  ;;  %vm2549_vm7 = vcmp.lt.s32.totalorder %v9274_v58, 2 }
 0x3a3   :  { %10995 = vst [vmem:[#allocation40_spill] sm:$0xff] %v9398_v39  ;;  %v9402_v13 = vmul.u32.u64.low %v9386_v62, %v2917_v9  ;;  %v9403_v4 = vmul.u32.u64.high %v9386_v62, %v2917_v9, %v9402_v13  ;;  %v2859_v6 = vadd.s32 3, %v2855_v29  ;;  %v2734_v49 = vsub.s32 32, %v2733_v16 }
 0x3a4   :  { %v3035_v59 = vadd.s32 536870912, %v9382_v41  ;;  %v2556_v44 = vsel %vm2549_vm7, %v2552_v52, %v2555_v32  ;;  %v2749_v53 = vsel %vm2664_vm0, %v2748_v25, %v9190_v1  ;;  %v3196_v61 = vand.u32 31, %v3194_v21 }
 0x3a5   :  { %v3088_v57 = vadd.s32 1, %v4713_v3  ;;  %5603 = vsinq.f32 %v2854_v36  ;;  %v2718_v42 = vadd.s32 %v9068_v46, %v9077_v2  ;;  %v2739_v55 = vadd.s32 127, %v2738_v15 }
 0x3a6   :  { %v2907_v34 = vsel %vm2905_vm13, %v2895_v10, 2102212464  ;;  %v9415_v58 = vadd.f32 %v3727_v12, %v8949_v54  ;;  %v10997_v40 = vand.u32 2147483647, %v8750_v63  ;;  %v9425_v1 = vmul.f32 %v5936_v11, %v10972_v48 }
 0x3a7   :  { %v2886_v46 = vshrl.u32 %v10751_v35, %v9264_v45  ;;  %v2557_v2 = vsel %vm2546_vm4, nan, %v2556_v44  ;;  %v2736_v10 = vshrl.u32 %v2718_v42, %v2734_v49  ;;  %v9433_v36 = vshrl.u32 %v3035_v59, 30 }
 0x3a8   :  { %10996 = vst [vmem:[#allocation49_spill] sm:$0xff] %v9415_v58  ;;  %vm9419_vm10 = vcmp.le.f32.partialorder %v10997_v40, 0.7853982  ;;  %11000 = vst [vmem:[#allocation38_spill] sm:$0xff] %v9425_v1  ;;  %v9435_v56 = vpop.eup %5601  ;;  %v2908_v48 = vsel %vm2904_vm14, %v9340_v7, %v2907_v34  ;;  %v9443_v45 = vsub.s32 32, %v3196_v61  ;;  %vm3089_vm11 = vcmp.gt.s32.totalorder %v3088_v57, 0 }
 0x3a9   :  { %v2751_v54 = vsel %vm9419_vm10, 0, %v2749_v53  ;;  %v2906_v29 = vsel %vm2902_vm8, %v2886_v46, %v9338_v23  ;;  %v9445_v5 = vand.u32 3, %v2859_v6  ;;  %v2740_v9 = vshll.u32 %v2739_v55, 23 }
 0x3aa   :  { %v2928_v52 = vadd.s32 1, %v9393_v31  ;;  %v10715_v32 = vand.u32 2147483647, %v9255_v50  ;;  %v9450_v25 = vmul.f32 %v10804_v19, %v2557_v2  ;;  %v2735_v3 = vshll.u32 %v9228_v51, %v2733_v16  ;;  %v11001_v16 = vld [vmem:[#allocation48_spill] sm:$0xff]  ;;  %v3770_v2 = vld [vmem:[#allocation2] sm:$0xff] }
 0x3ab   :  { %v9453_v23 = vadd.s32 3, %v2751_v54  ;;  %vm2927_vm1 = vc.u32 %v9403_v4, %v9392_v18  ;;  %v9460_v15 = vadd.s32 %v9296_v30, %v9304_v22  ;;  %v2909_v43 = vsel %vm2903_vm2, %v2906_v29, %v2908_v48 }
 0x3ac   :  { %v3090_v12 = vsel %vm3089_vm11, %v3088_v57, 0  ;;  %v9464_v13 = vor.u32 %v2736_v10, %v2735_v3  ;;  %v3037_v6 = vshll.u32 %v9433_v36, 30  ;;  %v3212_v51 = vshrl.u32 %v10957_v24, %v9443_v45 }
 0x3ad   :  { %v9471_v49 = vadd.f32 %v11001_v16, %v5863_v60  ;;  %v9473_v59 = vor.u32 4788187, %v2740_v9  ;;  %v2929_v30 = vsel %vm2927_vm1, %v2928_v52, %v9393_v31  ;;  %v3189_v22 = vand.u32 8388607, %v10715_v32 }
 0x3ae   :  { %v3209_v47 = vshrl.u32 %v10752_v27, %v9443_v45  ;;  %v2925_v44 = vmul.u32 %v9386_v62, %v2909_v43  ;;  %v9481_v53 = vshrl.u32 %v3194_v21, 5  ;;  %v3211_v57 = vshll.u32 %v10752_v27, %v3196_v61  ;;  %v3771_v62 = vld [vmem:[#allocation2 + $0x8] sm:$0xff] }
 0x3af   :  { %11002 = vst [vmem:[#allocation36_spill] sm:$0xff] %v9471_v49  ;;  %v3092_v42 = vand.u32 31, %v3090_v12  ;;  %v9484_v55 = vpop.eup %5603  ;;  %v3200_v34 = vshrl.u32 %v10794_v33, %v9443_v45  ;;  %v3203_v31 = vshrl.u32 %v10795_v37, %v9443_v45  ;;  %v3206_v40 = vshrl.u32 %v10958_v8, %v9443_v45 }
 0x3b0   :  { %v3208_v46 = vshll.u32 %v10958_v8, %v3196_v61  ;;  %v9494_v21 = vsub.s32 %v9382_v41, %v3037_v6  ;;  %v9496_v10 = vadd.s32 %v2929_v30, %v2925_v44  ;;  %v3213_v54 = vor.u32 %v3212_v51, %v3211_v57 }
 0x3b1   :  { %v3393_v29 = vand.u32 2139095040, %v9471_v49  ;;  %v3199_v48 = vshll.u32 %v10751_v35, %v3196_v61  ;;  %v3202_v9 = vshll.u32 %v10794_v33, %v3196_v61  ;;  %v3205_v52 = vshll.u32 %v10795_v37, %v3196_v61 }
 0x3b2   :  { %v3210_v3 = vor.u32 %v3209_v47, %v3208_v46  ;;  %v2744_v32 = vcvt.s32.f32 %v9464_v13  ;;  %v9504_v7 = vsub.s32 32, %v3092_v42  ;;  %v5284_v41 = vpack.c.bf16 %v3771_v62, %v3770_v2 }
 0x3b3   :  { %v9506_v6 = vor.u32 %v3200_v34, %v3199_v48  ;;  %v9508_v30 = vor.u32 %v3203_v31, %v3202_v9  ;;  %v9510_v51 = vor.u32 %v3206_v40, %v3205_v52  ;;  %vm3217_vm12 = vcmp.lt.s32.totalorder %v9481_v53, 4 }
 0x3b4   :  { %v2742_v44 = vand.u32 2147483647, %v9473_v59  ;;  %v3040_v61 = vsub.s32 0, %v9494_v21  ;;  %v3227_v47 = vsel %vm3217_vm12, %v3213_v54, 1326507024  ;;  %v3394_v57 = vshrl.u32 %v3393_v29, 23  ;;  %5285 = vmatprep.subr.bf16.mxu1 %v5284_v41 }
 0x3b5   :  { %v2931_v13 = vadd.s32 536870912, %v9496_v10  ;;  %v3190_v46 = vor.u32 8388608, %v3189_v22  ;;  %v3223_v34 = vsel %vm3217_vm12, %v3210_v3, 920167782  ;;  %5287 = vmatpush3.bf16.msra.mxu1 %v5284_v41  ;;  %vm3214_vm13 = vcmp.lt.s32.totalorder %v9481_v53, 1 }
 0x3b6   :  { %vm3215_vm6 = vcmp.lt.s32.totalorder %v9481_v53, 2  ;;  %vm3216_vm8 = vcmp.lt.s32.totalorder %v9481_v53, 3  ;;  %v3105_v59 = vshrl.u32 %v10752_v27, %v9504_v7  ;;  %v3222_v22 = vsel %vm3214_vm13, %v9506_v6, %v9508_v30 }
 0x3b7   :  { %v3226_v40 = vsel %vm3214_vm13, %v9508_v30, %v9510_v51  ;;  %v3228_v2 = vsel %vm3216_vm8, %v3210_v3, %v3227_v47  ;;  %v3108_v62 = vshrl.u32 %v10957_v24, %v9504_v7  ;;  %v3224_v54 = vsel %vm3216_vm8, %v9510_v51, %v3223_v34 }
 0x3b8   :  { %v9541_v29 = vshrl.u32 %v3090_v12, 5  ;;  %v3104_v48 = vshll.u32 %v10958_v8, %v3092_v42  ;;  %v4725_v9 = vadd.s32 4294967169, %v3394_v57  ;;  %vm2865_vm14 = vcmp.eq.s32.totalorder %v9445_v5, 2 }
 0x3b9   :  { %v3096_v52 = vshrl.u32 %v10794_v33, %v9504_v7  ;;  %v3099_v3 = vshrl.u32 %v10795_v37, %v9504_v7  ;;  %v3102_v41 = vshrl.u32 %v10958_v8, %v9504_v7  ;;  %v3107_v47 = vshll.u32 %v10752_v27, %v3092_v42 }
 0x3ba   :  { %v4710_v34 = vmin.u32 %v3040_v61, %v9494_v21  ;;  %v3229_v12 = vsel %vm3215_vm6, %v3226_v40, %v3228_v2  ;;  %v9555_v43 = vshll.u32 %v3190_v46, 8  ;;  %v3106_v57 = vor.u32 %v3105_v59, %v3104_v48 }
 0x3bb   :  { %vm2862_vm3 = vcmp.eq.s32.totalorder %v9445_v5, 0  ;;  %v3095_v31 = vshll.u32 %v10751_v35, %v3092_v42  ;;  %v3098_v16 = vshll.u32 %v10794_v33, %v3092_v42  ;;  %v3101_v58 = vshll.u32 %v10795_v37, %v3092_v42 }
 0x3bc   :  { %v3109_v1 = vor.u32 %v3108_v62, %v3107_v47  ;;  %v9561_v39 = vshrl.u32 %v2931_v13, 30  ;;  %v3225_v61 = vsel %vm3215_vm6, %v3222_v22, %v3224_v54  ;;  %v11003_v17 = vand.u32 2147483647, %v9327_v14 }
 0x3bd   :  { %v3400_v46 = vadd.s32 1, %v4725_v9  ;;  %v9567_v2 = vor.u32 %v3096_v52, %v3095_v31  ;;  %v9569_v59 = vor.u32 %v3099_v3, %v3098_v16  ;;  %v3103_v48 = vor.u32 %v3102_v41, %v3101_v58  ;;  %v11006_v9 = vld [vmem:[#allocation50_spill] sm:$0xff] }
 0x3be   :  { %v3085_v40 = vand.u32 8388607, %v11003_v17  ;;  %vm3113_vm15 = vcmp.lt.s32.totalorder %v9541_v29, 4  ;;  %v2745_v50 = vmul.f32 %v2744_v32, %v2742_v44  ;;  %vm2976_vm2 = vcmp.lt.s32.totalorder %v9013_v20, 0 }
 0x3bf   :  { %v9573_v42 = vmul.u32.u64.low %v9555_v43, %v3229_v12  ;;  %v9574_v62 = vmul.u32.u64.high %v9555_v43, %v3229_v12, %v9573_v42  ;;  %v3119_v13 = vsel %vm3113_vm15, %v3106_v57, 920167782  ;;  %v3042_v22 = vclz %v4710_v34 }
 0x3c0   :  { %v9580_v17 = vmul.u32.u64.low %v9555_v43, %v3225_v61  ;;  %v9581_v31 = vmul.u32.u64.high %v9555_v43, %v3225_v61, %v9580_v17  ;;  %v3123_v58 = vsel %vm3113_vm15, %v3109_v1, 1326507024  ;;  %v2933_v32 = vshll.u32 %v9561_v39, 30 }
 0x3c1   :  { %11004 = vst [vmem:[#allocation43_spill] sm:$0xff] %v9574_v62  ;;  %vm3110_vm4 = vcmp.lt.s32.totalorder %v9541_v29, 1  ;;  %vm3112_vm5 = vcmp.lt.s32.totalorder %v9541_v29, 3  ;;  %vm3401_vm7 = vcmp.gt.s32.totalorder %v3400_v46, 0  ;;  %v3086_v16 = vor.u32 8388608, %v3085_v40 }
 0x3c2   :  { %11005 = vst [vmem:[#allocation39_spill] sm:$0xff] %v9580_v17  ;;  %v3118_v44 = vsel %vm3110_vm4, %v9567_v2, %v9569_v59  ;;  %v3120_v54 = vsel %vm3112_vm5, %v3103_v48, %v3119_v13  ;;  %v9597_v52 = vadd.f32 %v5863_v60, %v11006_v9  ;;  %vm2861_vm11 = vcmp.lt.s32.totalorder %v9445_v5, 2 }
 0x3c3   :  { %v11008_v1 = vxor.u32 2147483648, %v9435_v56  ;;  %v2746_v41 = vxor.u32 2147483648, %v2745_v50  ;;  %v3122_v47 = vsel %vm3110_vm4, %v9569_v59, %v3103_v48  ;;  %v3124_v34 = vsel %vm3112_vm5, %v3106_v57, %v3123_v58 }
 0x3c4   :  { %11007 = vst [vmem:[#allocation33_spill] sm:$0xff] %v9597_v52  ;;  %v11009_v12 = vand.u32 2147483647, %v9013_v20  ;;  %v4711_v40 = vadd.s32 4294967294, %v3042_v22  ;;  %v3219_v42 = vsel %vm3217_vm12, %v9510_v51, 2102212464  ;;  %v9631_v9 = vsub.s32 %v9496_v10, %v2933_v32 }
 0x3c5   :  { %v2867_v3 = vsel %vm2865_vm14, %v11008_v1, %v9484_v55  ;;  %vm3111_vm14 = vcmp.lt.s32.totalorder %v9541_v29, 2  ;;  %v3402_v13 = vsel %vm3401_vm7, %v3400_v46, 0  ;;  %v11012_v1 = vxor.u32 2147483648, %v9484_v55 }
 0x3c6   :  { %vm9612_vm1 = vcmp.le.f32.partialorder %v11009_v12, 0.7853982  ;;  %v3060_v58 = vsub.s32 4, %v9433_v36  ;;  %v3198_v12 = vshrl.u32 %v10751_v35, %v9443_v45  ;;  %v3121_v22 = vsel %vm3111_vm14, %v3118_v44, %v3120_v54 }
 0x3c7   :  { %v2864_v57 = vsel %vm2862_vm3, %v9435_v56, %v11012_v1  ;;  %v3125_v51 = vsel %vm3111_vm14, %v3122_v47, %v3124_v34  ;;  %v9635_v46 = vshll.u32 %v3086_v16, 8  ;;  %v3289_v55 = vand.u32 2139095040, %v9597_v52 }
 0x3c8   :  { %v2747_v56 = vsel %vm2664_vm0, %v2746_v41, %v2745_v50  ;;  %v3218_v45 = vsel %vm3214_vm13, %v3198_v12, %v9506_v6  ;;  %v3220_v44 = vsel %vm3216_vm8, %v9508_v30, %v3219_v42  ;;  %v3404_v10 = vand.u32 31, %v3402_v13 }
 0x3c9   :  { %vm4712_vm12 = vcmp.lt.s32.totalorder %v4711_v40, 0  ;;  %v3240_v32 = vadd.s32 1, %v9581_v31  ;;  %v9648_v16 = vmul.u32.u64.low %v9635_v46, %v3121_v22  ;;  %v9649_v54 = vmul.u32.u64.high %v9635_v46, %v3121_v22, %v9648_v16 }
 0x3ca   :  { %v9655_v50 = vsel %vm2976_vm2, %v3060_v58, %v9433_v36  ;;  %vm3239_vm0 = vc.u32 %v9574_v62, %v9580_v17  ;;  %v9660_v6 = vmul.u32.u64.low %v9635_v46, %v3125_v51  ;;  %v9661_v30 = vmul.u32.u64.high %v9635_v46, %v3125_v51, %v9660_v6 }
 0x3cb   :  { %11013 = vst [vmem:[#allocation22_spill] sm:$0xff] %v9648_v16  ;;  %v2936_v41 = vsub.s32 0, %v9631_v9  ;;  %v3221_v47 = vsel %vm3215_vm6, %v3218_v45, %v3220_v44  ;;  %v3115_v34 = vsel %vm3113_vm15, %v3103_v48, 2102212464  ;;  %v3290_v42 = vshrl.u32 %v3289_v55, 23 }
 0x3cc   :  { %11014 = vst [vmem:[#allocation44_spill] sm:$0xff] %v9661_v30  ;;  %v9671_v36 = vsel %vm9419_vm10, %v8750_v63, %v2747_v56  ;;  %v9673_v1 = vsel %vm4712_vm12, 0, %v4711_v40  ;;  %v3094_v58 = vshrl.u32 %v10751_v35, %v9504_v7  ;;  %v9677_v12 = vsub.s32 32, %v3404_v10 }
 0x3cd   :  { %v9681_v53 = vsel %vm2861_vm11, %v2864_v57, %v2867_v3  ;;  %v3241_v22 = vsel %vm3239_vm0, %v3240_v32, %v9581_v31  ;;  %v10718_v48 = vand.u32 2147483647, %v9471_v49  ;;  %v4721_v51 = vadd.s32 4294967169, %v3290_v42 }
 0x3ce   :  { %v3237_v40 = vmul.u32 %v9555_v43, %v3221_v47  ;;  %v3114_v7 = vsel %vm3110_vm4, %v3094_v58, %v9567_v2  ;;  %v3116_v5 = vsel %vm3112_vm5, %v9569_v59, %v3115_v34  ;;  %5605 = vcosq.f32 %v9671_v36 }
 0x3cf   :  { %v9699_v57 = vmin.u32 %v2936_v41, %v9631_v9  ;;  %v3408_v43 = vshrl.u32 %v10794_v33, %v9677_v12  ;;  %v3411_v2 = vshrl.u32 %v10795_v37, %v9677_v12  ;;  %v3296_v56 = vadd.s32 1, %v4721_v51 }
 0x3d0   :  { %v9701_v55 = vadd.s32 %v3241_v22, %v3237_v40  ;;  %v3117_v59 = vsel %vm3111_vm14, %v3114_v7, %v3116_v5  ;;  %v3136_v45 = vadd.s32 1, %v9649_v54  ;;  %v3397_v44 = vand.u32 8388607, %v10718_v48  ;;  %v11015_v7 = vld [vmem:[#allocation21_spill] sm:$0xff] }
 0x3d1   :  { %v3417_v32 = vshrl.u32 %v10752_v27, %v9677_v12  ;;  %vm3135_vm10 = vc.u32 %v9661_v30, %v9648_v16  ;;  %v3407_v6 = vshll.u32 %v10751_v35, %v3404_v10  ;;  %v3410_v41 = vshll.u32 %v10794_v33, %v3404_v10 }
 0x3d2   :  { %v3420_v47 = vshrl.u32 %v10957_v24, %v9677_v12  ;;  %v9720_v29 = vshrl.u32 %v3402_v13, 5  ;;  %v3414_v34 = vshrl.u32 %v10958_v8, %v9677_v12  ;;  %v3416_v42 = vshll.u32 %v10958_v8, %v3404_v10 }
 0x3d3   :  { %vm3297_vm13 = vcmp.gt.s32.totalorder %v3296_v56, 0  ;;  %v9725_v58 = vor.u32 %v3408_v43, %v3407_v6  ;;  %v9727_v22 = vor.u32 %v3411_v2, %v3410_v41  ;;  %v3419_v51 = vshll.u32 %v10752_v27, %v3404_v10 }
 0x3d4   :  { %v3298_v40 = vsel %vm3297_vm13, %v3296_v56, 0  ;;  %v3243_v5 = vadd.s32 536870912, %v9701_v55  ;;  %v3418_v48 = vor.u32 %v3417_v32, %v3416_v42  ;;  %v3133_v3 = vmul.u32 %v9635_v46, %v3117_v59 }
 0x3d5   :  { %v3300_v13 = vand.u32 31, %v3298_v40  ;;  %v3398_v0 = vor.u32 8388608, %v3397_v44  ;;  %v3413_v31 = vshll.u32 %v10795_v37, %v3404_v10  ;;  %v3421_v49 = vor.u32 %v3420_v47, %v3419_v51 }
 0x3d6   :  { %v3137_v43 = vsel %vm3135_vm10, %v3136_v45, %v9649_v54  ;;  %vm3422_vm6 = vcmp.lt.s32.totalorder %v9720_v29, 1  ;;  %v10729_v2 = vand.u32 2147483647, %v9597_v52  ;;  %vm3424_vm8 = vcmp.lt.s32.totalorder %v9720_v29, 3 }
 0x3d7   :  { %v9740_v56 = vsub.s32 32, %v3300_v13  ;;  %v9742_v6 = vor.u32 %v3414_v34, %v3413_v31  ;;  %vm3425_vm3 = vcmp.lt.s32.totalorder %v9720_v29, 4  ;;  %v3430_v46 = vsel %vm3422_vm6, %v9725_v58, %v9727_v22 }
 0x3d8   :  { %v9750_v10 = vpop.eup %5605  ;;  %v3431_v54 = vsel %vm3425_vm3, %v3418_v48, 920167782  ;;  %v3435_v44 = vsel %vm3425_vm3, %v3421_v49, 1326507024  ;;  %v3303_v32 = vshll.u32 %v10751_v35, %v3300_v13  ;;  %v3306_v41 = vshll.u32 %v10794_v33, %v3300_v13 }
 0x3d9   :  { %v3304_v59 = vshrl.u32 %v10794_v33, %v9740_v56  ;;  %v3307_v31 = vshrl.u32 %v10795_v37, %v9740_v56  ;;  %v3310_v45 = vshrl.u32 %v10958_v8, %v9740_v56  ;;  %v3313_v47 = vshrl.u32 %v10752_v27, %v9740_v56 }
 0x3da   :  { %v3293_v34 = vand.u32 8388607, %v10729_v2  ;;  %v3309_v42 = vshll.u32 %v10795_v37, %v3300_v13  ;;  %v3312_v51 = vshll.u32 %v10958_v8, %v3300_v13  ;;  %v9772_v14 = vadd.f32 %v11015_v7, %v5863_v60 }
 0x3db   :  { %v3432_v49 = vsel %vm3424_vm8, %v9742_v6, %v3431_v54  ;;  %v9777_v63 = vshrl.u32 %v3298_v40, 5  ;;  %v9779_v19 = vor.u32 %v3304_v59, %v3303_v32  ;;  %v9781_v16 = vor.u32 %v3307_v31, %v3306_v41 }
 0x3dc   :  { %11016 = vst [vmem:[#allocation32_spill] sm:$0xff] %v9772_v14  ;;  %v3311_v52 = vor.u32 %v3310_v45, %v3309_v42  ;;  %v3314_v2 = vor.u32 %v3313_v47, %v3312_v51  ;;  %v3315_v30 = vshll.u32 %v10752_v27, %v3300_v13  ;;  %v3316_v17 = vshrl.u32 %v10957_v24, %v9740_v56 }
 0x3dd   :  { %vm2858_vm15 = vweird.f32 %v8492_v28  ;;  %v9787_v7 = vshrl.u32 %v3243_v5, 30  ;;  %v9789_v62 = vadd.s32 %v3137_v43, %v3133_v3  ;;  %vm3423_vm4 = vcmp.lt.s32.totalorder %v9720_v29, 2 }
 0x3de   :  { %v3434_v40 = vsel %vm3422_vm6, %v9727_v22, %v9742_v6  ;;  %v3436_v54 = vsel %vm3424_vm8, %v3418_v48, %v3435_v44  ;;  %v3294_v13 = vor.u32 8388608, %v3293_v34  ;;  %v3317_v59 = vor.u32 %v3316_v17, %v3315_v30 }
 0x3df   :  { %v3601_v31 = vand.u32 2139095040, %v9772_v14  ;;  %v3433_v5 = vsel %vm3423_vm4, %v3430_v46, %v3432_v49  ;;  %v9801_v45 = vshll.u32 %v3398_v0, 8  ;;  %vm3318_vm5 = vcmp.lt.s32.totalorder %v9777_v63, 1 }
 0x3e0   :  { %vm3321_vm7 = vcmp.lt.s32.totalorder %v9777_v63, 4  ;;  %vm3320_vm11 = vcmp.lt.s32.totalorder %v9777_v63, 3  ;;  %v3326_v48 = vsel %vm3318_vm5, %v9779_v19, %v9781_v16  ;;  %v3330_v30 = vsel %vm3318_vm5, %v9781_v16, %v3311_v52 }
 0x3e1   :  { %v3327_v17 = vsel %vm3321_vm7, %v3314_v2, 920167782  ;;  %v3437_v0 = vsel %vm3423_vm4, %v3434_v40, %v3436_v54  ;;  %vm3319_vm14 = vcmp.lt.s32.totalorder %v9777_v63, 2  ;;  %v3331_v43 = vsel %vm3321_vm7, %v3317_v59, 1326507024 }
 0x3e2   :  { %v3328_v3 = vsel %vm3320_vm11, %v3311_v52, %v3327_v17  ;;  %v3332_v44 = vsel %vm3320_vm11, %v3314_v2, %v3331_v43  ;;  %v9826_v32 = vshll.u32 %v3294_v13, 8  ;;  %v3602_v41 = vshrl.u32 %v3601_v31, 23 }
 0x3e3   :  { %v3329_v46 = vsel %vm3319_vm14, %v3326_v48, %v3328_v3  ;;  %v3139_v47 = vadd.s32 536870912, %v9789_v62  ;;  %v9830_v34 = vmul.u32.u64.low %v9801_v45, %v3433_v5  ;;  %v9831_v42 = vmul.u32.u64.high %v9801_v45, %v3433_v5, %v9830_v34  ;;  %v11017_v48 = vld [vmem:[#allocation34_spill] sm:$0xff] }
 0x3e4   :  { %v3333_v51 = vsel %vm3319_vm14, %v3330_v30, %v3332_v44  ;;  %v9837_v49 = vmul.u32.u64.low %v9801_v45, %v3437_v0  ;;  %v9838_v40 = vmul.u32.u64.high %v9801_v45, %v3437_v0, %v9837_v49  ;;  %v3245_v13 = vshll.u32 %v9787_v7, 30 }
 0x3e5   :  { %v9841_v54 = vmul.u32.u64.low %v9826_v32, %v3329_v46  ;;  %v9842_v2 = vmul.u32.u64.high %v9826_v32, %v3329_v46, %v9841_v54  ;;  %v9847_v59 = vmul.u32.u64.low %v9826_v32, %v3333_v51  ;;  %v9848_v31 = vmul.u32.u64.high %v9826_v32, %v3333_v51, %v9847_v59 }
 0x3e6   :  { %v4733_v5 = vadd.s32 4294967169, %v3602_v41  ;;  %v9852_v17 = vadd.f32 %v9450_v25, %v11017_v48  ;;  %v9857_v30 = vsel %vm2858_vm15, nan, %v9681_v53  ;;  %v9860_v0 = vand.u32 3, %v9453_v23 }
 0x3e7   :  { %v9864_v3 = vmul.f32 %v5936_v11, %v10991_v26  ;;  %v3047_v43 = vshll.u32 %v9494_v21, %v9673_v1  ;;  %v11020_v46 = vsub.s32 32, %v9673_v1  ;;  %v11021_v28 = vsel %vm9612_vm1, 0, %v9655_v50  ;;  %v3785_v11 = vld [vmem:[#allocation2 + $0x78] sm:$0xff] }
 0x3e8   :  { %11018 = vst [vmem:[#allocation34_spill] sm:$0xff] %v9852_v17  ;;  %v9875_v53 = vadd.s32 3, %v11021_v28  ;;  %v3427_v23 = vsel %vm3425_vm3, %v9742_v6, 2102212464  ;;  %v9880_v44 = vshrl.u32 %v3139_v47, 30  ;;  %v3406_v26 = vshrl.u32 %v10751_v35, %v9677_v12 }
 0x3e9   :  { %11019 = vst [vmem:[#allocation51_spill] sm:$0xff] %v9864_v3  ;;  %v3048_v25 = vshrl.u32 %v9460_v15, %v11020_v46  ;;  %v3323_v21 = vsel %vm3321_vm7, %v3311_v52, 2102212464  ;;  %v3608_v41 = vadd.s32 1, %v4733_v5  ;;  %v11022_v15 = vsub.s32 4294967266, %v9673_v1 }
 0x3ea   :  { %v11023_v50 = vclz %v9699_v57  ;;  %v9891_v59 = vsub.s32 %v9701_v55, %v3245_v13  ;;  %v3302_v6 = vshrl.u32 %v10751_v35, %v9740_v56  ;;  %v3426_v12 = vsel %vm3422_vm6, %v3406_v26, %v9725_v58 }
 0x3eb   :  { %v3051_v51 = vadd.s32 127, %v11022_v15  ;;  %v3428_v52 = vsel %vm3424_vm8, %v9727_v22, %v3427_v23  ;;  %v10733_v1 = vand.u32 2147483647, %v9772_v14  ;;  %vm3609_vm12 = vcmp.gt.s32.totalorder %v3608_v41, 0 }
 0x3ec   :  { %v4707_v49 = vadd.s32 4294967294, %v11023_v50  ;;  %v3448_v57 = vadd.s32 1, %v9831_v42  ;;  %v3322_v55 = vsel %vm3318_vm5, %v3302_v6, %v9779_v19  ;;  %v3324_v56 = vsel %vm3320_vm11, %v9781_v16, %v3323_v21 }
 0x3ed   :  { %v3610_v47 = vsel %vm3609_vm12, %v3608_v41, 0  ;;  %v3141_v58 = vshll.u32 %v9880_v44, 30  ;;  %vm3447_vm0 = vc.u32 %v9838_v40, %v9830_v34  ;;  %v3344_v22 = vadd.s32 1, %v9842_v2 }
 0x3ee   :  { %v3612_v13 = vand.u32 31, %v3610_v47  ;;  %5607 = vsinq.f32 %v9671_v36  ;;  %v3429_v19 = vsel %vm3423_vm4, %v3426_v12, %v3428_v52  ;;  %vm3343_vm10 = vc.u32 %v9848_v31, %v9841_v54 }
 0x3ef   :  { %v9919_v16 = vor.u32 %v3048_v25, %v3047_v43  ;;  %v3325_v48 = vsel %vm3319_vm14, %v3322_v55, %v3324_v56  ;;  %v3605_v46 = vand.u32 8388607, %v10733_v1  ;;  %v3052_v23 = vshll.u32 %v3051_v51, 23  ;;  %v11024_v56 = vld [vmem:[#allocation30_spill] sm:$0xff]  ;;  %v3772_v1 = vld [vmem:[#allocation2 + $0x10] sm:$0xff] }
 0x3f0   :  { %v3613_v28 = vsub.s32 32, %v3612_v13  ;;  %vm4708_vm13 = vcmp.lt.s32.totalorder %v4707_v49, 0  ;;  %v3248_v36 = vsub.s32 0, %v9891_v59  ;;  %v3449_v26 = vsel %vm3447_vm0, %v3448_v57, %v9831_v42 }
 0x3f1   :  { %v9928_v29 = vsub.s32 %v9789_v62, %v3141_v58  ;;  %v3445_v21 = vmul.u32 %v9801_v45, %v3429_v19  ;;  %v3345_v43 = vsel %vm3343_vm10, %v3344_v22, %v9842_v2  ;;  %v3341_v25 = vmul.u32 %v9826_v32, %v3325_v48 }
 0x3f2   :  { %v3616_v63 = vshrl.u32 %v10794_v33, %v3613_v28  ;;  %v3619_v41 = vshrl.u32 %v10795_v37, %v3613_v28  ;;  %v3622_v15 = vshrl.u32 %v10958_v8, %v3613_v28  ;;  %v3625_v51 = vshrl.u32 %v10752_v27, %v3613_v28 }
 0x3f3   :  { %v9937_v50 = vadd.s32 %v3449_v26, %v3445_v21  ;;  %v3606_v42 = vor.u32 8388608, %v3605_v46  ;;  %v3615_v62 = vshll.u32 %v10751_v35, %v3612_v13  ;;  %v3618_v6 = vshll.u32 %v10794_v33, %v3612_v13 }
 0x3f4   :  { %v9941_v45 = vadd.s32 %v3345_v43, %v3341_v25  ;;  %v3611_v2 = vshrl.u32 %v3610_v47, 5  ;;  %v3621_v12 = vshll.u32 %v10795_v37, %v3612_v13  ;;  %v3624_v32 = vshll.u32 %v10958_v8, %v3612_v13 }
 0x3f5   :  { %v3053_v52 = vor.u32 4788187, %v3052_v23  ;;  %v3617_v57 = vor.u32 %v3616_v63, %v3615_v62  ;;  %v3620_v55 = vor.u32 %v3619_v41, %v3618_v6  ;;  %v9947_v58 = vadd.f32 %v5863_v60, %v11024_v56 }
 0x3f6   :  { %v3623_v22 = vor.u32 %v3622_v15, %v3621_v12  ;;  %v3626_v19 = vor.u32 %v3625_v51, %v3624_v32  ;;  %v3627_v48 = vshll.u32 %v10752_v27, %v3612_v13  ;;  %v3628_v46 = vshrl.u32 %v10957_v24, %v3613_v28 }
 0x3f7   :  { %v9952_v26 = vsel %vm4708_vm13, 0, %v4707_v49  ;;  %v9955_v47 = vmin.u32 %v3248_v36, %v9891_v59  ;;  %v3144_v23 = vsub.s32 0, %v9928_v29  ;;  %v3451_v21 = vadd.s32 536870912, %v9937_v50 }
 0x3f8   :  { %v9959_v43 = vpop.eup %5607  ;;  %v3347_v60 = vadd.s32 536870912, %v9941_v45  ;;  %v3629_v63 = vor.u32 %v3628_v46, %v3627_v48  ;;  %vm3630_vm6 = vcmp.lt.s32.totalorder %v3611_v2, 1  ;;  %v9962_v25 = vshll.u32 %v3606_v42, 8 }
 0x3f9   :  { %vm3632_vm8 = vcmp.lt.s32.totalorder %v3611_v2, 3  ;;  %vm3633_vm3 = vcmp.lt.s32.totalorder %v3611_v2, 4  ;;  %v3638_v49 = vsel %vm3630_vm6, %v3617_v57, %v3620_v55  ;;  %v3497_v13 = vand.u32 2139095040, %v9947_v58 }
 0x3fa   :  { %v3635_v36 = vsel %vm3633_vm3, %v3623_v22, 2102212464  ;;  %v3639_v41 = vsel %vm3633_vm3, %v3626_v19, 920167782  ;;  %v3642_v15 = vsel %vm3630_vm6, %v3620_v55, %v3623_v22  ;;  %v3643_v51 = vsel %vm3633_vm3, %v3629_v63, 1326507024 }
 0x3fb   :  { %vm2761_vm15 = vcmp.eq.s32.totalorder %v9860_v0, 2  ;;  %v3614_v62 = vshrl.u32 %v10751_v35, %v3613_v28  ;;  %vm3631_vm4 = vcmp.lt.s32.totalorder %v3611_v2, 2  ;;  %v3640_v6 = vsel %vm3632_vm8, %v3623_v22, %v3639_v41  ;;  %v3773_v22 = vld [vmem:[#allocation2 + $0x18] sm:$0xff]  ;;  %v3775_v41 = vld [vmem:[#allocation2 + $0x28] sm:$0xff] }
 0x3fc   :  { %v3644_v42 = vsel %vm3632_vm8, %v3626_v19, %v3643_v51  ;;  %vm2758_vm5 = vcmp.eq.s32.totalorder %v9860_v0, 0  ;;  %v3054_v12 = vand.u32 2147483647, %v3053_v52  ;;  %v2946_v32 = vsub.s32 4294967266, %v9952_v26  ;;  %v3774_v19 = vld [vmem:[#allocation2 + $0x20] sm:$0xff] }
 0x3fd   :  { %v3641_v48 = vsel %vm3631_vm4, %v3638_v49, %v3640_v6  ;;  %v3645_v46 = vsel %vm3631_vm4, %v3642_v15, %v3644_v42  ;;  %v3634_v63 = vsel %vm3630_vm6, %v3614_v62, %v3617_v57  ;;  %v3636_v5 = vsel %vm3632_vm8, %v3620_v55, %v3635_v36 }
 0x3fe   :  { %v9978_v28 = vmul.u32.u64.low %v9962_v25, %v3645_v46  ;;  %v9979_v56 = vmul.u32.u64.high %v9962_v25, %v3645_v46, %v9978_v28  ;;  %v9981_v51 = vshrl.u32 %v3347_v60, 30  ;;  %v3498_v49 = vshrl.u32 %v3497_v13, 23 }
 0x3ff   :  { %v9984_v52 = vmul.u32.u64.low %v9962_v25, %v3641_v48  ;;  %v9985_v3 = vmul.u32.u64.high %v9962_v25, %v3641_v48, %v9984_v52  ;;  %v3056_v15 = vcvt.s32.f32 %v9919_v16  ;;  %v3250_v57 = vclz %v9955_v47  ;;  %v3776_v47 = vld [vmem:[#allocation2 + $0x30] sm:$0xff]  ;;  %v3777_v28 = vld [vmem:[#allocation2 + $0x38] sm:$0xff] }
 0x400   :  { %v4714_v55 = vmin.u32 %v3144_v23, %v9928_v29  ;;  %v9991_v36 = vshrl.u32 %v3451_v21, 30  ;;  %vm2757_vm7 = vcmp.lt.s32.totalorder %v9860_v0, 2  ;;  %v3637_v62 = vsel %vm3631_vm4, %v3634_v63, %v3636_v5 }
 0x401   :  { %v4729_v60 = vadd.s32 4294967169, %v3498_v49  ;;  %v5288_v6 = vpack.c.bf16 %v3773_v22, %v3772_v1  ;;  %v5292_v42 = vpack.c.bf16 %v3775_v41, %v3774_v19  ;;  %v2759_v48 = vxor.u32 2147483648, %v9959_v43 }
 0x402   :  { %v3057_v46 = vmul.f32 %v3056_v15, %v3054_v12  ;;  %v2926_v13 = vadd.s32 %v9392_v18, %v9403_v4  ;;  %v2942_v16 = vsub.s32 32, %v9952_v26  ;;  %v2947_v23 = vadd.s32 127, %v2946_v32 }
 0x403   :  { %v3349_v21 = vshll.u32 %v9981_v51, 30  ;;  %vm3655_vm11 = vc.u32 %v9979_v56, %v9984_v52  ;;  %v3656_v5 = vadd.s32 1, %v9985_v3  ;;  %5289 = vmatprep.subr.bf16.mxu1 %v5288_v6  ;;  %v3146_v1 = vclz %v4714_v55  ;;  %v3778_v55 = vld [vmem:[#allocation2 + $0x40] sm:$0xff] }
 0x404   :  { %v3453_v2 = vshll.u32 %v9991_v36, 30  ;;  %v3653_v12 = vmul.u32 %v9962_v25, %v3637_v62  ;;  %v3504_v63 = vadd.s32 1, %v4729_v60  ;;  %5291 = vmatpush3.bf16.msra.mxu1 %v5288_v6  ;;  %v11025_v18 = vxor.u32 2147483648, %v9750_v10  ;;  %v3779_v62 = vld [vmem:[#allocation2 + $0x48] sm:$0xff] }
 0x405   :  { %v4719_v32 = vadd.s32 4294967294, %v3250_v57  ;;  %v3657_v22 = vsel %vm3655_vm11, %v3656_v5, %v9985_v3  ;;  %5293 = vmatprep.subr.bf16.mxu1 %v5292_v42  ;;  %v5296_v19 = vpack.c.bf16 %v3777_v28, %v3776_v47  ;;  %v2760_v41 = vsel %vm2758_vm5, %v9750_v10, %v2759_v48 }
 0x406   :  { %v2763_v4 = vsel %vm2761_vm15, %v11025_v18, %v9959_v43  ;;  %v3058_v49 = vxor.u32 2147483648, %v3057_v46  ;;  %v2944_v15 = vshrl.u32 %v2926_v13, %v2942_v16  ;;  %v3658_v25 = vadd.s32 %v3657_v22, %v3653_v12  ;;  %v3782_v22 = vld [vmem:[#allocation2 + $0x60] sm:$0xff] }
 0x407   :  { %v2948_v60 = vshll.u32 %v2947_v23, 23  ;;  %v10015_v6 = vsub.s32 %v9941_v45, %v3349_v21  ;;  %v10734_v43 = vand.u32 2147483647, %v9947_v58  ;;  %vm3505_vm14 = vcmp.gt.s32.totalorder %v3504_v63, 0  ;;  %v3781_v21 = vld [vmem:[#allocation2 + $0x58] sm:$0xff] }
 0x408   :  { %v4715_v57 = vadd.s32 4294967294, %v3146_v1  ;;  %v10019_v3 = vsub.s32 %v9937_v50, %v3453_v2  ;;  %v3659_v47 = vadd.s32 536870912, %v3658_v25  ;;  %v3506_v28 = vsel %vm3505_vm14, %v3504_v63, 0  ;;  %5295 = vmatpush3.bf16.msra.mxu1 %v5292_v42  ;;  %v3780_v42 = vld [vmem:[#allocation2 + $0x50] sm:$0xff] }
 0x409   :  { %v2943_v10 = vshll.u32 %v9631_v9, %v9952_v26  ;;  %vm4720_vm12 = vcmp.lt.s32.totalorder %v4719_v32, 0  ;;  %v3508_v48 = vand.u32 31, %v3506_v28  ;;  %5297 = vmatprep.subr.bf16.mxu1 %v5296_v19  ;;  %v5300_v13 = vpack.c.bf16 %v3779_v62, %v3778_v55  ;;  %v3784_v50 = vld [vmem:[#allocation2 + $0x70] sm:$0xff] }
 0x40a   :  { %v10025_v45 = vsel %vm2757_vm7, %v2760_v41, %v2763_v4  ;;  %v10029_v16 = vsel %vm2976_vm2, %v3058_v49, %v3057_v46  ;;  %v10032_v23 = vshrl.u32 %v3659_v47, 30  ;;  %v3352_v9 = vsub.s32 0, %v10015_v6  ;;  %v3783_v41 = vld [vmem:[#allocation2 + $0x68] sm:$0xff] }
 0x40b   :  { %v10034_v5 = vor.u32 %v2944_v15, %v2943_v10  ;;  %v3501_v26 = vand.u32 8388607, %v10734_v43  ;;  %v3509_v0 = vsub.s32 32, %v3508_v48  ;;  %v10039_v1 = vor.u32 4788187, %v2948_v60 }
 0x40c   :  { %11026 = vst [vmem:[#allocation52_spill] sm:$0xff] %v10032_v23  ;;  %v10041_v2 = vsel %vm4720_vm12, 0, %v4719_v32  ;;  %vm4716_vm2 = vcmp.lt.s32.totalorder %v4715_v57, 0  ;;  %v3456_v46 = vsub.s32 0, %v10019_v3  ;;  %5299 = vmatpush3.bf16.msra.mxu1 %v5296_v19  ;;  %v5304_v4 = vpack.c.bf16 %v3781_v21, %v3780_v42 }
 0x40d   :  { %v3512_v12 = vshrl.u32 %v10794_v33, %v3509_v0  ;;  %v3515_v63 = vshrl.u32 %v10795_v37, %v3509_v0  ;;  %v3518_v18 = vshrl.u32 %v10958_v8, %v3509_v0  ;;  %5301 = vmatprep.subr.bf16.mxu1 %v5300_v13  ;;  %v3661_v49 = vshll.u32 %v10032_v23, 30 }
 0x40e   :  { %v3511_v15 = vshll.u32 %v10751_v35, %v3508_v48  ;;  %v3514_v32 = vshll.u32 %v10794_v33, %v3508_v48  ;;  %v3521_v55 = vshrl.u32 %v10752_v27, %v3509_v0  ;;  %v4722_v19 = vmin.u32 %v3352_v9, %v10015_v6 }
 0x40f   :  { %v3502_v62 = vor.u32 8388608, %v3501_v26  ;;  %v3517_v60 = vshll.u32 %v10795_v37, %v3508_v48  ;;  %v3520_v47 = vshll.u32 %v10958_v8, %v3508_v48  ;;  %v3507_v10 = vshrl.u32 %v3506_v28, 5 }
 0x410   :  { %v3513_v43 = vor.u32 %v3512_v12, %v3511_v15  ;;  %v3516_v42 = vor.u32 %v3515_v63, %v3514_v32  ;;  %5303 = vmatpush3.bf16.msra.mxu1 %v5300_v13  ;;  %v5308_v21 = vpack.c.bf16 %v3783_v41, %v3782_v22  ;;  %v3523_v33 = vshll.u32 %v10752_v27, %v3508_v48 }
 0x411   :  { %v3519_v17 = vor.u32 %v3518_v18, %v3517_v60  ;;  %v3522_v23 = vor.u32 %v3521_v55, %v3520_v47  ;;  %v3524_v14 = vshrl.u32 %v10957_v24, %v3509_v0  ;;  %5305 = vmatprep.subr.bf16.mxu1 %v5304_v4  ;;  %v3258_v9 = vsub.s32 4294967266, %v10041_v2  ;;  %v11028_v60 = vld [vmem:[#allocation7_spill] sm:$0xff] }
 0x412   :  { %v10058_v37 = vsel %vm4716_vm2, 0, %v4715_v57  ;;  %v4726_v8 = vmin.u32 %v3456_v46, %v10019_v3  ;;  %v10061_v28 = vsub.s32 %v3658_v25, %v3661_v49  ;;  %v3354_v13 = vclz %v4722_v19  ;;  %v11027_v49 = vld [vmem:[#allocation15_spill] sm:$0xff] }
 0x413   :  { %v3525_v26 = vor.u32 %v3524_v14, %v3523_v33  ;;  %v3542_v12 = vshll.u32 %v3502_v62, 8  ;;  %v5312_v63 = vpack.c.bf16 %v3785_v11, %v3784_v50  ;;  %v3510_v18 = vshrl.u32 %v10751_v35, %v3509_v0 }
 0x414   :  { %vm3526_vm0 = vcmp.lt.s32.totalorder %v3507_v10, 1  ;;  %vm3528_vm10 = vcmp.lt.s32.totalorder %v3507_v10, 3  ;;  %vm3529_vm13 = vcmp.lt.s32.totalorder %v3507_v10, 4  ;;  %5307 = vmatpush3.bf16.msra.mxu1 %v5304_v4  ;;  %v3664_v57 = vsub.s32 0, %v10061_v28 }
 0x415   :  { %v3531_v27 = vsel %vm3529_vm13, %v3519_v17, 2102212464  ;;  %v3534_v24 = vsel %vm3526_vm0, %v3513_v43, %v3516_v42  ;;  %v3535_v48 = vsel %vm3529_vm13, %v3522_v23, 920167782  ;;  %v3538_v22 = vsel %vm3526_vm0, %v3516_v42, %v3519_v17  ;;  %5309 = vmatprep.subr.bf16.mxu1 %v5308_v21 }
 0x416   :  { %vm3527_vm6 = vcmp.lt.s32.totalorder %v3507_v10, 2  ;;  %v3536_v25 = vsel %vm3528_vm10, %v3519_v17, %v3535_v48  ;;  %v3539_v46 = vsel %vm3529_vm13, %v3525_v26, 1326507024  ;;  %vm2872_vm8 = vcmp.lt.s32.totalorder %v9121_v38, 0  ;;  %v11034_v26 = vld [vmem:[#allocation28_spill] sm:$0xff] }
 0x417   :  { %v3530_v11 = vsel %vm3526_vm0, %v3510_v18, %v3513_v43  ;;  %v3532_v35 = vsel %vm3528_vm10, %v3516_v42, %v3531_v27  ;;  %v3537_v14 = vsel %vm3527_vm6, %v3534_v24, %v3536_v25  ;;  %v3540_v50 = vsel %vm3528_vm10, %v3522_v23, %v3539_v46 }
 0x418   :  { %v3541_v0 = vsel %vm3527_vm6, %v3538_v22, %v3540_v50  ;;  %v10071_v4 = vmul.u32.u64.low %v3542_v12, %v3537_v14  ;;  %v10072_v41 = vmul.u32.u64.high %v3542_v12, %v3537_v14, %v10071_v4  ;;  %5311 = vmatpush3.bf16.msra.mxu1 %v5308_v21  ;;  %v460_v15 = vsub.s32 4, %v11027_v49  ;;  %v11033_v21 = vld [vmem:[#allocation39_spill] sm:$0xff]  ;;  %v4051_v14 = vld [vmem:[#allocation2 + $0x98] sm:$0xff] }
 0x419   :  { %v10080_v17 = vsel %vm9612_vm1, %v9013_v20, %v10029_v16  ;;  %v2950_v43 = vand.u32 2147483647, %v10039_v1  ;;  %v10083_v32 = vmul.u32.u64.low %v3542_v12, %v3541_v0  ;;  %v10084_v55 = vmul.u32.u64.high %v3542_v12, %v3541_v0, %v10083_v32  ;;  %5313 = vmatprep.subr.bf16.mxu1 %v5312_v63  ;;  %v11032_v16 = vld [vmem:[#allocation43_spill] sm:$0xff] }
 0x41a   :  { %v3154_v23 = vsub.s32 4294967266, %v10058_v37  ;;  %v3458_v19 = vclz %v4726_v8  ;;  %v3533_v62 = vsel %vm3527_vm6, %v3530_v11, %v3532_v35  ;;  %v11029_v47 = vand.u32 2147483647, %v11028_v60  ;;  %v4050_v35 = vld [vmem:[#allocation2 + $0x90] sm:$0xff] }
 0x41b   :  { %v2952_v61 = vcvt.s32.f32 %v10034_v5  ;;  %v3238_v1 = vadd.s32 %v11033_v21, %v11032_v16  ;;  %v4723_v33 = vadd.s32 4294967294, %v3354_v13  ;;  %v3259_v8 = vadd.s32 127, %v3258_v9  ;;  %v4048_v9 = vld [vmem:[#allocation2 + $0x80] sm:$0xff] }
 0x41c   :  { %vm10090_vm3 = vcmp.le.f32.partialorder %v11029_v47, 0.7853982  ;;  %v4734_v10 = vmin.u32 %v3664_v57, %v10061_v28  ;;  %v3552_v27 = vadd.s32 1, %v10072_v41  ;;  %5315 = vmatpush3.bf16.msra.mxu1 %v5312_v63  ;;  %v461_v24 = vsel %vm376_vm9, %v460_v15, %v11027_v49  ;;  %v4049_v57 = vld [vmem:[#allocation2 + $0x88] sm:$0xff] }
 0x41d   :  { %v462_v18 = vsel %vm10090_vm3, %v11028_v60, %v11034_v26  ;;  %v11035_v5 = vand.u32 2147483647, %v9121_v38  ;;  %v3254_v13 = vsub.s32 32, %v10041_v2  ;;  %v3549_v22 = vmul.u32 %v3542_v12, %v3533_v62  ;;  %v4052_v62 = vld [vmem:[#allocation2 + $0xa0] sm:$0xff]  ;;  %v4053_v47 = vld [vmem:[#allocation2 + $0xa8] sm:$0xff] }
 0x41e   :  { %vm3551_vm15 = vc.u32 %v10084_v55, %v10071_v4  ;;  %5609 = vcosq.f32 %v462_v18  ;;  %v2953_v63 = vmul.f32 %v2952_v61, %v2950_v43  ;;  %v3155_v25 = vadd.s32 127, %v3154_v23 }
 0x41f   :  { %vm10108_vm1 = vcmp.le.f32.partialorder %v11035_v5, 0.7853982  ;;  %v4727_v46 = vadd.s32 4294967294, %v3458_v19  ;;  %v3553_v11 = vsel %vm3551_vm15, %v3552_v27, %v10072_v41  ;;  %vm4724_vm9 = vcmp.lt.s32.totalorder %v4723_v33, 0 }
 0x420   :  { %v3554_v50 = vadd.s32 %v3553_v11, %v3549_v22  ;;  %v463_v0 = vsel %vm10090_vm3, 0, %v461_v24  ;;  %5611 = vsinq.f32 %v462_v18  ;;  %v11038_v12 = vsub.s32 4, %v9561_v39 }
 0x421   :  { %v3260_v15 = vshll.u32 %v3259_v8, 23  ;;  %v3666_v43 = vclz %v4734_v10  ;;  %v5316_v32 = vpack.c.bf16 %v4049_v57, %v4048_v9  ;;  %5613 = vcosq.f32 %v10080_v17  ;;  %v11039_v8 = vld [vmem:[#allocation44_spill] sm:$0xff]  ;;  %v11040_v10 = vld [vmem:[#allocation22_spill] sm:$0xff] }
 0x422   :  { %v10123_v49 = vsel %vm2872_vm8, %v11038_v12, %v9561_v39  ;;  %v3256_v41 = vshrl.u32 %v3238_v1, %v3254_v13  ;;  %v3555_v23 = vadd.s32 536870912, %v3554_v50  ;;  %v5320_v19 = vpack.c.bf16 %v4051_v14, %v4050_v35  ;;  %v4055_v9 = vld [vmem:[#allocation2 + $0xb8] sm:$0xff] }
 0x423   :  { %v3150_v42 = vsub.s32 32, %v10058_v37  ;;  %vm4728_vm4 = vcmp.lt.s32.totalorder %v4727_v46, 0  ;;  %v10128_v61 = vsel %vm4724_vm9, 0, %v4723_v33  ;;  %v467_v16 = vadd.s32 3, %v463_v0  ;;  %5317 = vmatprep.subr.bf16.mxu0 %v5316_v32 }
 0x424   :  { %v2954_v39 = vxor.u32 2147483648, %v2953_v63  ;;  %v3255_v21 = vshll.u32 %v9891_v59, %v10041_v2  ;;  %v3156_v26 = vshll.u32 %v3155_v25, 23  ;;  %v10132_v18 = vshrl.u32 %v3555_v23, 30  ;;  %5319 = vmatpush3.bf16.msra.mxu0 %v5316_v32  ;;  %v4054_v2 = vld [vmem:[#allocation2 + $0xb0] sm:$0xff] }
 0x425   :  { %v10134_v1 = vor.u32 4788187, %v3260_v15  ;;  %v3134_v27 = vadd.s32 %v11040_v10, %v11039_v8  ;;  %v4735_v24 = vadd.s32 4294967294, %v3666_v43  ;;  %5321 = vmatprep.subr.bf16.mxu0 %v5320_v19  ;;  %v5324_v5 = vpack.c.bf16 %v4053_v47, %v4052_v62  ;;  %v4056_v47 = vld [vmem:[#allocation2 + $0xc0] sm:$0xff] }
 0x426   :  { %v10138_v33 = vor.u32 %v3256_v41, %v3255_v21  ;;  %v10140_v13 = vsel %vm4728_vm4, 0, %v4727_v46  ;;  %v3362_v22 = vsub.s32 4294967266, %v10128_v61  ;;  %v3557_v59 = vshll.u32 %v10132_v18, 30 }
 0x427   :  { %5615 = vsinq.f32 %v10080_v17  ;;  %v2959_v57 = vsel %vm10108_vm1, 0, %v10123_v49  ;;  %v3152_v25 = vshrl.u32 %v3134_v27, %v3150_v42  ;;  %v468_v11 = vand.u32 3, %v467_v16 }
 0x428   :  { %v5610_v35 = vpop.eup %5609  ;;  %v10150_v14 = vsel %vm2872_vm8, %v2954_v39, %v2953_v63  ;;  %v3151_v46 = vshll.u32 %v9928_v29, %v10058_v37  ;;  %v3157_v0 = vor.u32 4788187, %v3156_v26  ;;  %v10154_v12 = vsub.s32 %v3554_v50, %v3557_v59  ;;  %5323 = vmatpush3.bf16.msra.mxu0 %v5320_v19  ;;  %v4057_v29 = vld [vmem:[#allocation2 + $0xc8] sm:$0xff] }
 0x429   :  { %v3466_v17 = vsub.s32 4294967266, %v10140_v13  ;;  %vm4736_vm5 = vcmp.lt.s32.totalorder %v4735_v24, 0  ;;  %v474_v15 = vxor.u32 2147483648, %v5610_v35  ;;  %5325 = vmatprep.subr.bf16.mxu0 %v5324_v5  ;;  %v5328_v43 = vpack.c.bf16 %v4055_v9, %v4054_v2  ;;  %v4058_v9 = vld [vmem:[#allocation2 + $0xd0] sm:$0xff] }
 0x42a   :  { %v5612_v32 = vpop.eup %5611  ;;  %v3262_v41 = vand.u32 2147483647, %v10134_v1  ;;  %v3264_v23 = vcvt.s32.f32 %v10138_v33  ;;  %v3363_v63 = vadd.s32 127, %v3362_v22  ;;  %v3560_v62 = vsub.s32 0, %v10154_v12  ;;  %v11047_v33 = vld [vmem:[#allocation14_spill] sm:$0xff] }
 0x42b   :  { %v3153_v37 = vor.u32 %v3152_v25, %v3151_v46  ;;  %v3358_v50 = vsub.s32 32, %v10128_v61  ;;  %v471_v19 = vxor.u32 2147483648, %v5612_v32  ;;  %vm473_vm7 = vcmp.eq.s32.totalorder %v468_v11, 2  ;;  %v10161_v42 = vpop.eup %5613  ;;  %v4059_v25 = vld [vmem:[#allocation2 + $0xd8] sm:$0xff] }
 0x42c   :  { %v10164_v16 = vsel %vm4736_vm5, 0, %v4735_v24  ;;  %v4730_v39 = vmin.u32 %v3560_v62, %v10154_v12  ;;  %vm470_vm11 = vcmp.eq.s32.totalorder %v468_v11, 0  ;;  %v475_v21 = vsel %vm473_vm7, %v474_v15, %v5612_v32  ;;  %5327 = vmatpush3.bf16.msra.mxu0 %v5324_v5 }
 0x42d   :  { %v3158_v26 = vand.u32 2147483647, %v3157_v0  ;;  %v3467_v8 = vadd.s32 127, %v3466_v17  ;;  %v472_v10 = vsel %vm470_vm11, %v5610_v35, %v471_v19  ;;  %5329 = vmatprep.subr.bf16.mxu0 %v5328_v43  ;;  %v5332_v27 = vpack.c.bf16 %v4057_v29, %v4056_v47 }
 0x42e   :  { %v3342_v22 = vadd.s32 %v9841_v54, %v9848_v31  ;;  %v3364_v59 = vshll.u32 %v3363_v63, 23  ;;  %v3562_v2 = vclz %v4730_v39  ;;  %vm469_vm14 = vcmp.lt.s32.totalorder %v468_v11, 2  ;;  %v11041_v11 = vld [vmem:[#allocation10_spill] sm:$0xff] }
 0x42f   :  { %v3462_v24 = vsub.s32 32, %v10140_v13  ;;  %v3674_v46 = vsub.s32 4294967266, %v10164_v16  ;;  %vm466_vm12 = vweird.f32 %v11028_v60  ;;  %v476_v5 = vsel %vm469_vm14, %v472_v10, %v475_v21  ;;  %v11042_v21 = vld [vmem:[#allocation20_spill] sm:$0xff] }
 0x430   :  { %v3160_v0 = vcvt.s32.f32 %v3153_v37  ;;  %v3360_v17 = vshrl.u32 %v3342_v22, %v3358_v50  ;;  %v4731_v35 = vadd.s32 4294967294, %v3562_v2  ;;  %v477_v15 = vsel %vm466_vm12, nan, %v476_v5  ;;  %5331 = vmatpush3.bf16.msra.mxu0 %v5328_v43  ;;  %v4060_v37 = vld [vmem:[#allocation2 + $0xe0] sm:$0xff]  ;;  %v4061_v50 = vld [vmem:[#allocation2 + $0xe8] sm:$0xff] }
 0x431   :  { %v10172_v32 = vpop.eup %5615  ;;  %v3446_v54 = vadd.s32 %v9830_v34, %v9838_v40  ;;  %v3468_v31 = vshll.u32 %v3467_v8, 23  ;;  %v3706_v63 = vmul.f32 %v11041_v11, %v477_v15  ;;  %5333 = vmatprep.subr.bf16.mxu0 %v5332_v27  ;;  %v5336_v62 = vpack.c.bf16 %v4059_v25, %v4058_v9  ;;  %v11043_v2 = vld [vmem:[#allocation13_spill] sm:$0xff] }
 0x432   :  { %v3161_v47 = vmul.f32 %v3160_v0, %v3158_v26  ;;  %v3359_v60 = vshll.u32 %v10015_v6, %v10128_v61  ;;  %v3365_v29 = vor.u32 4788187, %v3364_v59  ;;  %vm4732_vm2 = vcmp.lt.s32.totalorder %v4731_v35, 0 }
 0x433   :  { %v3464_v19 = vshrl.u32 %v3446_v54, %v3462_v24  ;;  %v3675_v43 = vadd.s32 127, %v3674_v46  ;;  %v3565_v39 = vsel %vm4732_vm2, 0, %v4731_v35  ;;  %v3738_v10 = vadd.f32 %v3706_v63, %v11042_v21  ;;  %v11049_v21 = vld [vmem:[#allocation47_spill] sm:$0xff] }
 0x434   :  { %v3361_v22 = vor.u32 %v3360_v17, %v3359_v60  ;;  %v3550_v34 = vadd.s32 %v10071_v4, %v10084_v55  ;;  %v3566_v40 = vsub.s32 32, %v3565_v39  ;;  %v3570_v8 = vsub.s32 4294967266, %v3565_v39  ;;  %5335 = vmatpush3.bf16.msra.mxu0 %v5332_v27  ;;  %v11044_v4 = vld [vmem:[#allocation11_spill] sm:$0xff]  ;;  %v4063_v27 = vld [vmem:[#allocation2 + $0xf8] sm:$0xff]  ;;  %v11045_v17 = vld [vmem:[#allocation6_spill] sm:$0xff] }
 0x435   :  { %v3463_v26 = vshll.u32 %v10019_v3, %v10140_v13  ;;  %v3469_v6 = vor.u32 4788187, %v3468_v31  ;;  %v3670_v61 = vsub.s32 32, %v10164_v16  ;;  %5044 = vmatprep.mubr.f32.mxu1 %v3738_v10  ;;  %5337 = vmatprep.subr.bf16.mxu0 %v5336_v62  ;;  %v5340_v59 = vpack.c.bf16 %v4061_v50, %v4060_v37  ;;  %v4062_v55 = vld [vmem:[#allocation2 + $0xf0] sm:$0xff]  ;;  %v11048_v37 = vld [vmem:[#allocation24_spill] sm:$0xff] }
 0x436   :  { %vm2754_vm0 = vweird.f32 %v11043_v2  ;;  %v3366_v9 = vand.u32 2147483647, %v3365_v29  ;;  %v3567_v25 = vshll.u32 %v10154_v12, %v3565_v39  ;;  %v3568_v24 = vshrl.u32 %v3550_v34, %v3566_v40  ;;  %5045 = vmatmul.mubr.f32.vlgmr.msra.gmra.mrb[0].mxu1 %v11044_v4  ;;  %v11053_v34 = vld [vmem:[#allocation25_spill] sm:$0xff] }
 0x437   :  { %v3571_v46 = vadd.s32 127, %v3570_v8  ;;  %v2958_v3 = vsel %vm10108_vm1, %v9121_v38, %v10150_v14  ;;  %v3465_v13 = vor.u32 %v3464_v19, %v3463_v26  ;;  %v3654_v5 = vadd.s32 %v9984_v52, %v9979_v56  ;;  %5047 = vmatprep.mubr.f32.mxu1 %v11045_v17  ;;  %v11046_v52 = vld [vmem:[#allocation23_spill] sm:$0xff] }
 0x438   :  { %v3676_v0 = vshll.u32 %v3675_v43, 23  ;;  %v3265_v12 = vmul.f32 %v3264_v23, %v3262_v41  ;;  %v3368_v35 = vcvt.s32.f32 %v3361_v22  ;;  %v3569_v15 = vor.u32 %v3568_v24, %v3567_v25  ;;  %5339 = vmatpush3.bf16.msra.mxu0 %v5336_v62  ;;  %v11059_v24 = vld [vmem:[#allocation33_spill] sm:$0xff] }
 0x439   :  { %v3572_v54 = vshll.u32 %v3571_v46, 23  ;;  %v3162_v31 = vxor.u32 2147483648, %v3161_v47  ;;  %v3470_v63 = vand.u32 2147483647, %v3469_v6  ;;  %v3672_v60 = vshrl.u32 %v3654_v5, %v3670_v61  ;;  %5341 = vmatprep.subr.bf16.mxu0 %v5340_v59  ;;  %v11057_v6 = vld [vmem:[#allocation5_spill] sm:$0xff] }
 0x43a   :  { %v5344_v14 = vpack.c.bf16 %v4063_v27, %v4062_v55  ;;  %v2963_v56 = vadd.s32 3, %v2959_v57  ;;  %vm3080_vm10 = vcmp.lt.s32.totalorder %v11046_v52, 0  ;;  %v3369_v1 = vmul.f32 %v3368_v35, %v3366_v9  ;;  %5048 = vmatmul.mubr.f32.gmra.mrb[2].mxu1 %v11047_v33 }
 0x43b   :  { %v3573_v29 = vor.u32 4788187, %v3572_v54  ;;  %5617 = vcosq.f32 %v2958_v3  ;;  %v3472_v41 = vcvt.s32.f32 %v3465_v13  ;;  %v3671_v23 = vshll.u32 %v10061_v28, %v10164_v16  ;;  %5050 = vmatprep.mubr.f32.mxu1 %v11048_v37  ;;  %v11060_v13 = vld [vmem:[#allocation12_spill] sm:$0xff] }
 0x43c   :  { %v3677_v62 = vor.u32 4788187, %v3676_v0  ;;  %5619 = vsinq.f32 %v2958_v3  ;;  %v3266_v50 = vxor.u32 2147483648, %v3265_v12  ;;  %v3576_v19 = vcvt.s32.f32 %v3569_v15  ;;  %5343 = vmatpush3.bf16.msra.mxu0 %v5340_v59  ;;  %v11062_v15 = vld [vmem:[#allocation36_spill] sm:$0xff] }
 0x43d   :  { %v3574_v48 = vand.u32 2147483647, %v3573_v29  ;;  %v3729_v49 = vmul.f32 %v11041_v11, %v9857_v30  ;;  %v3163_v57 = vsel %vm3080_vm10, %v3162_v31, %v3161_v47  ;;  %v3473_v43 = vmul.f32 %v3472_v41, %v3470_v63  ;;  %5345 = vmatprep.subr.bf16.mxu0 %v5344_v14 }
 0x43e   :  { %v3673_v39 = vor.u32 %v3672_v60, %v3671_v23  ;;  %v11050_v10 = vand.u32 2147483647, %v11049_v21  ;;  %vm3184_vm6 = vcmp.lt.s32.totalorder %v11049_v21, 0  ;;  %v3370_v16 = vxor.u32 2147483648, %v3369_v1  ;;  %5051 = vmatmul.mubr.f32.gmra.mrb[4].mxu1 %v11053_v34  ;;  %v11069_v23 = vld [vmem:[#allocation17_spill] sm:$0xff]  ;;  %v11074_v34 = vld [vmem:[#allocation32_spill] sm:$0xff] }
 0x43f   :  { %v3577_v22 = vmul.f32 %v3576_v19, %v3574_v48  ;;  %v2765_v30 = vsel %vm2754_vm0, nan, %v10025_v45  ;;  %v10224_v47 = vand.u32 3, %v9875_v53  ;;  %v11054_v40 = vand.u32 2147483647, %v11046_v52  ;;  %5053 = vmatprep.mubr.f32.mxu1 %v11057_v6  ;;  %v11058_v45 = vld [vmem:[#allocation37_spill] sm:$0xff]  ;;  %v11076_v6 = vld [vmem:[#allocation18_spill] sm:$0xff] }
 0x440   :  { %vm10214_vm13 = vcmp.le.f32.partialorder %v11050_v10, 0.7853982  ;;  %v3678_v26 = vand.u32 2147483647, %v3677_v62  ;;  %v10233_v61 = vand.u32 3, %v2963_v56  ;;  %v3267_v59 = vsel %vm3184_vm6, %v3266_v50, %v3265_v12  ;;  %5347 = vmatpush3.bf16.msra.mxu0 %v5344_v14  ;;  %v11061_v12 = vld [vmem:[#allocation8_spill] sm:$0xff] }
 0x441   :  { %vm10228_vm8 = vcmp.le.f32.partialorder %v11054_v40, 0.7853982  ;;  %v3164_v2 = vsub.s32 4, %v9880_v44  ;;  %v10242_v9 = vadd.f32 %v3729_v49, %v11058_v45  ;;  %v3474_v25 = vxor.u32 2147483648, %v3473_v43  ;;  %v11070_v50 = vld [vmem:[#allocation26_spill] sm:$0xff] }
 0x442   :  { %v3166_v53 = vsel %vm10228_vm8, %v11046_v52, %v3163_v57  ;;  %vm3288_vm3 = vcmp.lt.s32.totalorder %v11059_v24, 0  ;;  %v3680_v46 = vcvt.s32.f32 %v3673_v39  ;;  %v10246_v4 = vmul.f32 %v11041_v11, %v2765_v30  ;;  %5054 = vmatmul.mubr.f32.gmra.mrb[6].mxu1 %v11060_v13  ;;  %v11075_v30 = vld [vmem:[#allocation31_spill] sm:$0xff]  ;;  %v11081_v13 = vld [vmem:[#allocation52_spill] sm:$0xff] }
 0x443   :  { %v3268_v55 = vsub.s32 4, %v9787_v7  ;;  %v3371_v27 = vsel %vm3288_vm3, %v3370_v16, %v3369_v1  ;;  %v3578_v3 = vxor.u32 2147483648, %v3577_v22  ;;  %vm3070_vm1 = vcmp.eq.s32.totalorder %v10224_v47, 0  ;;  %5056 = vmatprep.mubr.f32.mxu1 %v11061_v12 }
 0x444   :  { %vm3073_vm15 = vcmp.eq.s32.totalorder %v10224_v47, 2  ;;  %v3074_v5 = vxor.u32 2147483648, %v10161_v42  ;;  %v3270_v0 = vsel %vm10214_vm13, %v11049_v21, %v3267_v59  ;;  %5621 = vcosq.f32 %v3166_v53 }
 0x445   :  { %v3681_v17 = vmul.f32 %v3680_v46, %v3678_v26  ;;  %vm2966_vm9 = vcmp.eq.s32.totalorder %v10233_v61, 0  ;;  %v3165_v35 = vsel %vm3080_vm10, %v3164_v2, %v9880_v44  ;;  %5623 = vsinq.f32 %v3166_v53  ;;  %v5618_v63 = vpop.eup %5617 }
 0x446   :  { %vm3392_vm4 = vcmp.lt.s32.totalorder %v11062_v15, 0  ;;  %v11063_v54 = vand.u32 2147483647, %v11059_v24  ;;  %v3071_v60 = vxor.u32 2147483648, %v10172_v32  ;;  %vm3496_vm7 = vcmp.lt.s32.totalorder %v9947_v58, 0  ;;  %v5620_v44 = vpop.eup %5619  ;;  %5057 = vmatmul.mubr.f32.gmra.mrb[8].mxu1 %v11069_v23 }
 0x447   :  { %v3475_v14 = vsel %vm3392_vm4, %v3474_v25, %v3473_v43  ;;  %v3269_v1 = vsel %vm3184_vm6, %v3268_v55, %v9787_v7  ;;  %5625 = vcosq.f32 %v3270_v0  ;;  %v11066_v29 = vand.u32 2147483647, %v11062_v15  ;;  %5059 = vmatprep.mubr.f32.mxu1 %v11070_v50 }
 0x448   :  { %vm10266_vm5 = vcmp.le.f32.partialorder %v11063_v54, 0.7853982  ;;  %v3579_v41 = vsel %vm3496_vm7, %v3578_v3, %v3577_v22  ;;  %vm3069_vm14 = vcmp.lt.s32.totalorder %v10224_v47, 2  ;;  %5627 = vsinq.f32 %v3270_v0  ;;  %v11080_v3 = vld [vmem:[#allocation16_spill] sm:$0xff] }
 0x449   :  { %v3374_v56 = vsel %vm10266_vm5, %v11059_v24, %v3371_v27  ;;  %vm10282_vm11 = vcmp.le.f32.partialorder %v11066_v29, 0.7853982  ;;  %v3167_v62 = vsel %vm10228_vm8, 0, %v3165_v35  ;;  %v3372_v7 = vsub.s32 4, %v9981_v51  ;;  %v11083_v35 = vld [vmem:[#allocation45_spill] sm:$0xff]  ;;  %v11084_v29 = vld [vmem:[#allocation42_spill] sm:$0xff] }
 0x44a   :  { %v3682_v37 = vxor.u32 2147483648, %v3681_v17  ;;  %v2970_v48 = vxor.u32 2147483648, %v5618_v63  ;;  %v3478_v19 = vsel %vm10282_vm11, %v11062_v15, %v3475_v14  ;;  %5629 = vcosq.f32 %v3374_v56  ;;  %5060 = vmatmul.mubr.f32.gmra.mrb[10].mxu1 %v11075_v30 }
 0x44b   :  { %v11071_v49 = vand.u32 2147483647, %v9947_v58  ;;  %v2967_v43 = vxor.u32 2147483648, %v5620_v44  ;;  %v3476_v39 = vsub.s32 4, %v9991_v36  ;;  %5631 = vsinq.f32 %v3374_v56  ;;  %5062 = vmatprep.mubr.f32.mxu1 %v11076_v6 }
 0x44c   :  { %vm3066_vm2 = vweird.f32 %v9013_v20  ;;  %vm2962_vm0 = vweird.f32 %v9121_v38  ;;  %vm2969_vm10 = vcmp.eq.s32.totalorder %v10233_v61, 2  ;;  %v3271_v16 = vsel %vm10214_vm13, 0, %v3269_v1 }
 0x44d   :  { %vm10299_vm12 = vcmp.le.f32.partialorder %v11071_v49, 0.7853982  ;;  %v3171_v22 = vadd.s32 3, %v3167_v62  ;;  %vm3600_vm6 = vcmp.lt.s32.totalorder %v11074_v34, 0  ;;  %5633 = vcosq.f32 %v3478_v19  ;;  %v11085_v62 = vld [vmem:[#allocation19_spill] sm:$0xff] }
 0x44e   :  { %v3582_v10 = vsel %vm10299_vm12, %v9947_v58, %v3579_v41  ;;  %v3373_v40 = vsel %vm3288_vm3, %v3372_v7, %v9981_v51  ;;  %v3683_v8 = vsel %vm3600_vm6, %v3682_v37, %v3681_v17  ;;  %v3580_v26 = vsub.s32 4, %v10132_v18  ;;  %v5622_v53 = vpop.eup %5621  ;;  %5063 = vmatmul.mubr.f32.gmra.mrb[12].mxu1 %v11080_v3  ;;  %v11082_v17 = vld [vmem:[#allocation27_spill] sm:$0xff] }
 0x44f   :  { %v3072_v28 = vsel %vm3070_vm1, %v10161_v42, %v3071_v60  ;;  %v3075_v59 = vsel %vm3073_vm15, %v3074_v5, %v10172_v32  ;;  %v2971_v2 = vsel %vm2969_vm10, %v2970_v48, %v5620_v44  ;;  %5635 = vcosq.f32 %v3582_v10  ;;  %v5624_v42 = vpop.eup %5623  ;;  %5065 = vmatprep.mubr.f32.mxu1 %v11082_v17 }
 0x450   :  { %v2968_v51 = vsel %vm2966_vm9, %v5618_v63, %v2967_v43  ;;  %v3477_v45 = vsel %vm3392_vm4, %v3476_v39, %v9991_v36  ;;  %v11077_v25 = vand.u32 2147483647, %v11074_v34  ;;  %5637 = vsinq.f32 %v3582_v10 }
 0x451   :  { %v3275_v55 = vadd.s32 3, %v3271_v16  ;;  %5639 = vsinq.f32 %v3478_v19  ;;  %v3375_v32 = vsel %vm10266_vm5, 0, %v3373_v40  ;;  %vm2965_vm8 = vcmp.lt.s32.totalorder %v10233_v61, 2  ;;  %v5626_v12 = vpop.eup %5625  ;;  %v11086_v16 = vld [vmem:[#allocation35_spill] sm:$0xff]  ;;  %v11087_v40 = vld [vmem:[#allocation40_spill] sm:$0xff] }
 0x452   :  { %vm10334_vm13 = vcmp.le.f32.partialorder %v11077_v25, 0.7853982  ;;  %v3172_v36 = vand.u32 3, %v3171_v22  ;;  %v3684_v5 = vsub.s32 4, %v11081_v13  ;;  %v3581_v0 = vsel %vm3496_vm7, %v3580_v26, %v10132_v18  ;;  %v5628_v60 = vpop.eup %5627  ;;  %5066 = vmatmul.mubr.f32.gmra.mrb[14].mxu1 %v11084_v29  ;;  %v11093_v29 = vld [vmem:[#allocation29_spill] sm:$0xff] }
 0x453   :  { %v3686_v27 = vsel %vm10334_vm13, %v11074_v34, %v3683_v8  ;;  %v10352_v54 = vadd.f32 %v10246_v4, %v11083_v35  ;;  %v3076_v31 = vsel %vm3069_vm14, %v3072_v28, %v3075_v59  ;;  %v2972_v63 = vsel %vm2965_vm8, %v2968_v51, %v2971_v2  ;;  %5068 = vmatprep.mubr.f32.mxu1 %v11085_v62  ;;  %v11094_v62 = vld [vmem:[#allocation51_spill] sm:$0xff] }
 0x454   :  { %v3479_v61 = vsel %vm10282_vm11, 0, %v3477_v45  ;;  %v3175_v14 = vxor.u32 2147483648, %v5624_v42  ;;  %v3178_v56 = vxor.u32 2147483648, %v5622_v53  ;;  %v3379_v44 = vadd.s32 3, %v3375_v32  ;;  %v5630_v18 = vpop.eup %5629  ;;  %v11089_v32 = vld [vmem:[#allocation38_spill] sm:$0xff] }
 0x455   :  { %5641 = vcosq.f32 %v3686_v27  ;;  %v3276_v1 = vand.u32 3, %v3275_v55  ;;  %vm3170_vm3 = vweird.f32 %v11046_v52  ;;  %v3583_v4 = vsel %vm10299_vm12, 0, %v3581_v0  ;;  %v5632_v47 = vpop.eup %5631 }
 0x456   :  { %5643 = vsinq.f32 %v3686_v27  ;;  %v10364_v33 = vsel %vm3066_vm2, nan, %v3076_v31  ;;  %v2973_v41 = vsel %vm2962_vm0, nan, %v2972_v63  ;;  %vm3174_vm1 = vcmp.eq.s32.totalorder %v3172_v36, 0  ;;  %5069 = vmatmul.mubr.f32.gmra.mrb[16].mxu1 %v11086_v16  ;;  %v11097_v16 = vld [vmem:[#allocation30_spill] sm:$0xff] }
 0x457   :  { %v3685_v23 = vsel %vm3600_vm6, %v3684_v5, %v11081_v13  ;;  %v3279_v7 = vxor.u32 2147483648, %v5628_v60  ;;  %v3282_v37 = vxor.u32 2147483648, %v5626_v12  ;;  %vm3177_vm15 = vcmp.eq.s32.totalorder %v3172_v36, 2  ;;  %v5634_v48 = vpop.eup %5633  ;;  %5071 = vmatprep.mubr.f32.mxu1 %v11087_v40  ;;  %v11090_v5 = vld [vmem:[#allocation34_spill] sm:$0xff] }
 0x458   :  { %v3483_v50 = vadd.s32 3, %v3479_v61  ;;  %v3176_v19 = vsel %vm3174_vm1, %v5622_v53, %v3175_v14  ;;  %v3179_v49 = vsel %vm3177_vm15, %v3178_v56, %v5624_v42  ;;  %v3380_v20 = vand.u32 3, %v3379_v44  ;;  %v11088_v42 = vld [vmem:[#allocation46_spill] sm:$0xff]  ;;  %v11091_v61 = vld [vmem:[#allocation49_spill] sm:$0xff] }
 0x459   :  { %v3587_v57 = vadd.s32 3, %v3583_v4  ;;  %v5636_v43 = vpop.eup %5635  ;;  %vm3277_vm9 = vcmp.lt.s32.totalorder %v3276_v1, 2  ;;  %v3383_v38 = vxor.u32 2147483648, %v5632_v47  ;;  %v3386_v39 = vxor.u32 2147483648, %v5630_v18  ;;  %v11092_v4 = vld [vmem:[#allocation9_spill] sm:$0xff] }
 0x45a   :  { %v3687_v10 = vsel %vm10334_vm13, 0, %v3685_v23  ;;  %v5638_v22 = vpop.eup %5637  ;;  %v3730_v30 = vmul.f32 %v11041_v11, %v2973_v41  ;;  %vm3278_vm4 = vcmp.eq.s32.totalorder %v3276_v1, 0  ;;  %vm3281_vm5 = vcmp.eq.s32.totalorder %v3276_v1, 2  ;;  %5072 = vmatmul.mubr.f32.gmra.mrb[18].mxu1 %v11088_v42  ;;  %v4330_v42 = vld [vmem:[#allocation2 + $0x120] sm:$0xff] }
 0x45b   :  { %vm3173_vm7 = vcmp.lt.s32.totalorder %v3172_v36, 2  ;;  %v5640_v8 = vpop.eup %5639  ;;  %v3280_v26 = vsel %vm3278_vm4, %v5626_v12, %v3279_v7  ;;  %v3283_v6 = vsel %vm3281_vm5, %v3282_v37, %v5628_v60  ;;  %v3484_v59 = vand.u32 3, %v3483_v50  ;;  %5074 = vmatprep.mubr.f32.mxu1 %v11090_v5 }
 0x45c   :  { %v3180_v28 = vsel %vm3173_vm7, %v3176_v19, %v3179_v49  ;;  %vm3382_vm11 = vcmp.eq.s32.totalorder %v3380_v20, 0  ;;  %vm3385_vm14 = vcmp.eq.s32.totalorder %v3380_v20, 2  ;;  %v3691_v2 = vadd.s32 3, %v3687_v10  ;;  %v11095_v49 = vld [vmem:[#allocation50_spill] sm:$0xff] }
 0x45d   :  { %v3588_v53 = vand.u32 3, %v3587_v57  ;;  %v3384_v51 = vsel %vm3382_vm11, %v5630_v18, %v3383_v38  ;;  %v3387_v45 = vsel %vm3385_vm14, %v3386_v39, %v5632_v47  ;;  %v3591_v25 = vxor.u32 2147483648, %v5638_v22 }
 0x45e   :  { %v3594_v46 = vxor.u32 2147483648, %v5636_v43  ;;  %v3762_v27 = vadd.f32 %v3730_v30, %v11089_v32  ;;  %v3181_v3 = vsel %vm3170_vm3, nan, %v3180_v28  ;;  %v3487_v36 = vxor.u32 2147483648, %v5640_v8  ;;  %5075 = vmatmul.mubr.f32.gmra.mrb[20].mxu1 %v11091_v61  ;;  %v11098_v30 = vld [vmem:[#allocation48_spill] sm:$0xff]  ;;  %v11099_v28 = vld [vmem:[#allocation21_spill] sm:$0xff] }
 0x45f   :  { %v5642_v55 = vpop.eup %5641  ;;  %v3490_v13 = vxor.u32 2147483648, %v5634_v48  ;;  %v3284_v17 = vsel %vm3277_vm9, %v3280_v26, %v3283_v6  ;;  %vm3486_vm12 = vcmp.eq.s32.totalorder %v3484_v59, 0  ;;  %vm3378_vm2 = vweird.f32 %v11059_v24  ;;  %5077 = vmatprep.mubr.f32.mxu1 %v10352_v54  ;;  %v4341_v61 = vld [vmem:[#allocation2 + $0x178] sm:$0xff] }
 0x460   :  { %v5644_v0 = vpop.eup %5643  ;;  %vm3381_vm0 = vcmp.lt.s32.totalorder %v3380_v20, 2  ;;  %vm3489_vm10 = vcmp.eq.s32.totalorder %v3484_v59, 2  ;;  %vm3590_vm6 = vcmp.eq.s32.totalorder %v3588_v53, 0  ;;  %vm3593_vm13 = vcmp.eq.s32.totalorder %v3588_v53, 2 }
 0x461   :  { %v3388_v12 = vsel %vm3381_vm0, %v3384_v51, %v3387_v45  ;;  %v3732_v35 = vmul.f32 %v11041_v11, %v3181_v3  ;;  %v3692_v31 = vand.u32 3, %v3691_v2  ;;  %v3592_v52 = vsel %vm3590_vm6, %v5636_v43, %v3591_v25  ;;  %v4328_v51 = vld [vmem:[#allocation2 + $0x110] sm:$0xff]  ;;  %v4329_v25 = vld [vmem:[#allocation2 + $0x118] sm:$0xff] }
 0x462   :  { %v3595_v63 = vsel %vm3593_vm13, %v3594_v46, %v5638_v22  ;;  %v3488_v60 = vsel %vm3486_vm12, %v5634_v48, %v3487_v36  ;;  %v3491_v14 = vsel %vm3489_vm10, %v3490_v13, %v5640_v8  ;;  %v3695_v56 = vxor.u32 2147483648, %v5644_v0  ;;  %5078 = vmatmul.mubr.f32.gmra.mrb[22].mxu1 %v10242_v9  ;;  %v11096_v9 = vld [vmem:[#allocation41_spill] sm:$0xff]  ;;  %v4335_v13 = vld [vmem:[#allocation2 + $0x148] sm:$0xff] }
 0x463   :  { %v3698_v44 = vxor.u32 2147483648, %v5642_v55  ;;  %v3731_v18 = vmul.f32 %v11041_v11, %v10364_v33  ;;  %vm3274_vm8 = vweird.f32 %v11049_v21  ;;  %v3389_v1 = vsel %vm3378_vm2, nan, %v3388_v12  ;;  %5080 = vmatprep.mubr.f32.mxu1 %v3762_v27  ;;  %v4333_v27 = vld [vmem:[#allocation2 + $0x138] sm:$0xff]  ;;  %v4334_v36 = vld [vmem:[#allocation2 + $0x140] sm:$0xff] }
 0x464   :  { %vm3589_vm3 = vcmp.lt.s32.totalorder %v3588_v53, 2  ;;  %v331_v47 = vmul.f32 %v11093_v29, %v11092_v4  ;;  %v3285_v41 = vsel %vm3274_vm8, nan, %v3284_v17  ;;  %vm3485_vm1 = vcmp.lt.s32.totalorder %v3484_v59, 2  ;;  %v4327_v53 = vld [vmem:[#allocation2 + $0x108] sm:$0xff]  ;;  %v4337_v17 = vld [vmem:[#allocation2 + $0x158] sm:$0xff] }
 0x465   :  { %v3596_v23 = vsel %vm3589_vm3, %v3592_v52, %v3595_v63  ;;  %v3764_v7 = vadd.f32 %v3732_v35, %v11094_v62  ;;  %v3492_v37 = vsel %vm3485_vm1, %v3488_v60, %v3491_v14  ;;  %vm3694_vm15 = vcmp.eq.s32.totalorder %v3692_v31, 0  ;;  %v4338_v35 = vld [vmem:[#allocation2 + $0x160] sm:$0xff]  ;;  %v4340_v63 = vld [vmem:[#allocation2 + $0x170] sm:$0xff]  ;;  %v10417_v14 = vld [vmem:[%s10622_s1 + $0x88] ss:$0 sm:$0xff] }
 0x466   :  { %vm3697_vm9 = vcmp.eq.s32.totalorder %v3692_v31, 2  ;;  %v3734_v54 = vmul.f32 %v11041_v11, %v3389_v1  ;;  %v3696_v21 = vsel %vm3694_vm15, %v5642_v55, %v3695_v56  ;;  %vm3586_vm4 = vweird.f32 %v9947_v58  ;;  %v4331_v55 = vld [vmem:[#allocation2 + $0x128] sm:$0xff] }
 0x467   :  { %v3699_v33 = vsel %vm3697_vm9, %v3698_v44, %v5644_v0  ;;  %v3763_v24 = vadd.f32 %v3731_v18, %v331_v47  ;;  %v3733_v50 = vmul.f32 %v11041_v11, %v3285_v41  ;;  %vm3482_vm5 = vweird.f32 %v11062_v15  ;;  %v4336_v0 = vld [vmem:[#allocation2 + $0x150] sm:$0xff] }
 0x468   :  { %v3597_v48 = vsel %vm3586_vm4, nan, %v3596_v23  ;;  %v3493_v19 = vsel %vm3482_vm5, nan, %v3492_v37  ;;  %v334_v20 = vmul.f32 %v11092_v4, %v11095_v49  ;;  %vm3693_vm7 = vcmp.lt.s32.totalorder %v3692_v31, 2  ;;  %v4339_v31 = vld [vmem:[#allocation2 + $0x168] sm:$0xff] }
 0x469   :  { %v333_v57 = vmul.f32 %v11096_v9, %v11092_v4  ;;  %v3700_v43 = vsel %vm3693_vm7, %v3696_v21, %v3699_v33  ;;  %5081 = vmatmul.mubr.f32.gmra.mrb[24].mxu1 %v3763_v24  ;;  %v3736_v58 = vmul.f32 %v11041_v11, %v3597_v48  ;;  %v3735_v10 = vmul.f32 %v11041_v11, %v3493_v19 }
 0x46a   :  { %v3766_v38 = vadd.f32 %v3734_v54, %v334_v20  ;;  %5083 = vmatprep.mubr.f32.mxu1 %v3764_v7  ;;  %vm3690_vm11 = vweird.f32 %v11074_v34  ;;  %v336_v22 = vmul.f32 %v11092_v4, %v11097_v16  ;;  %v335_v40 = vmul.f32 %v11098_v30, %v11092_v4  ;;  %v4326_v34 = vld [vmem:[#allocation2 + $0x100] sm:$0xff] }
 0x46b   :  { %v3765_v39 = vadd.f32 %v3733_v50, %v333_v57  ;;  %v3701_v15 = vsel %vm3690_vm11, nan, %v3700_v43  ;;  %v337_v59 = vmul.f32 %v11099_v28, %v11092_v4  ;;  %v5348_v45 = vpack.c.bf16 %v4327_v53, %v4326_v34 }
 0x46c   :  { %v3768_v8 = vadd.f32 %v3736_v58, %v336_v22  ;;  %v3767_v26 = vadd.f32 %v3735_v10, %v335_v40  ;;  %v3737_v6 = vmul.f32 %v11041_v11, %v3701_v15  ;;  %v5352_v46 = vpack.c.bf16 %v4329_v25, %v4328_v51  ;;  %v4332_v11 = vld [vmem:[#allocation2 + $0x130] sm:$0xff] }
 0x46d   :  { %5084 = vmatmul.mubr.f32.gmra.mrb[26].mxu1 %v3765_v39  ;;  %5349 = vmatprep.subr.bf16.mxu1 %v5348_v45  ;;  %v5356_v32 = vpack.c.bf16 %v4331_v55, %v4330_v42  ;;  %v5360_v3 = vpack.c.bf16 %v4333_v27, %v4332_v11  ;;  %v5364_v5 = vpack.c.bf16 %v4335_v13, %v4334_v36 }
 0x46e   :  { %5086 = vmatprep.mubr.f32.mxu1 %v3766_v38  ;;  %v3769_v2 = vadd.f32 %v3737_v6, %v337_v59  ;;  %5351 = vmatpush3.bf16.msra.mxu1 %v5348_v45  ;;  %v5368_v12 = vpack.c.bf16 %v4337_v17, %v4336_v0  ;;  %v5372_v52 = vpack.c.bf16 %v4339_v31, %v4338_v35 }
 0x46f   :  { %5353 = vmatprep.subr.bf16.mxu1 %v5352_v46  ;;  %v5376_v60 = vpack.c.bf16 %v4341_v61, %v4340_v63 }
 0x471   :  { %5087 = vmatmul.mubr.f32.gmra.mrb[28].mxu1 %v3767_v26 }
 0x472   :  { %5089 = vmatprep.mubr.f32.mxu1 %v3768_v8  ;;  %5355 = vmatpush3.bf16.msra.mxu1 %v5352_v46 }
 0x473   :  { %5357 = vmatprep.subr.bf16.mxu1 %v5356_v32 }
 0x475   :  { %5090 = vmatmul.mubr.f32.gmra.mrb[30].mxu1 %v3769_v2 }
 0x476   :  { %5359 = vmatpush3.bf16.msra.mxu1 %v5356_v32 }
 0x477   :  { %5361 = vmatprep.subr.bf16.mxu1 %v5360_v3 }
 0x47a   :  { %5363 = vmatpush3.bf16.msra.mxu1 %v5360_v3 }
 0x47b   :  { %5365 = vmatprep.subr.bf16.mxu1 %v5364_v5 }
 0x47e   :  { %5367 = vmatpush3.bf16.msra.mxu1 %v5364_v5 }
 0x47f   :  { %5369 = vmatprep.subr.bf16.mxu1 %v5368_v12 }
 0x482   :  { %5371 = vmatpush3.bf16.msra.mxu1 %v5368_v12 }
 0x483   :  { %5373 = vmatprep.subr.bf16.mxu1 %v5372_v52 }
 0x486   :  { %5375 = vmatpush3.bf16.msra.mxu1 %v5372_v52 }
 0x487   :  { %5377 = vmatprep.subr.bf16.mxu1 %v5376_v60 }
 0x48a   :  { %5379 = vmatpush3.bf16.msra.mxu1 %v5376_v60 }
 0x509   :  { %v5046_v56 = vpop.f32.mrb[0].mxu1 }
 0x50a   :  { %v3863_v44 = vadd.f32 %v5046_v56, %v10417_v14  ;;  %v3857_v18 = vpop.f32.mrb[1].mxu1 }
 0x50b   :  { %v3858_v1 = vadd.f32 %v10417_v14, %v3857_v18 }
 0x50c   :  { %v4017_v47 = vmax.f32 %v3863_v44, 0.0 }
 0x50d   :  { %v4016_v4 = vmax.f32 %v3858_v1, 0.0  ;;  %v5049_v29 = vpop.f32.mrb[2].mxu1 }
 0x50e   :  { %v3873_v41 = vadd.f32 %v5049_v29, %v10417_v14  ;;  %v3867_v23 = vpop.f32.mrb[3].mxu1 }
 0x50f   :  { %v3868_v62 = vadd.f32 %v10417_v14, %v3867_v23  ;;  %5124 = vmatprep.mubr.f32.mxu0 %v4016_v4 }
 0x510   :  { %5125 = vmatmul.mubr.f32.vlgmr.msra.gmra.mrb[32].mxu0 %v4017_v47  ;;  %v4019_v54 = vmax.f32 %v3873_v41, 0.0 }
 0x511   :  { %v4018_v7 = vmax.f32 %v3868_v62, 0.0  ;;  %v5052_v37 = vpop.f32.mrb[4].mxu1 }
 0x512   :  { %v3883_v21 = vadd.f32 %v5052_v37, %v10417_v14  ;;  %v3877_v33 = vpop.f32.mrb[5].mxu1 }
 0x513   :  { %v3878_v24 = vadd.f32 %v10417_v14, %v3877_v33  ;;  %5127 = vmatprep.mubr.f32.mxu0 %v4018_v7 }
 0x514   :  { %5128 = vmatmul.mubr.f32.gmra.mrb[34].mxu0 %v4019_v54  ;;  %v4021_v19 = vmax.f32 %v3883_v21, 0.0 }
 0x515   :  { %v4020_v50 = vmax.f32 %v3878_v24, 0.0  ;;  %v5055_v48 = vpop.f32.mrb[6].mxu1 }
 0x516   :  { %v3893_v49 = vadd.f32 %v5055_v48, %v10417_v14  ;;  %v3887_v20 = vpop.f32.mrb[7].mxu1 }
 0x517   :  { %v3888_v9 = vadd.f32 %v10417_v14, %v3887_v20  ;;  %5130 = vmatprep.mubr.f32.mxu0 %v4020_v50 }
 0x518   :  { %5131 = vmatmul.mubr.f32.gmra.mrb[36].mxu0 %v4021_v19  ;;  %v4023_v38 = vmax.f32 %v3893_v49, 0.0 }
 0x519   :  { %v4022_v57 = vmax.f32 %v3888_v9, 0.0  ;;  %v5058_v43 = vpop.f32.mrb[8].mxu1 }
 0x51a   :  { %v3903_v58 = vadd.f32 %v5058_v43, %v10417_v14  ;;  %v3897_v39 = vpop.f32.mrb[9].mxu1 }
 0x51b   :  { %v3898_v10 = vadd.f32 %v10417_v14, %v3897_v39  ;;  %5133 = vmatprep.mubr.f32.mxu0 %v4022_v57 }
 0x51c   :  { %5134 = vmatmul.mubr.f32.gmra.mrb[38].mxu0 %v4023_v38  ;;  %v4025_v22 = vmax.f32 %v3903_v58, 0.0 }
 0x51d   :  { %v4024_v15 = vmax.f32 %v3898_v10, 0.0  ;;  %v5061_v16 = vpop.f32.mrb[10].mxu1 }
 0x51e   :  { %v3913_v30 = vadd.f32 %v5061_v16, %v10417_v14  ;;  %v3907_v40 = vpop.f32.mrb[11].mxu1 }
 0x51f   :  { %v3908_v8 = vadd.f32 %v10417_v14, %v3907_v40  ;;  %5136 = vmatprep.mubr.f32.mxu0 %v4024_v15 }
 0x520   :  { %5137 = vmatmul.mubr.f32.gmra.mrb[40].mxu0 %v4025_v22  ;;  %v4027_v28 = vmax.f32 %v3913_v30, 0.0 }
 0x521   :  { %v4026_v26 = vmax.f32 %v3908_v8, 0.0  ;;  %v5064_v6 = vpop.f32.mrb[12].mxu1  ;;  %v10454_v8 = vld [vmem:[%s10622_s1 + $0x90] ss:$0 sm:$0xff] }
 0x522   :  { %v3923_v59 = vadd.f32 %v5064_v6, %v10417_v14  ;;  %v3917_v2 = vpop.f32.mrb[13].mxu1 }
 0x523   :  { %v3918_v34 = vadd.f32 %v10417_v14, %v3917_v2  ;;  %5139 = vmatprep.mubr.f32.mxu0 %v4026_v26 }
 0x524   :  { %5140 = vmatmul.mubr.f32.gmra.mrb[42].mxu0 %v4027_v28  ;;  %v4029_v45 = vmax.f32 %v3923_v59, 0.0 }
 0x525   :  { %v4028_v53 = vmax.f32 %v3918_v34, 0.0  ;;  %v5067_v51 = vpop.f32.mrb[14].mxu1 }
 0x526   :  { %v3933_v25 = vadd.f32 %v5067_v51, %v10417_v14  ;;  %v3927_v46 = vpop.f32.mrb[15].mxu1 }
 0x527   :  { %v3928_v42 = vadd.f32 %v10417_v14, %v3927_v46  ;;  %5142 = vmatprep.mubr.f32.mxu0 %v4028_v53 }
 0x528   :  { %5143 = vmatmul.mubr.f32.gmra.mrb[44].mxu0 %v4029_v45  ;;  %v4031_v11 = vmax.f32 %v3933_v25, 0.0 }
 0x529   :  { %v4030_v55 = vmax.f32 %v3928_v42, 0.0  ;;  %v5070_v32 = vpop.f32.mrb[16].mxu1 }
 0x52a   :  { %v3943_v27 = vadd.f32 %v5070_v32, %v10417_v14  ;;  %v3937_v3 = vpop.f32.mrb[17].mxu1 }
 0x52b   :  { %v3938_v36 = vadd.f32 %v10417_v14, %v3937_v3  ;;  %5145 = vmatprep.mubr.f32.mxu0 %v4030_v55 }
 0x52c   :  { %5146 = vmatmul.mubr.f32.gmra.mrb[46].mxu0 %v4031_v11  ;;  %v4033_v0 = vmax.f32 %v3943_v27, 0.0 }
 0x52d   :  { %v4032_v13 = vmax.f32 %v3938_v36, 0.0  ;;  %v5073_v5 = vpop.f32.mrb[18].mxu1 }
 0x52e   :  { %v3953_v17 = vadd.f32 %v5073_v5, %v10417_v14  ;;  %v3947_v12 = vpop.f32.mrb[19].mxu1 }
 0x52f   :  { %v3948_v35 = vadd.f32 %v10417_v14, %v3947_v12  ;;  %5148 = vmatprep.mubr.f32.mxu0 %v4032_v13 }
 0x530   :  { %5149 = vmatmul.mubr.f32.gmra.mrb[48].mxu0 %v4033_v0  ;;  %v4035_v63 = vmax.f32 %v3953_v17, 0.0 }
 0x531   :  { %v4034_v31 = vmax.f32 %v3948_v35, 0.0  ;;  %v5076_v52 = vpop.f32.mrb[20].mxu1 }
 0x532   :  { %v3963_v61 = vadd.f32 %v5076_v52, %v10417_v14  ;;  %v3957_v60 = vpop.f32.mrb[21].mxu1 }
 0x533   :  { %v3958_v56 = vadd.f32 %v10417_v14, %v3957_v60  ;;  %5151 = vmatprep.mubr.f32.mxu0 %v4034_v31 }
 0x534   :  { %5152 = vmatmul.mubr.f32.gmra.mrb[50].mxu0 %v4035_v63  ;;  %v4037_v1 = vmax.f32 %v3963_v61, 0.0 }
 0x535   :  { %v4036_v44 = vmax.f32 %v3958_v56, 0.0  ;;  %v5079_v18 = vpop.f32.mrb[22].mxu1 }
 0x536   :  { %v3973_v4 = vadd.f32 %v5079_v18, %v10417_v14  ;;  %v3967_v29 = vpop.f32.mrb[23].mxu1 }
 0x537   :  { %v3968_v47 = vadd.f32 %v10417_v14, %v3967_v29  ;;  %5154 = vmatprep.mubr.f32.mxu0 %v4036_v44 }
 0x538   :  { %5155 = vmatmul.mubr.f32.gmra.mrb[52].mxu0 %v4037_v1  ;;  %v4039_v62 = vmax.f32 %v3973_v4, 0.0 }
 0x539   :  { %v4038_v41 = vmax.f32 %v3968_v47, 0.0 }
 0x53b   :  { %5157 = vmatprep.mubr.f32.mxu0 %v4038_v41 }
 0x53c   :  { %v5082_v23 = vpop.f32.mrb[24].mxu1  ;;  %5158 = vmatmul.mubr.f32.gmra.mrb[54].mxu0 %v4039_v62 }
 0x53d   :  { %v3983_v7 = vadd.f32 %v5082_v23, %v10417_v14  ;;  %v3977_v37 = vpop.f32.mrb[25].mxu1 }
 0x53e   :  { %v3978_v54 = vadd.f32 %v10417_v14, %v3977_v37 }
 0x53f   :  { %v4041_v24 = vmax.f32 %v3983_v7, 0.0 }
 0x540   :  { %v4040_v21 = vmax.f32 %v3978_v54, 0.0  ;;  %v5085_v33 = vpop.f32.mrb[26].mxu1 }
 0x541   :  { %v3993_v50 = vadd.f32 %v5085_v33, %v10417_v14  ;;  %v3987_v48 = vpop.f32.mrb[27].mxu1 }
 0x542   :  { %v3988_v19 = vadd.f32 %v10417_v14, %v3987_v48  ;;  %5160 = vmatprep.mubr.f32.mxu0 %v4040_v21 }
 0x543   :  { %5161 = vmatmul.mubr.f32.gmra.mrb[56].mxu0 %v4041_v24  ;;  %v4043_v9 = vmax.f32 %v3993_v50, 0.0 }
 0x544   :  { %v4042_v49 = vmax.f32 %v3988_v19, 0.0  ;;  %v5088_v20 = vpop.f32.mrb[28].mxu1 }
 0x545   :  { %v4003_v57 = vadd.f32 %v5088_v20, %v10417_v14  ;;  %v3997_v43 = vpop.f32.mrb[29].mxu1 }
 0x546   :  { %v3998_v38 = vadd.f32 %v10417_v14, %v3997_v43  ;;  %5163 = vmatprep.mubr.f32.mxu0 %v4042_v49 }
 0x547   :  { %5164 = vmatmul.mubr.f32.gmra.mrb[58].mxu0 %v4043_v9  ;;  %v4045_v10 = vmax.f32 %v4003_v57, 0.0 }
 0x548   :  { %v4044_v58 = vmax.f32 %v3998_v38, 0.0  ;;  %v5091_v39 = vpop.f32.mrb[30].mxu1 }
 0x549   :  { %v4013_v15 = vadd.f32 %v5091_v39, %v10417_v14  ;;  %v4007_v16 = vpop.f32.mrb[31].mxu1 }
 0x54a   :  { %v4008_v22 = vadd.f32 %v10417_v14, %v4007_v16  ;;  %5166 = vmatprep.mubr.f32.mxu0 %v4044_v58 }
 0x54b   :  { %5167 = vmatmul.mubr.f32.gmra.mrb[60].mxu0 %v4045_v10  ;;  %v4047_v40 = vmax.f32 %v4013_v15, 0.0 }
 0x54c   :  { %v4046_v30 = vmax.f32 %v4008_v22, 0.0 }
 0x54e   :  { %5169 = vmatprep.mubr.f32.mxu0 %v4046_v30 }
 0x54f   :  { %5170 = vmatmul.mubr.f32.gmra.mrb[62].mxu0 %v4047_v40 }
 0x5e3   :  { %v5126_v26 = vpop.f32.mrb[32].mxu0 }
 0x5e4   :  { %v4141_v6 = vadd.f32 %v5126_v26, %v10454_v8  ;;  %v4135_v28 = vpop.f32.mrb[33].mxu0 }
 0x5e5   :  { %v4136_v59 = vadd.f32 %v10454_v8, %v4135_v28 }
 0x5e6   :  { %v4295_v14 = vmax.f32 %v4141_v6, 0.0 }
 0x5e7   :  { %v4294_v2 = vmax.f32 %v4136_v59, 0.0  ;;  %v5129_v34 = vpop.f32.mrb[34].mxu0 }
 0x5e8   :  { %v4151_v53 = vadd.f32 %v5129_v34, %v10454_v8  ;;  %v4145_v51 = vpop.f32.mrb[35].mxu0 }
 0x5e9   :  { %v4146_v45 = vadd.f32 %v10454_v8, %v4145_v51  ;;  %5204 = vmatprep.mubr.f32.mxu1 %v4294_v2 }
 0x5ea   :  { %5205 = vmatmul.mubr.f32.vlgmr.msra.gmra.mrb[32].mxu1 %v4295_v14  ;;  %v4297_v42 = vmax.f32 %v4151_v53, 0.0 }
 0x5eb   :  { %v4296_v25 = vmax.f32 %v4146_v45, 0.0  ;;  %v5132_v46 = vpop.f32.mrb[36].mxu0 }
 0x5ec   :  { %v4161_v55 = vadd.f32 %v5132_v46, %v10454_v8  ;;  %v4155_v32 = vpop.f32.mrb[37].mxu0 }
 0x5ed   :  { %v4156_v11 = vadd.f32 %v10454_v8, %v4155_v32  ;;  %5207 = vmatprep.mubr.f32.mxu1 %v4296_v25 }
 0x5ee   :  { %5208 = vmatmul.mubr.f32.gmra.mrb[34].mxu1 %v4297_v42  ;;  %v4299_v36 = vmax.f32 %v4161_v55, 0.0 }
 0x5ef   :  { %v4298_v27 = vmax.f32 %v4156_v11, 0.0  ;;  %v5135_v3 = vpop.f32.mrb[38].mxu0 }
 0x5f0   :  { %v4171_v13 = vadd.f32 %v5135_v3, %v10454_v8  ;;  %v4165_v5 = vpop.f32.mrb[39].mxu0 }
 0x5f1   :  { %v4166_v0 = vadd.f32 %v10454_v8, %v4165_v5  ;;  %5210 = vmatprep.mubr.f32.mxu1 %v4298_v27 }
 0x5f2   :  { %5211 = vmatmul.mubr.f32.gmra.mrb[36].mxu1 %v4299_v36  ;;  %v4301_v35 = vmax.f32 %v4171_v13, 0.0 }
 0x5f3   :  { %v4300_v17 = vmax.f32 %v4166_v0, 0.0  ;;  %v5138_v12 = vpop.f32.mrb[40].mxu0 }
 0x5f4   :  { %v4181_v31 = vadd.f32 %v5138_v12, %v10454_v8  ;;  %v4175_v52 = vpop.f32.mrb[41].mxu0 }
 0x5f5   :  { %v4176_v63 = vadd.f32 %v10454_v8, %v4175_v52  ;;  %5213 = vmatprep.mubr.f32.mxu1 %v4300_v17 }
 0x5f6   :  { %5214 = vmatmul.mubr.f32.gmra.mrb[38].mxu1 %v4301_v35  ;;  %v4303_v56 = vmax.f32 %v4181_v31, 0.0 }
 0x5f7   :  { %v4302_v61 = vmax.f32 %v4176_v63, 0.0  ;;  %v5141_v60 = vpop.f32.mrb[42].mxu0 }
 0x5f8   :  { %v4191_v44 = vadd.f32 %v5141_v60, %v10454_v8  ;;  %v4185_v18 = vpop.f32.mrb[43].mxu0 }
 0x5f9   :  { %v4186_v1 = vadd.f32 %v10454_v8, %v4185_v18  ;;  %5216 = vmatprep.mubr.f32.mxu1 %v4302_v61 }
 0x5fa   :  { %5217 = vmatmul.mubr.f32.gmra.mrb[40].mxu1 %v4303_v56  ;;  %v4305_v47 = vmax.f32 %v4191_v44, 0.0 }
 0x5fb   :  { %v4304_v4 = vmax.f32 %v4186_v1, 0.0  ;;  %v5144_v29 = vpop.f32.mrb[44].mxu0  ;;  %v10491_v1 = vld [vmem:[%s10622_s1 + $0x98] ss:$0 sm:$0xff] }
 0x5fc   :  { %v4201_v41 = vadd.f32 %v5144_v29, %v10454_v8  ;;  %v4195_v23 = vpop.f32.mrb[45].mxu0 }
 0x5fd   :  { %v4196_v62 = vadd.f32 %v10454_v8, %v4195_v23  ;;  %5219 = vmatprep.mubr.f32.mxu1 %v4304_v4 }
 0x5fe   :  { %5220 = vmatmul.mubr.f32.gmra.mrb[42].mxu1 %v4305_v47  ;;  %v4307_v54 = vmax.f32 %v4201_v41, 0.0 }
 0x5ff   :  { %v4306_v7 = vmax.f32 %v4196_v62, 0.0  ;;  %v5147_v37 = vpop.f32.mrb[46].mxu0 }
 0x600   :  { %v4211_v21 = vadd.f32 %v5147_v37, %v10454_v8  ;;  %v4205_v33 = vpop.f32.mrb[47].mxu0 }
 0x601   :  { %v4206_v24 = vadd.f32 %v10454_v8, %v4205_v33  ;;  %5222 = vmatprep.mubr.f32.mxu1 %v4306_v7 }
 0x602   :  { %5223 = vmatmul.mubr.f32.gmra.mrb[44].mxu1 %v4307_v54  ;;  %v4309_v19 = vmax.f32 %v4211_v21, 0.0 }
 0x603   :  { %v4308_v50 = vmax.f32 %v4206_v24, 0.0  ;;  %v5150_v48 = vpop.f32.mrb[48].mxu0 }
 0x604   :  { %v4221_v49 = vadd.f32 %v5150_v48, %v10454_v8  ;;  %v4215_v20 = vpop.f32.mrb[49].mxu0 }
 0x605   :  { %v4216_v9 = vadd.f32 %v10454_v8, %v4215_v20  ;;  %5225 = vmatprep.mubr.f32.mxu1 %v4308_v50 }
 0x606   :  { %5226 = vmatmul.mubr.f32.gmra.mrb[46].mxu1 %v4309_v19  ;;  %v4311_v38 = vmax.f32 %v4221_v49, 0.0 }
 0x607   :  { %v4310_v57 = vmax.f32 %v4216_v9, 0.0  ;;  %v5153_v43 = vpop.f32.mrb[50].mxu0 }
 0x608   :  { %v4231_v58 = vadd.f32 %v5153_v43, %v10454_v8  ;;  %v4225_v39 = vpop.f32.mrb[51].mxu0 }
 0x609   :  { %v4226_v10 = vadd.f32 %v10454_v8, %v4225_v39  ;;  %5228 = vmatprep.mubr.f32.mxu1 %v4310_v57 }
 0x60a   :  { %5229 = vmatmul.mubr.f32.gmra.mrb[48].mxu1 %v4311_v38  ;;  %v4313_v22 = vmax.f32 %v4231_v58, 0.0 }
 0x60b   :  { %v4312_v15 = vmax.f32 %v4226_v10, 0.0  ;;  %v5156_v16 = vpop.f32.mrb[52].mxu0 }
 0x60c   :  { %v4241_v30 = vadd.f32 %v5156_v16, %v10454_v8  ;;  %v4235_v40 = vpop.f32.mrb[53].mxu0 }
 0x60d   :  { %v4236_v26 = vadd.f32 %v10454_v8, %v4235_v40  ;;  %5231 = vmatprep.mubr.f32.mxu1 %v4312_v15 }
 0x60e   :  { %5232 = vmatmul.mubr.f32.gmra.mrb[50].mxu1 %v4313_v22  ;;  %v4315_v59 = vmax.f32 %v4241_v30, 0.0 }
 0x60f   :  { %v4314_v6 = vmax.f32 %v4236_v26, 0.0  ;;  %v5159_v28 = vpop.f32.mrb[54].mxu0 }
 0x610   :  { %v4251_v2 = vadd.f32 %v5159_v28, %v10454_v8  ;;  %v4245_v34 = vpop.f32.mrb[55].mxu0 }
 0x611   :  { %v4246_v14 = vadd.f32 %v10454_v8, %v4245_v34  ;;  %5234 = vmatprep.mubr.f32.mxu1 %v4314_v6 }
 0x612   :  { %5235 = vmatmul.mubr.f32.gmra.mrb[52].mxu1 %v4315_v59  ;;  %v4317_v45 = vmax.f32 %v4251_v2, 0.0 }
 0x613   :  { %v4316_v53 = vmax.f32 %v4246_v14, 0.0 }
 0x615   :  { %5237 = vmatprep.mubr.f32.mxu1 %v4316_v53 }
 0x616   :  { %v5162_v51 = vpop.f32.mrb[56].mxu0  ;;  %5238 = vmatmul.mubr.f32.gmra.mrb[54].mxu1 %v4317_v45 }
 0x617   :  { %v4261_v25 = vadd.f32 %v5162_v51, %v10454_v8  ;;  %v4255_v46 = vpop.f32.mrb[57].mxu0 }
 0x618   :  { %v4256_v42 = vadd.f32 %v10454_v8, %v4255_v46 }
 0x619   :  { %v4319_v11 = vmax.f32 %v4261_v25, 0.0 }
 0x61a   :  { %v4318_v55 = vmax.f32 %v4256_v42, 0.0  ;;  %v5165_v32 = vpop.f32.mrb[58].mxu0 }
 0x61b   :  { %v4271_v27 = vadd.f32 %v5165_v32, %v10454_v8  ;;  %v4265_v3 = vpop.f32.mrb[59].mxu0 }
 0x61c   :  { %v4266_v36 = vadd.f32 %v10454_v8, %v4265_v3  ;;  %5240 = vmatprep.mubr.f32.mxu1 %v4318_v55 }
 0x61d   :  { %5241 = vmatmul.mubr.f32.gmra.mrb[56].mxu1 %v4319_v11  ;;  %v4321_v0 = vmax.f32 %v4271_v27, 0.0 }
 0x61e   :  { %v4320_v13 = vmax.f32 %v4266_v36, 0.0  ;;  %v5168_v5 = vpop.f32.mrb[60].mxu0 }
 0x61f   :  { %v4281_v17 = vadd.f32 %v5168_v5, %v10454_v8  ;;  %v4275_v12 = vpop.f32.mrb[61].mxu0 }
 0x620   :  { %v4276_v35 = vadd.f32 %v10454_v8, %v4275_v12  ;;  %5243 = vmatprep.mubr.f32.mxu1 %v4320_v13 }
 0x621   :  { %5244 = vmatmul.mubr.f32.gmra.mrb[58].mxu1 %v4321_v0  ;;  %v4323_v63 = vmax.f32 %v4281_v17, 0.0 }
 0x622   :  { %v4322_v31 = vmax.f32 %v4276_v35, 0.0  ;;  %v5171_v52 = vpop.f32.mrb[62].mxu0 }
 0x623   :  { %v4291_v61 = vadd.f32 %v5171_v52, %v10454_v8  ;;  %v4285_v60 = vpop.f32.mrb[63].mxu0 }
 0x624   :  { %v4286_v56 = vadd.f32 %v10454_v8, %v4285_v60  ;;  %5246 = vmatprep.mubr.f32.mxu1 %v4322_v31 }
 0x625   :  { %5247 = vmatmul.mubr.f32.gmra.mrb[60].mxu1 %v4323_v63  ;;  %v4325_v18 = vmax.f32 %v4291_v61, 0.0 }
 0x626   :  { %v4324_v44 = vmax.f32 %v4286_v56, 0.0 }
 0x628   :  { %5249 = vmatprep.mubr.f32.mxu1 %v4324_v44 }
 0x629   :  { %5250 = vmatmul.mubr.f32.gmra.mrb[62].mxu1 %v4325_v18 }
 0x6bd   :  { %v5206_v4 = vpop.f32.mrb[32].mxu1 }
 0x6be   :  { %v4419_v29 = vadd.f32 %v5206_v4, %v10491_v1  ;;  %v4413_v47 = vpop.f32.mrb[33].mxu1 }
 0x6bf   :  { %v4414_v41 = vadd.f32 %v10491_v1, %v4413_v47 }
 0x6c0   :  { %4573 = vst [vmem:[%s10624_s3 + $0x8] sm:$0xff] %v4419_v29 }
 0x6c1   :  { %4572 = vst [vmem:[%s10624_s3] sm:$0xff] %v4414_v41  ;;  %v5209_v8 = vpop.f32.mrb[34].mxu1 }
 0x6c2   :  { %v4429_v23 = vadd.f32 %v5209_v8, %v10491_v1  ;;  %v4423_v62 = vpop.f32.mrb[35].mxu1 }
 0x6c3   :  { %v4424_v7 = vadd.f32 %v10491_v1, %v4423_v62 }
 0x6c4   :  { %4575 = vst [vmem:[%s10624_s3 + $0x18] sm:$0xff] %v4429_v23 }
 0x6c5   :  { %4574 = vst [vmem:[%s10624_s3 + $0x10] sm:$0xff] %v4424_v7  ;;  %v5212_v37 = vpop.f32.mrb[36].mxu1 }
 0x6c6   :  { %v4439_v54 = vadd.f32 %v5212_v37, %v10491_v1  ;;  %v4433_v21 = vpop.f32.mrb[37].mxu1 }
 0x6c7   :  { %v4434_v33 = vadd.f32 %v10491_v1, %v4433_v21 }
 0x6c8   :  { %4577 = vst [vmem:[%s10624_s3 + $0x28] sm:$0xff] %v4439_v54 }
 0x6c9   :  { %4576 = vst [vmem:[%s10624_s3 + $0x20] sm:$0xff] %v4434_v33  ;;  %v5215_v24 = vpop.f32.mrb[38].mxu1 }
 0x6ca   :  { %v4449_v50 = vadd.f32 %v5215_v24, %v10491_v1  ;;  %v4443_v48 = vpop.f32.mrb[39].mxu1 }
 0x6cb   :  { %v4444_v19 = vadd.f32 %v10491_v1, %v4443_v48 }
 0x6cc   :  { %4579 = vst [vmem:[%s10624_s3 + $0x38] sm:$0xff] %v4449_v50 }
 0x6cd   :  { %4578 = vst [vmem:[%s10624_s3 + $0x30] sm:$0xff] %v4444_v19  ;;  %v5218_v49 = vpop.f32.mrb[40].mxu1 }
 0x6ce   :  { %v4459_v20 = vadd.f32 %v5218_v49, %v10491_v1  ;;  %v4453_v9 = vpop.f32.mrb[41].mxu1 }
 0x6cf   :  { %v4454_v57 = vadd.f32 %v10491_v1, %v4453_v9 }
 0x6d0   :  { %4581 = vst [vmem:[%s10624_s3 + $0x48] sm:$0xff] %v4459_v20 }
 0x6d1   :  { %4580 = vst [vmem:[%s10624_s3 + $0x40] sm:$0xff] %v4454_v57  ;;  %v5221_v43 = vpop.f32.mrb[42].mxu1 }
 0x6d2   :  { %v4469_v38 = vadd.f32 %v5221_v43, %v10491_v1  ;;  %v4463_v58 = vpop.f32.mrb[43].mxu1 }
 0x6d3   :  { %v4464_v39 = vadd.f32 %v10491_v1, %v4463_v58 }
 0x6d4   :  { %4583 = vst [vmem:[%s10624_s3 + $0x58] sm:$0xff] %v4469_v38 }
 0x6d5   :  { %4582 = vst [vmem:[%s10624_s3 + $0x50] sm:$0xff] %v4464_v39  ;;  %v5224_v10 = vpop.f32.mrb[44].mxu1 }
 0x6d6   :  { %v4479_v15 = vadd.f32 %v5224_v10, %v10491_v1  ;;  %v4473_v16 = vpop.f32.mrb[45].mxu1 }
 0x6d7   :  { %v4474_v22 = vadd.f32 %v10491_v1, %v4473_v16 }
 0x6d8   :  { %4585 = vst [vmem:[%s10624_s3 + $0x68] sm:$0xff] %v4479_v15 }
 0x6d9   :  { %4584 = vst [vmem:[%s10624_s3 + $0x60] sm:$0xff] %v4474_v22  ;;  %v5227_v30 = vpop.f32.mrb[46].mxu1 }
 0x6da   :  { %v4489_v40 = vadd.f32 %v5227_v30, %v10491_v1  ;;  %v4483_v26 = vpop.f32.mrb[47].mxu1 }
 0x6db   :  { %v4484_v6 = vadd.f32 %v10491_v1, %v4483_v26 }
 0x6dc   :  { %4587 = vst [vmem:[%s10624_s3 + $0x78] sm:$0xff] %v4489_v40 }
 0x6dd   :  { %4586 = vst [vmem:[%s10624_s3 + $0x70] sm:$0xff] %v4484_v6  ;;  %v5230_v28 = vpop.f32.mrb[48].mxu1 }
 0x6de   :  { %v4499_v59 = vadd.f32 %v5230_v28, %v10491_v1  ;;  %v4493_v2 = vpop.f32.mrb[49].mxu1 }
 0x6df   :  { %v4494_v34 = vadd.f32 %v10491_v1, %v4493_v2 }
 0x6e0   :  { %4589 = vst [vmem:[%s10624_s3 + $0x88] sm:$0xff] %v4499_v59 }
 0x6e1   :  { %4588 = vst [vmem:[%s10624_s3 + $0x80] sm:$0xff] %v4494_v34  ;;  %v5233_v14 = vpop.f32.mrb[50].mxu1 }
 0x6e2   :  { %v4509_v53 = vadd.f32 %v5233_v14, %v10491_v1  ;;  %v4503_v51 = vpop.f32.mrb[51].mxu1 }
 0x6e3   :  { %v4504_v45 = vadd.f32 %v10491_v1, %v4503_v51 }
 0x6e4   :  { %4591 = vst [vmem:[%s10624_s3 + $0x98] sm:$0xff] %v4509_v53 }
 0x6e5   :  { %4590 = vst [vmem:[%s10624_s3 + $0x90] sm:$0xff] %v4504_v45  ;;  %v5236_v25 = vpop.f32.mrb[52].mxu1 }
 0x6e6   :  { %v4519_v46 = vadd.f32 %v5236_v25, %v10491_v1  ;;  %v4513_v42 = vpop.f32.mrb[53].mxu1 }
 0x6e7   :  { %v4514_v55 = vadd.f32 %v10491_v1, %v4513_v42 }
 0x6e8   :  { %4593 = vst [vmem:[%s10624_s3 + $0xa8] sm:$0xff] %v4519_v46 }
 0x6e9   :  { %4592 = vst [vmem:[%s10624_s3 + $0xa0] sm:$0xff] %v4514_v55  ;;  %v5239_v32 = vpop.f32.mrb[54].mxu1 }
 0x6ea   :  { %v4529_v11 = vadd.f32 %v5239_v32, %v10491_v1  ;;  %v4523_v27 = vpop.f32.mrb[55].mxu1 }
 0x6eb   :  { %v4524_v3 = vadd.f32 %v10491_v1, %v4523_v27 }
 0x6ec   :  { %4595 = vst [vmem:[%s10624_s3 + $0xb8] sm:$0xff] %v4529_v11 }
 0x6ed   :  { %4594 = vst [vmem:[%s10624_s3 + $0xb0] sm:$0xff] %v4524_v3 }
 0x6f0   :  { %v5242_v36 = vpop.f32.mrb[56].mxu1 }
 0x6f1   :  { %v4539_v13 = vadd.f32 %v5242_v36, %v10491_v1  ;;  %v4533_v5 = vpop.f32.mrb[57].mxu1 }
 0x6f2   :  { %v4534_v0 = vadd.f32 %v10491_v1, %v4533_v5 }
 0x6f3   :  { %4597 = vst [vmem:[%s10624_s3 + $0xc8] sm:$0xff] %v4539_v13 }
 0x6f4   :  { %4596 = vst [vmem:[%s10624_s3 + $0xc0] sm:$0xff] %v4534_v0  ;;  %v5245_v17 = vpop.f32.mrb[58].mxu1 }
 0x6f5   :  { %v4549_v12 = vadd.f32 %v5245_v17, %v10491_v1  ;;  %v4543_v35 = vpop.f32.mrb[59].mxu1 }
 0x6f6   :  { %v4544_v31 = vadd.f32 %v10491_v1, %v4543_v35 }
 0x6f7   :  { %4599 = vst [vmem:[%s10624_s3 + $0xd8] sm:$0xff] %v4549_v12 }
 0x6f8   :  { %4598 = vst [vmem:[%s10624_s3 + $0xd0] sm:$0xff] %v4544_v31  ;;  %v5248_v52 = vpop.f32.mrb[60].mxu1 }
 0x6f9   :  { %v4559_v63 = vadd.f32 %v5248_v52, %v10491_v1  ;;  %v4553_v61 = vpop.f32.mrb[61].mxu1 }
 0x6fa   :  { %v4554_v60 = vadd.f32 %v10491_v1, %v4553_v61 }
 0x6fb   :  { %4601 = vst [vmem:[%s10624_s3 + $0xe8] sm:$0xff] %v4559_v63 }
 0x6fc   :  { %4600 = vst [vmem:[%s10624_s3 + $0xe0] sm:$0xff] %v4554_v60  ;;  %v5251_v56 = vpop.f32.mrb[62].mxu1 }
 0x6fd   :  { %v4569_v44 = vadd.f32 %v5251_v56, %v10491_v1  ;;  %v4563_v18 = vpop.f32.mrb[63].mxu1 }
 0x6fe   :  { %v4564_v4 = vadd.f32 %v10491_v1, %v4563_v18 }
 0x6ff   :  { %4603 = vst [vmem:[%s10624_s3 + $0xf8] sm:$0xff] %v4569_v44 }
 0x700   :  { %4602 = vst [vmem:[%s10624_s3 + $0xf0] sm:$0xff] %v4564_v4 }
 0x701   :  { %4608 = vsyncpa [#allocation3], 1 }

</bundles_post_ra>
